<compile_context>
chip_gen: v5e
topology: v5e:2x2
jax: 0.10.0
libtpu: 0.0.40
codegen_flags: <defaults>
</compile_context>

<pallas_src>
import functools

import jax
import jax.numpy as jnp
from jax.experimental import pallas as pl
from jax.experimental.pallas import tpu as pltpu

NUM_FEATURES = 1280  # efficientnet_b0 num_features


def _head_kernel(pooled_ref, esc_ref,
                 w1f_ref, w1s_ref, b1_ref,
                 w2_ref, b2_ref,
                 w3_ref, b3_ref,
                 w4_ref, b4_ref,
                 out_ref):
  # bf16 LHS/RHS straight into the MXU, f32 accumulation throughout.
  pooled = pooled_ref[...]                               # (bm, 1280) bf16
  esc = esc_ref[...]                                     # (bm, 1)    f32

  # Linear(1281, 512) on cat((pooled, escala), 1), split into two exact terms:
  #   pooled @ W1[:1280] + escala * W1[1280:1281] + b1
  h = jnp.dot(pooled, w1f_ref[...],                      # bf16 x bf16 -> f32
              preferred_element_type=jnp.float32)
  h = h + esc * w1s_ref[...].astype(jnp.float32) + b1_ref[...]
  h = jnp.maximum(h, 0.0)                                # (bm, 512) f32
  # Dropout(0.3): identity at inference.

  h = jnp.dot(h.astype(jnp.bfloat16), w2_ref[...],
              preferred_element_type=jnp.float32) + b2_ref[...]
  h = jnp.maximum(h, 0.0)                                # (bm, 256) f32

  h = jnp.dot(h.astype(jnp.bfloat16), w3_ref[...],
              preferred_element_type=jnp.float32) + b3_ref[...]
  h = jnp.maximum(h, 0.0)                                # (bm, 128) f32

  # Linear(128, 1): VPU multiply + lane reduction (avoids an N=1 MXU matmul).
  w4 = w4_ref[...].astype(jnp.float32)                   # (1, 128)
  out = jnp.sum(h * w4, axis=-1, keepdims=True) + b4_ref[...]
  out_ref[...] = out.astype(out_ref.dtype)               # (bm, 1)


@functools.partial(jax.jit,
                   static_argnames=("block_b", "single_buffer_weights"))
def volume_estimator_head(features_nchw, escala, params, *,
                          block_b=256, single_buffer_weights=True):
  """features_nchw: (B, 1280, H, W) backbone output; escala: (B,) or (B, 1)."""
  B, C, H, W = features_nchw.shape
  assert C == NUM_FEATURES

  # AdaptiveAvgPool2d(1) + Flatten in XLA: one pass over the NCHW map, no
  # transposed HBM copy. Reduce over flattened H*W so the minor axis is
  # lane-dense once H*W >= 128; accumulate the mean in f32, then cast to bf16
  # so the activation DMA into the kernel is half width and MXU-ready.
  pooled = jnp.mean(
      features_nchw.reshape(B, C, H * W).astype(jnp.float32), axis=-1)
  pooled = pooled.astype(jnp.bfloat16)                   # (B, 1280) bf16
  esc = escala.reshape(B, 1).astype(jnp.float32)

  # Batch tiling: one full-batch block if small, else block_b-row blocks.
  bm = block_b if B >= block_b else B
  n_blocks = pl.cdiv(B, bm)
  Bp = n_blocks * bm
  if Bp != B:
    pad = Bp - B
    pooled = jnp.pad(pooled, ((0, pad), (0, 0)))
    esc = jnp.pad(esc, ((0, pad), (0, 0)))

  def batch_spec(cols):
    return pl.BlockSpec((bm, cols), lambda i: (i, 0))

  def fixed_spec(rows, cols):
    # Weight-stationary: constant index map keeps the tile VMEM-resident
    # across grid steps; single-buffer it (never changes) to halve its VMEM.
    if single_buffer_weights:
      return pl.BlockSpec((rows, cols), lambda i: (0, 0),
                          pipeline_mode=pl.Buffered(1))
    return pl.BlockSpec((rows, cols), lambda i: (0, 0))

  out = pl.pallas_call(
      _head_kernel,
      out_shape=jax.ShapeDtypeStruct((Bp, 1), jnp.float32),
      grid=(n_blocks,),
      in_specs=[
          batch_spec(C),            # pooled (bf16)
          batch_spec(1),            # escala (f32)
          fixed_spec(C, 512),       # w1f (bf16)
          fixed_spec(1, 512),       # w1s (bf16)
          fixed_spec(1, 512),       # b1  (f32)
          fixed_spec(512, 256),     # w2  (bf16)
          fixed_spec(1, 256),       # b2  (f32)
          fixed_spec(256, 128),     # w3  (bf16)
          fixed_spec(1, 128),       # b3  (f32)
          fixed_spec(1, 128),       # w4 row (bf16)
          fixed_spec(1, 1),         # b4  (f32)
      ],
      out_specs=batch_spec(1),
      compiler_params=pltpu.CompilerParams(
          dimension_semantics=("parallel",)),
  )(pooled, esc,
    params["w1f"], params["w1s"], params["b1"],
    params["w2"], params["b2"],
    params["w3"], params["b3"],
    params["w4"], params["b4"])
  return out[:B]


def init_params(key):
  """nn.Linear default init (U[-1/sqrt(fan_in), +]); weights stored as bf16."""
  def linear(k, fan_in, fan_out):
    kw, kb = jax.random.split(k)
    bound = 1.0 / jnp.sqrt(fan_in)
    w = jax.random.uniform(kw, (fan_in, fan_out), jnp.float32, -bound, bound)
    b = jax.random.uniform(kb, (1, fan_out), jnp.float32, -bound, bound)
    return w, b

  k1, k2, k3, k4 = jax.random.split(key, 4)
  w1, b1 = linear(k1, NUM_FEATURES + 1, 512)   # Linear(1281, 512)
  w2, b2 = linear(k2, 512, 256)
  w3, b3 = linear(k3, 256, 128)
  w4, b4 = linear(k4, 128, 1)
  bf16 = jnp.bfloat16
  return {
      "w1f": w1[:NUM_FEATURES, :].astype(bf16),   # (1280, 512) feature part
      "w1s": w1[NUM_FEATURES:, :].astype(bf16),   # (1, 512)    escala column
      "b1": b1,
      "w2": w2.astype(bf16), "b2": b2,
      "w3": w3.astype(bf16), "b3": b3,
      "w4": w4.T.astype(bf16),                    # (1, 128) row for VPU path
      "b4": b4,                                   # (1, 1)
  }


def reference_head(features_nchw, escala, params):
  """Precision-matched pure-JAX reference of pool + concat + MLP (eval mode).

  Applies the same bf16 rounding to weights and pre-matmul activations as the
  kernel, with f32 accumulation, so the two paths compute the same function up
  to summation order.
  """
  B, C, H, W = features_nchw.shape
  pooled = jnp.mean(
      features_nchw.reshape(B, C, H * W).astype(jnp.float32), axis=-1)
  pooled = pooled.astype(jnp.bfloat16).astype(jnp.float32)           # (B, 1280)
  esc = escala.reshape(B, 1).astype(jnp.float32)
  cat = jnp.concatenate([pooled, esc], axis=1)                       # (B, 1281)
  w1 = jnp.concatenate([params["w1f"].astype(jnp.float32),
                        params["w1s"].astype(jnp.float32)], axis=0)
  h = jnp.maximum(jnp.dot(cat, w1, precision="highest") + params["b1"], 0.0)
  h = h.astype(jnp.bfloat16).astype(jnp.float32)
  h = jnp.maximum(jnp.dot(h, params["w2"].astype(jnp.float32),
                          precision="highest") + params["b2"], 0.0)
  h = h.astype(jnp.bfloat16).astype(jnp.float32)
  h = jnp.maximum(jnp.dot(h, params["w3"].astype(jnp.float32),
                          precision="highest") + params["b3"], 0.0)
  w4 = params["w4"].astype(jnp.float32)                              # (1, 128)
  return jnp.dot(h, w4.T, precision="highest") + params["b4"]


if __name__ == "__main__":
  key = jax.random.PRNGKey(0)
  k_param, k_feat, k_scale = jax.random.split(key, 3)

  params = init_params(k_param)

  # Small shapes: batch=2, feature map 1280 x 4 x 4 (efficientnet_b0
  # forward_features of a 128x128 input image), escala: (2,).
  B, H, W = 2, 4, 4
  features = jax.random.normal(k_feat, (B, NUM_FEATURES, H, W), jnp.float32)
  escala = jax.random.uniform(k_scale, (B,), jnp.float32)

  try:
    out = volume_estimator_head(features, escala, params)
    out = jax.block_until_ready(out)
  except Exception:
    # Fallback if this jax build rejects pipeline_mode=pl.Buffered(1) on
    # pallas_call BlockSpecs: identical kernel with default buffering.
    out = volume_estimator_head(features, escala, params,
                                single_buffer_weights=False)
    out = jax.block_until_ready(out)

  ref = reference_head(features, escala, params)
  assert out.shape == (B, 1)
  assert jnp.allclose(out, ref, atol=1e-3, rtol=1e-3), (out, ref)

  print("KERNEL_OK")
</pallas_src>

<mosaic_0001>
module attributes {stable_mosaic.version = 11 : i64} {
  func.func @_head_kernel(%arg0: i32, %arg1: memref<2x1280xbf16, #tpu.memory_space<vmem>>, %arg2: memref<2x1xf32, #tpu.memory_space<vmem>>, %arg3: memref<1280x512xbf16, #tpu.memory_space<vmem>>, %arg4: memref<1x512xbf16, #tpu.memory_space<vmem>>, %arg5: memref<1x512xf32, #tpu.memory_space<vmem>>, %arg6: memref<512x256xbf16, #tpu.memory_space<vmem>>, %arg7: memref<1x256xf32, #tpu.memory_space<vmem>>, %arg8: memref<256x128xbf16, #tpu.memory_space<vmem>>, %arg9: memref<1x128xf32, #tpu.memory_space<vmem>>, %arg10: memref<1x128xbf16, #tpu.memory_space<vmem>>, %arg11: memref<1x1xf32, #tpu.memory_space<vmem>>, %arg12: memref<2x1xf32, #tpu.memory_space<vmem>>) attributes {dimension_semantics = [#tpu.dimension_semantics<parallel>], iteration_bounds = array<i64: 1>, scalar_prefetch = 0 : i64, scratch_operands = 0 : i64, tpu.core_type = #tpu.core_type<tc>, window_params = [{transform_indices = @transform_0, window_bounds = array<i64: 2, 1280>}, {transform_indices = @transform_1, window_bounds = array<i64: 2, 1>}, {pipeline_mode = #tpu.pipeline_mode<synchronous>, transform_indices = @transform_2, window_bounds = array<i64: 1280, 512>}, {pipeline_mode = #tpu.pipeline_mode<synchronous>, transform_indices = @transform_3, window_bounds = array<i64: 1, 512>}, {pipeline_mode = #tpu.pipeline_mode<synchronous>, transform_indices = @transform_4, window_bounds = array<i64: 1, 512>}, {pipeline_mode = #tpu.pipeline_mode<synchronous>, transform_indices = @transform_5, window_bounds = array<i64: 512, 256>}, {pipeline_mode = #tpu.pipeline_mode<synchronous>, transform_indices = @transform_6, window_bounds = array<i64: 1, 256>}, {pipeline_mode = #tpu.pipeline_mode<synchronous>, transform_indices = @transform_7, window_bounds = array<i64: 256, 128>}, {pipeline_mode = #tpu.pipeline_mode<synchronous>, transform_indices = @transform_8, window_bounds = array<i64: 1, 128>}, {pipeline_mode = #tpu.pipeline_mode<synchronous>, transform_indices = @transform_9, window_bounds = array<i64: 1, 128>}, {pipeline_mode = #tpu.pipeline_mode<synchronous>, transform_indices = @transform_10, window_bounds = array<i64: 1, 1>}, {transform_indices = @transform_11, window_bounds = array<i64: 2, 1>}]} {
    %c0 = arith.constant 0 : index
    %c0_0 = arith.constant 0 : index
    %0 = vector.load %arg1[%c0, %c0_0] : memref<2x1280xbf16, #tpu.memory_space<vmem>>, vector<2x1280xbf16>
    %c0_1 = arith.constant 0 : index
    %c0_2 = arith.constant 0 : index
    %1 = vector.load %arg2[%c0_1, %c0_2] : memref<2x1xf32, #tpu.memory_space<vmem>>, vector<2x1xf32>
    %c0_3 = arith.constant 0 : index
    %c0_4 = arith.constant 0 : index
    %2 = vector.load %arg3[%c0_3, %c0_4] : memref<1280x512xbf16, #tpu.memory_space<vmem>>, vector<1280x512xbf16>
    %cst = arith.constant dense<0.000000e+00> : vector<2x512xf32>
    %3 = tpu.matmul %0, %2, %cst {dimension_numbers = #tpu.dot_dimension_numbers<[1], [0], [0], [1], [0, 0, 1, 1], [], []>} : vector<2x1280xbf16>, vector<1280x512xbf16>, vector<2x512xf32> -> vector<2x512xf32>
    %c0_5 = arith.constant 0 : index
    %c0_6 = arith.constant 0 : index
    %4 = vector.load %arg4[%c0_5, %c0_6] : memref<1x512xbf16, #tpu.memory_space<vmem>>, vector<1x512xbf16>
    %5 = arith.extf %4 : vector<1x512xbf16> to vector<1x512xf32>
    %6 = vector.broadcast %1 : vector<2x1xf32> to vector<2x512xf32>
    %7 = vector.broadcast %5 : vector<1x512xf32> to vector<2x512xf32>
    %8 = arith.mulf %6, %7 : vector<2x512xf32>
    %9 = arith.addf %3, %8 : vector<2x512xf32>
    %c0_7 = arith.constant 0 : index
    %c0_8 = arith.constant 0 : index
    %10 = vector.load %arg5[%c0_7, %c0_8] : memref<1x512xf32, #tpu.memory_space<vmem>>, vector<1x512xf32>
    %11 = vector.broadcast %10 : vector<1x512xf32> to vector<2x512xf32>
    %12 = arith.addf %9, %11 : vector<2x512xf32>
    %cst_9 = arith.constant 0.000000e+00 : f32
    %13 = vector.broadcast %cst_9 : f32 to vector<2x512xf32>
    %14 = arith.maximumf %12, %13 : vector<2x512xf32>
    %15 = arith.truncf %14 : vector<2x512xf32> to vector<2x512xbf16>
    %c0_10 = arith.constant 0 : index
    %c0_11 = arith.constant 0 : index
    %16 = vector.load %arg6[%c0_10, %c0_11] : memref<512x256xbf16, #tpu.memory_space<vmem>>, vector<512x256xbf16>
    %cst_12 = arith.constant dense<0.000000e+00> : vector<2x256xf32>
    %17 = tpu.matmul %15, %16, %cst_12 {dimension_numbers = #tpu.dot_dimension_numbers<[1], [0], [0], [1], [0, 0, 1, 1], [], []>} : vector<2x512xbf16>, vector<512x256xbf16>, vector<2x256xf32> -> vector<2x256xf32>
    %c0_13 = arith.constant 0 : index
    %c0_14 = arith.constant 0 : index
    %18 = vector.load %arg7[%c0_13, %c0_14] : memref<1x256xf32, #tpu.memory_space<vmem>>, vector<1x256xf32>
    %19 = vector.broadcast %18 : vector<1x256xf32> to vector<2x256xf32>
    %20 = arith.addf %17, %19 : vector<2x256xf32>
    %cst_15 = arith.constant 0.000000e+00 : f32
    %21 = vector.broadcast %cst_15 : f32 to vector<2x256xf32>
    %22 = arith.maximumf %20, %21 : vector<2x256xf32>
    %23 = arith.truncf %22 : vector<2x256xf32> to vector<2x256xbf16>
    %c0_16 = arith.constant 0 : index
    %c0_17 = arith.constant 0 : index
    %24 = vector.load %arg8[%c0_16, %c0_17] : memref<256x128xbf16, #tpu.memory_space<vmem>>, vector<256x128xbf16>
    %cst_18 = arith.constant dense<0.000000e+00> : vector<2x128xf32>
    %25 = tpu.matmul %23, %24, %cst_18 {dimension_numbers = #tpu.dot_dimension_numbers<[1], [0], [0], [1], [0, 0, 1, 1], [], []>} : vector<2x256xbf16>, vector<256x128xbf16>, vector<2x128xf32> -> vector<2x128xf32>
    %c0_19 = arith.constant 0 : index
    %c0_20 = arith.constant 0 : index
    %26 = vector.load %arg9[%c0_19, %c0_20] : memref<1x128xf32, #tpu.memory_space<vmem>>, vector<1x128xf32>
    %27 = vector.broadcast %26 : vector<1x128xf32> to vector<2x128xf32>
    %28 = arith.addf %25, %27 : vector<2x128xf32>
    %cst_21 = arith.constant 0.000000e+00 : f32
    %29 = vector.broadcast %cst_21 : f32 to vector<2x128xf32>
    %30 = arith.maximumf %28, %29 : vector<2x128xf32>
    %c0_22 = arith.constant 0 : index
    %c0_23 = arith.constant 0 : index
    %31 = vector.load %arg10[%c0_22, %c0_23] : memref<1x128xbf16, #tpu.memory_space<vmem>>, vector<1x128xbf16>
    %32 = arith.extf %31 : vector<1x128xbf16> to vector<1x128xf32>
    %33 = vector.broadcast %32 : vector<1x128xf32> to vector<2x128xf32>
    %34 = arith.mulf %30, %33 : vector<2x128xf32>
    %cst_24 = arith.constant dense<0.000000e+00> : vector<2xf32>
    %35 = vector.multi_reduction <add>, %34, %cst_24 [1] : vector<2x128xf32> to vector<2xf32>
    %36 = vector.shape_cast %35 : vector<2xf32> to vector<2x1xf32>
    %c0_25 = arith.constant 0 : index
    %c0_26 = arith.constant 0 : index
    %37 = vector.load %arg11[%c0_25, %c0_26] : memref<1x1xf32, #tpu.memory_space<vmem>>, vector<1x1xf32>
    %38 = vector.broadcast %37 : vector<1x1xf32> to vector<2x1xf32>
    %39 = arith.addf %36, %38 : vector<2x1xf32>
    %c0_27 = arith.constant 0 : index
    %c0_28 = arith.constant 0 : index
    %40 = vector.load %arg12[%c0_27, %c0_28] : memref<2x1xf32, #tpu.memory_space<vmem>>, vector<2x1xf32>
    tpu.vector_store %arg12[%c0_27, %c0_28], %39 {strides = array<i32>} : memref<2x1xf32, #tpu.memory_space<vmem>>, vector<2x1xf32>,
    return
  }
  func.func @transform_0(%arg0: i32) -> (i32, i32) {
    %c0_i32 = arith.constant 0 : i32
    %c0_i32_0 = arith.constant 0 : i32
    return %arg0, %c0_i32 : i32, i32
  }
  func.func @transform_1(%arg0: i32) -> (i32, i32) {
    %c0_i32 = arith.constant 0 : i32
    %c0_i32_0 = arith.constant 0 : i32
    return %arg0, %c0_i32 : i32, i32
  }
  func.func @transform_2(%arg0: i32) -> (i32, i32) {
    %c0_i32 = arith.constant 0 : i32
    %c0_i32_0 = arith.constant 0 : i32
    %c0_i32_1 = arith.constant 0 : i32
    return %c0_i32, %c0_i32_0 : i32, i32
  }
  func.func @transform_3(%arg0: i32) -> (i32, i32) {
    %c0_i32 = arith.constant 0 : i32
    %c0_i32_0 = arith.constant 0 : i32
    %c0_i32_1 = arith.constant 0 : i32
    return %c0_i32, %c0_i32_0 : i32, i32
  }
  func.func @transform_4(%arg0: i32) -> (i32, i32) {
    %c0_i32 = arith.constant 0 : i32
    %c0_i32_0 = arith.constant 0 : i32
    %c0_i32_1 = arith.constant 0 : i32
    return %c0_i32, %c0_i32_0 : i32, i32
  }
  func.func @transform_5(%arg0: i32) -> (i32, i32) {
    %c0_i32 = arith.constant 0 : i32
    %c0_i32_0 = arith.constant 0 : i32
    %c0_i32_1 = arith.constant 0 : i32
    return %c0_i32, %c0_i32_0 : i32, i32
  }
  func.func @transform_6(%arg0: i32) -> (i32, i32) {
    %c0_i32 = arith.constant 0 : i32
    %c0_i32_0 = arith.constant 0 : i32
    %c0_i32_1 = arith.constant 0 : i32
    return %c0_i32, %c0_i32_0 : i32, i32
  }
  func.func @transform_7(%arg0: i32) -> (i32, i32) {
    %c0_i32 = arith.constant 0 : i32
    %c0_i32_0 = arith.constant 0 : i32
    %c0_i32_1 = arith.constant 0 : i32
    return %c0_i32, %c0_i32_0 : i32, i32
  }
  func.func @transform_8(%arg0: i32) -> (i32, i32) {
    %c0_i32 = arith.constant 0 : i32
    %c0_i32_0 = arith.constant 0 : i32
    %c0_i32_1 = arith.constant 0 : i32
    return %c0_i32, %c0_i32_0 : i32, i32
  }
  func.func @transform_9(%arg0: i32) -> (i32, i32) {
    %c0_i32 = arith.constant 0 : i32
    %c0_i32_0 = arith.constant 0 : i32
    %c0_i32_1 = arith.constant 0 : i32
    return %c0_i32, %c0_i32_0 : i32, i32
  }
  func.func @transform_10(%arg0: i32) -> (i32, i32) {
    %c0_i32 = arith.constant 0 : i32
    %c0_i32_0 = arith.constant 0 : i32
    %c0_i32_1 = arith.constant 0 : i32
    return %c0_i32, %c0_i32_0 : i32, i32
  }
  func.func @transform_11(%arg0: i32) -> (i32, i32) {
    %c0_i32 = arith.constant 0 : i32
    %c0_i32_0 = arith.constant 0 : i32
    return %arg0, %c0_i32 : i32, i32
  }
}

module attributes {stable_mosaic.version = 11 : i64} {
  func.func @_head_kernel(%arg0: i32, %arg1: memref<2x1280xbf16, #tpu.memory_space<vmem>>, %arg2: memref<2x1xf32, #tpu.memory_space<vmem>>, %arg3: memref<1280x512xbf16, #tpu.memory_space<vmem>>, %arg4: memref<1x512xbf16, #tpu.memory_space<vmem>>, %arg5: memref<1x512xf32, #tpu.memory_space<vmem>>, %arg6: memref<512x256xbf16, #tpu.memory_space<vmem>>, %arg7: memref<1x256xf32, #tpu.memory_space<vmem>>, %arg8: memref<256x128xbf16, #tpu.memory_space<vmem>>, %arg9: memref<1x128xf32, #tpu.memory_space<vmem>>, %arg10: memref<1x128xbf16, #tpu.memory_space<vmem>>, %arg11: memref<1x1xf32, #tpu.memory_space<vmem>>, %arg12: memref<2x1xf32, #tpu.memory_space<vmem>>) attributes {dimension_semantics = [#tpu.dimension_semantics<parallel>], iteration_bounds = array<i64: 1>, scalar_prefetch = 0 : i64, scratch_operands = 0 : i64, tpu.core_type = #tpu.core_type<tc>, window_params = [{transform_indices = @transform_0, window_bounds = array<i64: 2, 1280>}, {transform_indices = @transform_1, window_bounds = array<i64: 2, 1>}, {pipeline_mode = #tpu.pipeline_mode<synchronous>, transform_indices = @transform_2, window_bounds = array<i64: 1280, 512>}, {pipeline_mode = #tpu.pipeline_mode<synchronous>, transform_indices = @transform_3, window_bounds = array<i64: 1, 512>}, {pipeline_mode = #tpu.pipeline_mode<synchronous>, transform_indices = @transform_4, window_bounds = array<i64: 1, 512>}, {pipeline_mode = #tpu.pipeline_mode<synchronous>, transform_indices = @transform_5, window_bounds = array<i64: 512, 256>}, {pipeline_mode = #tpu.pipeline_mode<synchronous>, transform_indices = @transform_6, window_bounds = array<i64: 1, 256>}, {pipeline_mode = #tpu.pipeline_mode<synchronous>, transform_indices = @transform_7, window_bounds = array<i64: 256, 128>}, {pipeline_mode = #tpu.pipeline_mode<synchronous>, transform_indices = @transform_8, window_bounds = array<i64: 1, 128>}, {pipeline_mode = #tpu.pipeline_mode<synchronous>, transform_indices = @transform_9, window_bounds = array<i64: 1, 128>}, {pipeline_mode = #tpu.pipeline_mode<synchronous>, transform_indices = @transform_10, window_bounds = array<i64: 1, 1>}, {transform_indices = @transform_11, window_bounds = array<i64: 2, 1>}]} {
    %c0 = arith.constant 0 : index
    %c0_0 = arith.constant 0 : index
    %0 = vector.load %arg1[%c0, %c0_0] : memref<2x1280xbf16, #tpu.memory_space<vmem>>, vector<2x1280xbf16>
    %c0_1 = arith.constant 0 : index
    %c0_2 = arith.constant 0 : index
    %1 = vector.load %arg2[%c0_1, %c0_2] : memref<2x1xf32, #tpu.memory_space<vmem>>, vector<2x1xf32>
    %c0_3 = arith.constant 0 : index
    %c0_4 = arith.constant 0 : index
    %2 = vector.load %arg3[%c0_3, %c0_4] : memref<1280x512xbf16, #tpu.memory_space<vmem>>, vector<1280x512xbf16>
    %cst = arith.constant dense<0.000000e+00> : vector<2x512xf32>
    %3 = tpu.matmul %0, %2, %cst {dimension_numbers = #tpu.dot_dimension_numbers<[1], [0], [0], [1], [0, 0, 1, 1], [], []>} : vector<2x1280xbf16>, vector<1280x512xbf16>, vector<2x512xf32> -> vector<2x512xf32>
    %c0_5 = arith.constant 0 : index
    %c0_6 = arith.constant 0 : index
    %4 = vector.load %arg4[%c0_5, %c0_6] : memref<1x512xbf16, #tpu.memory_space<vmem>>, vector<1x512xbf16>
    %5 = arith.extf %4 : vector<1x512xbf16> to vector<1x512xf32>
    %6 = vector.broadcast %1 : vector<2x1xf32> to vector<2x512xf32>
    %7 = vector.broadcast %5 : vector<1x512xf32> to vector<2x512xf32>
    %8 = arith.mulf %6, %7 : vector<2x512xf32>
    %9 = arith.addf %3, %8 : vector<2x512xf32>
    %c0_7 = arith.constant 0 : index
    %c0_8 = arith.constant 0 : index
    %10 = vector.load %arg5[%c0_7, %c0_8] : memref<1x512xf32, #tpu.memory_space<vmem>>, vector<1x512xf32>
    %11 = vector.broadcast %10 : vector<1x512xf32> to vector<2x512xf32>
    %12 = arith.addf %9, %11 : vector<2x512xf32>
    %cst_9 = arith.constant 0.000000e+00 : f32
    %13 = vector.broadcast %cst_9 : f32 to vector<2x512xf32>
    %14 = arith.maximumf %12, %13 : vector<2x512xf32>
    %15 = arith.truncf %14 : vector<2x512xf32> to vector<2x512xbf16>
    %c0_10 = arith.constant 0 : index
    %c0_11 = arith.constant 0 : index
    %16 = vector.load %arg6[%c0_10, %c0_11] : memref<512x256xbf16, #tpu.memory_space<vmem>>, vector<512x256xbf16>
    %cst_12 = arith.constant dense<0.000000e+00> : vector<2x256xf32>
    %17 = tpu.matmul %15, %16, %cst_12 {dimension_numbers = #tpu.dot_dimension_numbers<[1], [0], [0], [1], [0, 0, 1, 1], [], []>} : vector<2x512xbf16>, vector<512x256xbf16>, vector<2x256xf32> -> vector<2x256xf32>
    %c0_13 = arith.constant 0 : index
    %c0_14 = arith.constant 0 : index
    %18 = vector.load %arg7[%c0_13, %c0_14] : memref<1x256xf32, #tpu.memory_space<vmem>>, vector<1x256xf32>
    %19 = vector.broadcast %18 : vector<1x256xf32> to vector<2x256xf32>
    %20 = arith.addf %17, %19 : vector<2x256xf32>
    %cst_15 = arith.constant 0.000000e+00 : f32
    %21 = vector.broadcast %cst_15 : f32 to vector<2x256xf32>
    %22 = arith.maximumf %20, %21 : vector<2x256xf32>
    %23 = arith.truncf %22 : vector<2x256xf32> to vector<2x256xbf16>
    %c0_16 = arith.constant 0 : index
    %c0_17 = arith.constant 0 : index
    %24 = vector.load %arg8[%c0_16, %c0_17] : memref<256x128xbf16, #tpu.memory_space<vmem>>, vector<256x128xbf16>
    %cst_18 = arith.constant dense<0.000000e+00> : vector<2x128xf32>
    %25 = tpu.matmul %23, %24, %cst_18 {dimension_numbers = #tpu.dot_dimension_numbers<[1], [0], [0], [1], [0, 0, 1, 1], [], []>} : vector<2x256xbf16>, vector<256x128xbf16>, vector<2x128xf32> -> vector<2x128xf32>
    %c0_19 = arith.constant 0 : index
    %c0_20 = arith.constant 0 : index
    %26 = vector.load %arg9[%c0_19, %c0_20] : memref<1x128xf32, #tpu.memory_space<vmem>>, vector<1x128xf32>
    %27 = vector.broadcast %26 : vector<1x128xf32> to vector<2x128xf32>
    %28 = arith.addf %25, %27 : vector<2x128xf32>
    %cst_21 = arith.constant 0.000000e+00 : f32
    %29 = vector.broadcast %cst_21 : f32 to vector<2x128xf32>
    %30 = arith.maximumf %28, %29 : vector<2x128xf32>
    %c0_22 = arith.constant 0 : index
    %c0_23 = arith.constant 0 : index
    %31 = vector.load %arg10[%c0_22, %c0_23] : memref<1x128xbf16, #tpu.memory_space<vmem>>, vector<1x128xbf16>
    %32 = arith.extf %31 : vector<1x128xbf16> to vector<1x128xf32>
    %33 = vector.broadcast %32 : vector<1x128xf32> to vector<2x128xf32>
    %34 = arith.mulf %30, %33 : vector<2x128xf32>
    %cst_24 = arith.constant dense<0.000000e+00> : vector<2xf32>
    %35 = vector.multi_reduction <add>, %34, %cst_24 [1] : vector<2x128xf32> to vector<2xf32>
    %36 = vector.shape_cast %35 : vector<2xf32> to vector<2x1xf32>
    %c0_25 = arith.constant 0 : index
    %c0_26 = arith.constant 0 : index
    %37 = vector.load %arg11[%c0_25, %c0_26] : memref<1x1xf32, #tpu.memory_space<vmem>>, vector<1x1xf32>
    %38 = vector.broadcast %37 : vector<1x1xf32> to vector<2x1xf32>
    %39 = arith.addf %36, %38 : vector<2x1xf32>
    %c0_27 = arith.constant 0 : index
    %c0_28 = arith.constant 0 : index
    %40 = vector.load %arg12[%c0_27, %c0_28] : memref<2x1xf32, #tpu.memory_space<vmem>>, vector<2x1xf32>
    tpu.vector_store %arg12[%c0_27, %c0_28], %39 {strides = array<i32>} : memref<2x1xf32, #tpu.memory_space<vmem>>, vector<2x1xf32>,
    return
  }
  func.func @transform_0(%arg0: i32) -> (i32, i32) {
    %c0_i32 = arith.constant 0 : i32
    %c0_i32_0 = arith.constant 0 : i32
    return %arg0, %c0_i32 : i32, i32
  }
  func.func @transform_1(%arg0: i32) -> (i32, i32) {
    %c0_i32 = arith.constant 0 : i32
    %c0_i32_0 = arith.constant 0 : i32
    return %arg0, %c0_i32 : i32, i32
  }
  func.func @transform_2(%arg0: i32) -> (i32, i32) {
    %c0_i32 = arith.constant 0 : i32
    %c0_i32_0 = arith.constant 0 : i32
    %c0_i32_1 = arith.constant 0 : i32
    return %c0_i32, %c0_i32_0 : i32, i32
  }
  func.func @transform_3(%arg0: i32) -> (i32, i32) {
    %c0_i32 = arith.constant 0 : i32
    %c0_i32_0 = arith.constant 0 : i32
    %c0_i32_1 = arith.constant 0 : i32
    return %c0_i32, %c0_i32_0 : i32, i32
  }
  func.func @transform_4(%arg0: i32) -> (i32, i32) {
    %c0_i32 = arith.constant 0 : i32
    %c0_i32_0 = arith.constant 0 : i32
    %c0_i32_1 = arith.constant 0 : i32
    return %c0_i32, %c0_i32_0 : i32, i32
  }
  func.func @transform_5(%arg0: i32) -> (i32, i32) {
    %c0_i32 = arith.constant 0 : i32
    %c0_i32_0 = arith.constant 0 : i32
    %c0_i32_1 = arith.constant 0 : i32
    return %c0_i32, %c0_i32_0 : i32, i32
  }
  func.func @transform_6(%arg0: i32) -> (i32, i32) {
    %c0_i32 = arith.constant 0 : i32
    %c0_i32_0 = arith.constant 0 : i32
    %c0_i32_1 = arith.constant 0 : i32
    return %c0_i32, %c0_i32_0 : i32, i32
  }
  func.func @transform_7(%arg0: i32) -> (i32, i32) {
    %c0_i32 = arith.constant 0 : i32
    %c0_i32_0 = arith.constant 0 : i32
    %c0_i32_1 = arith.constant 0 : i32
    return %c0_i32, %c0_i32_0 : i32, i32
  }
  func.func @transform_8(%arg0: i32) -> (i32, i32) {
    %c0_i32 = arith.constant 0 : i32
    %c0_i32_0 = arith.constant 0 : i32
    %c0_i32_1 = arith.constant 0 : i32
    return %c0_i32, %c0_i32_0 : i32, i32
  }
  func.func @transform_9(%arg0: i32) -> (i32, i32) {
    %c0_i32 = arith.constant 0 : i32
    %c0_i32_0 = arith.constant 0 : i32
    %c0_i32_1 = arith.constant 0 : i32
    return %c0_i32, %c0_i32_0 : i32, i32
  }
  func.func @transform_10(%arg0: i32) -> (i32, i32) {
    %c0_i32 = arith.constant 0 : i32
    %c0_i32_0 = arith.constant 0 : i32
    %c0_i32_1 = arith.constant 0 : i32
    return %c0_i32, %c0_i32_0 : i32, i32
  }
  func.func @transform_11(%arg0: i32) -> (i32, i32) {
    %c0_i32 = arith.constant 0 : i32
    %c0_i32_0 = arith.constant 0 : i32
    return %arg0, %c0_i32 : i32, i32
  }
}

</mosaic_0001>

<bundles_post_ra>
// kernel: volume_estimator_head.1
= control target key start
LH: loop header
LB: loop body
LE: loop exit
PB: predicated region body
PF: predicated region fallthrough
CT: control target
= control target key end

     0   :  { %s5820_s0 = inlined_call_operand.vmem [shape: bf16[2,1280], index: 0, kind: input, shape index: {}]   ;;  %s5821_s1 = inlined_call_operand.vmem [shape: f32[2,1], index: 1, kind: input, shape index: {}]   ;;  %s5822_s2 = inlined_call_operand.hbm [shape: bf16[1280,512], index: 2, kind: input, shape index: {}]   ;;  %s5823_s3 = inlined_call_operand.hbm [shape: bf16[1,512], index: 3, kind: input, shape index: {}]   ;;  %s5824_s4 = inlined_call_operand.hbm [shape: f32[1,512], index: 4, kind: input, shape index: {}]   ;;  %s5825_s5 = inlined_call_operand.hbm [shape: bf16[512,256], index: 5, kind: input, shape index: {}]   ;;  %s5826_s6 = inlined_call_operand.hbm [shape: f32[1,256], index: 6, kind: input, shape index: {}]   ;;  %s5827_s7 = inlined_call_operand.hbm [shape: bf16[256,128], index: 7, kind: input, shape index: {}]   ;;  %s5828_s8 = inlined_call_operand.hbm [shape: f32[1,128], index: 8, kind: input, shape index: {}]   ;;  %s5829_s9 = inlined_call_operand.hbm [shape: bf16[1,128], index: 9, kind: input, shape index: {}]   ;;  %s5830_s10 = inlined_call_operand.<no memory space> [shape: f32[1,1], index: 10, kind: input, shape index: {}]   ;;  %s5831_s11 = inlined_call_operand.vmem [shape: f32[2,1], index: 11, kind: output, shape index: {}]  }
   0x1   :  { %v16_v0 = vstv %s5830_s10 }
   0x2   :  { %17 = vst [vmem:[#allocation2] sm:$0x1] %v16_v0 }
   0x3   :  { %18 = vsyncpa [#allocation4], 0 }
   0x4   :  { %19 = vsyncpa [#allocation6], 0 }
   0x5   :  { %20 = vsyncpa [#allocation9], 0 }
   0x6   :  { %21 = vsyncpa [#allocation12], 0  ;;  %s45_s21 = sshll.u32 %s5823_s3, 4  ;;  %s46_s21 = int_to_ptr.hbm [resolvable:$true] %s45_s21 }
   0x7   :  { %22 = vsyncpa [#allocation15], 0  ;;  %s5571_s22 = smov [#allocation5]   ;;  %s66_s26 = sshll.u32 %s5825_s5, 4  ;;  %s67_s26 = int_to_ptr.hbm [resolvable:$true] %s66_s26 }
   0x8   :  { %s47_s23 = sshll.u32 %s5571_s22, 4  ;;  %s5572_s10 = smov [#allocation8]   ;;  %s48_s23 = int_to_ptr.vmem [resolvable:$true] %s47_s23 }
   0x9   :  { %50 = dma.hbm_to_vmem [thread:$0]  %s46_s21, 64, %s48_s23, [#allocation6]  }
   0xa   :  { %s68_s27 = sshll.u32 %s5572_s10, 4  ;;  %s5573_s28 = smov 128   ;;  %s69_s27 = int_to_ptr.vmem [resolvable:$true] %s68_s27 }
   0xb   :  { %s5574_s29 = smov 8   ;;  %s90_s3 = sshll.u32 %s5827_s7, 4  ;;  %s91_s3 = int_to_ptr.hbm [resolvable:$true] %s90_s3 }
   0xc   :  { %74 = dma.hbm_to_vmem [thread:$0]  %s67_s26, 8192, %s69_s27, [#allocation9], %s5573_s28, %s5573_s28, %s5574_s29  }
   0xd   :  { %s5575_s13 = smov [#allocation11]   ;;  %s31_s5 = sshll.u32 %s5822_s2, 4  ;;  %s32_s5 = int_to_ptr.hbm [resolvable:$true] %s31_s5 }
   0xe   :  { %s92_s14 = sshll.u32 %s5575_s13, 4  ;;  %s5576_s17 = smov 64   ;;  %s93_s14 = int_to_ptr.vmem [resolvable:$true] %s92_s14 }
   0xf   :  { %s5577_s18 = smov 4   ;;  %s5578_s19 = smov [#allocation3]  }
  0x10   :  { %98 = dma.hbm_to_vmem [thread:$0]  %s91_s3, 2048, %s93_s14, [#allocation12], %s5576_s17, %s5576_s17, %s5577_s18  }
  0x11   :  { %s33_s20 = sshll.u32 %s5578_s19, 4  ;;  %s5579_s21 = smov 256   ;;  %s34_s20 = int_to_ptr.vmem [resolvable:$true] %s33_s20 }
  0x12   :  { %s5580_s22 = smov 16   ;;  %s56_s24 = sshll.u32 %s5824_s4, 4  ;;  %s57_s24 = int_to_ptr.hbm [resolvable:$true] %s56_s24 }
  0x13   :  { %39 = dma.hbm_to_vmem [thread:$0]  %s32_s5, 40960, %s34_s20, [#allocation4], %s5579_s21, %s5579_s21, %s5580_s22  }
  0x14   :  { %s5581_s25 = smov [#allocation7]   ;;  %s80_s27 = sshll.u32 %s5826_s6, 4  ;;  %s81_s27 = int_to_ptr.hbm [resolvable:$true] %s80_s27 }
  0x15   :  { %s58_s26 = sshll.u32 %s5581_s25, 4  ;;  %s5582_s28 = smov [#allocation10]   ;;  %s59_s26 = int_to_ptr.vmem [resolvable:$true] %s58_s26 }
  0x16   :  { %61 = dma.hbm_to_vmem [thread:$0]  %s57_s24, 64, %s59_s26, [#allocation6]  }
  0x17   :  { %s82_s29 = sshll.u32 %s5582_s28, 4  ;;  %s104_s3 = sshll.u32 %s5828_s8, 4  ;;  %s83_s29 = int_to_ptr.vmem [resolvable:$true] %s82_s29  ;;  %s105_s3 = int_to_ptr.hbm [resolvable:$true] %s104_s3 }
  0x18   :  { %85 = dma.hbm_to_vmem [thread:$0]  %s81_s27, 32, %s83_s29, [#allocation9]  }
  0x19   :  { %s115_s14 = sshll.u32 %s5829_s9, 4  ;;  %s5583_s15 = smov [#allocation13]   ;;  %s116_s14 = int_to_ptr.hbm [resolvable:$true] %s115_s14 }
  0x1a   :  { %s106_s16 = sshll.u32 %s5583_s15, 4  ;;  %s5584_s6 = smov [#allocation14]   ;;  %s107_s16 = int_to_ptr.vmem [resolvable:$true] %s106_s16 }
  0x1b   :  { %109 = dma.hbm_to_vmem [thread:$0]  %s105_s3, 16, %s107_s16, [#allocation12]  }
  0x1c   :  { %s117_s5 = sshll.u32 %s5584_s6, 4  ;;  %s118_s5 = int_to_ptr.vmem [resolvable:$true] %s117_s5 }
  0x1d   :  { %120 = dma.hbm_to_vmem [thread:$0]  %s116_s14, 16, %s118_s5, [#allocation15]  }
  0x1e   :  { %5561 = dma.done.wait [#allocation4], 40960  }
  0x1f   :  { %5562 = vsyncadd [#allocation4], 4294926336 }
  0x20   :  { %5563 = dma.done.wait [#allocation6], 128  }
  0x21   :  { %5564 = vsyncadd [#allocation6], 4294967168 }
  0x22   :  { %5565 = dma.done.wait [#allocation9], 8224  }
  0x23   :  { %5566 = vsyncadd [#allocation9], 4294959072 }
  0x24   :  { %5567 = dma.done.wait [#allocation12], 2064  }
  0x25   :  { %5568 = vsyncadd [#allocation12], 4294965232 }
  0x26   :  { %5569 = dma.done.wait [#allocation15], 16  }
  0x27   :  { %5570 = vsyncadd [#allocation15], 4294967280  ;;  %v3463_v1 = vld [vmem:[#allocation3 + $0xe0] sm:$0xf]  ;;  %v4979_v2 = vld [vmem:[#allocation3 + $0xec] sm:$0xf0] }
  0x28   :  { %v3591_v3 = vld [vmem:[#allocation3 + $0x1e0] sm:$0xf]  ;;  %v3464_v4 = vor.u32 %v4979_v2, %v3463_v1  ;;  %v5011_v5 = vld [vmem:[#allocation3 + $0x1ec] sm:$0xf0]  ;;  %vm3329_vm0 = vcmask 1041408   ;;  %vm3338_vm1 = vcmask 1024  }
  0x29   :  { %v3719_v6 = vld [vmem:[#allocation3 + $0x2e0] sm:$0xf]  ;;  %v5043_v7 = vld [vmem:[#allocation3 + $0x2ec] sm:$0xf0]  ;;  %v3592_v8 = vor.u32 %v5011_v5, %v3591_v3 }
  0x2a   :  { %v3720_v9 = vor.u32 %v5043_v7, %v3719_v6  ;;  %v3847_v10 = vld [vmem:[#allocation3 + $0x3e0] sm:$0xf]  ;;  %v5075_v11 = vld [vmem:[#allocation3 + $0x3ec] sm:$0xf0]  ;;  %2126 = vmatpush.bf16.msra.mxu0 %v3464_v4 }
  0x2b   :  { %v3447_v12 = vld [vmem:[#allocation3 + $0xc0] sm:$0xf]  ;;  %v3848_v13 = vor.u32 %v5075_v11, %v3847_v10  ;;  %v4975_v14 = vld [vmem:[#allocation3 + $0xcc] sm:$0xf0]  ;;  %2139 = vmatpush.bf16.msra.mxu1 %v3592_v8 }
  0x2c   :  { %v3575_v15 = vld [vmem:[#allocation3 + $0x1c0] sm:$0xf]  ;;  %v5007_v16 = vld [vmem:[#allocation3 + $0x1cc] sm:$0xf0]  ;;  %2152 = vmatpush.bf16.msra.mxu2 %v3720_v9  ;;  %v3448_v17 = vor.u32 %v4975_v14, %v3447_v12 }
  0x2d   :  { %v3576_v18 = vor.u32 %v5007_v16, %v3575_v15  ;;  %v3703_v19 = vld [vmem:[#allocation3 + $0x2c0] sm:$0xf]  ;;  %v5039_v20 = vld [vmem:[#allocation3 + $0x2cc] sm:$0xf0]  ;;  %2165 = vmatpush.bf16.msra.mxu3 %v3848_v13 }
  0x2e   :  { %v3831_v21 = vld [vmem:[#allocation3 + $0x3c0] sm:$0xf]  ;;  %v3704_v22 = vor.u32 %v5039_v20, %v3703_v19  ;;  %v5071_v23 = vld [vmem:[#allocation3 + $0x3cc] sm:$0xf0]  ;;  %2127 = vmatpush.bf16.msra.mxu0 %v3448_v17 }
  0x2f   :  { %v3431_v24 = vld [vmem:[#allocation3 + $0xa0] sm:$0xf]  ;;  %v4971_v25 = vld [vmem:[#allocation3 + $0xac] sm:$0xf0]  ;;  %v3832_v26 = vor.u32 %v5071_v23, %v3831_v21  ;;  %2140 = vmatpush.bf16.msra.mxu1 %v3576_v18 }
  0x30   :  { %v3559_v27 = vld [vmem:[#allocation3 + $0x1a0] sm:$0xf]  ;;  %v5003_v28 = vld [vmem:[#allocation3 + $0x1ac] sm:$0xf0]  ;;  %v3432_v30 = vor.u32 %v4971_v25, %v3431_v24  ;;  %2153 = vmatpush.bf16.msra.mxu2 %v3704_v22 }
  0x31   :  { %v3687_v29 = vld [vmem:[#allocation3 + $0x2a0] sm:$0xf]  ;;  %v5035_v31 = vld [vmem:[#allocation3 + $0x2ac] sm:$0xf0]  ;;  %v3560_v34 = vor.u32 %v5003_v28, %v3559_v27  ;;  %2166 = vmatpush.bf16.msra.mxu3 %v3832_v26 }
  0x32   :  { %v3815_v32 = vld [vmem:[#allocation3 + $0x3a0] sm:$0xf]  ;;  %v5067_v33 = vld [vmem:[#allocation3 + $0x3ac] sm:$0xf0]  ;;  %v3688_v35 = vor.u32 %v5035_v31, %v3687_v29  ;;  %2128 = vmatpush.bf16.msra.mxu0 %v3432_v30 }
  0x33   :  { %v3415_v36 = vld [vmem:[#allocation3 + $0x80] sm:$0xf]  ;;  %v4967_v37 = vld [vmem:[#allocation3 + $0x8c] sm:$0xf0]  ;;  %v3816_v39 = vor.u32 %v5067_v33, %v3815_v32  ;;  %2141 = vmatpush.bf16.msra.mxu1 %v3560_v34 }
  0x34   :  { %v3543_v38 = vld [vmem:[#allocation3 + $0x180] sm:$0xf]  ;;  %v4999_v40 = vld [vmem:[#allocation3 + $0x18c] sm:$0xf0]  ;;  %v3416_v45 = vor.u32 %v4967_v37, %v3415_v36  ;;  %2154 = vmatpush.bf16.msra.mxu2 %v3688_v35 }
  0x35   :  { %v3671_v41 = vld [vmem:[#allocation3 + $0x280] sm:$0xf]  ;;  %v5031_v42 = vld [vmem:[#allocation3 + $0x28c] sm:$0xf0]  ;;  %v3544_v46 = vor.u32 %v4999_v40, %v3543_v38  ;;  %2167 = vmatpush.bf16.msra.mxu3 %v3816_v39 }
  0x36   :  { %v3799_v43 = vld [vmem:[#allocation3 + $0x380] sm:$0xf]  ;;  %v5063_v44 = vld [vmem:[#allocation3 + $0x38c] sm:$0xf0]  ;;  %v3672_v47 = vor.u32 %v5031_v42, %v3671_v41  ;;  %2129 = vmatpush.bf16.msra.mxu0 %v3416_v45 }
  0x37   :  { %v3399_v48 = vld [vmem:[#allocation3 + $0x60] sm:$0xf]  ;;  %v4963_v49 = vld [vmem:[#allocation3 + $0x6c] sm:$0xf0]  ;;  %v3800_v51 = vor.u32 %v5063_v44, %v3799_v43  ;;  %2142 = vmatpush.bf16.msra.mxu1 %v3544_v46 }
  0x38   :  { %v3527_v50 = vld [vmem:[#allocation3 + $0x160] sm:$0xf]  ;;  %v4995_v52 = vld [vmem:[#allocation3 + $0x16c] sm:$0xf0]  ;;  %v3400_v57 = vor.u32 %v4963_v49, %v3399_v48  ;;  %2155 = vmatpush.bf16.msra.mxu2 %v3672_v47 }
  0x39   :  { %v3655_v53 = vld [vmem:[#allocation3 + $0x260] sm:$0xf]  ;;  %v5027_v54 = vld [vmem:[#allocation3 + $0x26c] sm:$0xf0]  ;;  %v3528_v58 = vor.u32 %v4995_v52, %v3527_v50  ;;  %2168 = vmatpush.bf16.msra.mxu3 %v3800_v51 }
  0x3a   :  { %v3783_v55 = vld [vmem:[#allocation3 + $0x360] sm:$0xf]  ;;  %v5059_v56 = vld [vmem:[#allocation3 + $0x36c] sm:$0xf0]  ;;  %v3656_v59 = vor.u32 %v5027_v54, %v3655_v53  ;;  %2130 = vmatpush.bf16.msra.mxu0 %v3400_v57 }
  0x3b   :  { %v3383_v60 = vld [vmem:[#allocation3 + $0x40] sm:$0xf]  ;;  %v4959_v61 = vld [vmem:[#allocation3 + $0x4c] sm:$0xf0]  ;;  %v3784_v63 = vor.u32 %v5059_v56, %v3783_v55  ;;  %2143 = vmatpush.bf16.msra.mxu1 %v3528_v58 }
  0x3c   :  { %v3511_v62 = vld [vmem:[#allocation3 + $0x140] sm:$0xf]  ;;  %v4991_v0 = vld [vmem:[#allocation3 + $0x14c] sm:$0xf0]  ;;  %v3384_v5 = vor.u32 %v4959_v61, %v3383_v60  ;;  %2156 = vmatpush.bf16.msra.mxu2 %v3656_v59 }
  0x3d   :  { %v3639_v1 = vld [vmem:[#allocation3 + $0x240] sm:$0xf]  ;;  %v5023_v2 = vld [vmem:[#allocation3 + $0x24c] sm:$0xf0]  ;;  %v3512_v6 = vor.u32 %v4991_v0, %v3511_v62  ;;  %2169 = vmatpush.bf16.msra.mxu3 %v3784_v63 }
  0x3e   :  { %v3767_v3 = vld [vmem:[#allocation3 + $0x340] sm:$0xf]  ;;  %v5055_v4 = vld [vmem:[#allocation3 + $0x34c] sm:$0xf0]  ;;  %v3640_v7 = vor.u32 %v5023_v2, %v3639_v1  ;;  %2131 = vmatpush.bf16.msra.mxu0 %v3384_v5 }
  0x3f   :  { %v3367_v8 = vld [vmem:[#allocation3 + $0x20] sm:$0xf]  ;;  %v4955_v9 = vld [vmem:[#allocation3 + $0x2c] sm:$0xf0]  ;;  %v3768_v11 = vor.u32 %v5055_v4, %v3767_v3  ;;  %2144 = vmatpush.bf16.msra.mxu1 %v3512_v6  ;;  %v155_v3 = vld [vmem:[%s5820_s0] sm:$0xff] }
  0x40   :  { %v3495_v10 = vld [vmem:[#allocation3 + $0x120] sm:$0xf]  ;;  %v4987_v12 = vld [vmem:[#allocation3 + $0x12c] sm:$0xf0]  ;;  %v3368_v17 = vor.u32 %v4955_v9, %v3367_v8  ;;  %2157 = vmatpush.bf16.msra.mxu2 %v3640_v7  ;;  %503 = vst [vmem:[#allocation1] ss:$9 sm:$0xff] %v155_v3 }
  0x41   :  { %v3623_v13 = vld [vmem:[#allocation3 + $0x220] sm:$0xf]  ;;  %v5019_v14 = vld [vmem:[#allocation3 + $0x22c] sm:$0xf0]  ;;  %v3496_v20 = vor.u32 %v4987_v12, %v3495_v10  ;;  %2170 = vmatpush.bf16.msra.mxu3 %v3768_v11 }
  0x42   :  { %v3751_v15 = vld [vmem:[#allocation3 + $0x320] sm:$0xf]  ;;  %v5051_v16 = vld [vmem:[#allocation3 + $0x32c] sm:$0xf0]  ;;  %v3624_v21 = vor.u32 %v5019_v14, %v3623_v13  ;;  %2132 = vmatpush.bf16.msra.mxu0 %v3368_v17 }
  0x43   :  { %v3351_v18 = vld [vmem:[#allocation3] sm:$0xf]  ;;  %v4951_v19 = vld [vmem:[#allocation3 + $0xc] sm:$0xf0]  ;;  %v3752_v25 = vor.u32 %v5051_v16, %v3751_v15  ;;  %2145 = vmatpush.bf16.msra.mxu1 %v3496_v20 }
  0x44   :  { %v3479_v22 = vld [vmem:[#allocation3 + $0x100] sm:$0xf]  ;;  %v4983_v23 = vld [vmem:[#allocation3 + $0x10c] sm:$0xf0]  ;;  %v3352_v32 = vor.u32 %v4951_v19, %v3351_v18  ;;  %2158 = vmatpush.bf16.msra.mxu2 %v3624_v21 }
  0x45   :  { %v3607_v24 = vld [vmem:[#allocation3 + $0x200] sm:$0xf]  ;;  %v5015_v26 = vld [vmem:[#allocation3 + $0x20c] sm:$0xf0]  ;;  %v3480_v36 = vor.u32 %v4983_v23, %v3479_v22  ;;  %2171 = vmatpush.bf16.msra.mxu3 %v3752_v25 }
  0x46   :  { %v3735_v27 = vld [vmem:[#allocation3 + $0x300] sm:$0xf]  ;;  %v5047_v28 = vld [vmem:[#allocation3 + $0x30c] sm:$0xf0]  ;;  %v3608_v37 = vor.u32 %v5015_v26, %v3607_v24  ;;  %2133 = vmatpush.bf16.msra.mxu0 %v3352_v32 }
  0x47   :  { %v3975_v29 = vld [vmem:[#allocation3 + $0x4e0] sm:$0xf]  ;;  %v5107_v30 = vld [vmem:[#allocation3 + $0x4ec] sm:$0xf0]  ;;  %v3736_v40 = vor.u32 %v5047_v28, %v3735_v27  ;;  %2146 = vmatpush.bf16.msra.mxu1 %v3480_v36 }
  0x48   :  { %v4103_v31 = vld [vmem:[#allocation3 + $0x5e0] sm:$0xf]  ;;  %v5139_v33 = vld [vmem:[#allocation3 + $0x5ec] sm:$0xf0]  ;;  %v3976_v41 = vor.u32 %v5107_v30, %v3975_v29  ;;  %2159 = vmatpush.bf16.msra.mxu2 %v3608_v37  ;;  %v5678_v29 = vld [vmem:[#allocation1] sm:$0xff] }
  0x49   :  { %v4231_v34 = vld [vmem:[#allocation3 + $0x6e0] sm:$0xf]  ;;  %v5171_v35 = vld [vmem:[#allocation3 + $0x6ec] sm:$0xf0]  ;;  %v4104_v42 = vor.u32 %v5139_v33, %v4103_v31  ;;  %2172 = vmatpush.bf16.msra.mxu3 %v3736_v40  ;;  %2134 = vmatmul.bf16.vlgmr.msra.gmra.mxu0 %v5678_v29 }
  0x4a   :  { %v4359_v38 = vld [vmem:[#allocation3 + $0x7e0] sm:$0xf]  ;;  %v5203_v39 = vld [vmem:[#allocation3 + $0x7ec] sm:$0xf0]  ;;  %v4232_v43 = vor.u32 %v5171_v35, %v4231_v34  ;;  %2178 = vmatpush.bf16.msrb.mxu0 %v3976_v41 }
  0x4b   :  { %v3959_v44 = vld [vmem:[#allocation3 + $0x4c0] sm:$0xf]  ;;  %v5103_v45 = vld [vmem:[#allocation3 + $0x4cc] sm:$0xf0]  ;;  %v4360_v47 = vor.u32 %v5203_v39, %v4359_v38  ;;  %2191 = vmatpush.bf16.msrb.mxu1 %v4104_v42 }
  0x4c   :  { %v4087_v46 = vld [vmem:[#allocation3 + $0x5c0] sm:$0xf]  ;;  %v5135_v48 = vld [vmem:[#allocation3 + $0x5cc] sm:$0xf0]  ;;  %v3960_v53 = vor.u32 %v5103_v45, %v3959_v44  ;;  %2204 = vmatpush.bf16.msrb.mxu2 %v4232_v43 }
  0x4d   :  { %v4215_v49 = vld [vmem:[#allocation3 + $0x6c0] sm:$0xf]  ;;  %v5167_v50 = vld [vmem:[#allocation3 + $0x6cc] sm:$0xf0]  ;;  %v4088_v54 = vor.u32 %v5135_v48, %v4087_v46  ;;  %2217 = vmatpush.bf16.msrb.mxu3 %v4360_v47 }
  0x4e   :  { %v4343_v51 = vld [vmem:[#allocation3 + $0x7c0] sm:$0xf]  ;;  %v5199_v52 = vld [vmem:[#allocation3 + $0x7cc] sm:$0xf0]  ;;  %v4216_v55 = vor.u32 %v5167_v50, %v4215_v49  ;;  %2179 = vmatpush.bf16.msrb.mxu0 %v3960_v53 }
  0x4f   :  { %v3943_v56 = vld [vmem:[#allocation3 + $0x4a0] sm:$0xf]  ;;  %v5099_v57 = vld [vmem:[#allocation3 + $0x4ac] sm:$0xf0]  ;;  %v4344_v59 = vor.u32 %v5199_v52, %v4343_v51  ;;  %2192 = vmatpush.bf16.msrb.mxu1 %v4088_v54  ;;  %v5585_v52 = vmov 0  }
  0x50   :  { %v4071_v58 = vld [vmem:[#allocation3 + $0x5a0] sm:$0xf]  ;;  %v5131_v60 = vld [vmem:[#allocation3 + $0x5ac] sm:$0xf0]  ;;  %v3944_v1 = vor.u32 %v5099_v57, %v3943_v56  ;;  %2205 = vmatpush.bf16.msrb.mxu2 %v4216_v55  ;;  %5364 = vset.pattern.permute.xlu0 %v5585_v52 }
  0x51   :  { %v4199_v61 = vld [vmem:[#allocation3 + $0x6a0] sm:$0xf]  ;;  %v5163_v62 = vld [vmem:[#allocation3 + $0x6ac] sm:$0xf0]  ;;  %v4072_v4 = vor.u32 %v5131_v60, %v4071_v58  ;;  %2218 = vmatpush.bf16.msrb.mxu3 %v4344_v59  ;;  %v157_v58 = vld [vmem:[%s5821_s1] sm:$0x3] }
  0x52   :  { %v4327_v63 = vld [vmem:[#allocation3 + $0x7a0] sm:$0xf]  ;;  %v5195_v0 = vld [vmem:[#allocation3 + $0x7ac] sm:$0xf0]  ;;  %v4200_v5 = vor.u32 %v5163_v62, %v4199_v61  ;;  %2180 = vmatpush.bf16.msrb.mxu0 %v3944_v1  ;;  %482 = vperm.xlu0 %5364, %v157_v58   ;;  %v4997_v58 = vld [vmem:[#allocation3 + $0x184] sm:$0xf] }
  0x53   :  { %v3927_v2 = vld [vmem:[#allocation3 + $0x480] sm:$0xf]  ;;  %v5095_v6 = vld [vmem:[#allocation3 + $0x48c] sm:$0xf0]  ;;  %v4328_v8 = vor.u32 %v5195_v0, %v4327_v63  ;;  %2193 = vmatpush.bf16.msrb.mxu1 %v4072_v4 }
  0x54   :  { %v4055_v7 = vld [vmem:[#allocation3 + $0x580] sm:$0xf]  ;;  %v5127_v9 = vld [vmem:[#allocation3 + $0x58c] sm:$0xf0]  ;;  %v3928_v14 = vor.u32 %v5095_v6, %v3927_v2  ;;  %2206 = vmatpush.bf16.msrb.mxu2 %v4200_v5 }
  0x55   :  { %v4183_v10 = vld [vmem:[#allocation3 + $0x680] sm:$0xf]  ;;  %v5159_v11 = vld [vmem:[#allocation3 + $0x68c] sm:$0xf0]  ;;  %v4056_v15 = vor.u32 %v5127_v9, %v4055_v7  ;;  %2219 = vmatpush.bf16.msrb.mxu3 %v4328_v8  ;;  %v4977_v9 = vld [vmem:[#allocation3 + $0xe4] sm:$0xf] }
  0x56   :  { %v4311_v12 = vld [vmem:[#allocation3 + $0x780] sm:$0xf]  ;;  %v5191_v13 = vld [vmem:[#allocation3 + $0x78c] sm:$0xf0]  ;;  %v4184_v16 = vor.u32 %v5159_v11, %v4183_v10  ;;  %2181 = vmatpush.bf16.msrb.mxu0 %v3928_v14  ;;  %v3465_v10 = vld [vmem:[#allocation3 + $0xf0] sm:$0xf0] }
  0x57   :  { %v3911_v17 = vld [vmem:[#allocation3 + $0x460] sm:$0xf]  ;;  %v5091_v18 = vld [vmem:[#allocation3 + $0x46c] sm:$0xf0]  ;;  %v4312_v20 = vor.u32 %v5191_v13, %v4311_v12  ;;  %2194 = vmatpush.bf16.msrb.mxu1 %v4056_v15  ;;  %v5009_v13 = vld [vmem:[#allocation3 + $0x1e4] sm:$0xf] }
  0x58   :  { %v4039_v19 = vld [vmem:[#allocation3 + $0x560] sm:$0xf]  ;;  %v5123_v21 = vld [vmem:[#allocation3 + $0x56c] sm:$0xf0]  ;;  %v3912_v27 = vor.u32 %v5091_v18, %v3911_v17  ;;  %2207 = vmatpush.bf16.msrb.mxu2 %v4184_v16  ;;  %v3593_v14 = vld [vmem:[#allocation3 + $0x1f0] sm:$0xf0]  ;;  %v3468_v18 = vor.u32 %v4977_v9, %v3465_v10 }
  0x59   :  { %v4167_v22 = vld [vmem:[#allocation3 + $0x660] sm:$0xf]  ;;  %v5155_v23 = vld [vmem:[#allocation3 + $0x66c] sm:$0xf0]  ;;  %v4040_v31 = vor.u32 %v5123_v21, %v4039_v19  ;;  %2220 = vmatpush.bf16.msrb.mxu3 %v4312_v20 }
  0x5a   :  { %v4295_v24 = vld [vmem:[#allocation3 + $0x760] sm:$0xf]  ;;  %v5187_v25 = vld [vmem:[#allocation3 + $0x76c] sm:$0xf0]  ;;  %v4168_v32 = vor.u32 %v5155_v23, %v4167_v22  ;;  %2182 = vmatpush.bf16.msrb.mxu0 %v3912_v27  ;;  %v3596_v22 = vor.u32 %v5009_v13, %v3593_v14  ;;  %v3577_v27 = vld [vmem:[#allocation3 + $0x1d0] sm:$0xf0] }
  0x5b   :  { %v3895_v26 = vld [vmem:[#allocation3 + $0x440] sm:$0xf]  ;;  %v5676_v28 = vld [vmem:[#allocation1 + $0x12] sm:$0xff]  ;;  %v5680_v30 = vld [vmem:[#allocation1 + $0x1b] sm:$0xff]  ;;  %v4296_v36 = vor.u32 %v5187_v25, %v4295_v24  ;;  %2195 = vmatpush.bf16.msrb.mxu1 %v4040_v31 }
  0x5c   :  { %v5087_v33 = vld [vmem:[#allocation3 + $0x44c] sm:$0xf0]  ;;  %v4023_v34 = vld [vmem:[#allocation3 + $0x540] sm:$0xf]  ;;  %2160 = vmatmul.bf16.vlgmr.msra.gmra.mxu2 %v5676_v28  ;;  %2173 = vmatmul.bf16.vlgmr.msra.gmra.mxu3 %v5680_v30  ;;  %v4973_v24 = vld [vmem:[#allocation3 + $0xc4] sm:$0xf] }
  0x5d   :  { %v5682_v35 = vld [vmem:[#allocation1 + $0x9] sm:$0xff]  ;;  %v5119_v37 = vld [vmem:[#allocation3 + $0x54c] sm:$0xf0]  ;;  %v3896_v42 = vor.u32 %v5087_v33, %v3895_v26  ;;  %2208 = vmatpush.bf16.msrb.mxu2 %v4168_v32  ;;  %2221 = vmatpush.bf16.msrb.mxu3 %v4296_v36  ;;  %v3449_v25 = vld [vmem:[#allocation3 + $0xd0] sm:$0xf0] }
  0x5e   :  { %v4151_v38 = vld [vmem:[#allocation3 + $0x640] sm:$0xf]  ;;  %v5151_v39 = vld [vmem:[#allocation3 + $0x64c] sm:$0xf0]  ;;  %2147 = vmatmul.bf16.vlgmr.msra.gmra.mxu1 %v5682_v35  ;;  %v4024_v43 = vor.u32 %v5119_v37, %v4023_v34  ;;  %v5005_v26 = vld [vmem:[#allocation3 + $0x1c4] sm:$0xf] }
  0x5f   :  { %v4279_v40 = vld [vmem:[#allocation3 + $0x740] sm:$0xf]  ;;  %v5183_v41 = vld [vmem:[#allocation3 + $0x74c] sm:$0xf0]  ;;  %v4152_v44 = vor.u32 %v5151_v39, %v4151_v38  ;;  %2183 = vmatpush.bf16.msrb.mxu0 %v3896_v42  ;;  %v5695_v36 = vld [vmem:[#allocation1 + $0x3f] sm:$0xff]  ;;  %v3452_v38 = vor.u32 %v4973_v24, %v3449_v25  ;;  %v3580_v42 = vor.u32 %v5005_v26, %v3577_v27 }
  0x60   :  { %v3879_v45 = vld [vmem:[#allocation3 + $0x420] sm:$0xf]  ;;  %v5083_v46 = vld [vmem:[#allocation3 + $0x42c] sm:$0xf0]  ;;  %v4280_v48 = vor.u32 %v5183_v41, %v4279_v40  ;;  %2196 = vmatpush.bf16.msrb.mxu1 %v4024_v43  ;;  %v5697_v41 = vld [vmem:[#allocation1 + $0x2d] sm:$0xff] }
  0x61   :  { %v4007_v47 = vld [vmem:[#allocation3 + $0x520] sm:$0xf]  ;;  %v5115_v49 = vld [vmem:[#allocation3 + $0x52c] sm:$0xf0]  ;;  %v3880_v55 = vor.u32 %v5083_v46, %v3879_v45  ;;  %2209 = vmatpush.bf16.msrb.mxu2 %v4152_v44  ;;  %v4969_v44 = vld [vmem:[#allocation3 + $0xa4] sm:$0xf] }
  0x62   :  { %v4135_v50 = vld [vmem:[#allocation3 + $0x620] sm:$0xf]  ;;  %v5147_v51 = vld [vmem:[#allocation3 + $0x62c] sm:$0xf0]  ;;  %v4008_v59 = vor.u32 %v5115_v49, %v4007_v47  ;;  %2222 = vmatpush.bf16.msrb.mxu3 %v4280_v48  ;;  %v3433_v45 = vld [vmem:[#allocation3 + $0xb0] sm:$0xf0] }
  0x63   :  { %v4263_v53 = vld [vmem:[#allocation3 + $0x720] sm:$0xf]  ;;  %v5179_v54 = vld [vmem:[#allocation3 + $0x72c] sm:$0xf0]  ;;  %v4136_v60 = vor.u32 %v5147_v51, %v4135_v50  ;;  %2184 = vmatpush.bf16.msrb.mxu0 %v3880_v55  ;;  %v5001_v46 = vld [vmem:[#allocation3 + $0x1a4] sm:$0xf]  ;;  %v3436_v50 = vor.u32 %v4969_v44, %v3433_v45 }
  0x64   :  { %v3863_v56 = vld [vmem:[#allocation3 + $0x400] sm:$0xf]  ;;  %v5079_v57 = vld [vmem:[#allocation3 + $0x40c] sm:$0xf0]  ;;  %v4264_v0 = vor.u32 %v5179_v54, %v4263_v53  ;;  %2197 = vmatpush.bf16.msrb.mxu1 %v4008_v59  ;;  %v3561_v47 = vld [vmem:[#allocation3 + $0x1b0] sm:$0xf0] }
  0x65   :  { %v3991_v61 = vld [vmem:[#allocation3 + $0x500] sm:$0xf]  ;;  %v5111_v62 = vld [vmem:[#allocation3 + $0x50c] sm:$0xf0]  ;;  %v3864_v7 = vor.u32 %v5079_v57, %v3863_v56  ;;  %2210 = vmatpush.bf16.msrb.mxu2 %v4136_v60  ;;  %v3564_v54 = vor.u32 %v5001_v46, %v3561_v47  ;;  %v4965_v56 = vld [vmem:[#allocation3 + $0x84] sm:$0xf] }
  0x66   :  { %v4119_v63 = vld [vmem:[#allocation3 + $0x600] sm:$0xf]  ;;  %v5143_v1 = vld [vmem:[#allocation3 + $0x60c] sm:$0xf0]  ;;  %v3992_v11 = vor.u32 %v5111_v62, %v3991_v61  ;;  %2223 = vmatpush.bf16.msrb.mxu3 %v4264_v0  ;;  %v3417_v57 = vld [vmem:[#allocation3 + $0x90] sm:$0xf0] }
  0x67   :  { %v4247_v2 = vld [vmem:[#allocation3 + $0x700] sm:$0xf]  ;;  %v5175_v3 = vld [vmem:[#allocation3 + $0x70c] sm:$0xf0]  ;;  %v4120_v12 = vor.u32 %v5143_v1, %v4119_v63  ;;  %2185 = vmatpush.bf16.msrb.mxu0 %v3864_v7  ;;  %v3545_v59 = vld [vmem:[#allocation3 + $0x190] sm:$0xf0]  ;;  %v3420_v63 = vor.u32 %v4965_v56, %v3417_v57 }
  0x68   :  { %v4487_v4 = vld [vmem:[#allocation3 + $0x8e0] sm:$0xf]  ;;  %v5235_v5 = vld [vmem:[#allocation3 + $0x8ec] sm:$0xf0]  ;;  %v4248_v15 = vor.u32 %v5175_v3, %v4247_v2  ;;  %2198 = vmatpush.bf16.msrb.mxu1 %v3992_v11  ;;  %v3548_v3 = vor.u32 %v4997_v58, %v3545_v59  ;;  %v4993_v7 = vld [vmem:[#allocation3 + $0x164] sm:$0xf] }
  0x69   :  { %v4615_v6 = vld [vmem:[#allocation3 + $0x9e0] sm:$0xf]  ;;  %v5267_v8 = vld [vmem:[#allocation3 + $0x9ec] sm:$0xf0]  ;;  %v4488_v16 = vor.u32 %v5235_v5, %v4487_v4  ;;  %2211 = vmatpush.bf16.msrb.mxu2 %v4120_v12  ;;  %v4961_v5 = vld [vmem:[#allocation3 + $0x64] sm:$0xf] }
  0x6a   :  { %v4616_v17 = vor.u32 %v5267_v8, %v4615_v6  ;;  %v4471_v19 = vld [vmem:[#allocation3 + $0x8c0] sm:$0xf]  ;;  %v5231_v20 = vld [vmem:[#allocation3 + $0x8cc] sm:$0xf0]  ;;  %2224 = vmatpush.bf16.msrb.mxu3 %v4248_v15  ;;  %v3401_v6 = vld [vmem:[#allocation3 + $0x70] sm:$0xf0] }
  0x6b   :  { %v4599_v21 = vld [vmem:[#allocation3 + $0x9c0] sm:$0xf]  ;;  %v5263_v23 = vld [vmem:[#allocation3 + $0x9cc] sm:$0xf0]  ;;  %2230 = vmatpush.bf16.msra.mxu0 %v4488_v16  ;;  %v4472_v32 = vor.u32 %v5231_v20, %v4471_v19  ;;  %v3529_v8 = vld [vmem:[#allocation3 + $0x170] sm:$0xf0]  ;;  %v3404_v11 = vor.u32 %v4961_v5, %v3401_v6 }
  0x6c   :  { %v5691_v31 = vld [vmem:[#allocation1 + $0x36] sm:$0xff]  ;;  %v4455_v33 = vld [vmem:[#allocation3 + $0x8a0] sm:$0xf]  ;;  %2243 = vmatpush.bf16.msra.mxu1 %v4616_v17  ;;  %v4600_v37 = vor.u32 %v5263_v23, %v4599_v21  ;;  %v3532_v15 = vor.u32 %v4993_v7, %v3529_v8  ;;  %v4957_v17 = vld [vmem:[#allocation3 + $0x44] sm:$0xf] }
  0x6d   :  { %v5693_v34 = vld [vmem:[#allocation1 + $0x24] sm:$0xff]  ;;  %2256 = vmatpush.bf16.msra.mxu2 %v3468_v18  ;;  %v5227_v39 = vld [vmem:[#allocation3 + $0x8ac] sm:$0xf0]  ;;  %2225 = vmatmul.bf16.vlgmr.msrb.gmra.mxu3 %v5695_v36  ;;  %v3385_v18 = vld [vmem:[#allocation3 + $0x50] sm:$0xf0] }
  0x6e   :  { %v4583_v40 = vld [vmem:[#allocation3 + $0x9a0] sm:$0xf]  ;;  %2269 = vmatpush.bf16.msra.mxu3 %v3596_v22  ;;  %2212 = vmatmul.bf16.vlgmr.msrb.gmra.mxu2 %v5691_v31  ;;  %v5259_v43 = vld [vmem:[#allocation3 + $0x9ac] sm:$0xf0]  ;;  %v4456_v48 = vor.u32 %v5227_v39, %v4455_v33  ;;  %v4989_v19 = vld [vmem:[#allocation3 + $0x144] sm:$0xf]  ;;  %v3388_v23 = vor.u32 %v4957_v17, %v3385_v18 }
  0x6f   :  { %2186 = vmatmul.bf16.vlgmr.msrb.gmra.mxu0 %v5693_v34  ;;  %2199 = vmatmul.bf16.vlgmr.msrb.gmra.mxu1 %v5697_v41  ;;  %v4584_v49 = vor.u32 %v5259_v43, %v4583_v40  ;;  %v4439_v51 = vld [vmem:[#allocation3 + $0x880] sm:$0xf]  ;;  %v5223_v52 = vld [vmem:[#allocation3 + $0x88c] sm:$0xf0]  ;;  %v3513_v20 = vld [vmem:[#allocation3 + $0x150] sm:$0xf0] }
  0x70   :  { %2231 = vmatpush.bf16.msra.mxu0 %v4472_v32  ;;  %2244 = vmatpush.bf16.msra.mxu1 %v4600_v37  ;;  %v4567_v53 = vld [vmem:[#allocation3 + $0x980] sm:$0xf]  ;;  %v5255_v55 = vld [vmem:[#allocation3 + $0x98c] sm:$0xf0]  ;;  %v4440_v61 = vor.u32 %v5223_v52, %v4439_v51  ;;  %v3516_v27 = vor.u32 %v4989_v19, %v3513_v20  ;;  %v4953_v33 = vld [vmem:[#allocation3 + $0x24] sm:$0xf] }
  0x71   :  { %2257 = vmatpush.bf16.msra.mxu2 %v3452_v38  ;;  %v156_v60 = vld [vmem:[%s5820_s0 + $0x8] sm:$0x3]  ;;  %v4568_v62 = vor.u32 %v5255_v55, %v4567_v53  ;;  %v5219_v1 = vld [vmem:[#allocation3 + $0x86c] sm:$0xf0]  ;;  %v3369_v37 = vld [vmem:[#allocation3 + $0x30] sm:$0xf0] }
  0x72   :  { %2270 = vmatpush.bf16.msra.mxu3 %v3580_v42  ;;  %513 = vst [vmem:[#allocation1] ss:$9 sm:$0xff] %v156_v60  ;;  %v4423_v0 = vld [vmem:[#allocation3 + $0x860] sm:$0xf]  ;;  %v5251_v4 = vld [vmem:[#allocation3 + $0x96c] sm:$0xf0]  ;;  %v3372_v45 = vor.u32 %v4953_v33, %v3369_v37 }
  0x73   :  { %v4551_v2 = vld [vmem:[#allocation3 + $0x960] sm:$0xf]  ;;  %v4424_v9 = vor.u32 %v5219_v1, %v4423_v0  ;;  %v5215_v13 = vld [vmem:[#allocation3 + $0x84c] sm:$0xf0]  ;;  %v4985_v38 = vld [vmem:[#allocation3 + $0x124] sm:$0xf] }
  0x74   :  { %2232 = vmatpush.bf16.msra.mxu0 %v4456_v48  ;;  %2245 = vmatpush.bf16.msra.mxu1 %v4584_v49  ;;  %v4552_v10 = vor.u32 %v5251_v4, %v4551_v2  ;;  %v4407_v12 = vld [vmem:[#allocation3 + $0x840] sm:$0xf]  ;;  %v5247_v16 = vld [vmem:[#allocation3 + $0x94c] sm:$0xf0]  ;;  %v3497_v39 = vld [vmem:[#allocation3 + $0x130] sm:$0xf0] }
  0x75   :  { %2258 = vmatpush.bf16.msra.mxu2 %v3436_v50  ;;  %v4535_v14 = vld [vmem:[#allocation3 + $0x940] sm:$0xf]  ;;  %v4408_v21 = vor.u32 %v5215_v13, %v4407_v12  ;;  %v5211_v25 = vld [vmem:[#allocation3 + $0x82c] sm:$0xf0]  ;;  %v4949_v48 = vld [vmem:[#allocation3 + $0x4] sm:$0xf]  ;;  %v3500_v49 = vor.u32 %v4985_v38, %v3497_v39 }
  0x76   :  { %2271 = vmatpush.bf16.msra.mxu3 %v3564_v54  ;;  %v4536_v22 = vor.u32 %v5247_v16, %v4535_v14  ;;  %v4391_v24 = vld [vmem:[#allocation3 + $0x820] sm:$0xf]  ;;  %v5243_v32 = vld [vmem:[#allocation3 + $0x92c] sm:$0xf0]  ;;  %v3353_v50 = vld [vmem:[#allocation3 + $0x10] sm:$0xf0] }
  0x77   :  { %v4519_v26 = vld [vmem:[#allocation3 + $0x920] sm:$0xf]  ;;  %v4392_v40 = vor.u32 %v5211_v25, %v4391_v24  ;;  %v5207_v43 = vld [vmem:[#allocation3 + $0x80c] sm:$0xf0]  ;;  %v4981_v51 = vld [vmem:[#allocation3 + $0x104] sm:$0xf] }
  0x78   :  { %2233 = vmatpush.bf16.msra.mxu0 %v4440_v61  ;;  %2246 = vmatpush.bf16.msra.mxu1 %v4568_v62  ;;  %v4375_v42 = vld [vmem:[#allocation3 + $0x800] sm:$0xf]  ;;  %v4520_v44 = vor.u32 %v5243_v32, %v4519_v26  ;;  %v5239_v47 = vld [vmem:[#allocation3 + $0x90c] sm:$0xf0]  ;;  %v3481_v52 = vld [vmem:[#allocation3 + $0x110] sm:$0xf0]  ;;  %v3356_v61 = vor.u32 %v4949_v48, %v3353_v50 }
  0x79   :  { %2259 = vmatpush.bf16.msra.mxu2 %v3420_v63  ;;  %v4503_v46 = vld [vmem:[#allocation3 + $0x900] sm:$0xf]  ;;  %v5041_v53 = vld [vmem:[#allocation3 + $0x2e4] sm:$0xf]  ;;  %v3721_v54 = vld [vmem:[#allocation3 + $0x2f0] sm:$0xf0]  ;;  %v4376_v56 = vor.u32 %v5207_v43, %v4375_v42  ;;  %v3484_v0 = vor.u32 %v4981_v51, %v3481_v52 }
  0x7a   :  { %2272 = vmatpush.bf16.msra.mxu3 %v3548_v3  ;;  %v5073_v55 = vld [vmem:[#allocation3 + $0x3e4] sm:$0xf]  ;;  %v3849_v57 = vld [vmem:[#allocation3 + $0x3f0] sm:$0xf0]  ;;  %v4504_v60 = vor.u32 %v5239_v47, %v4503_v46  ;;  %v3724_v1 = vor.u32 %v5041_v53, %v3721_v54 }
  0x7b   :  { %v5105_v58 = vld [vmem:[#allocation3 + $0x4e4] sm:$0xf]  ;;  %v3977_v59 = vld [vmem:[#allocation3 + $0x4f0] sm:$0xf0]  ;;  %v3852_v2 = vor.u32 %v5073_v55, %v3849_v57 }
  0x7c   :  { %2234 = vmatpush.bf16.msra.mxu0 %v4424_v9  ;;  %2247 = vmatpush.bf16.msra.mxu1 %v4552_v10  ;;  %v5137_v62 = vld [vmem:[#allocation3 + $0x5e4] sm:$0xf]  ;;  %v4105_v63 = vld [vmem:[#allocation3 + $0x5f0] sm:$0xf0]  ;;  %v3980_v3 = vor.u32 %v5105_v58, %v3977_v59 }
  0x7d   :  { %2260 = vmatpush.bf16.msra.mxu2 %v3404_v11  ;;  %v5037_v4 = vld [vmem:[#allocation3 + $0x2c4] sm:$0xf]  ;;  %v3705_v5 = vld [vmem:[#allocation3 + $0x2d0] sm:$0xf0]  ;;  %v4108_v7 = vor.u32 %v5137_v62, %v4105_v63 }
  0x7e   :  { %2273 = vmatpush.bf16.msra.mxu3 %v3532_v15  ;;  %v5069_v6 = vld [vmem:[#allocation3 + $0x3c4] sm:$0xf]  ;;  %v3833_v8 = vld [vmem:[#allocation3 + $0x3d0] sm:$0xf0]  ;;  %v3708_v15 = vor.u32 %v5037_v4, %v3705_v5 }
  0x7f   :  { %v5101_v9 = vld [vmem:[#allocation3 + $0x4c4] sm:$0xf]  ;;  %v3961_v10 = vld [vmem:[#allocation3 + $0x4d0] sm:$0xf0]  ;;  %v3836_v16 = vor.u32 %v5069_v6, %v3833_v8 }
  0x80   :  { %2235 = vmatpush.bf16.msra.mxu0 %v4408_v21  ;;  %2248 = vmatpush.bf16.msra.mxu1 %v4536_v22  ;;  %v5706_v11 = vld [vmem:[#allocation1] sm:$0xff]  ;;  %v5133_v12 = vld [vmem:[#allocation3 + $0x5c4] sm:$0xf]  ;;  %v3964_v17 = vor.u32 %v5101_v9, %v3961_v10 }
  0x81   :  { %2261 = vmatpush.bf16.msra.mxu2 %v3388_v23  ;;  %v4089_v13 = vld [vmem:[#allocation3 + $0x5d0] sm:$0xf0]  ;;  %v5708_v14 = vld [vmem:[#allocation1 + $0x9] sm:$0xff] }
  0x82   :  { %2274 = vmatpush.bf16.msra.mxu3 %v3516_v27  ;;  %v5033_v18 = vld [vmem:[#allocation3 + $0x2a4] sm:$0xf]  ;;  %v3689_v19 = vld [vmem:[#allocation3 + $0x2b0] sm:$0xf0]  ;;  %v4092_v21 = vor.u32 %v5133_v12, %v4089_v13 }
  0x83   :  { %v5065_v20 = vld [vmem:[#allocation3 + $0x3a4] sm:$0xf]  ;;  %v3817_v22 = vld [vmem:[#allocation3 + $0x3b0] sm:$0xf0]  ;;  %v3692_v27 = vor.u32 %v5033_v18, %v3689_v19 }
  0x84   :  { %2236 = vmatpush.bf16.msra.mxu0 %v4392_v40  ;;  %2249 = vmatpush.bf16.msra.mxu1 %v4520_v44  ;;  %v5097_v23 = vld [vmem:[#allocation3 + $0x4a4] sm:$0xf]  ;;  %v3945_v24 = vld [vmem:[#allocation3 + $0x4b0] sm:$0xf0]  ;;  %v3820_v32 = vor.u32 %v5065_v20, %v3817_v22 }
  0x85   :  { %2262 = vmatpush.bf16.msra.mxu2 %v3372_v45  ;;  %v5129_v25 = vld [vmem:[#allocation3 + $0x5a4] sm:$0xf]  ;;  %v4073_v26 = vld [vmem:[#allocation3 + $0x5b0] sm:$0xf0]  ;;  %v3948_v33 = vor.u32 %v5097_v23, %v3945_v24 }
  0x86   :  { %2275 = vmatpush.bf16.msra.mxu3 %v3500_v49  ;;  %v5029_v37 = vld [vmem:[#allocation3 + $0x284] sm:$0xf]  ;;  %v3673_v38 = vld [vmem:[#allocation3 + $0x290] sm:$0xf0]  ;;  %v4076_v40 = vor.u32 %v5129_v25, %v4073_v26 }
  0x87   :  { %v5061_v39 = vld [vmem:[#allocation3 + $0x384] sm:$0xf]  ;;  %v3801_v42 = vld [vmem:[#allocation3 + $0x390] sm:$0xf0]  ;;  %v3676_v47 = vor.u32 %v5029_v37, %v3673_v38 }
  0x88   :  { %2237 = vmatpush.bf16.msra.mxu0 %v4376_v56  ;;  %2250 = vmatpush.bf16.msra.mxu1 %v4504_v60  ;;  %v5093_v43 = vld [vmem:[#allocation3 + $0x484] sm:$0xf]  ;;  %v3929_v44 = vld [vmem:[#allocation3 + $0x490] sm:$0xf0]  ;;  %v3804_v48 = vor.u32 %v5061_v39, %v3801_v42 }
  0x89   :  { %2263 = vmatpush.bf16.msra.mxu2 %v3356_v61  ;;  %v5125_v45 = vld [vmem:[#allocation3 + $0x584] sm:$0xf]  ;;  %v4057_v46 = vld [vmem:[#allocation3 + $0x590] sm:$0xf0]  ;;  %v3932_v49 = vor.u32 %v5093_v43, %v3929_v44 }
  0x8a   :  { %2276 = vmatpush.bf16.msra.mxu3 %v3484_v0  ;;  %v5025_v50 = vld [vmem:[#allocation3 + $0x264] sm:$0xf]  ;;  %v3657_v51 = vld [vmem:[#allocation3 + $0x270] sm:$0xf0]  ;;  %v4060_v53 = vor.u32 %v5125_v45, %v4057_v46 }
  0x8b   :  { %2238 = vmatmul.bf16.vlgmr.msra.gmra.mxu0 %v5706_v11  ;;  %2251 = vmatmul.bf16.vlgmr.msra.gmra.mxu1 %v5708_v14  ;;  %v5057_v52 = vld [vmem:[#allocation3 + $0x364] sm:$0xf]  ;;  %v3785_v54 = vld [vmem:[#allocation3 + $0x370] sm:$0xf0]  ;;  %v3660_v59 = vor.u32 %v5025_v50, %v3657_v51 }
  0x8c   :  { %2282 = vmatpush.bf16.msrb.mxu0 %v3724_v1  ;;  %2295 = vmatpush.bf16.msrb.mxu1 %v3852_v2  ;;  %v5089_v55 = vld [vmem:[#allocation3 + $0x464] sm:$0xf]  ;;  %v3913_v56 = vld [vmem:[#allocation3 + $0x470] sm:$0xf0]  ;;  %v3788_v60 = vor.u32 %v5057_v52, %v3785_v54 }
  0x8d   :  { %2308 = vmatpush.bf16.msrb.mxu2 %v3980_v3  ;;  %2277 = vmatmul.bf16.vlgmr.msra.gmra.mxu3 %v5682_v35  ;;  %v5121_v57 = vld [vmem:[#allocation3 + $0x564] sm:$0xf]  ;;  %v4041_v58 = vld [vmem:[#allocation3 + $0x570] sm:$0xf0]  ;;  %v3916_v61 = vor.u32 %v5089_v55, %v3913_v56 }
  0x8e   :  { %2321 = vmatpush.bf16.msrb.mxu3 %v4108_v7  ;;  %2264 = vmatmul.bf16.vlgmr.msra.gmra.mxu2 %v5678_v29  ;;  %v5021_v62 = vld [vmem:[#allocation3 + $0x244] sm:$0xf]  ;;  %v3641_v63 = vld [vmem:[#allocation3 + $0x250] sm:$0xf0]  ;;  %v4044_v1 = vor.u32 %v5121_v57, %v4041_v58 }
  0x8f   :  { %v5053_v0 = vld [vmem:[#allocation3 + $0x344] sm:$0xf]  ;;  %v3769_v2 = vld [vmem:[#allocation3 + $0x350] sm:$0xf0]  ;;  %v3644_v7 = vor.u32 %v5021_v62, %v3641_v63 }
  0x90   :  { %2283 = vmatpush.bf16.msrb.mxu0 %v3708_v15  ;;  %2296 = vmatpush.bf16.msrb.mxu1 %v3836_v16  ;;  %v5085_v3 = vld [vmem:[#allocation3 + $0x444] sm:$0xf]  ;;  %v3897_v4 = vld [vmem:[#allocation3 + $0x450] sm:$0xf0]  ;;  %v3772_v8 = vor.u32 %v5053_v0, %v3769_v2 }
  0x91   :  { %2309 = vmatpush.bf16.msrb.mxu2 %v3964_v17  ;;  %v5117_v5 = vld [vmem:[#allocation3 + $0x544] sm:$0xf]  ;;  %v4025_v6 = vld [vmem:[#allocation3 + $0x550] sm:$0xf0]  ;;  %v3900_v9 = vor.u32 %v5085_v3, %v3897_v4 }
  0x92   :  { %2322 = vmatpush.bf16.msrb.mxu3 %v4092_v21  ;;  %v5017_v10 = vld [vmem:[#allocation3 + $0x224] sm:$0xf]  ;;  %v3625_v12 = vld [vmem:[#allocation3 + $0x230] sm:$0xf0]  ;;  %v4028_v15 = vor.u32 %v5117_v5, %v4025_v6 }
  0x93   :  { %v5049_v13 = vld [vmem:[#allocation3 + $0x324] sm:$0xf]  ;;  %v3753_v16 = vld [vmem:[#allocation3 + $0x330] sm:$0xf0]  ;;  %v3628_v21 = vor.u32 %v5017_v10, %v3625_v12 }
  0x94   :  { %2284 = vmatpush.bf16.msrb.mxu0 %v3692_v27  ;;  %2297 = vmatpush.bf16.msrb.mxu1 %v3820_v32  ;;  %v5081_v17 = vld [vmem:[#allocation3 + $0x424] sm:$0xf]  ;;  %v3881_v18 = vld [vmem:[#allocation3 + $0x430] sm:$0xf0]  ;;  %v3756_v24 = vor.u32 %v5049_v13, %v3753_v16 }
  0x95   :  { %2310 = vmatpush.bf16.msrb.mxu2 %v3948_v33  ;;  %v5113_v19 = vld [vmem:[#allocation3 + $0x524] sm:$0xf]  ;;  %v4009_v20 = vld [vmem:[#allocation3 + $0x530] sm:$0xf0]  ;;  %v3884_v25 = vor.u32 %v5081_v17, %v3881_v18 }
  0x96   :  { %2323 = vmatpush.bf16.msrb.mxu3 %v4076_v40  ;;  %v5013_v22 = vld [vmem:[#allocation3 + $0x204] sm:$0xf]  ;;  %v3609_v23 = vld [vmem:[#allocation3 + $0x210] sm:$0xf0]  ;;  %v4012_v33 = vor.u32 %v5113_v19, %v4009_v20 }
  0x97   :  { %v5045_v26 = vld [vmem:[#allocation3 + $0x304] sm:$0xf]  ;;  %v3737_v27 = vld [vmem:[#allocation3 + $0x310] sm:$0xf0]  ;;  %v3612_v44 = vor.u32 %v5013_v22, %v3609_v23 }
  0x98   :  { %2285 = vmatpush.bf16.msrb.mxu0 %v3676_v47  ;;  %2298 = vmatpush.bf16.msrb.mxu1 %v3804_v48  ;;  %v5077_v32 = vld [vmem:[#allocation3 + $0x404] sm:$0xf]  ;;  %v3865_v37 = vld [vmem:[#allocation3 + $0x410] sm:$0xf0]  ;;  %v3740_v48 = vor.u32 %v5045_v26, %v3737_v27 }
  0x99   :  { %2311 = vmatpush.bf16.msrb.mxu2 %v3932_v49  ;;  %v5109_v38 = vld [vmem:[#allocation3 + $0x504] sm:$0xf]  ;;  %v3993_v39 = vld [vmem:[#allocation3 + $0x510] sm:$0xf0]  ;;  %v3868_v49 = vor.u32 %v5077_v32, %v3865_v37 }
  0x9a   :  { %2324 = vmatpush.bf16.msrb.mxu3 %v4060_v53  ;;  %v5169_v40 = vld [vmem:[#allocation3 + $0x6e4] sm:$0xf]  ;;  %v4233_v42 = vld [vmem:[#allocation3 + $0x6f0] sm:$0xf0]  ;;  %v3996_v52 = vor.u32 %v5109_v38, %v3993_v39 }
  0x9b   :  { %v5201_v43 = vld [vmem:[#allocation3 + $0x7e4] sm:$0xf]  ;;  %v4361_v45 = vld [vmem:[#allocation3 + $0x7f0] sm:$0xf0]  ;;  %v4236_v53 = vor.u32 %v5169_v40, %v4233_v42 }
  0x9c   :  { %2286 = vmatpush.bf16.msrb.mxu0 %v3660_v59  ;;  %2299 = vmatpush.bf16.msrb.mxu1 %v3788_v60  ;;  %v5233_v46 = vld [vmem:[#allocation3 + $0x8e4] sm:$0xf]  ;;  %v4489_v47 = vld [vmem:[#allocation3 + $0x8f0] sm:$0xf0]  ;;  %v4364_v54 = vor.u32 %v5201_v43, %v4361_v45 }
  0x9d   :  { %2312 = vmatpush.bf16.msrb.mxu2 %v3916_v61  ;;  %v5265_v50 = vld [vmem:[#allocation3 + $0x9e4] sm:$0xf]  ;;  %v4617_v51 = vld [vmem:[#allocation3 + $0x9f0] sm:$0xf0]  ;;  %v4492_v55 = vor.u32 %v5233_v46, %v4489_v47 }
  0x9e   :  { %2325 = vmatpush.bf16.msrb.mxu3 %v4044_v1  ;;  %v5165_v56 = vld [vmem:[#allocation3 + $0x6c4] sm:$0xf]  ;;  %v4217_v57 = vld [vmem:[#allocation3 + $0x6d0] sm:$0xf0]  ;;  %v4620_v59 = vor.u32 %v5265_v50, %v4617_v51 }
  0x9f   :  { %v5197_v58 = vld [vmem:[#allocation3 + $0x7c4] sm:$0xf]  ;;  %v4345_v60 = vld [vmem:[#allocation3 + $0x7d0] sm:$0xf0]  ;;  %v4220_v1 = vor.u32 %v5165_v56, %v4217_v57 }
  0xa0   :  { %2287 = vmatpush.bf16.msrb.mxu0 %v3644_v7  ;;  %2300 = vmatpush.bf16.msrb.mxu1 %v3772_v8  ;;  %v5229_v61 = vld [vmem:[#allocation3 + $0x8c4] sm:$0xf]  ;;  %v4473_v62 = vld [vmem:[#allocation3 + $0x8d0] sm:$0xf0]  ;;  %v4348_v2 = vor.u32 %v5197_v58, %v4345_v60 }
  0xa1   :  { %2313 = vmatpush.bf16.msrb.mxu2 %v3900_v9  ;;  %v5261_v63 = vld [vmem:[#allocation3 + $0x9c4] sm:$0xf]  ;;  %v4601_v0 = vld [vmem:[#allocation3 + $0x9d0] sm:$0xf0]  ;;  %v4476_v3 = vor.u32 %v5229_v61, %v4473_v62 }
  0xa2   :  { %2326 = vmatpush.bf16.msrb.mxu3 %v4028_v15  ;;  %v5161_v4 = vld [vmem:[#allocation3 + $0x6a4] sm:$0xf]  ;;  %v4201_v5 = vld [vmem:[#allocation3 + $0x6b0] sm:$0xf0]  ;;  %v4604_v7 = vor.u32 %v5261_v63, %v4601_v0 }
  0xa3   :  { %v5193_v6 = vld [vmem:[#allocation3 + $0x7a4] sm:$0xf]  ;;  %v4329_v8 = vld [vmem:[#allocation3 + $0x7b0] sm:$0xf0]  ;;  %v4204_v15 = vor.u32 %v5161_v4, %v4201_v5 }
  0xa4   :  { %2288 = vmatpush.bf16.msrb.mxu0 %v3628_v21  ;;  %2301 = vmatpush.bf16.msrb.mxu1 %v3756_v24  ;;  %v5225_v9 = vld [vmem:[#allocation3 + $0x8a4] sm:$0xf]  ;;  %v4457_v10 = vld [vmem:[#allocation3 + $0x8b0] sm:$0xf0]  ;;  %v4332_v16 = vor.u32 %v5193_v6, %v4329_v8 }
  0xa5   :  { %2314 = vmatpush.bf16.msrb.mxu2 %v3884_v25  ;;  %v5257_v12 = vld [vmem:[#allocation3 + $0x9a4] sm:$0xf]  ;;  %v4585_v13 = vld [vmem:[#allocation3 + $0x9b0] sm:$0xf0]  ;;  %v4460_v17 = vor.u32 %v5225_v9, %v4457_v10 }
  0xa6   :  { %2327 = vmatpush.bf16.msrb.mxu3 %v4012_v33  ;;  %v5157_v18 = vld [vmem:[#allocation3 + $0x684] sm:$0xf]  ;;  %v4185_v19 = vld [vmem:[#allocation3 + $0x690] sm:$0xf0]  ;;  %v4588_v21 = vor.u32 %v5257_v12, %v4585_v13 }
  0xa7   :  { %v5189_v20 = vld [vmem:[#allocation3 + $0x784] sm:$0xf]  ;;  %v4313_v22 = vld [vmem:[#allocation3 + $0x790] sm:$0xf0]  ;;  %v4188_v27 = vor.u32 %v5157_v18, %v4185_v19 }
  0xa8   :  { %2289 = vmatpush.bf16.msrb.mxu0 %v3612_v44  ;;  %2302 = vmatpush.bf16.msrb.mxu1 %v3740_v48  ;;  %v5221_v23 = vld [vmem:[#allocation3 + $0x884] sm:$0xf]  ;;  %v4441_v24 = vld [vmem:[#allocation3 + $0x890] sm:$0xf0]  ;;  %v4316_v32 = vor.u32 %v5189_v20, %v4313_v22  ;;  %v4980_v22 = vld [vmem:[#allocation3 + $0xf4] sm:$0xf0] }
  0xa9   :  { %2315 = vmatpush.bf16.msrb.mxu2 %v3868_v49  ;;  %v5253_v25 = vld [vmem:[#allocation3 + $0x984] sm:$0xf]  ;;  %v4569_v26 = vld [vmem:[#allocation3 + $0x990] sm:$0xf0]  ;;  %v4444_v33 = vor.u32 %v5221_v23, %v4441_v24  ;;  %v3599_v23 = vld [vmem:[#allocation3 + $0x1e8] sm:$0xf] }
  0xaa   :  { %2328 = vmatpush.bf16.msrb.mxu3 %v3996_v52  ;;  %v5153_v37 = vld [vmem:[#allocation3 + $0x664] sm:$0xf]  ;;  %v4169_v38 = vld [vmem:[#allocation3 + $0x670] sm:$0xf0]  ;;  %v4572_v40 = vor.u32 %v5253_v25, %v4569_v26  ;;  %v5012_v25 = vld [vmem:[#allocation3 + $0x1f4] sm:$0xf0] }
  0xab   :  { %2290 = vmatmul.bf16.vlgmr.msrb.gmra.mxu0 %v5676_v28  ;;  %2303 = vmatmul.bf16.vlgmr.msrb.gmra.mxu1 %v5680_v30  ;;  %v5185_v39 = vld [vmem:[#allocation3 + $0x764] sm:$0xf]  ;;  %v4297_v42 = vld [vmem:[#allocation3 + $0x770] sm:$0xf0]  ;;  %v4172_v47 = vor.u32 %v5153_v37, %v4169_v38  ;;  %v3727_v26 = vld [vmem:[#allocation3 + $0x2e8] sm:$0xf] }
  0xac   :  { %2334 = vmatpush.bf16.msra.mxu0 %v4236_v53  ;;  %2347 = vmatpush.bf16.msra.mxu1 %v4364_v54  ;;  %v5217_v43 = vld [vmem:[#allocation3 + $0x864] sm:$0xf]  ;;  %v4425_v44 = vld [vmem:[#allocation3 + $0x870] sm:$0xf0]  ;;  %v4300_v48 = vor.u32 %v5185_v39, %v4297_v42  ;;  %v3855_v37 = vld [vmem:[#allocation3 + $0x3e8] sm:$0xf]  ;;  %v3600_v42 = vor.u32 %v5012_v25, %v3599_v23 }
  0xad   :  { %2360 = vmatpush.bf16.msra.mxu2 %v4492_v55  ;;  %2329 = vmatmul.bf16.vlgmr.msrb.gmra.mxu3 %v5697_v41  ;;  %v5249_v45 = vld [vmem:[#allocation3 + $0x964] sm:$0xf]  ;;  %v4553_v46 = vld [vmem:[#allocation3 + $0x970] sm:$0xf0]  ;;  %v4428_v49 = vor.u32 %v5217_v43, %v4425_v44  ;;  %v5076_v38 = vld [vmem:[#allocation3 + $0x3f4] sm:$0xf0] }
  0xae   :  { %2373 = vmatpush.bf16.msra.mxu3 %v4620_v59  ;;  %2316 = vmatmul.bf16.vlgmr.msrb.gmra.mxu2 %v5693_v34  ;;  %v5149_v50 = vld [vmem:[#allocation3 + $0x644] sm:$0xf]  ;;  %v4153_v51 = vld [vmem:[#allocation3 + $0x650] sm:$0xf0]  ;;  %v4556_v53 = vor.u32 %v5249_v45, %v4553_v46  ;;  %v3455_v44 = vld [vmem:[#allocation3 + $0xc8] sm:$0xf] }
  0xaf   :  { %v5181_v52 = vld [vmem:[#allocation3 + $0x744] sm:$0xf]  ;;  %v4281_v54 = vld [vmem:[#allocation3 + $0x750] sm:$0xf0]  ;;  %v4156_v59 = vor.u32 %v5149_v50, %v4153_v51  ;;  %v4976_v45 = vld [vmem:[#allocation3 + $0xd4] sm:$0xf0] }
  0xb0   :  { %2335 = vmatpush.bf16.msra.mxu0 %v4220_v1  ;;  %2348 = vmatpush.bf16.msra.mxu1 %v4348_v2  ;;  %v5213_v55 = vld [vmem:[#allocation3 + $0x844] sm:$0xf]  ;;  %v4409_v56 = vld [vmem:[#allocation3 + $0x850] sm:$0xf0]  ;;  %v4284_v60 = vor.u32 %v5181_v52, %v4281_v54  ;;  %v3583_v46 = vld [vmem:[#allocation3 + $0x1c8] sm:$0xf] }
  0xb1   :  { %2361 = vmatpush.bf16.msra.mxu2 %v4476_v3  ;;  %v5245_v57 = vld [vmem:[#allocation3 + $0x944] sm:$0xf]  ;;  %v4537_v58 = vld [vmem:[#allocation3 + $0x950] sm:$0xf0]  ;;  %v4412_v61 = vor.u32 %v5213_v55, %v4409_v56  ;;  %v5040_v50 = vld [vmem:[#allocation3 + $0x2d4] sm:$0xf0] }
  0xb2   :  { %2374 = vmatpush.bf16.msra.mxu3 %v4604_v7  ;;  %v5145_v62 = vld [vmem:[#allocation3 + $0x624] sm:$0xf]  ;;  %v4137_v63 = vld [vmem:[#allocation3 + $0x630] sm:$0xf0]  ;;  %v4540_v1 = vor.u32 %v5245_v57, %v4537_v58  ;;  %v3839_v51 = vld [vmem:[#allocation3 + $0x3c8] sm:$0xf] }
  0xb3   :  { %v5177_v0 = vld [vmem:[#allocation3 + $0x724] sm:$0xf]  ;;  %v4265_v2 = vld [vmem:[#allocation3 + $0x730] sm:$0xf0]  ;;  %v4140_v7 = vor.u32 %v5145_v62, %v4137_v63  ;;  %v5072_v52 = vld [vmem:[#allocation3 + $0x3d4] sm:$0xf0] }
  0xb4   :  { %2336 = vmatpush.bf16.msra.mxu0 %v4204_v15  ;;  %2349 = vmatpush.bf16.msra.mxu1 %v4332_v16  ;;  %v5209_v3 = vld [vmem:[#allocation3 + $0x824] sm:$0xf]  ;;  %v4393_v4 = vld [vmem:[#allocation3 + $0x830] sm:$0xf0]  ;;  %v4268_v10 = vor.u32 %v5177_v0, %v4265_v2  ;;  %v3439_v56 = vld [vmem:[#allocation3 + $0xa8] sm:$0xf] }
  0xb5   :  { %2362 = vmatpush.bf16.msra.mxu2 %v4460_v17  ;;  %v5241_v5 = vld [vmem:[#allocation3 + $0x924] sm:$0xf]  ;;  %v4521_v6 = vld [vmem:[#allocation3 + $0x930] sm:$0xf0]  ;;  %v4396_v12 = vor.u32 %v5209_v3, %v4393_v4  ;;  %v4972_v57 = vld [vmem:[#allocation3 + $0xb4] sm:$0xf0] }
  0xb6   :  { %2375 = vmatpush.bf16.msra.mxu3 %v4588_v21  ;;  %v5141_v8 = vld [vmem:[#allocation3 + $0x604] sm:$0xf]  ;;  %v4121_v9 = vld [vmem:[#allocation3 + $0x610] sm:$0xf0]  ;;  %v4524_v17 = vor.u32 %v5241_v5, %v4521_v6  ;;  %v3471_v21 = vld [vmem:[#allocation3 + $0xe8] sm:$0xf]  ;;  %v3440_v2 = vor.u32 %v4972_v57, %v3439_v56 }
  0xb7   :  { %v5173_v13 = vld [vmem:[#allocation3 + $0x704] sm:$0xf]  ;;  %v4249_v15 = vld [vmem:[#allocation3 + $0x710] sm:$0xf0]  ;;  %v4124_v24 = vor.u32 %v5141_v8, %v4121_v9  ;;  %v3567_v58 = vld [vmem:[#allocation3 + $0x1a8] sm:$0xf] }
  0xb8   :  { %2337 = vmatpush.bf16.msra.mxu0 %v4188_v27  ;;  %2350 = vmatpush.bf16.msra.mxu1 %v4316_v32  ;;  %v5205_v16 = vld [vmem:[#allocation3 + $0x804] sm:$0xf]  ;;  %v4377_v18 = vld [vmem:[#allocation3 + $0x810] sm:$0xf0]  ;;  %v5044_v27 = vld [vmem:[#allocation3 + $0x2f4] sm:$0xf0]  ;;  %v4252_v32 = vor.u32 %v5173_v13, %v4249_v15 }
  0xb9   :  { %2363 = vmatpush.bf16.msra.mxu2 %v4444_v33  ;;  %v5237_v19 = vld [vmem:[#allocation3 + $0x904] sm:$0xf]  ;;  %v4505_v20 = vld [vmem:[#allocation3 + $0x910] sm:$0xf0]  ;;  %v4380_v33 = vor.u32 %v5205_v16, %v4377_v18  ;;  %v3728_v43 = vor.u32 %v5044_v27, %v3727_v26  ;;  %v5036_v62 = vld [vmem:[#allocation3 + $0x2b4] sm:$0xf0] }
  0xba   :  { %2376 = vmatpush.bf16.msra.mxu3 %v4572_v40  ;;  %v4508_v39 = vor.u32 %v5237_v19, %v4505_v20  ;;  %v3472_v40 = vor.u32 %v4980_v22, %v3471_v21  ;;  %v3823_v63 = vld [vmem:[#allocation3 + $0x3a8] sm:$0xf]  ;;  %v5068_v0 = vld [vmem:[#allocation3 + $0x3b4] sm:$0xf0] }
  0xbb   :  { %v3423_v5 = vld [vmem:[#allocation3 + $0x88] sm:$0xf]  ;;  %v4968_v6 = vld [vmem:[#allocation3 + $0x94] sm:$0xf0] }
  0xbc   :  { %2338 = vmatpush.bf16.msra.mxu0 %v4172_v47  ;;  %2351 = vmatpush.bf16.msra.mxu1 %v4300_v48  ;;  %v3856_v47 = vor.u32 %v5076_v38, %v3855_v37  ;;  %v5008_v48 = vld [vmem:[#allocation3 + $0x1d4] sm:$0xf0]  ;;  %v3807_v13 = vld [vmem:[#allocation3 + $0x388] sm:$0xf] }
  0xbd   :  { %2364 = vmatpush.bf16.msra.mxu2 %v4428_v49  ;;  %v3711_v49 = vld [vmem:[#allocation3 + $0x2c8] sm:$0xf]  ;;  %v3584_v54 = vor.u32 %v5008_v48, %v3583_v46  ;;  %v5000_v9 = vld [vmem:[#allocation3 + $0x194] sm:$0xf0] }
  0xbe   :  { %2377 = vmatpush.bf16.msra.mxu3 %v4556_v53  ;;  %v3456_v53 = vor.u32 %v4976_v45, %v3455_v44  ;;  %v3712_v55 = vor.u32 %v5040_v50, %v3711_v49  ;;  %v5064_v15 = vld [vmem:[#allocation3 + $0x394] sm:$0xf0]  ;;  %v3407_v16 = vld [vmem:[#allocation3 + $0x68] sm:$0xf] }
  0xbf   :  { %v4964_v19 = vld [vmem:[#allocation3 + $0x74] sm:$0xf0]  ;;  %v3535_v20 = vld [vmem:[#allocation3 + $0x168] sm:$0xf]  ;;  %v3808_v22 = vor.u32 %v5064_v15, %v3807_v13 }
  0xc0   :  { %2339 = vmatpush.bf16.msra.mxu0 %v4156_v59  ;;  %2352 = vmatpush.bf16.msra.mxu1 %v4284_v60  ;;  %v3840_v59 = vor.u32 %v5072_v52, %v3839_v51  ;;  %v5004_v60 = vld [vmem:[#allocation3 + $0x1b4] sm:$0xf0]  ;;  %v3791_v26 = vld [vmem:[#allocation3 + $0x368] sm:$0xf] }
  0xc1   :  { %2365 = vmatpush.bf16.msra.mxu2 %v4412_v61  ;;  %v3695_v61 = vld [vmem:[#allocation3 + $0x2a8] sm:$0xf]  ;;  %v3568_v3 = vor.u32 %v5004_v60, %v3567_v58  ;;  %v4996_v23 = vld [vmem:[#allocation3 + $0x174] sm:$0xf0] }
  0xc2   :  { %2378 = vmatpush.bf16.msra.mxu3 %v4540_v1  ;;  %v478_v1 = vld [vmem:[#allocation5] sm:$0xf]  ;;  %v3696_v4 = vor.u32 %v5036_v62, %v3695_v61  ;;  %v5028_v25 = vld [vmem:[#allocation3 + $0x274] sm:$0xf0]  ;;  %v3536_v37 = vor.u32 %v4996_v23, %v3535_v20  ;;  %v3647_v45 = vld [vmem:[#allocation3 + $0x248] sm:$0xf] }
  0xc3   :  { %v5722_v8 = vunpack.c.l.bf16 %v478_v1  ;;  %v5060_v27 = vld [vmem:[#allocation3 + $0x374] sm:$0xf0]  ;;  %v3759_v61 = vld [vmem:[#allocation3 + $0x328] sm:$0xf] }
  0xc4   :  { %2340 = vmatpush.bf16.msra.mxu0 %v4140_v7  ;;  %2353 = vmatpush.bf16.msra.mxu1 %v4268_v10  ;;  %v3551_v7 = vld [vmem:[#allocation3 + $0x188] sm:$0xf]  ;;  %v4992_v44 = vld [vmem:[#allocation3 + $0x154] sm:$0xf0]  ;;  %v5725_v50 = vpop.permute.xlu0 %482 }
  0xc5   :  { %2366 = vmatpush.bf16.msra.mxu2 %v4396_v12  ;;  %v3679_v10 = vld [vmem:[#allocation3 + $0x288] sm:$0xf]  ;;  %v5032_v12 = vld [vmem:[#allocation3 + $0x294] sm:$0xf0]  ;;  %v486_v21 = vperm.slane %v5722_v8, 0 }
  0xc6   :  { %2379 = vmatpush.bf16.msra.mxu3 %v4524_v17  ;;  %v3552_v17 = vor.u32 %v5000_v9, %v3551_v7  ;;  %v3680_v18 = vor.u32 %v5032_v12, %v3679_v10  ;;  %v5024_v46 = vld [vmem:[#allocation3 + $0x254] sm:$0xf0]  ;;  %v3615_v7 = vld [vmem:[#allocation3 + $0x208] sm:$0xf] }
  0xc7   :  { %v5056_v48 = vld [vmem:[#allocation3 + $0x354] sm:$0xf0]  ;;  %v3648_v52 = vor.u32 %v5024_v46, %v3647_v45  ;;  %v3743_v13 = vld [vmem:[#allocation3 + $0x308] sm:$0xf] }
  0xc8   :  { %2341 = vmatpush.bf16.msra.mxu0 %v4124_v24  ;;  %2354 = vmatpush.bf16.msra.mxu1 %v4252_v32  ;;  %v3663_v24 = vld [vmem:[#allocation3 + $0x268] sm:$0xf]  ;;  %v3408_v32 = vor.u32 %v4964_v19, %v3407_v16  ;;  %v4988_v58 = vld [vmem:[#allocation3 + $0x134] sm:$0xf0] }
  0xc9   :  { %2367 = vmatpush.bf16.msra.mxu2 %v4380_v33  ;;  %v3391_v33 = vld [vmem:[#allocation3 + $0x48] sm:$0xf]  ;;  %v3664_v38 = vor.u32 %v5028_v25, %v3663_v24  ;;  %v5020_v60 = vld [vmem:[#allocation3 + $0x234] sm:$0xf0] }
  0xca   :  { %2380 = vmatpush.bf16.msra.mxu3 %v4508_v39  ;;  %v4960_v39 = vld [vmem:[#allocation3 + $0x54] sm:$0xf0]  ;;  %v4367_v25 = vld [vmem:[#allocation3 + $0x7e8] sm:$0xf] }
  0xcb   :  { %2342 = vmatmul.bf16.vlgmr.msra.gmra.mxu0 %v5691_v31  ;;  %2355 = vmatmul.bf16.vlgmr.msra.gmra.mxu1 %v5695_v36  ;;  %v3392_v49 = vor.u32 %v4960_v39, %v3391_v33  ;;  %v5052_v62 = vld [vmem:[#allocation3 + $0x334] sm:$0xf0] }
  0xcc   :  { %2386 = vmatpush.bf16.msrb.mxu0 %v3472_v40  ;;  %2399 = vmatpush.bf16.msrb.mxu1 %v3600_v42  ;;  %v3519_v40 = vld [vmem:[#allocation3 + $0x148] sm:$0xf]  ;;  %v494_v42 = vperm.slane %v486_v21, 0  ;;  %v4952_v1 = vld [vmem:[#allocation3 + $0x14] sm:$0xf0]  ;;  %v3760_v10 = vor.u32 %v5052_v62, %v3759_v61 }
  0xcd   :  { %2412 = vmatpush.bf16.msrb.mxu2 %v3728_v43  ;;  %2381 = vmatmul.bf16.vlgmr.msra.gmra.mxu3 %v5708_v14  ;;  %v3424_v14 = vor.u32 %v4968_v6, %v3423_v5  ;;  %v3792_v43 = vor.u32 %v5060_v27, %v3791_v26  ;;  %v3520_v51 = vor.u32 %v4992_v44, %v3519_v40  ;;  %v3487_v5 = vld [vmem:[#allocation3 + $0x108] sm:$0xf]  ;;  %v4984_v6 = vld [vmem:[#allocation3 + $0x114] sm:$0xf0] }
  0xce   :  { %2425 = vmatpush.bf16.msrb.mxu3 %v3856_v47  ;;  %2368 = vmatmul.bf16.vlgmr.msra.gmra.mxu2 %v5706_v11  ;;  %v3824_v11 = vor.u32 %v5068_v0, %v3823_v63  ;;  %v3775_v47 = vld [vmem:[#allocation3 + $0x348] sm:$0xf]  ;;  %v498_v56 = vmul.f32 %v494_v42, %v5725_v50  ;;  %v5016_v12 = vld [vmem:[#allocation3 + $0x214] sm:$0xf0]  ;;  %v3488_v23 = vor.u32 %v4984_v6, %v3487_v5 }
  0xcf   :  { %v3776_v57 = vor.u32 %v5056_v48, %v3775_v47  ;;  %v3359_v0 = vld [vmem:[#allocation3 + $0x8] sm:$0xf]  ;;  %v5048_v15 = vld [vmem:[#allocation3 + $0x314] sm:$0xf0]  ;;  %v3616_v24 = vor.u32 %v5016_v12, %v3615_v7 }
  0xd0   :  { %2387 = vmatpush.bf16.msrb.mxu0 %v3456_v53  ;;  %2400 = vmatpush.bf16.msrb.mxu1 %v3584_v54  ;;  %v3375_v53 = vld [vmem:[#allocation3 + $0x28] sm:$0xf]  ;;  %v4956_v54 = vld [vmem:[#allocation3 + $0x34] sm:$0xf0]  ;;  %v3360_v19 = vor.u32 %v4952_v1, %v3359_v0 }
  0xd1   :  { %2413 = vmatpush.bf16.msrb.mxu2 %v3712_v55  ;;  %v3503_v55 = vld [vmem:[#allocation3 + $0x128] sm:$0xf]  ;;  %v3376_v63 = vor.u32 %v4956_v54, %v3375_v53  ;;  %v5108_v16 = vld [vmem:[#allocation3 + $0x4f4] sm:$0xf0] }
  0xd2   :  { %2426 = vmatpush.bf16.msrb.mxu3 %v3840_v59  ;;  %v3631_v59 = vld [vmem:[#allocation3 + $0x228] sm:$0xf]  ;;  %v5140_v20 = vld [vmem:[#allocation3 + $0x5f4] sm:$0xf0] }
  0xd3   :  { %v4239_v21 = vld [vmem:[#allocation3 + $0x6e8] sm:$0xf]  ;;  %v5204_v26 = vld [vmem:[#allocation3 + $0x7f4] sm:$0xf0] }
  0xd4   :  { %2388 = vmatpush.bf16.msrb.mxu0 %v3440_v2  ;;  %2401 = vmatpush.bf16.msrb.mxu1 %v3568_v3  ;;  %v2135_v2 = vpop.f32.mrf.mxu0  ;;  %v3504_v3 = vor.u32 %v4988_v58, %v3503_v55  ;;  %v3967_v42 = vld [vmem:[#allocation3 + $0x4c8] sm:$0xf]  ;;  %v4368_v45 = vor.u32 %v5204_v26, %v4367_v25  ;;  %v5136_v46 = vld [vmem:[#allocation3 + $0x5d4] sm:$0xf0] }
  0xd5   :  { %2414 = vmatpush.bf16.msrb.mxu2 %v3696_v4  ;;  %v3632_v4 = vor.u32 %v5020_v60, %v3631_v59  ;;  %v2136_v9 = vadd.f32 %v2135_v2, %v498_v56  ;;  %v4095_v44 = vld [vmem:[#allocation3 + $0x5c8] sm:$0xf]  ;;  %v5168_v48 = vld [vmem:[#allocation3 + $0x6d4] sm:$0xf0] }
  0xd6   :  { %2427 = vmatpush.bf16.msrb.mxu3 %v3824_v11  ;;  %v4223_v47 = vld [vmem:[#allocation3 + $0x6c8] sm:$0xf]  ;;  %v5200_v53 = vld [vmem:[#allocation3 + $0x7d4] sm:$0xf0]  ;;  %v4096_v56 = vor.u32 %v5136_v46, %v4095_v44 }
  0xd7   :  { %v3951_v58 = vld [vmem:[#allocation3 + $0x4a8] sm:$0xf]  ;;  %v5100_v59 = vld [vmem:[#allocation3 + $0x4b4] sm:$0xf0] }
  0xd8   :  { %2389 = vmatpush.bf16.msrb.mxu0 %v3424_v14  ;;  %2402 = vmatpush.bf16.msrb.mxu1 %v3552_v17  ;;  %v3983_v14 = vld [vmem:[#allocation3 + $0x4e8] sm:$0xf]  ;;  %v5132_v62 = vld [vmem:[#allocation3 + $0x5b4] sm:$0xf0] }
  0xd9   :  { %2415 = vmatpush.bf16.msrb.mxu2 %v3680_v18  ;;  %v4111_v17 = vld [vmem:[#allocation3 + $0x5e8] sm:$0xf]  ;;  %v3984_v33 = vor.u32 %v5108_v16, %v3983_v14  ;;  %v5164_v0 = vld [vmem:[#allocation3 + $0x6b4] sm:$0xf0] }
  0xda   :  { %2428 = vmatpush.bf16.msrb.mxu3 %v3808_v22  ;;  %v5172_v22 = vld [vmem:[#allocation3 + $0x6f4] sm:$0xf0]  ;;  %v4112_v39 = vor.u32 %v5140_v20, %v4111_v17  ;;  %v4079_v60 = vld [vmem:[#allocation3 + $0x5a8] sm:$0xf] }
  0xdb   :  { %v2148_v11 = vpop.f32.mrf.mxu1  ;;  %v4240_v40 = vor.u32 %v5172_v22, %v4239_v21  ;;  %v4335_v1 = vld [vmem:[#allocation3 + $0x7a8] sm:$0xf]  ;;  %v5196_v2 = vld [vmem:[#allocation3 + $0x7b4] sm:$0xf0]  ;;  %v4080_v6 = vor.u32 %v5132_v62, %v4079_v60 }
  0xdc   :  { %2390 = vmatpush.bf16.msrb.mxu0 %v3408_v32  ;;  %2403 = vmatpush.bf16.msrb.mxu1 %v3536_v37  ;;  %v2149_v18 = vadd.f32 %v2148_v11, %v2136_v9  ;;  %v3744_v32 = vor.u32 %v5048_v15, %v3743_v13  ;;  %v3935_v11 = vld [vmem:[#allocation3 + $0x488] sm:$0xf]  ;;  %v5096_v9 = vld [vmem:[#allocation3 + $0x494] sm:$0xf0]  ;;  %v4336_v12 = vor.u32 %v5196_v2, %v4335_v1 }
  0xdd   :  { %2416 = vmatpush.bf16.msrb.mxu2 %v3664_v38  ;;  %v5128_v13 = vld [vmem:[#allocation3 + $0x594] sm:$0xf0]  ;;  %v4191_v15 = vld [vmem:[#allocation3 + $0x688] sm:$0xf] }
  0xde   :  { %2429 = vmatpush.bf16.msrb.mxu3 %v3792_v43  ;;  %v5104_v43 = vld [vmem:[#allocation3 + $0x4d4] sm:$0xf0]  ;;  %v4319_v16 = vld [vmem:[#allocation3 + $0x788] sm:$0xf] }
  0xdf   :  { %v2161_v27 = vpop.f32.mrf.mxu2  ;;  %v2174_v38 = vpop.f32.mrf.mxu3  ;;  %v3968_v55 = vor.u32 %v5104_v43, %v3967_v42  ;;  %v5160_v14 = vld [vmem:[#allocation3 + $0x694] sm:$0xf0]  ;;  %v3919_v22 = vld [vmem:[#allocation3 + $0x468] sm:$0xf] }
  0xe0   :  { %2391 = vmatpush.bf16.msrb.mxu0 %v3392_v49  ;;  %2404 = vmatpush.bf16.msrb.mxu1 %v3520_v51  ;;  %v2162_v37 = vadd.f32 %v2161_v27, %v2149_v18  ;;  %v2137_v51 = vpop.f32.mrf.mxu0  ;;  %v5192_v17 = vld [vmem:[#allocation3 + $0x794] sm:$0xf0]  ;;  %v3936_v18 = vor.u32 %v5096_v9, %v3935_v11  ;;  %v4192_v21 = vor.u32 %v5160_v14, %v4191_v15  ;;  %v4015_v1 = vld [vmem:[#allocation3 + $0x528] sm:$0xf] }
  0xe1   :  { %2417 = vmatpush.bf16.msrb.mxu2 %v3648_v52  ;;  %v4351_v52 = vld [vmem:[#allocation3 + $0x7c8] sm:$0xf]  ;;  %v4320_v27 = vor.u32 %v5192_v17, %v4319_v16  ;;  %v5088_v46 = vld [vmem:[#allocation3 + $0x454] sm:$0xf0] }
  0xe2   :  { %2430 = vmatpush.bf16.msrb.mxu3 %v3776_v57  ;;  %v2175_v49 = vadd.f32 %v2174_v38, %v2162_v37  ;;  %v4224_v57 = vor.u32 %v5168_v48, %v4223_v47  ;;  %v4352_v61 = vor.u32 %v5200_v53, %v4351_v52  ;;  %v5156_v37 = vld [vmem:[#allocation3 + $0x674] sm:$0xf0]  ;;  %v4303_v38 = vld [vmem:[#allocation3 + $0x768] sm:$0xf] }
  0xe3   :  { %v2150_v54 = vpop.f32.mrf.mxu1  ;;  %v4031_v47 = vld [vmem:[#allocation3 + $0x548] sm:$0xf]  ;;  %v5120_v51 = vld [vmem:[#allocation3 + $0x554] sm:$0xf0] }
  0xe4   :  { %2392 = vmatpush.bf16.msrb.mxu0 %v3376_v63  ;;  %2405 = vmatpush.bf16.msrb.mxu1 %v3504_v3  ;;  %v4207_v63 = vld [vmem:[#allocation3 + $0x6a8] sm:$0xf]  ;;  %v5152_v53 = vld [vmem:[#allocation3 + $0x654] sm:$0xf0] }
  0xe5   :  { %2418 = vmatpush.bf16.msrb.mxu2 %v3632_v4  ;;  %v3952_v4 = vor.u32 %v5100_v59, %v3951_v58  ;;  %v4208_v7 = vor.u32 %v5164_v0, %v4207_v63  ;;  %v4159_v52 = vld [vmem:[#allocation3 + $0x648] sm:$0xf]  ;;  %v5084_v0 = vld [vmem:[#allocation3 + $0x434] sm:$0xf0] }
  0xe6   :  { %2431 = vmatpush.bf16.msrb.mxu3 %v3760_v10  ;;  %v4063_v10 = vld [vmem:[#allocation3 + $0x588] sm:$0xf]  ;;  %v4160_v62 = vor.u32 %v5152_v53, %v4159_v52  ;;  %v5180_v11 = vld [vmem:[#allocation3 + $0x734] sm:$0xf0]  ;;  %v4974_v53 = vld [vmem:[#allocation3 + $0xcc] sm:$0xf] }
  0xe7   :  { %v2163_v3 = vpop.f32.mrf.mxu2  ;;  %v2176_v5 = vpop.f32.mrf.mxu3  ;;  %v4064_v20 = vor.u32 %v5128_v13, %v4063_v10  ;;  %v3887_v63 = vld [vmem:[#allocation3 + $0x428] sm:$0xf]  ;;  %v5112_v16 = vld [vmem:[#allocation3 + $0x514] sm:$0xf0] }
  0xe8   :  { %2393 = vmatpush.bf16.msrb.mxu0 %v3360_v19  ;;  %2406 = vmatpush.bf16.msrb.mxu1 %v3488_v23  ;;  %v5092_v23 = vld [vmem:[#allocation3 + $0x474] sm:$0xf0]  ;;  %v4143_v5 = vld [vmem:[#allocation3 + $0x628] sm:$0xf]  ;;  %v3888_v9 = vor.u32 %v5084_v0, %v3887_v63 }
  0xe9   :  { %2419 = vmatpush.bf16.msrb.mxu2 %v3616_v24  ;;  %v4047_v24 = vld [vmem:[#allocation3 + $0x568] sm:$0xf]  ;;  %v3920_v42 = vor.u32 %v5092_v23, %v3919_v22  ;;  %v5176_v22 = vld [vmem:[#allocation3 + $0x714] sm:$0xf0] }
  0xea   :  { %2432 = vmatpush.bf16.msrb.mxu3 %v3744_v32  ;;  %v5124_v32 = vld [vmem:[#allocation3 + $0x574] sm:$0xf0]  ;;  %v3871_v10 = vld [vmem:[#allocation3 + $0x408] sm:$0xf] }
  0xeb   :  { %2394 = vmatmul.bf16.vlgmr.msrb.gmra.mxu0 %v5678_v29  ;;  %2407 = vmatmul.bf16.vlgmr.msrb.gmra.mxu1 %v5682_v35  ;;  %v4048_v43 = vor.u32 %v5124_v32, %v4047_v24  ;;  %v3999_v14 = vld [vmem:[#allocation3 + $0x508] sm:$0xf]  ;;  %v5268_v32 = vld [vmem:[#allocation3 + $0x9f4] sm:$0xf0] }
  0xec   :  { %2438 = vmatpush.bf16.msra.mxu0 %v3984_v33  ;;  %2451 = vmatpush.bf16.msra.mxu1 %v4112_v39  ;;  %v2187_v19 = vpop.f32.mrf.mxu0  ;;  %v2200_v26 = vpop.f32.mrf.mxu1  ;;  %v4175_v33 = vld [vmem:[#allocation3 + $0x668] sm:$0xf]  ;;  %v5188_v39 = vld [vmem:[#allocation3 + $0x774] sm:$0xf0] }
  0xed   :  { %2464 = vmatpush.bf16.msra.mxu2 %v4240_v40  ;;  %2433 = vmatmul.bf16.vlgmr.msrb.gmra.mxu3 %v5680_v30  ;;  %v2188_v25 = vadd.f32 %v2187_v19, %v2175_v49  ;;  %v4176_v44 = vor.u32 %v5156_v37, %v4175_v33  ;;  %v4304_v49 = vor.u32 %v5188_v39, %v4303_v38  ;;  %v4127_v17 = vld [vmem:[#allocation3 + $0x608] sm:$0xf]  ;;  %v4978_v33 = vld [vmem:[#allocation3 + $0xec] sm:$0xf]  ;;  %v3473_v37 = vld [vmem:[#allocation3 + $0xf8] sm:$0xf0] }
  0xee   :  { %2477 = vmatpush.bf16.msra.mxu3 %v4368_v45  ;;  %2420 = vmatmul.bf16.vlgmr.msrb.gmra.mxu2 %v5676_v28  ;;  %v3903_v45 = vld [vmem:[#allocation3 + $0x448] sm:$0xf]  ;;  %v4000_v38 = vor.u32 %v5112_v16, %v3999_v14  ;;  %v5264_v52 = vld [vmem:[#allocation3 + $0x9d4] sm:$0xf0]  ;;  %v4966_v16 = vld [vmem:[#allocation3 + $0x8c] sm:$0xf] }
  0xef   :  { %v2201_v40 = vadd.f32 %v2200_v26, %v2188_v25  ;;  %v3904_v58 = vor.u32 %v5088_v46, %v3903_v45  ;;  %v4495_v24 = vld [vmem:[#allocation3 + $0x8e8] sm:$0xf]  ;;  %v5236_v25 = vld [vmem:[#allocation3 + $0x8f4] sm:$0xf0]  ;;  %v3476_v46 = vor.u32 %v4978_v33, %v3473_v37 }
  0xf0   :  { %2439 = vmatpush.bf16.msra.mxu0 %v3968_v55  ;;  %2452 = vmatpush.bf16.msra.mxu1 %v4096_v56  ;;  %v2226_v55 = vpop.f32.mrf.mxu3  ;;  %v4287_v56 = vld [vmem:[#allocation3 + $0x748] sm:$0xf]  ;;  %v5256_v14 = vld [vmem:[#allocation3 + $0x994] sm:$0xf0] }
  0xf1   :  { %2465 = vmatpush.bf16.msra.mxu2 %v4224_v57  ;;  %v2213_v48 = vpop.f32.mrf.mxu2  ;;  %v5184_v57 = vld [vmem:[#allocation3 + $0x754] sm:$0xf0]  ;;  %v4623_v26 = vld [vmem:[#allocation3 + $0x9e8] sm:$0xf] }
  0xf2   :  { %2478 = vmatpush.bf16.msra.mxu3 %v4352_v61  ;;  %v2214_v54 = vadd.f32 %v2213_v48, %v2201_v40  ;;  %v4032_v61 = vor.u32 %v5120_v51, %v4031_v47  ;;  %v4288_v3 = vor.u32 %v5184_v57, %v4287_v56  ;;  %v5010_v40 = vld [vmem:[#allocation3 + $0x1ec] sm:$0xf]  ;;  %v4624_v45 = vor.u32 %v5268_v32, %v4623_v26  ;;  %v4479_v47 = vld [vmem:[#allocation3 + $0x8c8] sm:$0xf]  ;;  %v5232_v48 = vld [vmem:[#allocation3 + $0x8d4] sm:$0xf0] }
  0xf3   :  { %v3585_v56 = vld [vmem:[#allocation3 + $0x1d8] sm:$0xf0]  ;;  %v4480_v57 = vor.u32 %v5232_v48, %v4479_v47  ;;  %v4591_v63 = vld [vmem:[#allocation3 + $0x9a8] sm:$0xf]  ;;  %v5220_v32 = vld [vmem:[#allocation3 + $0x874] sm:$0xf0] }
  0xf4   :  { %2440 = vmatpush.bf16.msra.mxu0 %v3952_v4  ;;  %2453 = vmatpush.bf16.msra.mxu1 %v4080_v6  ;;  %v5732_v59 = vadd.f32 %v2226_v55, %v2214_v54  ;;  %v2189_v60 = vpop.f32.mrf.mxu0  ;;  %v2202_v2 = vpop.f32.mrf.mxu1  ;;  %v5116_v4 = vld [vmem:[#allocation3 + $0x534] sm:$0xf0]  ;;  %v3457_v54 = vld [vmem:[#allocation3 + $0xd8] sm:$0xf0]  ;;  %v5006_v55 = vld [vmem:[#allocation3 + $0x1cc] sm:$0xf] }
  0xf5   :  { %2466 = vmatpush.bf16.msra.mxu2 %v4208_v7  ;;  %v5148_v6 = vld [vmem:[#allocation3 + $0x634] sm:$0xf0]  ;;  %v4271_v7 = vld [vmem:[#allocation3 + $0x728] sm:$0xf]  ;;  %v4016_v13 = vor.u32 %v5116_v4, %v4015_v1  ;;  %v3460_v60 = vor.u32 %v4974_v53, %v3457_v54  ;;  %v3588_v0 = vor.u32 %v5006_v55, %v3585_v56  ;;  %v4970_v2 = vld [vmem:[#allocation3 + $0xac] sm:$0xf] }
  0xf6   :  { %2479 = vmatpush.bf16.msra.mxu3 %v4336_v12  ;;  %v5080_v12 = vld [vmem:[#allocation3 + $0x414] sm:$0xf0]  ;;  %v4144_v15 = vor.u32 %v5148_v6, %v4143_v5  ;;  %v4272_v19 = vor.u32 %v5180_v11, %v4271_v7  ;;  %v5002_v4 = vld [vmem:[#allocation3 + $0x1ac] sm:$0xf]  ;;  %v3569_v5 = vld [vmem:[#allocation3 + $0x1b8] sm:$0xf0] }
  0xf7   :  { %v5260_v1 = vld [vmem:[#allocation3 + $0x9b4] sm:$0xf0]  ;;  %v487_v7 = vperm.slane %v5722_v8, 2  ;;  %v4559_v33 = vld [vmem:[#allocation3 + $0x968] sm:$0xf] }
  0xf8   :  { %2441 = vmatpush.bf16.msra.mxu0 %v3936_v18  ;;  %2454 = vmatpush.bf16.msra.mxu1 %v4064_v20  ;;  %v5144_v20 = vld [vmem:[#allocation3 + $0x614] sm:$0xf0]  ;;  %v2228_v23 = vpop.f32.mrf.mxu3  ;;  %v4592_v11 = vor.u32 %v5260_v1, %v4591_v63  ;;  %v4415_v48 = vld [vmem:[#allocation3 + $0x848] sm:$0xf]  ;;  %v4958_v54 = vld [vmem:[#allocation3 + $0x4c] sm:$0xf] }
  0xf9   :  { %2467 = vmatpush.bf16.msra.mxu2 %v4192_v21  ;;  %v2215_v18 = vpop.f32.mrf.mxu2  ;;  %v4255_v21 = vld [vmem:[#allocation3 + $0x708] sm:$0xf]  ;;  %v4128_v39 = vor.u32 %v5144_v20, %v4127_v17  ;;  %v3425_v17 = vld [vmem:[#allocation3 + $0x98] sm:$0xf0]  ;;  %v5248_v53 = vld [vmem:[#allocation3 + $0x954] sm:$0xf0] }
  0xfa   :  { %2480 = vmatpush.bf16.msra.mxu3 %v4320_v27  ;;  %v3872_v27 = vor.u32 %v5080_v12, %v3871_v10  ;;  %v4447_v10 = vld [vmem:[#allocation3 + $0x888] sm:$0xf]  ;;  %v5224_v12 = vld [vmem:[#allocation3 + $0x894] sm:$0xf0]  ;;  %v3553_v20 = vld [vmem:[#allocation3 + $0x198] sm:$0xf0]  ;;  %v3428_v26 = vor.u32 %v4966_v16, %v3425_v17 }
  0xfb   :  { %v4448_v23 = vor.u32 %v5224_v12, %v4447_v10  ;;  %v3393_v55 = vld [vmem:[#allocation3 + $0x58] sm:$0xf0]  ;;  %v4986_v12 = vld [vmem:[#allocation3 + $0x12c] sm:$0xf]  ;;  %v5208_v16 = vld [vmem:[#allocation3 + $0x814] sm:$0xf0] }
  0xfc   :  { %2442 = vmatpush.bf16.msra.mxu0 %v3920_v42  ;;  %2455 = vmatpush.bf16.msra.mxu1 %v4048_v43  ;;  %v3601_v42 = vld [vmem:[#allocation3 + $0x1f8] sm:$0xf0]  ;;  %v4256_v43 = vor.u32 %v5176_v22, %v4255_v21  ;;  %v495_v21 = vperm.slane %v487_v7, 0 }
  0xfd   :  { %2468 = vmatpush.bf16.msra.mxu2 %v4176_v44  ;;  %v4496_v44 = vor.u32 %v5236_v25, %v4495_v24  ;;  %v3604_v51 = vor.u32 %v5010_v40, %v3601_v42  ;;  %v4962_v40 = vld [vmem:[#allocation3 + $0x6c] sm:$0xf]  ;;  %v3409_v42 = vld [vmem:[#allocation3 + $0x78] sm:$0xf0] }
  0xfe   :  { %2481 = vmatpush.bf16.msra.mxu3 %v4304_v49  ;;  %v4607_v49 = vld [vmem:[#allocation3 + $0x9c8] sm:$0xf]  ;;  %v3412_v47 = vor.u32 %v4962_v40, %v3409_v42  ;;  %v3377_v10 = vld [vmem:[#allocation3 + $0x38] sm:$0xf0]  ;;  %v5106_v42 = vld [vmem:[#allocation3 + $0x4ec] sm:$0xf] }
  0xff   :  { %v3857_v40 = vld [vmem:[#allocation3 + $0x3f8] sm:$0xf0] }
 0x100   :  { %2443 = vmatpush.bf16.msra.mxu0 %v3904_v58  ;;  %2456 = vmatpush.bf16.msra.mxu1 %v4032_v61  ;;  %v4608_v58 = vor.u32 %v5264_v52, %v4607_v49  ;;  %v4463_v61 = vld [vmem:[#allocation3 + $0x8a8] sm:$0xf]  ;;  %v5216_v49 = vld [vmem:[#allocation3 + $0x854] sm:$0xf0] }
 0x101   :  { %2469 = vmatpush.bf16.msra.mxu2 %v4160_v62  ;;  %v5228_v62 = vld [vmem:[#allocation3 + $0x8b4] sm:$0xf0]  ;;  %v4416_v63 = vor.u32 %v5216_v49, %v4415_v48 }
 0x102   :  { %2482 = vmatpush.bf16.msra.mxu3 %v4288_v3  ;;  %v3441_v3 = vld [vmem:[#allocation3 + $0xb8] sm:$0xf0]  ;;  %v4464_v6 = vor.u32 %v5228_v62, %v4463_v61 }
 0x104   :  { %2444 = vmatpush.bf16.msra.mxu0 %v3888_v9  ;;  %2457 = vmatpush.bf16.msra.mxu1 %v4016_v13  ;;  %v3444_v9 = vor.u32 %v4970_v2, %v3441_v3  ;;  %v4575_v13 = vld [vmem:[#allocation3 + $0x988] sm:$0xf]  ;;  %v3396_v2 = vor.u32 %v4958_v54, %v3393_v55  ;;  %v5070_v54 = vld [vmem:[#allocation3 + $0x3cc] sm:$0xf] }
 0x105   :  { %2470 = vmatpush.bf16.msra.mxu2 %v4144_v15  ;;  %v3572_v15 = vor.u32 %v5002_v4, %v3569_v5  ;;  %v4576_v25 = vor.u32 %v5256_v14, %v4575_v13  ;;  %v4399_v3 = vld [vmem:[#allocation3 + $0x828] sm:$0xf]  ;;  %v5212_v4 = vld [vmem:[#allocation3 + $0x834] sm:$0xf0]  ;;  %v3505_v13 = vld [vmem:[#allocation3 + $0x138] sm:$0xf0] }
 0x106   :  { %2483 = vmatpush.bf16.msra.mxu3 %v4272_v19  ;;  %v4998_v19 = vld [vmem:[#allocation3 + $0x18c] sm:$0xf]  ;;  %v4527_v5 = vld [vmem:[#allocation3 + $0x928] sm:$0xf] }
 0x107   :  { %v3556_v37 = vor.u32 %v4998_v19, %v3553_v20  ;;  %v4383_v14 = vld [vmem:[#allocation3 + $0x808] sm:$0xf]  ;;  %v5240_v20 = vld [vmem:[#allocation3 + $0x914] sm:$0xf0] }
 0x108   :  { %2445 = vmatpush.bf16.msra.mxu0 %v3872_v27  ;;  %2458 = vmatpush.bf16.msra.mxu1 %v4000_v38  ;;  %v2239_v18 = vpop.f32.mrf.mxu0  ;;  %v2252_v24 = vpop.f32.mrf.mxu1  ;;  %v4431_v27 = vld [vmem:[#allocation3 + $0x868] sm:$0xf] }
 0x109   :  { %2471 = vmatpush.bf16.msra.mxu2 %v4128_v39  ;;  %v2240_v22 = vadd.f32 %v2239_v18, %v5732_v59  ;;  %v5252_v39 = vld [vmem:[#allocation3 + $0x974] sm:$0xf0]  ;;  %v499_v59 = vmul.f32 %v495_v21, %v5725_v50  ;;  %v4511_v19 = vld [vmem:[#allocation3 + $0x908] sm:$0xf]  ;;  %v4950_v21 = vld [vmem:[#allocation3 + $0xc] sm:$0xf] }
 0x10a   :  { %2484 = vmatpush.bf16.msra.mxu3 %v4256_v43  ;;  %v4994_v43 = vld [vmem:[#allocation3 + $0x16c] sm:$0xf] }
 0x10b   :  { %2446 = vmatmul.bf16.vlgmr.msra.gmra.mxu0 %v5693_v34  ;;  %2459 = vmatmul.bf16.vlgmr.msra.gmra.mxu1 %v5697_v41  ;;  %v5740_v38 = vadd.f32 %v2252_v24, %v2240_v22  ;;  %v3508_v22 = vor.u32 %v4986_v12, %v3505_v13  ;;  %v4982_v24 = vld [vmem:[#allocation3 + $0x10c] sm:$0xf]  ;;  %v4081_v13 = vld [vmem:[#allocation3 + $0x5b8] sm:$0xf0] }
 0x10c   :  { %2490 = vmatpush.bf16.msrb.mxu0 %v4496_v44  ;;  %2503 = vmatpush.bf16.msrb.mxu1 %v4624_v45  ;;  %v3537_v44 = vld [vmem:[#allocation3 + $0x178] sm:$0xf0]  ;;  %v4432_v45 = vor.u32 %v5220_v32, %v4431_v27  ;;  %v5042_v27 = vld [vmem:[#allocation3 + $0x2ec] sm:$0xf] }
 0x10d   :  { %2516 = vmatpush.bf16.msrb.mxu2 %v3476_v46  ;;  %2485 = vmatmul.bf16.vlgmr.msra.gmra.mxu3 %v5695_v36  ;;  %v4560_v46 = vor.u32 %v5252_v39, %v4559_v33  ;;  %v3540_v52 = vor.u32 %v4994_v43, %v3537_v44  ;;  %v3729_v32 = vld [vmem:[#allocation3 + $0x2f8] sm:$0xf0]  ;;  %v5074_v33 = vld [vmem:[#allocation3 + $0x3ec] sm:$0xf]  ;;  %v4384_v39 = vor.u32 %v5208_v16, %v4383_v14 }
 0x10e   :  { %2529 = vmatpush.bf16.msrb.mxu3 %v3604_v51  ;;  %2472 = vmatmul.bf16.vlgmr.msra.gmra.mxu2 %v5691_v31  ;;  %v4543_v51 = vld [vmem:[#allocation3 + $0x948] sm:$0xf]  ;;  %v3985_v43 = vld [vmem:[#allocation3 + $0x4f8] sm:$0xf0]  ;;  %v4512_v44 = vor.u32 %v5240_v20, %v4511_v19  ;;  %v3732_v48 = vor.u32 %v5042_v27, %v3729_v32  ;;  %v3860_v49 = vor.u32 %v5074_v33, %v3857_v40  ;;  %v5130_v12 = vld [vmem:[#allocation3 + $0x5ac] sm:$0xf] }
 0x10f   :  { %v4544_v1 = vor.u32 %v5248_v53, %v4543_v51  ;;  %v3988_v51 = vor.u32 %v5106_v42, %v3985_v43  ;;  %v3713_v53 = vld [vmem:[#allocation3 + $0x2d8] sm:$0xf0]  ;;  %v5062_v19 = vld [vmem:[#allocation3 + $0x38c] sm:$0xf]  ;;  %v4084_v20 = vor.u32 %v5130_v12, %v4081_v13 }
 0x110   :  { %2491 = vmatpush.bf16.msrb.mxu0 %v4480_v57  ;;  %2504 = vmatpush.bf16.msrb.mxu1 %v4608_v58  ;;  %v4990_v57 = vld [vmem:[#allocation3 + $0x14c] sm:$0xf]  ;;  %v3521_v58 = vld [vmem:[#allocation3 + $0x158] sm:$0xf0]  ;;  %v2278_v61 = vpop.f32.mrf.mxu3  ;;  %v2241_v62 = vpop.f32.mrf.mxu0 }
 0x111   :  { %2517 = vmatpush.bf16.msrb.mxu2 %v3460_v60  ;;  %v2265_v56 = vpop.f32.mrf.mxu2  ;;  %v3524_v7 = vor.u32 %v4990_v57, %v3521_v58  ;;  %v5102_v57 = vld [vmem:[#allocation3 + $0x4cc] sm:$0xf]  ;;  %v3969_v58 = vld [vmem:[#allocation3 + $0x4d8] sm:$0xf0] }
 0x112   :  { %2530 = vmatpush.bf16.msrb.mxu3 %v3588_v0  ;;  %v2266_v60 = vadd.f32 %v2265_v56, %v499_v59  ;;  %v2254_v0 = vpop.f32.mrf.mxu1  ;;  %v3841_v56 = vld [vmem:[#allocation3 + $0x3d8] sm:$0xf0]  ;;  %v5026_v32 = vld [vmem:[#allocation3 + $0x26c] sm:$0xf] }
 0x113   :  { %v3972_v0 = vor.u32 %v5102_v57, %v3969_v58  ;;  %v3665_v33 = vld [vmem:[#allocation3 + $0x278] sm:$0xf0]  ;;  %v5090_v43 = vld [vmem:[#allocation3 + $0x46c] sm:$0xf] }
 0x114   :  { %2492 = vmatpush.bf16.msrb.mxu0 %v4464_v6  ;;  %2505 = vmatpush.bf16.msrb.mxu1 %v4592_v11  ;;  %v5743_v6 = vadd.f32 %v2278_v61, %v2266_v60  ;;  %v5244_v11 = vld [vmem:[#allocation3 + $0x934] sm:$0xf0]  ;;  %v5134_v60 = vld [vmem:[#allocation3 + $0x5cc] sm:$0xf]  ;;  %v4097_v61 = vld [vmem:[#allocation3 + $0x5d8] sm:$0xf0] }
 0x115   :  { %2518 = vmatpush.bf16.msrb.mxu2 %v3444_v9  ;;  %v4954_v9 = vld [vmem:[#allocation3 + $0x2c] sm:$0xf]  ;;  %v4528_v17 = vor.u32 %v5244_v11, %v4527_v5  ;;  %v4100_v5 = vor.u32 %v5134_v60, %v4097_v61  ;;  %v3793_v42 = vld [vmem:[#allocation3 + $0x378] sm:$0xf0] }
 0x116   :  { %2531 = vmatpush.bf16.msrb.mxu3 %v3572_v15  ;;  %v4400_v15 = vor.u32 %v5212_v4, %v4399_v3  ;;  %v3380_v18 = vor.u32 %v4954_v9, %v3377_v10  ;;  %v5066_v3 = vld [vmem:[#allocation3 + $0x3ac] sm:$0xf]  ;;  %v5745_v4 = vld [vmem:[#allocation1] sm:$0xff]  ;;  %v5748_v10 = vld [vmem:[#allocation1 + $0x9] sm:$0xff] }
 0x117   :  { %v5098_v11 = vld [vmem:[#allocation3 + $0x4ac] sm:$0xf]  ;;  %v3953_v9 = vld [vmem:[#allocation3 + $0x4b8] sm:$0xf0] }
 0x118   :  { %2493 = vmatpush.bf16.msrb.mxu0 %v4448_v23  ;;  %2506 = vmatpush.bf16.msrb.mxu1 %v4576_v25  ;;  %v3361_v23 = vld [vmem:[#allocation3 + $0x18] sm:$0xf0]  ;;  %v3956_v16 = vor.u32 %v5098_v11, %v3953_v9  ;;  %v5118_v60 = vld [vmem:[#allocation3 + $0x54c] sm:$0xf] }
 0x119   :  { %2519 = vmatpush.bf16.msrb.mxu2 %v3428_v26  ;;  %v3489_v25 = vld [vmem:[#allocation3 + $0x118] sm:$0xf0]  ;;  %v2267_v26 = vpop.f32.mrf.mxu2  ;;  %v3364_v59 = vor.u32 %v4950_v21, %v3361_v23  ;;  %v5082_v12 = vld [vmem:[#allocation3 + $0x42c] sm:$0xf] }
 0x11a   :  { %2532 = vmatpush.bf16.msrb.mxu3 %v3556_v37  ;;  %v2280_v37 = vpop.f32.mrf.mxu3  ;;  %v3809_v21 = vld [vmem:[#allocation3 + $0x398] sm:$0xf0] }
 0x11b   :  { %v3937_v23 = vld [vmem:[#allocation3 + $0x498] sm:$0xf0]  ;;  %v5058_v37 = vld [vmem:[#allocation3 + $0x36c] sm:$0xf] }
 0x11c   :  { %2494 = vmatpush.bf16.msrb.mxu0 %v4432_v45  ;;  %2507 = vmatpush.bf16.msrb.mxu1 %v4560_v46  ;;  %v5138_v45 = vld [vmem:[#allocation3 + $0x5ec] sm:$0xf]  ;;  %v4113_v46 = vld [vmem:[#allocation3 + $0x5f8] sm:$0xf0] }
 0x11d   :  { %2520 = vmatpush.bf16.msrb.mxu2 %v3412_v47  ;;  %v3492_v47 = vor.u32 %v4982_v24, %v3489_v25  ;;  %v4116_v55 = vor.u32 %v5138_v45, %v4113_v46  ;;  %v5126_v24 = vld [vmem:[#allocation3 + $0x58c] sm:$0xf]  ;;  %v4065_v25 = vld [vmem:[#allocation3 + $0x598] sm:$0xf0]  ;;  %v3668_v46 = vor.u32 %v5026_v32, %v3665_v33 }
 0x11e   :  { %2533 = vmatpush.bf16.msrb.mxu3 %v3540_v52  ;;  %v5038_v52 = vld [vmem:[#allocation3 + $0x2cc] sm:$0xf]  ;;  %v4068_v40 = vor.u32 %v5126_v24, %v4065_v25  ;;  %v4049_v45 = vld [vmem:[#allocation3 + $0x578] sm:$0xf0] }
 0x11f   :  { %v3716_v62 = vor.u32 %v5038_v52, %v3713_v53  ;;  %v5054_v52 = vld [vmem:[#allocation3 + $0x34c] sm:$0xf]  ;;  %v3905_v57 = vld [vmem:[#allocation3 + $0x458] sm:$0xf0] }
 0x120   :  { %2495 = vmatpush.bf16.msrb.mxu0 %v4416_v63  ;;  %2508 = vmatpush.bf16.msrb.mxu1 %v4544_v1  ;;  %v3844_v63 = vor.u32 %v5070_v54, %v3841_v56  ;;  %v5034_v1 = vld [vmem:[#allocation3 + $0x2ac] sm:$0xf]  ;;  %v4033_v61 = vld [vmem:[#allocation3 + $0x558] sm:$0xf0] }
 0x121   :  { %2521 = vmatpush.bf16.msrb.mxu2 %v3396_v2  ;;  %v3697_v2 = vld [vmem:[#allocation3 + $0x2b8] sm:$0xf0]  ;;  %v5086_v56 = vld [vmem:[#allocation3 + $0x44c] sm:$0xf]  ;;  %v4036_v11 = vor.u32 %v5118_v60, %v4033_v61 }
 0x122   :  { %2534 = vmatpush.bf16.msrb.mxu3 %v3524_v7  ;;  %v3825_v7 = vld [vmem:[#allocation3 + $0x3b8] sm:$0xf0]  ;;  %v5170_v33 = vld [vmem:[#allocation3 + $0x6ec] sm:$0xf] }
 0x123   :  { %v3828_v14 = vor.u32 %v5066_v3, %v3825_v7  ;;  %v3633_v3 = vld [vmem:[#allocation3 + $0x238] sm:$0xf0] }
 0x124   :  { %2496 = vmatpush.bf16.msrb.mxu0 %v4400_v15  ;;  %2509 = vmatpush.bf16.msrb.mxu1 %v4528_v17  ;;  %v3700_v15 = vor.u32 %v5034_v1, %v3697_v2  ;;  %v5030_v17 = vld [vmem:[#allocation3 + $0x28c] sm:$0xf]  ;;  %v3908_v1 = vor.u32 %v5086_v56, %v3905_v57  ;;  %v3761_v9 = vld [vmem:[#allocation3 + $0x338] sm:$0xf0] }
 0x125   :  { %2522 = vmatpush.bf16.msrb.mxu2 %v3380_v18  ;;  %v3681_v18 = vld [vmem:[#allocation3 + $0x298] sm:$0xf0]  ;;  %v5018_v2 = vld [vmem:[#allocation3 + $0x22c] sm:$0xf] }
 0x126   :  { %2535 = vmatpush.bf16.msrb.mxu3 %v3508_v22  ;;  %v5094_v22 = vld [vmem:[#allocation3 + $0x48c] sm:$0xf]  ;;  %v3889_v13 = vld [vmem:[#allocation3 + $0x438] sm:$0xf0] }
 0x127   :  { %v3940_v27 = vor.u32 %v5094_v22, %v3937_v23  ;;  %v3745_v22 = vld [vmem:[#allocation3 + $0x318] sm:$0xf0]  ;;  %v5078_v23 = vld [vmem:[#allocation3 + $0x40c] sm:$0xf] }
 0x128   :  { %2497 = vmatpush.bf16.msrb.mxu0 %v4384_v39  ;;  %2510 = vmatpush.bf16.msrb.mxu1 %v4512_v44  ;;  %v5753_v26 = vpop.f32.mrf.mxu0  ;;  %v5755_v39 = vpop.f32.mrf.mxu1  ;;  %v3921_v44 = vld [vmem:[#allocation3 + $0x478] sm:$0xf0]  ;;  %v5198_v57 = vld [vmem:[#allocation3 + $0x7cc] sm:$0xf] }
 0x129   :  { %2523 = vmatpush.bf16.msrb.mxu2 %v3364_v59  ;;  %v5122_v59 = vld [vmem:[#allocation3 + $0x56c] sm:$0xf]  ;;  %v4225_v56 = vld [vmem:[#allocation3 + $0x6d8] sm:$0xf0] }
 0x12a   :  { %2536 = vmatpush.bf16.msrb.mxu3 %v3492_v47  ;;  %v3796_v47 = vor.u32 %v5058_v37, %v3793_v42  ;;  %v4052_v54 = vor.u32 %v5122_v59, %v4049_v45  ;;  %v4241_v37 = vld [vmem:[#allocation3 + $0x6f8] sm:$0xf0] }
 0x12b   :  { %2498 = vmatmul.bf16.vlgmr.msrb.gmra.mxu0 %v5745_v4  ;;  %2511 = vmatmul.bf16.vlgmr.msrb.gmra.mxu1 %v5748_v10  ;;  %v4497_v59 = vld [vmem:[#allocation3 + $0x8f8] sm:$0xf0] }
 0x12c   :  { %2542 = vmatpush.bf16.msra.mxu0 %v3732_v48  ;;  %2555 = vmatpush.bf16.msra.mxu1 %v3860_v49  ;;  %v3924_v48 = vor.u32 %v5090_v43, %v3921_v44  ;;  %v5022_v49 = vld [vmem:[#allocation3 + $0x24c] sm:$0xf]  ;;  %v4369_v43 = vld [vmem:[#allocation3 + $0x7f8] sm:$0xf0] }
 0x12d   :  { %2568 = vmatpush.bf16.msra.mxu2 %v3988_v51  ;;  %2537 = vmatmul.bf16.vlgmr.msrb.gmra.mxu3 %v5682_v35  ;;  %v3812_v35 = vor.u32 %v5062_v19, %v3809_v21  ;;  %v3649_v51 = vld [vmem:[#allocation3 + $0x258] sm:$0xf0]  ;;  %v5046_v21 = vld [vmem:[#allocation3 + $0x30c] sm:$0xf] }
 0x12e   :  { %2581 = vmatpush.bf16.msra.mxu3 %v4116_v55  ;;  %2524 = vmatmul.bf16.vlgmr.msrb.gmra.mxu2 %v5678_v29  ;;  %v3684_v29 = vor.u32 %v5030_v17, %v3681_v18  ;;  %v3777_v55 = vld [vmem:[#allocation3 + $0x358] sm:$0xf0]  ;;  %v5014_v17 = vld [vmem:[#allocation3 + $0x20c] sm:$0xf]  ;;  %v3748_v45 = vor.u32 %v5046_v21, %v3745_v22 }
 0x12f   :  { %v3617_v18 = vld [vmem:[#allocation3 + $0x218] sm:$0xf0]  ;;  %v5234_v44 = vld [vmem:[#allocation3 + $0x8ec] sm:$0xf] }
 0x130   :  { %2543 = vmatpush.bf16.msra.mxu0 %v3716_v62  ;;  %2556 = vmatpush.bf16.msra.mxu1 %v3844_v63  ;;  %v5759_v58 = vpop.f32.mrf.mxu3  ;;  %v3652_v62 = vor.u32 %v5022_v49, %v3649_v51  ;;  %v2293_v63 = vpop.f32.mrf.mxu0  ;;  %v3620_v42 = vor.u32 %v5014_v17, %v3617_v18  ;;  %v4244_v51 = vor.u32 %v5170_v33, %v4241_v37  ;;  %v4353_v61 = vld [vmem:[#allocation3 + $0x7d8] sm:$0xf0]  ;;  %v5158_v21 = vld [vmem:[#allocation3 + $0x68c] sm:$0xf] }
 0x131   :  { %2569 = vmatpush.bf16.msra.mxu2 %v3972_v0  ;;  %v5757_v53 = vpop.f32.mrf.mxu2  ;;  %v3780_v0 = vor.u32 %v5054_v52, %v3777_v55  ;;  %v2306_v7 = vpop.f32.mrf.mxu1  ;;  %v5166_v55 = vld [vmem:[#allocation3 + $0x6cc] sm:$0xf]  ;;  %v4481_v63 = vld [vmem:[#allocation3 + $0x8d8] sm:$0xf0] }
 0x132   :  { %2582 = vmatpush.bf16.msra.mxu3 %v4100_v5  ;;  %v5050_v5 = vld [vmem:[#allocation3 + $0x32c] sm:$0xf]  ;;  %v4593_v17 = vld [vmem:[#allocation3 + $0x9b8] sm:$0xf0] }
 0x133   :  { %v3764_v19 = vor.u32 %v5050_v5, %v3761_v9  ;;  %v5162_v7 = vld [vmem:[#allocation3 + $0x6ac] sm:$0xf]  ;;  %v4193_v22 = vld [vmem:[#allocation3 + $0x698] sm:$0xf0] }
 0x134   :  { %2544 = vmatpush.bf16.msra.mxu0 %v3700_v15  ;;  %2557 = vmatpush.bf16.msra.mxu1 %v3828_v14  ;;  %v5114_v15 = vld [vmem:[#allocation3 + $0x52c] sm:$0xf]  ;;  %v4017_v14 = vld [vmem:[#allocation3 + $0x538] sm:$0xf0] }
 0x135   :  { %2570 = vmatpush.bf16.msra.mxu2 %v3956_v16  ;;  %v3636_v16 = vor.u32 %v5018_v2, %v3633_v3  ;;  %v4020_v25 = vor.u32 %v5114_v15, %v4017_v14  ;;  %v4228_v2 = vor.u32 %v5166_v55, %v4225_v56  ;;  %v4356_v3 = vor.u32 %v5198_v57, %v4353_v61  ;;  %v5194_v9 = vld [vmem:[#allocation3 + $0x7ac] sm:$0xf]  ;;  %v4465_v14 = vld [vmem:[#allocation3 + $0x8b8] sm:$0xf0] }
 0x136   :  { %2583 = vmatpush.bf16.msra.mxu3 %v4084_v20  ;;  %v3892_v20 = vor.u32 %v5082_v12, %v3889_v13  ;;  %v4337_v13 = vld [vmem:[#allocation3 + $0x7b8] sm:$0xf0]  ;;  %v5226_v15 = vld [vmem:[#allocation3 + $0x8ac] sm:$0xf] }
 0x137   :  { %v5154_v37 = vld [vmem:[#allocation3 + $0x66c] sm:$0xf] }
 0x138   :  { %2545 = vmatpush.bf16.msra.mxu0 %v3684_v29  ;;  %2558 = vmatpush.bf16.msra.mxu1 %v3812_v35  ;;  %v3873_v29 = vld [vmem:[#allocation3 + $0x418] sm:$0xf0]  ;;  %v5110_v35 = vld [vmem:[#allocation3 + $0x50c] sm:$0xf]  ;;  %v2332_v32 = vpop.f32.mrf.mxu3 }
 0x139   :  { %2571 = vmatpush.bf16.msra.mxu2 %v3940_v27  ;;  %v2319_v24 = vpop.f32.mrf.mxu2  ;;  %v4001_v27 = vld [vmem:[#allocation3 + $0x518] sm:$0xf0]  ;;  %v5182_v55 = vld [vmem:[#allocation3 + $0x74c] sm:$0xf] }
 0x13a   :  { %2584 = vmatpush.bf16.msra.mxu3 %v4068_v40  ;;  %v5202_v40 = vld [vmem:[#allocation3 + $0x7ec] sm:$0xf]  ;;  %v4004_v49 = vor.u32 %v5110_v35, %v4001_v27  ;;  %v4321_v24 = vld [vmem:[#allocation3 + $0x798] sm:$0xf0]  ;;  %v4196_v27 = vor.u32 %v5158_v21, %v4193_v22 }
 0x13b   :  { %v4372_v52 = vor.u32 %v5202_v40, %v4369_v43  ;;  %v4177_v40 = vld [vmem:[#allocation3 + $0x678] sm:$0xf0]  ;;  %v5214_v61 = vld [vmem:[#allocation3 + $0x84c] sm:$0xf] }
 0x13c   :  { %2546 = vmatpush.bf16.msra.mxu0 %v3668_v46  ;;  %2559 = vmatpush.bf16.msra.mxu1 %v3796_v47  ;;  %v3876_v46 = vor.u32 %v5078_v23, %v3873_v29  ;;  %v5266_v47 = vld [vmem:[#allocation3 + $0x9ec] sm:$0xf]  ;;  %v4449_v29 = vld [vmem:[#allocation3 + $0x898] sm:$0xf0] }
 0x13d   :  { %2572 = vmatpush.bf16.msra.mxu2 %v3924_v48  ;;  %v4625_v48 = vld [vmem:[#allocation3 + $0x9f8] sm:$0xf0]  ;;  %v5142_v21 = vld [vmem:[#allocation3 + $0x60c] sm:$0xf] }
 0x13e   :  { %2585 = vmatpush.bf16.msra.mxu3 %v4052_v54  ;;  %v4500_v54 = vor.u32 %v5234_v44, %v4497_v59  ;;  %v4628_v60 = vor.u32 %v5266_v47, %v4625_v48  ;;  %v4305_v44 = vld [vmem:[#allocation3 + $0x778] sm:$0xf0]  ;;  %v5218_v59 = vld [vmem:[#allocation3 + $0x86c] sm:$0xf]  ;;  %v4180_v48 = vor.u32 %v5154_v37, %v4177_v40  ;;  %v4687_v40 = vld [vmem:[#allocation8 + $0x70] sm:$0xf] }
 0x13f   :  { %v4561_v47 = vld [vmem:[#allocation3 + $0x978] sm:$0xf0] }
 0x140   :  { %2547 = vmatpush.bf16.msra.mxu0 %v3652_v62  ;;  %2560 = vmatpush.bf16.msra.mxu1 %v3780_v0  ;;  %v5230_v62 = vld [vmem:[#allocation3 + $0x8cc] sm:$0xf]  ;;  %v4513_v37 = vld [vmem:[#allocation3 + $0x918] sm:$0xf0] }
 0x141   :  { %2573 = vmatpush.bf16.msra.mxu2 %v3908_v1  ;;  %v5262_v0 = vld [vmem:[#allocation3 + $0x9cc] sm:$0xf]  ;;  %v4609_v1 = vld [vmem:[#allocation3 + $0x9d8] sm:$0xf0]  ;;  %v4484_v5 = vor.u32 %v5230_v62, %v4481_v63 }
 0x142   :  { %2586 = vmatpush.bf16.msra.mxu3 %v4036_v11  ;;  %v4209_v11 = vld [vmem:[#allocation3 + $0x6b8] sm:$0xf0]  ;;  %v4612_v12 = vor.u32 %v5262_v0, %v4609_v1  ;;  %v5246_v0 = vld [vmem:[#allocation3 + $0x94c] sm:$0xf] }
 0x143   :  { %v4212_v18 = vor.u32 %v5162_v7, %v4209_v11  ;;  %v4417_v62 = vld [vmem:[#allocation3 + $0x858] sm:$0xf0] }
 0x144   :  { %2548 = vmatpush.bf16.msra.mxu0 %v3636_v16  ;;  %2561 = vmatpush.bf16.msra.mxu1 %v3764_v19  ;;  %v5258_v16 = vld [vmem:[#allocation3 + $0x9ac] sm:$0xf]  ;;  %v4340_v19 = vor.u32 %v5194_v9, %v4337_v13  ;;  %v4545_v1 = vld [vmem:[#allocation3 + $0x958] sm:$0xf0]  ;;  %v4420_v11 = vor.u32 %v5214_v61, %v4417_v62  ;;  %v4671_v62 = vld [vmem:[#allocation8 + $0x50] sm:$0xf] }
 0x145   :  { %2574 = vmatpush.bf16.msra.mxu2 %v3892_v20  ;;  %v4468_v20 = vor.u32 %v5226_v15, %v4465_v14  ;;  %v4596_v23 = vor.u32 %v5258_v16, %v4593_v17  ;;  %v5146_v9 = vld [vmem:[#allocation3 + $0x62c] sm:$0xf]  ;;  %v4548_v15 = vor.u32 %v5246_v0, %v4545_v1  ;;  %v4273_v14 = vld [vmem:[#allocation3 + $0x738] sm:$0xf0]  ;;  %v5280_v0 = vld [vmem:[#allocation8 + $0x54] sm:$0xf0] }
 0x146   :  { %2587 = vmatpush.bf16.msra.mxu3 %v4020_v25  ;;  %v5222_v25 = vld [vmem:[#allocation3 + $0x88c] sm:$0xf]  ;;  %v4401_v17 = vld [vmem:[#allocation3 + $0x838] sm:$0xf0]  ;;  %v5296_v1 = vld [vmem:[#allocation8 + $0xd4] sm:$0xf0] }
 0x147   :  { %v4452_v33 = vor.u32 %v5222_v25, %v4449_v29  ;;  %v5178_v13 = vld [vmem:[#allocation3 + $0x72c] sm:$0xf]  ;;  %v4257_v25 = vld [vmem:[#allocation3 + $0x718] sm:$0xf0] }
 0x148   :  { %2549 = vmatpush.bf16.msra.mxu0 %v3620_v42  ;;  %2562 = vmatpush.bf16.msra.mxu1 %v3748_v45  ;;  %v5765_v35 = vpop.f32.mrf.mxu0  ;;  %v5767_v32 = vpop.f32.mrf.mxu1  ;;  %v5186_v42 = vld [vmem:[#allocation3 + $0x76c] sm:$0xf]  ;;  %v4433_v45 = vld [vmem:[#allocation3 + $0x878] sm:$0xf0]  ;;  %v4276_v22 = vor.u32 %v5178_v13, %v4273_v14  ;;  %v5294_v13 = vld [vmem:[#allocation8 + $0xc4] sm:$0xf0] }
 0x149   :  { %2575 = vmatpush.bf16.msra.mxu2 %v3876_v46  ;;  %v5250_v46 = vld [vmem:[#allocation3 + $0x96c] sm:$0xf] }
 0x14a   :  { %2588 = vmatpush.bf16.msra.mxu3 %v4004_v49  ;;  %v4308_v49 = vor.u32 %v5186_v42, %v4305_v44  ;;  %v4564_v56 = vor.u32 %v5250_v46, %v4561_v47  ;;  %v5210_v16 = vld [vmem:[#allocation3 + $0x82c] sm:$0xf]  ;;  %v5284_v42 = vld [vmem:[#allocation8 + $0x74] sm:$0xf0] }
 0x14b   :  { %2550 = vmatmul.bf16.vlgmr.msra.gmra.mxu0 %v5676_v28  ;;  %2563 = vmatmul.bf16.vlgmr.msra.gmra.mxu1 %v5680_v30  ;;  %v5254_v28 = vld [vmem:[#allocation3 + $0x98c] sm:$0xf] }
 0x14c   :  { %2594 = vmatpush.bf16.msrb.mxu0 %v4244_v51  ;;  %2607 = vmatpush.bf16.msrb.mxu1 %v4372_v52  ;;  %v4436_v51 = vor.u32 %v5218_v59, %v4433_v45  ;;  %v5150_v52 = vld [vmem:[#allocation3 + $0x64c] sm:$0xf]  ;;  %v4751_v59 = vld [vmem:[#allocation8 + $0xf0] sm:$0xf]  ;;  %v5300_v45 = vld [vmem:[#allocation8 + $0xf4] sm:$0xf0] }
 0x14d   :  { %2620 = vmatpush.bf16.msrb.mxu2 %v4500_v54  ;;  %2589 = vmatmul.bf16.vlgmr.msra.gmra.mxu3 %v5697_v41  ;;  %v4577_v41 = vld [vmem:[#allocation3 + $0x998] sm:$0xf0] }
 0x14e   :  { %2633 = vmatpush.bf16.msrb.mxu3 %v4628_v60  ;;  %2576 = vmatmul.bf16.vlgmr.msra.gmra.mxu2 %v5693_v34  ;;  %v5190_v34 = vld [vmem:[#allocation3 + $0x78c] sm:$0xf]  ;;  %v4580_v43 = vor.u32 %v5254_v28, %v4577_v41  ;;  %v4161_v54 = vld [vmem:[#allocation3 + $0x658] sm:$0xf0] }
 0x14f   :  { %v4324_v30 = vor.u32 %v5190_v34, %v4321_v24  ;;  %v4289_v60 = vld [vmem:[#allocation3 + $0x758] sm:$0xf0]  ;;  %v4404_v34 = vor.u32 %v5210_v16, %v4401_v17  ;;  %v5174_v24 = vld [vmem:[#allocation3 + $0x70c] sm:$0xf] }
 0x150   :  { %2595 = vmatpush.bf16.msrb.mxu0 %v4228_v2  ;;  %2608 = vmatpush.bf16.msrb.mxu1 %v4356_v3  ;;  %v5771_v63 = vpop.f32.mrf.mxu3  ;;  %v2345_v2 = vpop.f32.mrf.mxu0  ;;  %v4164_v3 = vor.u32 %v5150_v52, %v4161_v54  ;;  %v4292_v7 = vor.u32 %v5182_v55, %v4289_v60  ;;  %v5206_v28 = vld [vmem:[#allocation3 + $0x80c] sm:$0xf]  ;;  %v4385_v41 = vld [vmem:[#allocation3 + $0x818] sm:$0xf0]  ;;  %v4260_v46 = vor.u32 %v5174_v24, %v4257_v25  ;;  %v4679_v54 = vld [vmem:[#allocation8 + $0x60] sm:$0xf] }
 0x151   :  { %2621 = vmatpush.bf16.msrb.mxu2 %v4484_v5  ;;  %v5769_v57 = vpop.f32.mrf.mxu2  ;;  %v2358_v5 = vpop.f32.mrf.mxu1  ;;  %v4388_v47 = vor.u32 %v5206_v28, %v4385_v41  ;;  %v4752_v52 = vor.u32 %v5300_v45, %v4751_v59  ;;  %v5298_v55 = vld [vmem:[#allocation8 + $0xe4] sm:$0xf0]  ;;  %v4815_v2 = vld [vmem:[#allocation8 + $0x170] sm:$0xf]  ;;  %v4647_v41 = vld [vmem:[#allocation8 + $0x20] sm:$0xf] }
 0x152   :  { %2634 = vmatpush.bf16.msrb.mxu3 %v4612_v12  ;;  %v4145_v12 = vld [vmem:[#allocation3 + $0x638] sm:$0xf0] }
 0x154   :  { %2596 = vmatpush.bf16.msrb.mxu0 %v4212_v18  ;;  %2609 = vmatpush.bf16.msrb.mxu1 %v4340_v19  ;;  %v5242_v18 = vld [vmem:[#allocation3 + $0x92c] sm:$0xf]  ;;  %v4529_v19 = vld [vmem:[#allocation3 + $0x938] sm:$0xf0] }
 0x155   :  { %2622 = vmatpush.bf16.msrb.mxu2 %v4468_v20  ;;  %v4148_v20 = vor.u32 %v5146_v9, %v4145_v12  ;;  %v4532_v29 = vor.u32 %v5242_v18, %v4529_v19  ;;  %v5278_v9 = vld [vmem:[#allocation8 + $0x44] sm:$0xf0]  ;;  %v4727_v12 = vld [vmem:[#allocation8 + $0xc0] sm:$0xf]  ;;  %v4655_v18 = vld [vmem:[#allocation8 + $0x30] sm:$0xf] }
 0x156   :  { %2635 = vmatpush.bf16.msrb.mxu3 %v4596_v23  ;;  %v4129_v23 = vld [vmem:[#allocation3 + $0x618] sm:$0xf0]  ;;  %v4728_v17 = vor.u32 %v5294_v13, %v4727_v12  ;;  %v4719_v19 = vld [vmem:[#allocation8 + $0xb0] sm:$0xf] }
 0x157   :  { %v4132_v44 = vor.u32 %v5142_v21, %v4129_v23  ;;  %v5292_v21 = vld [vmem:[#allocation8 + $0xb4] sm:$0xf0] }
 0x158   :  { %2597 = vmatpush.bf16.msrb.mxu0 %v4196_v27  ;;  %2610 = vmatpush.bf16.msrb.mxu1 %v4324_v30  ;;  %v5238_v27 = vld [vmem:[#allocation3 + $0x90c] sm:$0xf]  ;;  %v4720_v28 = vor.u32 %v5292_v21, %v4719_v19  ;;  %v5304_v19 = vld [vmem:[#allocation8 + $0x114] sm:$0xf0] }
 0x159   :  { %2623 = vmatpush.bf16.msrb.mxu2 %v4452_v33  ;;  %v2371_v30 = vpop.f32.mrf.mxu2  ;;  %v2292_v33 = vadd.f32 %v5753_v26, %v5743_v6  ;;  %v5282_v6 = vld [vmem:[#allocation8 + $0x64] sm:$0xf0]  ;;  %v4743_v26 = vld [vmem:[#allocation8 + $0xe0] sm:$0xf]  ;;  %v5297_v21 = vld [vmem:[#allocation8 + $0xe4] sm:$0xf] }
 0x15a   :  { %2636 = vmatpush.bf16.msrb.mxu3 %v4580_v43  ;;  %v2384_v43 = vpop.f32.mrf.mxu3  ;;  %v4744_v61 = vor.u32 %v5298_v55, %v4743_v26  ;;  %v4711_v30 = vld [vmem:[#allocation8 + $0xa0] sm:$0xf]  ;;  %v5308_v26 = vld [vmem:[#allocation8 + $0x134] sm:$0xf0] }
 0x15c   :  { %2598 = vmatpush.bf16.msrb.mxu0 %v4180_v48  ;;  %2611 = vmatpush.bf16.msrb.mxu1 %v4308_v49  ;;  %v4516_v48 = vor.u32 %v5238_v27, %v4513_v37  ;;  %v4688_v49 = vor.u32 %v5284_v42, %v4687_v40  ;;  %v5274_v27 = vld [vmem:[#allocation8 + $0x24] sm:$0xf0]  ;;  %v4791_v42 = vld [vmem:[#allocation8 + $0x140] sm:$0xf] }
 0x15d   :  { %2624 = vmatpush.bf16.msrb.mxu2 %v4436_v51  ;;  %v2305_v51 = vadd.f32 %v5755_v39, %v2292_v33  ;;  %v4735_v39 = vld [vmem:[#allocation8 + $0xd0] sm:$0xf]  ;;  %v5290_v37 = vld [vmem:[#allocation8 + $0xa4] sm:$0xf0] }
 0x15e   :  { %2637 = vmatpush.bf16.msrb.mxu3 %v4564_v56  ;;  %v4680_v56 = vor.u32 %v5282_v6, %v4679_v54  ;;  %v5288_v54 = vld [vmem:[#allocation8 + $0x94] sm:$0xf0]  ;;  %v4783_v6 = vld [vmem:[#allocation8 + $0x130] sm:$0xf] }
 0x15f   :  { %v2318_v60 = vadd.f32 %v5757_v53, %v2305_v51  ;;  %v4703_v51 = vld [vmem:[#allocation8 + $0x90] sm:$0xf]  ;;  %v4784_v55 = vor.u32 %v5308_v26, %v4783_v6  ;;  %v4809_v6 = vld [vmem:[#allocation8 + $0x168] sm:$0xf0] }
 0x160   :  { %2599 = vmatpush.bf16.msrb.mxu0 %v4164_v3  ;;  %2612 = vmatpush.bf16.msrb.mxu1 %v4292_v7  ;;  %v5316_v3 = vld [vmem:[#allocation8 + $0x174] sm:$0xf0]  ;;  %v4672_v7 = vor.u32 %v5280_v0, %v4671_v62 }
 0x161   :  { %2625 = vmatpush.bf16.msrb.mxu2 %v4420_v11  ;;  %v4816_v5 = vor.u32 %v5316_v3, %v4815_v2  ;;  %v2331_v53 = vadd.f32 %v5759_v58, %v2318_v60  ;;  %v4663_v11 = vld [vmem:[#allocation8 + $0x40] sm:$0xf]  ;;  %v5276_v58 = vld [vmem:[#allocation8 + $0x34] sm:$0xf0]  ;;  %v5283_v2 = vld [vmem:[#allocation8 + $0x74] sm:$0xf] }
 0x162   :  { %2638 = vmatpush.bf16.msrb.mxu3 %v4548_v15  ;;  %v5314_v15 = vld [vmem:[#allocation8 + $0x164] sm:$0xf0]  ;;  %v4664_v16 = vor.u32 %v5278_v9, %v4663_v11  ;;  %v4656_v25 = vor.u32 %v5276_v58, %v4655_v18  ;;  %v4631_v60 = vld [vmem:[#allocation8] sm:$0xf]  ;;  %v5299_v11 = vld [vmem:[#allocation8 + $0xf4] sm:$0xf] }
 0x163   :  { %v4753_v9 = vld [vmem:[#allocation8 + $0xf8] sm:$0xf0]  ;;  %v4681_v18 = vld [vmem:[#allocation8 + $0x68] sm:$0xf0]  ;;  %v4767_v58 = vld [vmem:[#allocation8 + $0x110] sm:$0xf] }
 0x164   :  { %2600 = vmatpush.bf16.msrb.mxu0 %v4148_v20  ;;  %2613 = vmatpush.bf16.msrb.mxu1 %v4276_v22  ;;  %v4799_v22 = vld [vmem:[#allocation8 + $0x150] sm:$0xf] }
 0x165   :  { %2626 = vmatpush.bf16.msrb.mxu2 %v4404_v34  ;;  %v5312_v34 = vld [vmem:[#allocation8 + $0x154] sm:$0xf0] }
 0x166   :  { %2639 = vmatpush.bf16.msrb.mxu3 %v4532_v29  ;;  %v4800_v24 = vor.u32 %v5312_v34, %v4799_v22  ;;  %v4745_v22 = vld [vmem:[#allocation8 + $0xe8] sm:$0xf0]  ;;  %v4768_v34 = vor.u32 %v5304_v19, %v4767_v58  ;;  %v5307_v19 = vld [vmem:[#allocation8 + $0x134] sm:$0xf] }
 0x168   :  { %2601 = vmatpush.bf16.msrb.mxu0 %v4132_v44  ;;  %2614 = vmatpush.bf16.msrb.mxu1 %v4260_v46  ;;  %v5785_v20 = vpop.f32.mrf.mxu1 }
 0x169   :  { %2627 = vmatpush.bf16.msrb.mxu2 %v4388_v47  ;;  %v4712_v47 = vor.u32 %v5290_v37, %v4711_v30  ;;  %v4748_v30 = vor.u32 %v5297_v21, %v4745_v22  ;;  %v5279_v37 = vld [vmem:[#allocation8 + $0x54] sm:$0xf]  ;;  %v4785_v21 = vld [vmem:[#allocation8 + $0x138] sm:$0xf0] }
 0x16a   :  { %2640 = vmatpush.bf16.msrb.mxu3 %v4516_v48  ;;  %v4639_v48 = vld [vmem:[#allocation8 + $0x10] sm:$0xf]  ;;  %v5287_v22 = vld [vmem:[#allocation8 + $0x94] sm:$0xf] }
 0x16b   :  { %2602 = vmatmul.bf16.vlgmr.msrb.gmra.mxu0 %v5691_v31  ;;  %2615 = vmatmul.bf16.vlgmr.msrb.gmra.mxu1 %v5695_v36  ;;  %v4736_v31 = vor.u32 %v5296_v1, %v4735_v39  ;;  %v4807_v36 = vld [vmem:[#allocation8 + $0x160] sm:$0xf]  ;;  %v5286_v1 = vld [vmem:[#allocation8 + $0x84] sm:$0xf0] }
 0x16c   :  { %3058 = vmatpush.bf16.msra.mxu0 %v4688_v49  ;;  %3071 = vmatpush.bf16.msra.mxu1 %v4752_v52  ;;  %v4808_v14 = vor.u32 %v5314_v15, %v4807_v36  ;;  %v5272_v49 = vld [vmem:[#allocation8 + $0x14] sm:$0xf0]  ;;  %v4695_v39 = vld [vmem:[#allocation8 + $0x80] sm:$0xf]  ;;  %v488_v36 = vperm.slane %v5722_v8, 4 }
 0x16d   :  { %2628 = vmatmul.bf16.vlgmr.msrb.gmra.mxu2 %v5745_v4  ;;  %2641 = vmatmul.bf16.vlgmr.msrb.gmra.mxu3 %v5748_v10  ;;  %v2344_v4 = vadd.f32 %v5765_v35, %v2331_v53  ;;  %v5783_v10 = vpop.f32.mrf.mxu0  ;;  %v5788_v35 = vld [vmem:[#allocation7] sm:$0xf]  ;;  %v4775_v53 = vld [vmem:[#allocation8 + $0x120] sm:$0xf] }
 0x16e   :  { %3084 = vmatpush.bf16.msra.mxu2 %v4816_v5  ;;  %v2648_v44 = vperm.slane %v5788_v35, 0  ;;  %v2649_v59 = vperm.slane %v5788_v35, 1  ;;  %v4689_v5 = vld [vmem:[#allocation8 + $0x78] sm:$0xf0] }
 0x16f   :  { %v2357_v23 = vadd.f32 %v5767_v32, %v2344_v4  ;;  %v5310_v32 = vld [vmem:[#allocation8 + $0x144] sm:$0xf0]  ;;  %v4696_v4 = vor.u32 %v5286_v1, %v4695_v39  ;;  %v4721_v39 = vld [vmem:[#allocation8 + $0xb8] sm:$0xf0] }
 0x170   :  { %3059 = vmatpush.bf16.msra.mxu0 %v4680_v56  ;;  %3072 = vmatpush.bf16.msra.mxu1 %v4744_v61  ;;  %v5793_v40 = vpop.f32.mrf.mxu3  ;;  %v4792_v43 = vor.u32 %v5310_v32, %v4791_v42  ;;  %v2410_v52 = vpop.f32.mrf.mxu1  ;;  %v4640_v56 = vor.u32 %v5272_v49, %v4639_v48  ;;  %v5270_v61 = vld [vmem:[#allocation8 + $0x4] sm:$0xf0]  ;;  %v2656_v62 = vadd.f32 %v2648_v44, %v5740_v38  ;;  %v4673_v42 = vld [vmem:[#allocation8 + $0x58] sm:$0xf0]  ;;  %v5295_v44 = vld [vmem:[#allocation8 + $0xd4] sm:$0xf] }
 0x171   :  { %v2370_v29 = vadd.f32 %v5769_v57, %v2357_v23  ;;  %v5791_v33 = vpop.f32.mrf.mxu2  ;;  %v4648_v57 = vor.u32 %v5274_v27, %v4647_v41  ;;  %v4632_v13 = vor.u32 %v5270_v61, %v4631_v60  ;;  %v496_v23 = vperm.slane %v488_v36, 0  ;;  %v5315_v41 = vld [vmem:[#allocation8 + $0x174] sm:$0xf]  ;;  %v5277_v48 = vld [vmem:[#allocation8 + $0x44] sm:$0xf] }
 0x172   :  { %3085 = vmatpush.bf16.msra.mxu2 %v4808_v14  ;;  %v2660_v38 = vmax.f32 %v2656_v62, 0.0  ;;  %v4692_v14 = vor.u32 %v5283_v2, %v4689_v5  ;;  %v4665_v49 = vld [vmem:[#allocation8 + $0x48] sm:$0xf0]  ;;  %v5275_v61 = vld [vmem:[#allocation8 + $0x34] sm:$0xf] }
 0x173   :  { %v2383_v46 = vadd.f32 %v5771_v63, %v2370_v29  ;;  %v4704_v63 = vor.u32 %v5288_v54, %v4703_v51  ;;  %v4759_v29 = vld [vmem:[#allocation8 + $0x100] sm:$0xf]  ;;  %v5293_v51 = vld [vmem:[#allocation8 + $0xc4] sm:$0xf]  ;;  %v4729_v52 = vld [vmem:[#allocation8 + $0xc8] sm:$0xf0] }
 0x174   :  { %3060 = vmatpush.bf16.msra.mxu0 %v4672_v7  ;;  %3073 = vmatpush.bf16.msra.mxu1 %v4736_v31  ;;  %v5306_v31 = vld [vmem:[#allocation8 + $0x124] sm:$0xf0]  ;;  %v5313_v54 = vld [vmem:[#allocation8 + $0x164] sm:$0xf]  ;;  %v4732_v60 = vor.u32 %v5293_v51, %v4729_v52  ;;  %v4657_v62 = vld [vmem:[#allocation8 + $0x38] sm:$0xf0] }
 0x175   :  { %v2397_v45 = vpop.f32.mrf.mxu0  ;;  %v2657_v0 = vadd.f32 %v2649_v59, %v2383_v46  ;;  %v4776_v12 = vor.u32 %v5306_v31, %v4775_v53  ;;  %v4737_v59 = vld [vmem:[#allocation8 + $0xd8] sm:$0xf0]  ;;  %v500_v46 = vmul.f32 %v496_v23, %v5725_v50  ;;  %v4812_v26 = vor.u32 %v5313_v54, %v4809_v6  ;;  %v5311_v2 = vld [vmem:[#allocation8 + $0x154] sm:$0xf]  ;;  %v5309_v36 = vld [vmem:[#allocation8 + $0x144] sm:$0xf] }
 0x176   :  { %3086 = vmatpush.bf16.msra.mxu2 %v4800_v24  ;;  %v5800_v24 = vpack.c.bf16 %v2660_v38, %v2660_v38  ;;  %v4676_v45 = vor.u32 %v5279_v37, %v4673_v42  ;;  %v4793_v38 = vld [vmem:[#allocation8 + $0x148] sm:$0xf0] }
 0x177   :  { %v2661_v15 = vmax.f32 %v2657_v0, 0.0  ;;  %v5291_v0 = vld [vmem:[#allocation8 + $0xb4] sm:$0xf]  ;;  %v4633_v42 = vld [vmem:[#allocation8 + $0x8] sm:$0xf0] }
 0x178   :  { %3061 = vmatpush.bf16.msra.mxu0 %v4664_v16  ;;  %3074 = vmatpush.bf16.msra.mxu1 %v4728_v17  ;;  %v2436_v7 = vpop.f32.mrf.mxu3  ;;  %v5281_v16 = vld [vmem:[#allocation8 + $0x64] sm:$0xf]  ;;  %v4756_v17 = vor.u32 %v5299_v11, %v4753_v9  ;;  %v4724_v31 = vor.u32 %v5291_v0, %v4721_v39  ;;  %v4761_v52 = vld [vmem:[#allocation8 + $0x108] sm:$0xf0] }
 0x179   :  { %v2423_v3 = vpop.f32.mrf.mxu2  ;;  %v5802_v27 = vpack.c.bf16 %v2661_v15, %v2661_v15  ;;  %v4660_v7 = vor.u32 %v5275_v61, %v4657_v62  ;;  %v5273_v11 = vld [vmem:[#allocation8 + $0x24] sm:$0xf]  ;;  %v5330_v62 = vld [vmem:[#allocation8 + $0x1e4] sm:$0xf0] }
 0x17a   :  { %3087 = vmatpush.bf16.msra.mxu2 %v4792_v43  ;;  %v4817_v43 = vld [vmem:[#allocation8 + $0x178] sm:$0xf0]  ;;  %v5289_v9 = vld [vmem:[#allocation8 + $0xa4] sm:$0xf] }
 0x17b   :  { %v4801_v3 = vld [vmem:[#allocation8 + $0x158] sm:$0xf0] }
 0x17c   :  { %3062 = vmatpush.bf16.msra.mxu0 %v4656_v25  ;;  %3075 = vmatpush.bf16.msra.mxu1 %v4720_v28  ;;  %v4684_v25 = vor.u32 %v5281_v16, %v4681_v18  ;;  %v5302_v28 = vld [vmem:[#allocation8 + $0x104] sm:$0xf0]  ;;  %v4804_v5 = vor.u32 %v5311_v2, %v4801_v3  ;;  %v5271_v16 = vld [vmem:[#allocation8 + $0x14] sm:$0xf]  ;;  %v2650_v3 = vperm.slane %v5788_v35, 2 }
 0x17d   :  { %v4760_v32 = vor.u32 %v5302_v28, %v4759_v29  ;;  %v5305_v29 = vld [vmem:[#allocation8 + $0x124] sm:$0xf]  ;;  %v4777_v28 = vld [vmem:[#allocation8 + $0x128] sm:$0xf0] }
 0x17e   :  { %3088 = vmatpush.bf16.msra.mxu2 %v4784_v55  ;;  %v4668_v55 = vor.u32 %v5277_v48, %v4665_v49 }
 0x180   :  { %3063 = vmatpush.bf16.msra.mxu0 %v4648_v57  ;;  %3076 = vmatpush.bf16.msra.mxu1 %v4712_v47  ;;  %v4820_v57 = vor.u32 %v5315_v41, %v4817_v43  ;;  %v4740_v47 = vor.u32 %v5295_v44, %v4737_v59  ;;  %v4697_v43 = vld [vmem:[#allocation8 + $0x88] sm:$0xf0]  ;;  %v4780_v59 = vor.u32 %v5305_v29, %v4777_v28  ;;  %v5318_v29 = vld [vmem:[#allocation8 + $0x184] sm:$0xf0] }
 0x182   :  { %3089 = vmatpush.bf16.msra.mxu2 %v4776_v12  ;;  %v4713_v12 = vld [vmem:[#allocation8 + $0xa8] sm:$0xf0] }
 0x183   :  { %v4716_v18 = vor.u32 %v5289_v9, %v4713_v12  ;;  %v5326_v9 = vld [vmem:[#allocation8 + $0x1c4] sm:$0xf0] }
 0x184   :  { %3064 = vmatpush.bf16.msra.mxu0 %v4640_v56  ;;  %3077 = vmatpush.bf16.msra.mxu1 %v4704_v63  ;;  %v2396_v56 = vadd.f32 %v5783_v10, %v500_v46  ;;  %v4649_v10 = vld [vmem:[#allocation8 + $0x28] sm:$0xf0]  ;;  %v4769_v46 = vld [vmem:[#allocation8 + $0x118] sm:$0xf0] }
 0x186   :  { %3090 = vmatpush.bf16.msra.mxu2 %v4768_v34  ;;  %v2409_v53 = vadd.f32 %v5785_v20, %v2396_v56  ;;  %v4641_v20 = vld [vmem:[#allocation8 + $0x18] sm:$0xf0]  ;;  %v5332_v56 = vld [vmem:[#allocation8 + $0x1f4] sm:$0xf0] }
 0x187   :  { %v4705_v34 = vld [vmem:[#allocation8 + $0x98] sm:$0xf0]  ;;  %v4644_v41 = vor.u32 %v5271_v16, %v4641_v20 }
 0x188   :  { %3065 = vmatpush.bf16.msra.mxu0 %v4632_v13  ;;  %3078 = vmatpush.bf16.msra.mxu1 %v4696_v4  ;;  %v2447_v63 = vpop.f32.mrf.mxu0  ;;  %v2460_v1 = vpop.f32.mrf.mxu1  ;;  %v4796_v4 = vor.u32 %v5309_v36, %v4793_v38  ;;  %v4708_v37 = vor.u32 %v5287_v22, %v4705_v34  ;;  %v4847_v38 = vld [vmem:[#allocation8 + $0x1b0] sm:$0xf] }
 0x18a   :  { %3091 = vmatpush.bf16.msra.mxu2 %v4760_v32  ;;  %v5285_v32 = vld [vmem:[#allocation8 + $0x84] sm:$0xf] }
 0x18b   :  { %3066 = vmatmul.bf16.vlgmr.msra.gmra.mxu0 %v5800_v24  ;;  %3079 = vmatmul.bf16.vlgmr.msra.gmra.mxu1 %v5802_v27  ;;  %v4700_v49 = vor.u32 %v5285_v32, %v4697_v43  ;;  %v5329_v43 = vld [vmem:[#allocation8 + $0x1e4] sm:$0xf] }
 0x18c   :  { %3110 = vmatpush.bf16.msrb.mxu0 %v4692_v14  ;;  %3123 = vmatpush.bf16.msrb.mxu1 %v4756_v17  ;;  %v4652_v14 = vor.u32 %v5273_v11, %v4649_v10  ;;  %v2422_v17 = vadd.f32 %v5791_v33, %v2409_v53  ;;  %v5269_v33 = vld [vmem:[#allocation8 + $0x4] sm:$0xf]  ;;  %v4855_v10 = vld [vmem:[#allocation8 + $0x1c0] sm:$0xf] }
 0x18d   :  { %v4856_v36 = vor.u32 %v5326_v9, %v4855_v10 }
 0x18e   :  { %3136 = vmatpush.bf16.msrb.mxu2 %v4820_v57 }
 0x190   :  { %3111 = vmatpush.bf16.msrb.mxu0 %v4684_v25  ;;  %3124 = vmatpush.bf16.msrb.mxu1 %v4748_v30  ;;  %v2486_v15 = vpop.f32.mrf.mxu3  ;;  %v2449_v58 = vpop.f32.mrf.mxu0  ;;  %v4788_v25 = vor.u32 %v5307_v19, %v4785_v21  ;;  %v2435_v30 = vadd.f32 %v5793_v40, %v2422_v17  ;;  %v5301_v40 = vld [vmem:[#allocation8 + $0x104] sm:$0xf]  ;;  %v4839_v17 = vld [vmem:[#allocation8 + $0x1a0] sm:$0xf]  ;;  %v4831_v19 = vld [vmem:[#allocation8 + $0x190] sm:$0xf] }
 0x191   :  { %v2473_v13 = vpop.f32.mrf.mxu2  ;;  %v2462_v23 = vpop.f32.mrf.mxu1  ;;  %v4764_v6 = vor.u32 %v5301_v40, %v4761_v52  ;;  %v5320_v21 = vld [vmem:[#allocation8 + $0x194] sm:$0xf0]  ;;  %v5325_v52 = vld [vmem:[#allocation8 + $0x1c4] sm:$0xf] }
 0x192   :  { %3137 = vmatpush.bf16.msrb.mxu2 %v4812_v26  ;;  %v2448_v48 = vadd.f32 %v2447_v63, %v2435_v30  ;;  %v4832_v34 = vor.u32 %v5320_v21, %v4831_v19  ;;  %v489_v23 = vperm.slane %v5722_v8, 6  ;;  %v4881_v30 = vld [vmem:[#allocation8 + $0x1f8] sm:$0xf0]  ;;  %v5327_v8 = vld [vmem:[#allocation8 + $0x1d4] sm:$0xf] }
 0x193   :  { %v2732_v21 = vld [vmem:[#allocation10] sm:$0x3] }
 0x194   :  { %3112 = vmatpush.bf16.msrb.mxu0 %v4676_v45  ;;  %3125 = vmatpush.bf16.msrb.mxu1 %v4740_v47  ;;  %v5303_v45 = vld [vmem:[#allocation8 + $0x114] sm:$0xf]  ;;  %v4636_v47 = vor.u32 %v5269_v33, %v4633_v42  ;;  %v2461_v54 = vadd.f32 %v2460_v1, %v2448_v48  ;;  %v497_v33 = vperm.slane %v489_v23, 0 }
 0x195   :  { %v4772_v51 = vor.u32 %v5303_v45, %v4769_v46  ;;  %v4865_v46 = vld [vmem:[#allocation8 + $0x1d8] sm:$0xf0] }
 0x196   :  { %3138 = vmatpush.bf16.msrb.mxu2 %v4804_v5  ;;  %v2474_v26 = vadd.f32 %v2473_v13, %v2461_v54  ;;  %v4863_v5 = vld [vmem:[#allocation8 + $0x1d0] sm:$0xf]  ;;  %v4868_v48 = vor.u32 %v5327_v8, %v4865_v46  ;;  %v4857_v54 = vld [vmem:[#allocation8 + $0x1c8] sm:$0xf0] }
 0x197   :  { %v5338_v8 = vld [vmem:[#allocation11 + $0x28] sm:$0xff] }
 0x198   :  { %3113 = vmatpush.bf16.msrb.mxu0 %v4668_v55  ;;  %3126 = vmatpush.bf16.msrb.mxu1 %v4732_v60  ;;  %v2488_v57 = vpop.f32.mrf.mxu3  ;;  %v4879_v55 = vld [vmem:[#allocation8 + $0x1f0] sm:$0xf]  ;;  %v4871_v60 = vld [vmem:[#allocation8 + $0x1e0] sm:$0xf]  ;;  %v2487_v63 = vadd.f32 %v2486_v15, %v2474_v26  ;;  %v5324_v15 = vld [vmem:[#allocation8 + $0x1b4] sm:$0xf0] }
 0x199   :  { %v2475_v44 = vpop.f32.mrf.mxu2  ;;  %v4880_v61 = vor.u32 %v5332_v56, %v4879_v55  ;;  %v4872_v0 = vor.u32 %v5330_v62, %v4871_v60  ;;  %v4848_v16 = vor.u32 %v5324_v15, %v4847_v38  ;;  %v501_v57 = vmul.f32 %v497_v33, %v5725_v50  ;;  %v5323_v56 = vld [vmem:[#allocation8 + $0x1b4] sm:$0xf]  ;;  %v4849_v60 = vld [vmem:[#allocation8 + $0x1b8] sm:$0xf0]  ;;  %v5321_v62 = vld [vmem:[#allocation8 + $0x1a4] sm:$0xf] }
 0x19a   :  { %3139 = vmatpush.bf16.msrb.mxu2 %v4796_v4  ;;  %v4873_v44 = vld [vmem:[#allocation8 + $0x1e8] sm:$0xf0]  ;;  %v4852_v50 = vor.u32 %v5323_v56, %v4849_v60  ;;  %v2651_v15 = vperm.slane %v5788_v35, 3  ;;  %v5333_v56 = vld [vmem:[#allocation11] sm:$0xff] }
 0x19b   :  { %3097 = vmatpush.bf16.msra.mxu3 %v4880_v61  ;;  %v5345_v60 = vld [vmem:[#allocation11 + $0x60] sm:$0xff] }
 0x19c   :  { %3114 = vmatpush.bf16.msrb.mxu0 %v4660_v7  ;;  %3127 = vmatpush.bf16.msrb.mxu1 %v4724_v31 }
 0x19e   :  { %3140 = vmatpush.bf16.msrb.mxu2 %v4788_v25  ;;  %v4823_v25 = vld [vmem:[#allocation8 + $0x180] sm:$0xf] }
 0x19f   :  { %3098 = vmatpush.bf16.msra.mxu3 %v4872_v0  ;;  %v4824_v28 = vor.u32 %v5318_v29, %v4823_v25  ;;  %v4841_v0 = vld [vmem:[#allocation8 + $0x1a8] sm:$0xf0] }
 0x1a0   :  { %3115 = vmatpush.bf16.msrb.mxu0 %v4652_v14  ;;  %3128 = vmatpush.bf16.msrb.mxu1 %v4716_v18  ;;  %v5322_v18 = vld [vmem:[#allocation8 + $0x1a4] sm:$0xf0] }
 0x1a1   :  { %v4840_v20 = vor.u32 %v5322_v18, %v4839_v17 }
 0x1a2   :  { %3141 = vmatpush.bf16.msrb.mxu2 %v4780_v59  ;;  %v4876_v59 = vor.u32 %v5329_v43, %v4873_v44  ;;  %v5340_v44 = vld [vmem:[#allocation11 + $0x38] sm:$0xff] }
 0x1a4   :  { %3116 = vmatpush.bf16.msrb.mxu0 %v4644_v41  ;;  %3129 = vmatpush.bf16.msrb.mxu1 %v4708_v37  ;;  %v5331_v41 = vld [vmem:[#allocation8 + $0x1f4] sm:$0xf] }
 0x1a5   :  { %v4884_v37 = vor.u32 %v5331_v41, %v4881_v30  ;;  %v2735_v30 = vperm.slane %v2732_v21, 1 }
 0x1a6   :  { %3142 = vmatpush.bf16.msrb.mxu2 %v4772_v51 }
 0x1a8   :  { %3117 = vmatpush.bf16.msrb.mxu0 %v4636_v47  ;;  %3130 = vmatpush.bf16.msrb.mxu1 %v4700_v49  ;;  %v2499_v39 = vpop.f32.mrf.mxu0  ;;  %v2512_v1 = vpop.f32.mrf.mxu1 }
 0x1a9   :  { %v2500_v2 = vadd.f32 %v2499_v39, %v2487_v63  ;;  %v4844_v39 = vor.u32 %v5321_v62, %v4841_v0  ;;  %v5342_v62 = vld [vmem:[#allocation11 + $0x48] sm:$0xff]  ;;  %v5341_v0 = vld [vmem:[#allocation11 + $0x40] sm:$0xff] }
 0x1aa   :  { %3143 = vmatpush.bf16.msrb.mxu2 %v4764_v6  ;;  %v4860_v6 = vor.u32 %v5325_v52, %v4857_v54 }
 0x1ab   :  { %3118 = vmatmul.bf16.vlgmr.msrb.gmra.mxu0 %v5800_v24  ;;  %3131 = vmatmul.bf16.vlgmr.msrb.gmra.mxu1 %v5802_v27  ;;  %v5328_v24 = vld [vmem:[#allocation8 + $0x1d4] sm:$0xf0]  ;;  %v2513_v7 = vadd.f32 %v2512_v1, %v2500_v2  ;;  %v5319_v2 = vld [vmem:[#allocation8 + $0x194] sm:$0xf]  ;;  %v4833_v1 = vld [vmem:[#allocation8 + $0x198] sm:$0xf0] }
 0x1ac   :  { %v4864_v27 = vor.u32 %v5328_v24, %v4863_v5  ;;  %v4836_v5 = vor.u32 %v5319_v2, %v4833_v1  ;;  %3298 = vmatpush.bf16.msra.mxu0 %v5340_v44 }
 0x1ad   :  { %v2658_v53 = vadd.f32 %v2650_v3, %v2513_v7  ;;  %v5317_v7 = vld [vmem:[#allocation8 + $0x184] sm:$0xf] }
 0x1ae   :  { %3099 = vmatpush.bf16.msra.mxu3 %v4864_v27  ;;  %v4825_v27 = vld [vmem:[#allocation8 + $0x188] sm:$0xf0] }
 0x1af   :  { %v2662_v31 = vmax.f32 %v2658_v53, 0.0  ;;  %v4828_v53 = vor.u32 %v5317_v7, %v4825_v27 }
 0x1b0   :  { %v2538_v12 = vpop.f32.mrf.mxu3  ;;  %v2501_v13 = vpop.f32.mrf.mxu0 }
 0x1b1   :  { %v2525_v11 = vpop.f32.mrf.mxu2  ;;  %v2666_v4 = vpack.c.bf16 %v2662_v31, %v2662_v31  ;;  %v2514_v14 = vpop.f32.mrf.mxu1 }
 0x1b2   :  { %3100 = vmatpush.bf16.msra.mxu3 %v4856_v36  ;;  %v2526_v49 = vadd.f32 %v2525_v11, %v501_v57  ;;  %v5339_v57 = vld [vmem:[#allocation11 + $0x30] sm:$0xff] }
 0x1b3   :  { %3092 = vmatmul.bf16.vlgmr.msra.gmra.mxu2 %v2666_v4  ;;  %3299 = vmatpush.bf16.msra.mxu0 %v5339_v57 }
 0x1b4   :  { %v2539_v26 = vadd.f32 %v2538_v12, %v2526_v49  ;;  %v5336_v49 = vld [vmem:[#allocation11 + $0x18] sm:$0xff] }
 0x1b6   :  { %3101 = vmatpush.bf16.msra.mxu3 %v4848_v16 }
 0x1b7   :  { %3300 = vmatpush.bf16.msra.mxu0 %v5338_v8 }
 0x1b8   :  { %v2540_v22 = vpop.f32.mrf.mxu3 }
 0x1b9   :  { %v2527_v58 = vpop.f32.mrf.mxu2  ;;  %v2734_v22 = vperm.slane %v2732_v21, 0 }
 0x1ba   :  { %3102 = vmatpush.bf16.msra.mxu3 %v4840_v20 }
 0x1be   :  { %3103 = vmatpush.bf16.msra.mxu3 %v4832_v34 }
 0x1c2   :  { %3104 = vmatpush.bf16.msra.mxu3 %v4824_v28 }
 0x1c3   :  { %3144 = vmatmul.bf16.vlgmr.msrb.gmra.mxu2 %v2666_v4 }
 0x1c6   :  { %3149 = vmatpush.bf16.msrb.mxu3 %v4884_v37 }
 0x1c8   :  { %v2551_v42 = vpop.f32.mrf.mxu0  ;;  %v2564_v32 = vpop.f32.mrf.mxu1 }
 0x1c9   :  { %v2552_v63 = vadd.f32 %v2551_v42, %v2539_v26  ;;  %v5334_v26 = vld [vmem:[#allocation11 + $0x8] sm:$0xff] }
 0x1ca   :  { %3150 = vmatpush.bf16.msrb.mxu3 %v4876_v59  ;;  %v5348_v59 = vld [vmem:[#allocation11 + $0x78] sm:$0xff] }
 0x1cb   :  { %v2565_v3 = vadd.f32 %v2564_v32, %v2552_v63  ;;  %3311 = vmatpush.bf16.msra.mxu1 %v5348_v59 }
 0x1ce   :  { %3151 = vmatpush.bf16.msrb.mxu3 %v4868_v48  ;;  %v5337_v48 = vld [vmem:[#allocation11 + $0x20] sm:$0xff] }
 0x1cf   :  { %3301 = vmatpush.bf16.msra.mxu0 %v5337_v48 }
 0x1d0   :  { %v2590_v47 = vpop.f32.mrf.mxu3  ;;  %v2553_v51 = vpop.f32.mrf.mxu0 }
 0x1d1   :  { %v2577_v45 = vpop.f32.mrf.mxu2  ;;  %v2566_v40 = vpop.f32.mrf.mxu1 }
 0x1d2   :  { %3152 = vmatpush.bf16.msrb.mxu3 %v4860_v6  ;;  %v2578_v24 = vadd.f32 %v2577_v45, %v2565_v3  ;;  %v5347_v45 = vld [vmem:[#allocation11 + $0x70] sm:$0xff] }
 0x1d3   :  { %3312 = vmatpush.bf16.msra.mxu1 %v5347_v45  ;;  %3302 = vmatpush.bf16.msra.mxu0 %v5336_v49  ;;  %v5335_v40 = vld [vmem:[#allocation11 + $0x10] sm:$0xff] }
 0x1d4   :  { %v2591_v31 = vadd.f32 %v2590_v47, %v2578_v24 }
 0x1d6   :  { %3153 = vmatpush.bf16.msrb.mxu3 %v4852_v50  ;;  %v5343_v50 = vld [vmem:[#allocation11 + $0x50] sm:$0xff] }
 0x1d7   :  { %3303 = vmatpush.bf16.msra.mxu0 %v5335_v40 }
 0x1d8   :  { %v2592_v61 = vpop.f32.mrf.mxu3 }
 0x1d9   :  { %v2579_v55 = vpop.f32.mrf.mxu2  ;;  %v5344_v61 = vld [vmem:[#allocation11 + $0x58] sm:$0xff] }
 0x1da   :  { %3154 = vmatpush.bf16.msrb.mxu3 %v4844_v39  ;;  %v5346_v55 = vld [vmem:[#allocation11 + $0x68] sm:$0xff] }
 0x1db   :  { %3304 = vmatpush.bf16.msra.mxu0 %v5334_v26  ;;  %3313 = vmatpush.bf16.msra.mxu1 %v5346_v55 }
 0x1de   :  { %3155 = vmatpush.bf16.msrb.mxu3 %v4836_v5 }
 0x1df   :  { %3305 = vmatpush.bf16.msra.mxu0 %v5333_v56  ;;  %3314 = vmatpush.bf16.msra.mxu1 %v5345_v60 }
 0x1e2   :  { %3156 = vmatpush.bf16.msrb.mxu3 %v4828_v53 }
 0x1e3   :  { %3315 = vmatpush.bf16.msra.mxu1 %v5344_v61 }
 0x1e7   :  { %3316 = vmatpush.bf16.msra.mxu1 %v5343_v50 }
 0x1e8   :  { %v2603_v11 = vpop.f32.mrf.mxu0  ;;  %v2616_v10 = vpop.f32.mrf.mxu1 }
 0x1e9   :  { %v2604_v9 = vadd.f32 %v2603_v11, %v2591_v31 }
 0x1eb   :  { %v2617_v12 = vadd.f32 %v2616_v10, %v2604_v9  ;;  %3317 = vmatpush.bf16.msra.mxu1 %v5342_v62  ;;  %v3325_v10 = vld [vmem:[#allocation14] sm:$0x1]  ;;  %v5365_v9 = vld [vmem:[#allocation13] ss:$0 sm:$0xff] }
 0x1ef   :  { %3318 = vmatpush.bf16.msra.mxu1 %v5341_v0 }
 0x1f0   :  { %v2629_v13 = vpop.f32.mrf.mxu2  ;;  %v2642_v38 = vpop.f32.mrf.mxu3 }
 0x1f1   :  { %v2630_v36 = vadd.f32 %v2629_v13, %v2617_v12  ;;  %v2605_v4 = vpop.f32.mrf.mxu0  ;;  %v2618_v14 = vpop.f32.mrf.mxu1  ;;  %v3326_v12 = vunpack.c.l.bf16 %v3325_v10 }
 0x1f3   :  { %v2643_v16 = vadd.f32 %v2642_v38, %v2630_v36 }
 0x1f5   :  { %v2659_v17 = vadd.f32 %v2651_v15, %v2643_v16  ;;  %v3327_v15 = vperm.slane %v3326_v12, 0 }
 0x1f7   :  { %v2663_v18 = vmax.f32 %v2659_v17, 0.0 }
 0x1f8   :  { %v2631_v20 = vpop.f32.mrf.mxu2  ;;  %v2644_v19 = vpop.f32.mrf.mxu3 }
 0x1f9   :  { %v2667_v58 = vpack.c.bf16 %v2663_v18, %v2663_v18  ;;  %v5366_v18 = vld [vmem:[#allocation2] ss:$0 sm:$0xff] }
 0x1fb   :  { %3105 = vmatmul.bf16.vlgmr.msra.gmra.mxu3 %v2667_v58 }
 0x208   :  { %v3067_v34 = vpop.f32.mrf.mxu0  ;;  %v3080_v25 = vpop.f32.mrf.mxu1 }
 0x209   :  { %v3068_v23 = vadd.f32 %v3067_v34, %v2734_v22 }
 0x20b   :  { %v3081_v29 = vadd.f32 %v3080_v25, %v3068_v23  ;;  %3157 = vmatmul.bf16.vlgmr.msrb.gmra.mxu3 %v2667_v58 }
 0x210   :  { %v3069_v28 = vpop.f32.mrf.mxu0  ;;  %v3082_v41 = vpop.f32.mrf.mxu1 }
 0x228   :  { %v3119_v35 = vpop.f32.mrf.mxu0  ;;  %v3132_v33 = vpop.f32.mrf.mxu1 }
 0x229   :  { %v3120_v37 = vadd.f32 %v3119_v35, %v2735_v30 }
 0x22b   :  { %v3133_v42 = vadd.f32 %v3132_v33, %v3120_v37 }
 0x230   :  { %v3121_v32 = vpop.f32.mrf.mxu0  ;;  %v3134_v43 = vpop.f32.mrf.mxu1 }
 0x236   :  { %v3093_v46 = vpop.f32.mrf.mxu2 }
 0x237   :  { %v3094_v47 = vadd.f32 %v3093_v46, %v3081_v29 }
 0x23e   :  { %v3095_v51 = vpop.f32.mrf.mxu2 }
 0x246   :  { %v3145_v52 = vpop.f32.mrf.mxu2 }
 0x247   :  { %v3146_v54 = vadd.f32 %v3145_v52, %v3133_v42 }
 0x24e   :  { %v3147_v6 = vpop.f32.mrf.mxu2 }
 0x27e   :  { %v3106_v63 = vpop.f32.mrf.mxu3 }
 0x27f   :  { %v3107_v39 = vadd.f32 %v3106_v63, %v3094_v47 }
 0x281   :  { %v3162_v2 = vmax.f32 %v3107_v39, 0.0 }
 0x283   :  { %v3164_v1 = vpack.c.bf16 %v3162_v2, %v3162_v2 }
 0x285   :  { %3306 = vmatmul.bf16.vlgmr.msra.gmra.mxu0 %v3164_v1 }
 0x286   :  { %v3108_v3 = vpop.f32.mrf.mxu3 }
 0x28e   :  { %v3158_v5 = vpop.f32.mrf.mxu3 }
 0x28f   :  { %v3159_v24 = vadd.f32 %v3158_v5, %v3146_v54 }
 0x291   :  { %v3163_v7 = vmax.f32 %v3159_v24, 0.0 }
 0x293   :  { %v3165_v27 = vpack.c.bf16 %v3163_v7, %v3163_v7 }
 0x295   :  { %3319 = vmatmul.bf16.vlgmr.msra.gmra.mxu1 %v3165_v27 }
 0x296   :  { %v3160_v53 = vpop.f32.mrf.mxu3 }
 0x302   :  { %v3307_v31 = vpop.f32.mrf.mxu0 }
 0x303   :  { %v3308_v13 = vadd.f32 %v5365_v9, %v3307_v31 }
 0x30a   :  { %v3309_v11 = vpop.f32.mrf.mxu0 }
 0x312   :  { %v3320_v36 = vpop.f32.mrf.mxu1 }
 0x313   :  { %v3321_v38 = vadd.f32 %v3320_v36, %v3308_v13 }
 0x315   :  { %v3324_v4 = vmax.f32 %v3321_v38, 0.0 }
 0x317   :  { %v3328_v14 = vmul.f32 %v3327_v15, %v3324_v4 }
 0x319   :  { %v3330_v16 = vsel %vm3329_vm0, %v3328_v14, 0.0 }
 0x31a   :  { %v3322_v17 = vpop.f32.mrf.mxu1  ;;  %3331 = vadd.xlane.f32.xlu0 %v3330_v16 }
 0x38d   :  { %v3332_v20 = vpop.xlane.xlu0 %3331 }
 0x38e   :  { %v3337_v58 = vadd.f32 %v5366_v18, %v3332_v20 }
 0x390   :  { %3339 = vst.msk [vmem:[%s5831_s11] sm:$0x3] %vm3338_vm1, %v3337_v58 }
 0x391   :  { %3344 = vsyncpa [#allocation4], 1 }
 0x392   :  { %3345 = vsyncpa [#allocation6], 1 }
 0x393   :  { %3346 = vsyncpa [#allocation9], 1 }
 0x394   :  { %3347 = vsyncpa [#allocation12], 1 }
 0x395   :  { %3348 = vsyncpa [#allocation15], 1 }

// kernel: volume_estimator_head.1
= control target key start
LH: loop header
LB: loop body
LE: loop exit
PB: predicated region body
PF: predicated region fallthrough
CT: control target
= control target key end

     0   :  { %s5820_s0 = inlined_call_operand.vmem [shape: bf16[2,1280], index: 0, kind: input, shape index: {}]   ;;  %s5821_s1 = inlined_call_operand.vmem [shape: f32[2,1], index: 1, kind: input, shape index: {}]   ;;  %s5822_s2 = inlined_call_operand.hbm [shape: bf16[1280,512], index: 2, kind: input, shape index: {}]   ;;  %s5823_s3 = inlined_call_operand.hbm [shape: bf16[1,512], index: 3, kind: input, shape index: {}]   ;;  %s5824_s4 = inlined_call_operand.hbm [shape: f32[1,512], index: 4, kind: input, shape index: {}]   ;;  %s5825_s5 = inlined_call_operand.hbm [shape: bf16[512,256], index: 5, kind: input, shape index: {}]   ;;  %s5826_s6 = inlined_call_operand.hbm [shape: f32[1,256], index: 6, kind: input, shape index: {}]   ;;  %s5827_s7 = inlined_call_operand.hbm [shape: bf16[256,128], index: 7, kind: input, shape index: {}]   ;;  %s5828_s8 = inlined_call_operand.hbm [shape: f32[1,128], index: 8, kind: input, shape index: {}]   ;;  %s5829_s9 = inlined_call_operand.hbm [shape: bf16[1,128], index: 9, kind: input, shape index: {}]   ;;  %s5830_s10 = inlined_call_operand.<no memory space> [shape: f32[1,1], index: 10, kind: input, shape index: {}]   ;;  %s5831_s11 = inlined_call_operand.vmem [shape: f32[2,1], index: 11, kind: output, shape index: {}]  }
   0x1   :  { %v16_v0 = vstv %s5830_s10 }
   0x2   :  { %17 = vst [vmem:[#allocation2] sm:$0x1] %v16_v0 }
   0x3   :  { %18 = vsyncpa [#allocation4], 0 }
   0x4   :  { %19 = vsyncpa [#allocation6], 0 }
   0x5   :  { %20 = vsyncpa [#allocation9], 0 }
   0x6   :  { %21 = vsyncpa [#allocation12], 0  ;;  %s45_s21 = sshll.u32 %s5823_s3, 4  ;;  %s46_s21 = int_to_ptr.hbm [resolvable:$true] %s45_s21 }
   0x7   :  { %22 = vsyncpa [#allocation15], 0  ;;  %s5571_s22 = smov [#allocation5]   ;;  %s66_s26 = sshll.u32 %s5825_s5, 4  ;;  %s67_s26 = int_to_ptr.hbm [resolvable:$true] %s66_s26 }
   0x8   :  { %s47_s23 = sshll.u32 %s5571_s22, 4  ;;  %s5572_s10 = smov [#allocation8]   ;;  %s48_s23 = int_to_ptr.vmem [resolvable:$true] %s47_s23 }
   0x9   :  { %50 = dma.hbm_to_vmem [thread:$0]  %s46_s21, 64, %s48_s23, [#allocation6]  }
   0xa   :  { %s68_s27 = sshll.u32 %s5572_s10, 4  ;;  %s5573_s28 = smov 128   ;;  %s69_s27 = int_to_ptr.vmem [resolvable:$true] %s68_s27 }
   0xb   :  { %s5574_s29 = smov 8   ;;  %s90_s3 = sshll.u32 %s5827_s7, 4  ;;  %s91_s3 = int_to_ptr.hbm [resolvable:$true] %s90_s3 }
   0xc   :  { %74 = dma.hbm_to_vmem [thread:$0]  %s67_s26, 8192, %s69_s27, [#allocation9], %s5573_s28, %s5573_s28, %s5574_s29  }
   0xd   :  { %s5575_s13 = smov [#allocation11]   ;;  %s31_s5 = sshll.u32 %s5822_s2, 4  ;;  %s32_s5 = int_to_ptr.hbm [resolvable:$true] %s31_s5 }
   0xe   :  { %s92_s14 = sshll.u32 %s5575_s13, 4  ;;  %s5576_s17 = smov 64   ;;  %s93_s14 = int_to_ptr.vmem [resolvable:$true] %s92_s14 }
   0xf   :  { %s5577_s18 = smov 4   ;;  %s5578_s19 = smov [#allocation3]  }
  0x10   :  { %98 = dma.hbm_to_vmem [thread:$0]  %s91_s3, 2048, %s93_s14, [#allocation12], %s5576_s17, %s5576_s17, %s5577_s18  }
  0x11   :  { %s33_s20 = sshll.u32 %s5578_s19, 4  ;;  %s5579_s21 = smov 256   ;;  %s34_s20 = int_to_ptr.vmem [resolvable:$true] %s33_s20 }
  0x12   :  { %s5580_s22 = smov 16   ;;  %s56_s24 = sshll.u32 %s5824_s4, 4  ;;  %s57_s24 = int_to_ptr.hbm [resolvable:$true] %s56_s24 }
  0x13   :  { %39 = dma.hbm_to_vmem [thread:$0]  %s32_s5, 40960, %s34_s20, [#allocation4], %s5579_s21, %s5579_s21, %s5580_s22  }
  0x14   :  { %s5581_s25 = smov [#allocation7]   ;;  %s80_s27 = sshll.u32 %s5826_s6, 4  ;;  %s81_s27 = int_to_ptr.hbm [resolvable:$true] %s80_s27 }
  0x15   :  { %s58_s26 = sshll.u32 %s5581_s25, 4  ;;  %s5582_s28 = smov [#allocation10]   ;;  %s59_s26 = int_to_ptr.vmem [resolvable:$true] %s58_s26 }
  0x16   :  { %61 = dma.hbm_to_vmem [thread:$0]  %s57_s24, 64, %s59_s26, [#allocation6]  }
  0x17   :  { %s82_s29 = sshll.u32 %s5582_s28, 4  ;;  %s104_s3 = sshll.u32 %s5828_s8, 4  ;;  %s83_s29 = int_to_ptr.vmem [resolvable:$true] %s82_s29  ;;  %s105_s3 = int_to_ptr.hbm [resolvable:$true] %s104_s3 }
  0x18   :  { %85 = dma.hbm_to_vmem [thread:$0]  %s81_s27, 32, %s83_s29, [#allocation9]  }
  0x19   :  { %s115_s14 = sshll.u32 %s5829_s9, 4  ;;  %s5583_s15 = smov [#allocation13]   ;;  %s116_s14 = int_to_ptr.hbm [resolvable:$true] %s115_s14 }
  0x1a   :  { %s106_s16 = sshll.u32 %s5583_s15, 4  ;;  %s5584_s6 = smov [#allocation14]   ;;  %s107_s16 = int_to_ptr.vmem [resolvable:$true] %s106_s16 }
  0x1b   :  { %109 = dma.hbm_to_vmem [thread:$0]  %s105_s3, 16, %s107_s16, [#allocation12]  }
  0x1c   :  { %s117_s5 = sshll.u32 %s5584_s6, 4  ;;  %s118_s5 = int_to_ptr.vmem [resolvable:$true] %s117_s5 }
  0x1d   :  { %120 = dma.hbm_to_vmem [thread:$0]  %s116_s14, 16, %s118_s5, [#allocation15]  }
  0x1e   :  { %5561 = dma.done.wait [#allocation4], 40960  }
  0x1f   :  { %5562 = vsyncadd [#allocation4], 4294926336 }
  0x20   :  { %5563 = dma.done.wait [#allocation6], 128  }
  0x21   :  { %5564 = vsyncadd [#allocation6], 4294967168 }
  0x22   :  { %5565 = dma.done.wait [#allocation9], 8224  }
  0x23   :  { %5566 = vsyncadd [#allocation9], 4294959072 }
  0x24   :  { %5567 = dma.done.wait [#allocation12], 2064  }
  0x25   :  { %5568 = vsyncadd [#allocation12], 4294965232 }
  0x26   :  { %5569 = dma.done.wait [#allocation15], 16  }
  0x27   :  { %5570 = vsyncadd [#allocation15], 4294967280  ;;  %v3463_v1 = vld [vmem:[#allocation3 + $0xe0] sm:$0xf]  ;;  %v4979_v2 = vld [vmem:[#allocation3 + $0xec] sm:$0xf0] }
  0x28   :  { %v3591_v3 = vld [vmem:[#allocation3 + $0x1e0] sm:$0xf]  ;;  %v3464_v4 = vor.u32 %v4979_v2, %v3463_v1  ;;  %v5011_v5 = vld [vmem:[#allocation3 + $0x1ec] sm:$0xf0]  ;;  %vm3329_vm0 = vcmask 1041408   ;;  %vm3338_vm1 = vcmask 1024  }
  0x29   :  { %v3719_v6 = vld [vmem:[#allocation3 + $0x2e0] sm:$0xf]  ;;  %v5043_v7 = vld [vmem:[#allocation3 + $0x2ec] sm:$0xf0]  ;;  %v3592_v8 = vor.u32 %v5011_v5, %v3591_v3 }
  0x2a   :  { %v3720_v9 = vor.u32 %v5043_v7, %v3719_v6  ;;  %v3847_v10 = vld [vmem:[#allocation3 + $0x3e0] sm:$0xf]  ;;  %v5075_v11 = vld [vmem:[#allocation3 + $0x3ec] sm:$0xf0]  ;;  %2126 = vmatpush.bf16.msra.mxu0 %v3464_v4 }
  0x2b   :  { %v3447_v12 = vld [vmem:[#allocation3 + $0xc0] sm:$0xf]  ;;  %v3848_v13 = vor.u32 %v5075_v11, %v3847_v10  ;;  %v4975_v14 = vld [vmem:[#allocation3 + $0xcc] sm:$0xf0]  ;;  %2139 = vmatpush.bf16.msra.mxu1 %v3592_v8 }
  0x2c   :  { %v3575_v15 = vld [vmem:[#allocation3 + $0x1c0] sm:$0xf]  ;;  %v5007_v16 = vld [vmem:[#allocation3 + $0x1cc] sm:$0xf0]  ;;  %2152 = vmatpush.bf16.msra.mxu2 %v3720_v9  ;;  %v3448_v17 = vor.u32 %v4975_v14, %v3447_v12 }
  0x2d   :  { %v3576_v18 = vor.u32 %v5007_v16, %v3575_v15  ;;  %v3703_v19 = vld [vmem:[#allocation3 + $0x2c0] sm:$0xf]  ;;  %v5039_v20 = vld [vmem:[#allocation3 + $0x2cc] sm:$0xf0]  ;;  %2165 = vmatpush.bf16.msra.mxu3 %v3848_v13 }
  0x2e   :  { %v3831_v21 = vld [vmem:[#allocation3 + $0x3c0] sm:$0xf]  ;;  %v3704_v22 = vor.u32 %v5039_v20, %v3703_v19  ;;  %v5071_v23 = vld [vmem:[#allocation3 + $0x3cc] sm:$0xf0]  ;;  %2127 = vmatpush.bf16.msra.mxu0 %v3448_v17 }
  0x2f   :  { %v3431_v24 = vld [vmem:[#allocation3 + $0xa0] sm:$0xf]  ;;  %v4971_v25 = vld [vmem:[#allocation3 + $0xac] sm:$0xf0]  ;;  %v3832_v26 = vor.u32 %v5071_v23, %v3831_v21  ;;  %2140 = vmatpush.bf16.msra.mxu1 %v3576_v18 }
  0x30   :  { %v3559_v27 = vld [vmem:[#allocation3 + $0x1a0] sm:$0xf]  ;;  %v5003_v28 = vld [vmem:[#allocation3 + $0x1ac] sm:$0xf0]  ;;  %v3432_v30 = vor.u32 %v4971_v25, %v3431_v24  ;;  %2153 = vmatpush.bf16.msra.mxu2 %v3704_v22 }
  0x31   :  { %v3687_v29 = vld [vmem:[#allocation3 + $0x2a0] sm:$0xf]  ;;  %v5035_v31 = vld [vmem:[#allocation3 + $0x2ac] sm:$0xf0]  ;;  %v3560_v34 = vor.u32 %v5003_v28, %v3559_v27  ;;  %2166 = vmatpush.bf16.msra.mxu3 %v3832_v26 }
  0x32   :  { %v3815_v32 = vld [vmem:[#allocation3 + $0x3a0] sm:$0xf]  ;;  %v5067_v33 = vld [vmem:[#allocation3 + $0x3ac] sm:$0xf0]  ;;  %v3688_v35 = vor.u32 %v5035_v31, %v3687_v29  ;;  %2128 = vmatpush.bf16.msra.mxu0 %v3432_v30 }
  0x33   :  { %v3415_v36 = vld [vmem:[#allocation3 + $0x80] sm:$0xf]  ;;  %v4967_v37 = vld [vmem:[#allocation3 + $0x8c] sm:$0xf0]  ;;  %v3816_v39 = vor.u32 %v5067_v33, %v3815_v32  ;;  %2141 = vmatpush.bf16.msra.mxu1 %v3560_v34 }
  0x34   :  { %v3543_v38 = vld [vmem:[#allocation3 + $0x180] sm:$0xf]  ;;  %v4999_v40 = vld [vmem:[#allocation3 + $0x18c] sm:$0xf0]  ;;  %v3416_v45 = vor.u32 %v4967_v37, %v3415_v36  ;;  %2154 = vmatpush.bf16.msra.mxu2 %v3688_v35 }
  0x35   :  { %v3671_v41 = vld [vmem:[#allocation3 + $0x280] sm:$0xf]  ;;  %v5031_v42 = vld [vmem:[#allocation3 + $0x28c] sm:$0xf0]  ;;  %v3544_v46 = vor.u32 %v4999_v40, %v3543_v38  ;;  %2167 = vmatpush.bf16.msra.mxu3 %v3816_v39 }
  0x36   :  { %v3799_v43 = vld [vmem:[#allocation3 + $0x380] sm:$0xf]  ;;  %v5063_v44 = vld [vmem:[#allocation3 + $0x38c] sm:$0xf0]  ;;  %v3672_v47 = vor.u32 %v5031_v42, %v3671_v41  ;;  %2129 = vmatpush.bf16.msra.mxu0 %v3416_v45 }
  0x37   :  { %v3399_v48 = vld [vmem:[#allocation3 + $0x60] sm:$0xf]  ;;  %v4963_v49 = vld [vmem:[#allocation3 + $0x6c] sm:$0xf0]  ;;  %v3800_v51 = vor.u32 %v5063_v44, %v3799_v43  ;;  %2142 = vmatpush.bf16.msra.mxu1 %v3544_v46 }
  0x38   :  { %v3527_v50 = vld [vmem:[#allocation3 + $0x160] sm:$0xf]  ;;  %v4995_v52 = vld [vmem:[#allocation3 + $0x16c] sm:$0xf0]  ;;  %v3400_v57 = vor.u32 %v4963_v49, %v3399_v48  ;;  %2155 = vmatpush.bf16.msra.mxu2 %v3672_v47 }
  0x39   :  { %v3655_v53 = vld [vmem:[#allocation3 + $0x260] sm:$0xf]  ;;  %v5027_v54 = vld [vmem:[#allocation3 + $0x26c] sm:$0xf0]  ;;  %v3528_v58 = vor.u32 %v4995_v52, %v3527_v50  ;;  %2168 = vmatpush.bf16.msra.mxu3 %v3800_v51 }
  0x3a   :  { %v3783_v55 = vld [vmem:[#allocation3 + $0x360] sm:$0xf]  ;;  %v5059_v56 = vld [vmem:[#allocation3 + $0x36c] sm:$0xf0]  ;;  %v3656_v59 = vor.u32 %v5027_v54, %v3655_v53  ;;  %2130 = vmatpush.bf16.msra.mxu0 %v3400_v57 }
  0x3b   :  { %v3383_v60 = vld [vmem:[#allocation3 + $0x40] sm:$0xf]  ;;  %v4959_v61 = vld [vmem:[#allocation3 + $0x4c] sm:$0xf0]  ;;  %v3784_v63 = vor.u32 %v5059_v56, %v3783_v55  ;;  %2143 = vmatpush.bf16.msra.mxu1 %v3528_v58 }
  0x3c   :  { %v3511_v62 = vld [vmem:[#allocation3 + $0x140] sm:$0xf]  ;;  %v4991_v0 = vld [vmem:[#allocation3 + $0x14c] sm:$0xf0]  ;;  %v3384_v5 = vor.u32 %v4959_v61, %v3383_v60  ;;  %2156 = vmatpush.bf16.msra.mxu2 %v3656_v59 }
  0x3d   :  { %v3639_v1 = vld [vmem:[#allocation3 + $0x240] sm:$0xf]  ;;  %v5023_v2 = vld [vmem:[#allocation3 + $0x24c] sm:$0xf0]  ;;  %v3512_v6 = vor.u32 %v4991_v0, %v3511_v62  ;;  %2169 = vmatpush.bf16.msra.mxu3 %v3784_v63 }
  0x3e   :  { %v3767_v3 = vld [vmem:[#allocation3 + $0x340] sm:$0xf]  ;;  %v5055_v4 = vld [vmem:[#allocation3 + $0x34c] sm:$0xf0]  ;;  %v3640_v7 = vor.u32 %v5023_v2, %v3639_v1  ;;  %2131 = vmatpush.bf16.msra.mxu0 %v3384_v5 }
  0x3f   :  { %v3367_v8 = vld [vmem:[#allocation3 + $0x20] sm:$0xf]  ;;  %v4955_v9 = vld [vmem:[#allocation3 + $0x2c] sm:$0xf0]  ;;  %v3768_v11 = vor.u32 %v5055_v4, %v3767_v3  ;;  %2144 = vmatpush.bf16.msra.mxu1 %v3512_v6  ;;  %v155_v3 = vld [vmem:[%s5820_s0] sm:$0xff] }
  0x40   :  { %v3495_v10 = vld [vmem:[#allocation3 + $0x120] sm:$0xf]  ;;  %v4987_v12 = vld [vmem:[#allocation3 + $0x12c] sm:$0xf0]  ;;  %v3368_v17 = vor.u32 %v4955_v9, %v3367_v8  ;;  %2157 = vmatpush.bf16.msra.mxu2 %v3640_v7  ;;  %503 = vst [vmem:[#allocation1] ss:$9 sm:$0xff] %v155_v3 }
  0x41   :  { %v3623_v13 = vld [vmem:[#allocation3 + $0x220] sm:$0xf]  ;;  %v5019_v14 = vld [vmem:[#allocation3 + $0x22c] sm:$0xf0]  ;;  %v3496_v20 = vor.u32 %v4987_v12, %v3495_v10  ;;  %2170 = vmatpush.bf16.msra.mxu3 %v3768_v11 }
  0x42   :  { %v3751_v15 = vld [vmem:[#allocation3 + $0x320] sm:$0xf]  ;;  %v5051_v16 = vld [vmem:[#allocation3 + $0x32c] sm:$0xf0]  ;;  %v3624_v21 = vor.u32 %v5019_v14, %v3623_v13  ;;  %2132 = vmatpush.bf16.msra.mxu0 %v3368_v17 }
  0x43   :  { %v3351_v18 = vld [vmem:[#allocation3] sm:$0xf]  ;;  %v4951_v19 = vld [vmem:[#allocation3 + $0xc] sm:$0xf0]  ;;  %v3752_v25 = vor.u32 %v5051_v16, %v3751_v15  ;;  %2145 = vmatpush.bf16.msra.mxu1 %v3496_v20 }
  0x44   :  { %v3479_v22 = vld [vmem:[#allocation3 + $0x100] sm:$0xf]  ;;  %v4983_v23 = vld [vmem:[#allocation3 + $0x10c] sm:$0xf0]  ;;  %v3352_v32 = vor.u32 %v4951_v19, %v3351_v18  ;;  %2158 = vmatpush.bf16.msra.mxu2 %v3624_v21 }
  0x45   :  { %v3607_v24 = vld [vmem:[#allocation3 + $0x200] sm:$0xf]  ;;  %v5015_v26 = vld [vmem:[#allocation3 + $0x20c] sm:$0xf0]  ;;  %v3480_v36 = vor.u32 %v4983_v23, %v3479_v22  ;;  %2171 = vmatpush.bf16.msra.mxu3 %v3752_v25 }
  0x46   :  { %v3735_v27 = vld [vmem:[#allocation3 + $0x300] sm:$0xf]  ;;  %v5047_v28 = vld [vmem:[#allocation3 + $0x30c] sm:$0xf0]  ;;  %v3608_v37 = vor.u32 %v5015_v26, %v3607_v24  ;;  %2133 = vmatpush.bf16.msra.mxu0 %v3352_v32 }
  0x47   :  { %v3975_v29 = vld [vmem:[#allocation3 + $0x4e0] sm:$0xf]  ;;  %v5107_v30 = vld [vmem:[#allocation3 + $0x4ec] sm:$0xf0]  ;;  %v3736_v40 = vor.u32 %v5047_v28, %v3735_v27  ;;  %2146 = vmatpush.bf16.msra.mxu1 %v3480_v36 }
  0x48   :  { %v4103_v31 = vld [vmem:[#allocation3 + $0x5e0] sm:$0xf]  ;;  %v5139_v33 = vld [vmem:[#allocation3 + $0x5ec] sm:$0xf0]  ;;  %v3976_v41 = vor.u32 %v5107_v30, %v3975_v29  ;;  %2159 = vmatpush.bf16.msra.mxu2 %v3608_v37  ;;  %v5678_v29 = vld [vmem:[#allocation1] sm:$0xff] }
  0x49   :  { %v4231_v34 = vld [vmem:[#allocation3 + $0x6e0] sm:$0xf]  ;;  %v5171_v35 = vld [vmem:[#allocation3 + $0x6ec] sm:$0xf0]  ;;  %v4104_v42 = vor.u32 %v5139_v33, %v4103_v31  ;;  %2172 = vmatpush.bf16.msra.mxu3 %v3736_v40  ;;  %2134 = vmatmul.bf16.vlgmr.msra.gmra.mxu0 %v5678_v29 }
  0x4a   :  { %v4359_v38 = vld [vmem:[#allocation3 + $0x7e0] sm:$0xf]  ;;  %v5203_v39 = vld [vmem:[#allocation3 + $0x7ec] sm:$0xf0]  ;;  %v4232_v43 = vor.u32 %v5171_v35, %v4231_v34  ;;  %2178 = vmatpush.bf16.msrb.mxu0 %v3976_v41 }
  0x4b   :  { %v3959_v44 = vld [vmem:[#allocation3 + $0x4c0] sm:$0xf]  ;;  %v5103_v45 = vld [vmem:[#allocation3 + $0x4cc] sm:$0xf0]  ;;  %v4360_v47 = vor.u32 %v5203_v39, %v4359_v38  ;;  %2191 = vmatpush.bf16.msrb.mxu1 %v4104_v42 }
  0x4c   :  { %v4087_v46 = vld [vmem:[#allocation3 + $0x5c0] sm:$0xf]  ;;  %v5135_v48 = vld [vmem:[#allocation3 + $0x5cc] sm:$0xf0]  ;;  %v3960_v53 = vor.u32 %v5103_v45, %v3959_v44  ;;  %2204 = vmatpush.bf16.msrb.mxu2 %v4232_v43 }
  0x4d   :  { %v4215_v49 = vld [vmem:[#allocation3 + $0x6c0] sm:$0xf]  ;;  %v5167_v50 = vld [vmem:[#allocation3 + $0x6cc] sm:$0xf0]  ;;  %v4088_v54 = vor.u32 %v5135_v48, %v4087_v46  ;;  %2217 = vmatpush.bf16.msrb.mxu3 %v4360_v47 }
  0x4e   :  { %v4343_v51 = vld [vmem:[#allocation3 + $0x7c0] sm:$0xf]  ;;  %v5199_v52 = vld [vmem:[#allocation3 + $0x7cc] sm:$0xf0]  ;;  %v4216_v55 = vor.u32 %v5167_v50, %v4215_v49  ;;  %2179 = vmatpush.bf16.msrb.mxu0 %v3960_v53 }
  0x4f   :  { %v3943_v56 = vld [vmem:[#allocation3 + $0x4a0] sm:$0xf]  ;;  %v5099_v57 = vld [vmem:[#allocation3 + $0x4ac] sm:$0xf0]  ;;  %v4344_v59 = vor.u32 %v5199_v52, %v4343_v51  ;;  %2192 = vmatpush.bf16.msrb.mxu1 %v4088_v54  ;;  %v5585_v52 = vmov 0  }
  0x50   :  { %v4071_v58 = vld [vmem:[#allocation3 + $0x5a0] sm:$0xf]  ;;  %v5131_v60 = vld [vmem:[#allocation3 + $0x5ac] sm:$0xf0]  ;;  %v3944_v1 = vor.u32 %v5099_v57, %v3943_v56  ;;  %2205 = vmatpush.bf16.msrb.mxu2 %v4216_v55  ;;  %5364 = vset.pattern.permute.xlu0 %v5585_v52 }
  0x51   :  { %v4199_v61 = vld [vmem:[#allocation3 + $0x6a0] sm:$0xf]  ;;  %v5163_v62 = vld [vmem:[#allocation3 + $0x6ac] sm:$0xf0]  ;;  %v4072_v4 = vor.u32 %v5131_v60, %v4071_v58  ;;  %2218 = vmatpush.bf16.msrb.mxu3 %v4344_v59  ;;  %v157_v58 = vld [vmem:[%s5821_s1] sm:$0x3] }
  0x52   :  { %v4327_v63 = vld [vmem:[#allocation3 + $0x7a0] sm:$0xf]  ;;  %v5195_v0 = vld [vmem:[#allocation3 + $0x7ac] sm:$0xf0]  ;;  %v4200_v5 = vor.u32 %v5163_v62, %v4199_v61  ;;  %2180 = vmatpush.bf16.msrb.mxu0 %v3944_v1  ;;  %482 = vperm.xlu0 %5364, %v157_v58   ;;  %v4997_v58 = vld [vmem:[#allocation3 + $0x184] sm:$0xf] }
  0x53   :  { %v3927_v2 = vld [vmem:[#allocation3 + $0x480] sm:$0xf]  ;;  %v5095_v6 = vld [vmem:[#allocation3 + $0x48c] sm:$0xf0]  ;;  %v4328_v8 = vor.u32 %v5195_v0, %v4327_v63  ;;  %2193 = vmatpush.bf16.msrb.mxu1 %v4072_v4 }
  0x54   :  { %v4055_v7 = vld [vmem:[#allocation3 + $0x580] sm:$0xf]  ;;  %v5127_v9 = vld [vmem:[#allocation3 + $0x58c] sm:$0xf0]  ;;  %v3928_v14 = vor.u32 %v5095_v6, %v3927_v2  ;;  %2206 = vmatpush.bf16.msrb.mxu2 %v4200_v5 }
  0x55   :  { %v4183_v10 = vld [vmem:[#allocation3 + $0x680] sm:$0xf]  ;;  %v5159_v11 = vld [vmem:[#allocation3 + $0x68c] sm:$0xf0]  ;;  %v4056_v15 = vor.u32 %v5127_v9, %v4055_v7  ;;  %2219 = vmatpush.bf16.msrb.mxu3 %v4328_v8  ;;  %v4977_v9 = vld [vmem:[#allocation3 + $0xe4] sm:$0xf] }
  0x56   :  { %v4311_v12 = vld [vmem:[#allocation3 + $0x780] sm:$0xf]  ;;  %v5191_v13 = vld [vmem:[#allocation3 + $0x78c] sm:$0xf0]  ;;  %v4184_v16 = vor.u32 %v5159_v11, %v4183_v10  ;;  %2181 = vmatpush.bf16.msrb.mxu0 %v3928_v14  ;;  %v3465_v10 = vld [vmem:[#allocation3 + $0xf0] sm:$0xf0] }
  0x57   :  { %v3911_v17 = vld [vmem:[#allocation3 + $0x460] sm:$0xf]  ;;  %v5091_v18 = vld [vmem:[#allocation3 + $0x46c] sm:$0xf0]  ;;  %v4312_v20 = vor.u32 %v5191_v13, %v4311_v12  ;;  %2194 = vmatpush.bf16.msrb.mxu1 %v4056_v15  ;;  %v5009_v13 = vld [vmem:[#allocation3 + $0x1e4] sm:$0xf] }
  0x58   :  { %v4039_v19 = vld [vmem:[#allocation3 + $0x560] sm:$0xf]  ;;  %v5123_v21 = vld [vmem:[#allocation3 + $0x56c] sm:$0xf0]  ;;  %v3912_v27 = vor.u32 %v5091_v18, %v3911_v17  ;;  %2207 = vmatpush.bf16.msrb.mxu2 %v4184_v16  ;;  %v3593_v14 = vld [vmem:[#allocation3 + $0x1f0] sm:$0xf0]  ;;  %v3468_v18 = vor.u32 %v4977_v9, %v3465_v10 }
  0x59   :  { %v4167_v22 = vld [vmem:[#allocation3 + $0x660] sm:$0xf]  ;;  %v5155_v23 = vld [vmem:[#allocation3 + $0x66c] sm:$0xf0]  ;;  %v4040_v31 = vor.u32 %v5123_v21, %v4039_v19  ;;  %2220 = vmatpush.bf16.msrb.mxu3 %v4312_v20 }
  0x5a   :  { %v4295_v24 = vld [vmem:[#allocation3 + $0x760] sm:$0xf]  ;;  %v5187_v25 = vld [vmem:[#allocation3 + $0x76c] sm:$0xf0]  ;;  %v4168_v32 = vor.u32 %v5155_v23, %v4167_v22  ;;  %2182 = vmatpush.bf16.msrb.mxu0 %v3912_v27  ;;  %v3596_v22 = vor.u32 %v5009_v13, %v3593_v14  ;;  %v3577_v27 = vld [vmem:[#allocation3 + $0x1d0] sm:$0xf0] }
  0x5b   :  { %v3895_v26 = vld [vmem:[#allocation3 + $0x440] sm:$0xf]  ;;  %v5676_v28 = vld [vmem:[#allocation1 + $0x12] sm:$0xff]  ;;  %v5680_v30 = vld [vmem:[#allocation1 + $0x1b] sm:$0xff]  ;;  %v4296_v36 = vor.u32 %v5187_v25, %v4295_v24  ;;  %2195 = vmatpush.bf16.msrb.mxu1 %v4040_v31 }
  0x5c   :  { %v5087_v33 = vld [vmem:[#allocation3 + $0x44c] sm:$0xf0]  ;;  %v4023_v34 = vld [vmem:[#allocation3 + $0x540] sm:$0xf]  ;;  %2160 = vmatmul.bf16.vlgmr.msra.gmra.mxu2 %v5676_v28  ;;  %2173 = vmatmul.bf16.vlgmr.msra.gmra.mxu3 %v5680_v30  ;;  %v4973_v24 = vld [vmem:[#allocation3 + $0xc4] sm:$0xf] }
  0x5d   :  { %v5682_v35 = vld [vmem:[#allocation1 + $0x9] sm:$0xff]  ;;  %v5119_v37 = vld [vmem:[#allocation3 + $0x54c] sm:$0xf0]  ;;  %v3896_v42 = vor.u32 %v5087_v33, %v3895_v26  ;;  %2208 = vmatpush.bf16.msrb.mxu2 %v4168_v32  ;;  %2221 = vmatpush.bf16.msrb.mxu3 %v4296_v36  ;;  %v3449_v25 = vld [vmem:[#allocation3 + $0xd0] sm:$0xf0] }
  0x5e   :  { %v4151_v38 = vld [vmem:[#allocation3 + $0x640] sm:$0xf]  ;;  %v5151_v39 = vld [vmem:[#allocation3 + $0x64c] sm:$0xf0]  ;;  %2147 = vmatmul.bf16.vlgmr.msra.gmra.mxu1 %v5682_v35  ;;  %v4024_v43 = vor.u32 %v5119_v37, %v4023_v34  ;;  %v5005_v26 = vld [vmem:[#allocation3 + $0x1c4] sm:$0xf] }
  0x5f   :  { %v4279_v40 = vld [vmem:[#allocation3 + $0x740] sm:$0xf]  ;;  %v5183_v41 = vld [vmem:[#allocation3 + $0x74c] sm:$0xf0]  ;;  %v4152_v44 = vor.u32 %v5151_v39, %v4151_v38  ;;  %2183 = vmatpush.bf16.msrb.mxu0 %v3896_v42  ;;  %v5695_v36 = vld [vmem:[#allocation1 + $0x3f] sm:$0xff]  ;;  %v3452_v38 = vor.u32 %v4973_v24, %v3449_v25  ;;  %v3580_v42 = vor.u32 %v5005_v26, %v3577_v27 }
  0x60   :  { %v3879_v45 = vld [vmem:[#allocation3 + $0x420] sm:$0xf]  ;;  %v5083_v46 = vld [vmem:[#allocation3 + $0x42c] sm:$0xf0]  ;;  %v4280_v48 = vor.u32 %v5183_v41, %v4279_v40  ;;  %2196 = vmatpush.bf16.msrb.mxu1 %v4024_v43  ;;  %v5697_v41 = vld [vmem:[#allocation1 + $0x2d] sm:$0xff] }
  0x61   :  { %v4007_v47 = vld [vmem:[#allocation3 + $0x520] sm:$0xf]  ;;  %v5115_v49 = vld [vmem:[#allocation3 + $0x52c] sm:$0xf0]  ;;  %v3880_v55 = vor.u32 %v5083_v46, %v3879_v45  ;;  %2209 = vmatpush.bf16.msrb.mxu2 %v4152_v44  ;;  %v4969_v44 = vld [vmem:[#allocation3 + $0xa4] sm:$0xf] }
  0x62   :  { %v4135_v50 = vld [vmem:[#allocation3 + $0x620] sm:$0xf]  ;;  %v5147_v51 = vld [vmem:[#allocation3 + $0x62c] sm:$0xf0]  ;;  %v4008_v59 = vor.u32 %v5115_v49, %v4007_v47  ;;  %2222 = vmatpush.bf16.msrb.mxu3 %v4280_v48  ;;  %v3433_v45 = vld [vmem:[#allocation3 + $0xb0] sm:$0xf0] }
  0x63   :  { %v4263_v53 = vld [vmem:[#allocation3 + $0x720] sm:$0xf]  ;;  %v5179_v54 = vld [vmem:[#allocation3 + $0x72c] sm:$0xf0]  ;;  %v4136_v60 = vor.u32 %v5147_v51, %v4135_v50  ;;  %2184 = vmatpush.bf16.msrb.mxu0 %v3880_v55  ;;  %v5001_v46 = vld [vmem:[#allocation3 + $0x1a4] sm:$0xf]  ;;  %v3436_v50 = vor.u32 %v4969_v44, %v3433_v45 }
  0x64   :  { %v3863_v56 = vld [vmem:[#allocation3 + $0x400] sm:$0xf]  ;;  %v5079_v57 = vld [vmem:[#allocation3 + $0x40c] sm:$0xf0]  ;;  %v4264_v0 = vor.u32 %v5179_v54, %v4263_v53  ;;  %2197 = vmatpush.bf16.msrb.mxu1 %v4008_v59  ;;  %v3561_v47 = vld [vmem:[#allocation3 + $0x1b0] sm:$0xf0] }
  0x65   :  { %v3991_v61 = vld [vmem:[#allocation3 + $0x500] sm:$0xf]  ;;  %v5111_v62 = vld [vmem:[#allocation3 + $0x50c] sm:$0xf0]  ;;  %v3864_v7 = vor.u32 %v5079_v57, %v3863_v56  ;;  %2210 = vmatpush.bf16.msrb.mxu2 %v4136_v60  ;;  %v3564_v54 = vor.u32 %v5001_v46, %v3561_v47  ;;  %v4965_v56 = vld [vmem:[#allocation3 + $0x84] sm:$0xf] }
  0x66   :  { %v4119_v63 = vld [vmem:[#allocation3 + $0x600] sm:$0xf]  ;;  %v5143_v1 = vld [vmem:[#allocation3 + $0x60c] sm:$0xf0]  ;;  %v3992_v11 = vor.u32 %v5111_v62, %v3991_v61  ;;  %2223 = vmatpush.bf16.msrb.mxu3 %v4264_v0  ;;  %v3417_v57 = vld [vmem:[#allocation3 + $0x90] sm:$0xf0] }
  0x67   :  { %v4247_v2 = vld [vmem:[#allocation3 + $0x700] sm:$0xf]  ;;  %v5175_v3 = vld [vmem:[#allocation3 + $0x70c] sm:$0xf0]  ;;  %v4120_v12 = vor.u32 %v5143_v1, %v4119_v63  ;;  %2185 = vmatpush.bf16.msrb.mxu0 %v3864_v7  ;;  %v3545_v59 = vld [vmem:[#allocation3 + $0x190] sm:$0xf0]  ;;  %v3420_v63 = vor.u32 %v4965_v56, %v3417_v57 }
  0x68   :  { %v4487_v4 = vld [vmem:[#allocation3 + $0x8e0] sm:$0xf]  ;;  %v5235_v5 = vld [vmem:[#allocation3 + $0x8ec] sm:$0xf0]  ;;  %v4248_v15 = vor.u32 %v5175_v3, %v4247_v2  ;;  %2198 = vmatpush.bf16.msrb.mxu1 %v3992_v11  ;;  %v3548_v3 = vor.u32 %v4997_v58, %v3545_v59  ;;  %v4993_v7 = vld [vmem:[#allocation3 + $0x164] sm:$0xf] }
  0x69   :  { %v4615_v6 = vld [vmem:[#allocation3 + $0x9e0] sm:$0xf]  ;;  %v5267_v8 = vld [vmem:[#allocation3 + $0x9ec] sm:$0xf0]  ;;  %v4488_v16 = vor.u32 %v5235_v5, %v4487_v4  ;;  %2211 = vmatpush.bf16.msrb.mxu2 %v4120_v12  ;;  %v4961_v5 = vld [vmem:[#allocation3 + $0x64] sm:$0xf] }
  0x6a   :  { %v4616_v17 = vor.u32 %v5267_v8, %v4615_v6  ;;  %v4471_v19 = vld [vmem:[#allocation3 + $0x8c0] sm:$0xf]  ;;  %v5231_v20 = vld [vmem:[#allocation3 + $0x8cc] sm:$0xf0]  ;;  %2224 = vmatpush.bf16.msrb.mxu3 %v4248_v15  ;;  %v3401_v6 = vld [vmem:[#allocation3 + $0x70] sm:$0xf0] }
  0x6b   :  { %v4599_v21 = vld [vmem:[#allocation3 + $0x9c0] sm:$0xf]  ;;  %v5263_v23 = vld [vmem:[#allocation3 + $0x9cc] sm:$0xf0]  ;;  %2230 = vmatpush.bf16.msra.mxu0 %v4488_v16  ;;  %v4472_v32 = vor.u32 %v5231_v20, %v4471_v19  ;;  %v3529_v8 = vld [vmem:[#allocation3 + $0x170] sm:$0xf0]  ;;  %v3404_v11 = vor.u32 %v4961_v5, %v3401_v6 }
  0x6c   :  { %v5691_v31 = vld [vmem:[#allocation1 + $0x36] sm:$0xff]  ;;  %v4455_v33 = vld [vmem:[#allocation3 + $0x8a0] sm:$0xf]  ;;  %2243 = vmatpush.bf16.msra.mxu1 %v4616_v17  ;;  %v4600_v37 = vor.u32 %v5263_v23, %v4599_v21  ;;  %v3532_v15 = vor.u32 %v4993_v7, %v3529_v8  ;;  %v4957_v17 = vld [vmem:[#allocation3 + $0x44] sm:$0xf] }
  0x6d   :  { %v5693_v34 = vld [vmem:[#allocation1 + $0x24] sm:$0xff]  ;;  %2256 = vmatpush.bf16.msra.mxu2 %v3468_v18  ;;  %v5227_v39 = vld [vmem:[#allocation3 + $0x8ac] sm:$0xf0]  ;;  %2225 = vmatmul.bf16.vlgmr.msrb.gmra.mxu3 %v5695_v36  ;;  %v3385_v18 = vld [vmem:[#allocation3 + $0x50] sm:$0xf0] }
  0x6e   :  { %v4583_v40 = vld [vmem:[#allocation3 + $0x9a0] sm:$0xf]  ;;  %2269 = vmatpush.bf16.msra.mxu3 %v3596_v22  ;;  %2212 = vmatmul.bf16.vlgmr.msrb.gmra.mxu2 %v5691_v31  ;;  %v5259_v43 = vld [vmem:[#allocation3 + $0x9ac] sm:$0xf0]  ;;  %v4456_v48 = vor.u32 %v5227_v39, %v4455_v33  ;;  %v4989_v19 = vld [vmem:[#allocation3 + $0x144] sm:$0xf]  ;;  %v3388_v23 = vor.u32 %v4957_v17, %v3385_v18 }
  0x6f   :  { %2186 = vmatmul.bf16.vlgmr.msrb.gmra.mxu0 %v5693_v34  ;;  %2199 = vmatmul.bf16.vlgmr.msrb.gmra.mxu1 %v5697_v41  ;;  %v4584_v49 = vor.u32 %v5259_v43, %v4583_v40  ;;  %v4439_v51 = vld [vmem:[#allocation3 + $0x880] sm:$0xf]  ;;  %v5223_v52 = vld [vmem:[#allocation3 + $0x88c] sm:$0xf0]  ;;  %v3513_v20 = vld [vmem:[#allocation3 + $0x150] sm:$0xf0] }
  0x70   :  { %2231 = vmatpush.bf16.msra.mxu0 %v4472_v32  ;;  %2244 = vmatpush.bf16.msra.mxu1 %v4600_v37  ;;  %v4567_v53 = vld [vmem:[#allocation3 + $0x980] sm:$0xf]  ;;  %v5255_v55 = vld [vmem:[#allocation3 + $0x98c] sm:$0xf0]  ;;  %v4440_v61 = vor.u32 %v5223_v52, %v4439_v51  ;;  %v3516_v27 = vor.u32 %v4989_v19, %v3513_v20  ;;  %v4953_v33 = vld [vmem:[#allocation3 + $0x24] sm:$0xf] }
  0x71   :  { %2257 = vmatpush.bf16.msra.mxu2 %v3452_v38  ;;  %v156_v60 = vld [vmem:[%s5820_s0 + $0x8] sm:$0x3]  ;;  %v4568_v62 = vor.u32 %v5255_v55, %v4567_v53  ;;  %v5219_v1 = vld [vmem:[#allocation3 + $0x86c] sm:$0xf0]  ;;  %v3369_v37 = vld [vmem:[#allocation3 + $0x30] sm:$0xf0] }
  0x72   :  { %2270 = vmatpush.bf16.msra.mxu3 %v3580_v42  ;;  %513 = vst [vmem:[#allocation1] ss:$9 sm:$0xff] %v156_v60  ;;  %v4423_v0 = vld [vmem:[#allocation3 + $0x860] sm:$0xf]  ;;  %v5251_v4 = vld [vmem:[#allocation3 + $0x96c] sm:$0xf0]  ;;  %v3372_v45 = vor.u32 %v4953_v33, %v3369_v37 }
  0x73   :  { %v4551_v2 = vld [vmem:[#allocation3 + $0x960] sm:$0xf]  ;;  %v4424_v9 = vor.u32 %v5219_v1, %v4423_v0  ;;  %v5215_v13 = vld [vmem:[#allocation3 + $0x84c] sm:$0xf0]  ;;  %v4985_v38 = vld [vmem:[#allocation3 + $0x124] sm:$0xf] }
  0x74   :  { %2232 = vmatpush.bf16.msra.mxu0 %v4456_v48  ;;  %2245 = vmatpush.bf16.msra.mxu1 %v4584_v49  ;;  %v4552_v10 = vor.u32 %v5251_v4, %v4551_v2  ;;  %v4407_v12 = vld [vmem:[#allocation3 + $0x840] sm:$0xf]  ;;  %v5247_v16 = vld [vmem:[#allocation3 + $0x94c] sm:$0xf0]  ;;  %v3497_v39 = vld [vmem:[#allocation3 + $0x130] sm:$0xf0] }
  0x75   :  { %2258 = vmatpush.bf16.msra.mxu2 %v3436_v50  ;;  %v4535_v14 = vld [vmem:[#allocation3 + $0x940] sm:$0xf]  ;;  %v4408_v21 = vor.u32 %v5215_v13, %v4407_v12  ;;  %v5211_v25 = vld [vmem:[#allocation3 + $0x82c] sm:$0xf0]  ;;  %v4949_v48 = vld [vmem:[#allocation3 + $0x4] sm:$0xf]  ;;  %v3500_v49 = vor.u32 %v4985_v38, %v3497_v39 }
  0x76   :  { %2271 = vmatpush.bf16.msra.mxu3 %v3564_v54  ;;  %v4536_v22 = vor.u32 %v5247_v16, %v4535_v14  ;;  %v4391_v24 = vld [vmem:[#allocation3 + $0x820] sm:$0xf]  ;;  %v5243_v32 = vld [vmem:[#allocation3 + $0x92c] sm:$0xf0]  ;;  %v3353_v50 = vld [vmem:[#allocation3 + $0x10] sm:$0xf0] }
  0x77   :  { %v4519_v26 = vld [vmem:[#allocation3 + $0x920] sm:$0xf]  ;;  %v4392_v40 = vor.u32 %v5211_v25, %v4391_v24  ;;  %v5207_v43 = vld [vmem:[#allocation3 + $0x80c] sm:$0xf0]  ;;  %v4981_v51 = vld [vmem:[#allocation3 + $0x104] sm:$0xf] }
  0x78   :  { %2233 = vmatpush.bf16.msra.mxu0 %v4440_v61  ;;  %2246 = vmatpush.bf16.msra.mxu1 %v4568_v62  ;;  %v4375_v42 = vld [vmem:[#allocation3 + $0x800] sm:$0xf]  ;;  %v4520_v44 = vor.u32 %v5243_v32, %v4519_v26  ;;  %v5239_v47 = vld [vmem:[#allocation3 + $0x90c] sm:$0xf0]  ;;  %v3481_v52 = vld [vmem:[#allocation3 + $0x110] sm:$0xf0]  ;;  %v3356_v61 = vor.u32 %v4949_v48, %v3353_v50 }
  0x79   :  { %2259 = vmatpush.bf16.msra.mxu2 %v3420_v63  ;;  %v4503_v46 = vld [vmem:[#allocation3 + $0x900] sm:$0xf]  ;;  %v5041_v53 = vld [vmem:[#allocation3 + $0x2e4] sm:$0xf]  ;;  %v3721_v54 = vld [vmem:[#allocation3 + $0x2f0] sm:$0xf0]  ;;  %v4376_v56 = vor.u32 %v5207_v43, %v4375_v42  ;;  %v3484_v0 = vor.u32 %v4981_v51, %v3481_v52 }
  0x7a   :  { %2272 = vmatpush.bf16.msra.mxu3 %v3548_v3  ;;  %v5073_v55 = vld [vmem:[#allocation3 + $0x3e4] sm:$0xf]  ;;  %v3849_v57 = vld [vmem:[#allocation3 + $0x3f0] sm:$0xf0]  ;;  %v4504_v60 = vor.u32 %v5239_v47, %v4503_v46  ;;  %v3724_v1 = vor.u32 %v5041_v53, %v3721_v54 }
  0x7b   :  { %v5105_v58 = vld [vmem:[#allocation3 + $0x4e4] sm:$0xf]  ;;  %v3977_v59 = vld [vmem:[#allocation3 + $0x4f0] sm:$0xf0]  ;;  %v3852_v2 = vor.u32 %v5073_v55, %v3849_v57 }
  0x7c   :  { %2234 = vmatpush.bf16.msra.mxu0 %v4424_v9  ;;  %2247 = vmatpush.bf16.msra.mxu1 %v4552_v10  ;;  %v5137_v62 = vld [vmem:[#allocation3 + $0x5e4] sm:$0xf]  ;;  %v4105_v63 = vld [vmem:[#allocation3 + $0x5f0] sm:$0xf0]  ;;  %v3980_v3 = vor.u32 %v5105_v58, %v3977_v59 }
  0x7d   :  { %2260 = vmatpush.bf16.msra.mxu2 %v3404_v11  ;;  %v5037_v4 = vld [vmem:[#allocation3 + $0x2c4] sm:$0xf]  ;;  %v3705_v5 = vld [vmem:[#allocation3 + $0x2d0] sm:$0xf0]  ;;  %v4108_v7 = vor.u32 %v5137_v62, %v4105_v63 }
  0x7e   :  { %2273 = vmatpush.bf16.msra.mxu3 %v3532_v15  ;;  %v5069_v6 = vld [vmem:[#allocation3 + $0x3c4] sm:$0xf]  ;;  %v3833_v8 = vld [vmem:[#allocation3 + $0x3d0] sm:$0xf0]  ;;  %v3708_v15 = vor.u32 %v5037_v4, %v3705_v5 }
  0x7f   :  { %v5101_v9 = vld [vmem:[#allocation3 + $0x4c4] sm:$0xf]  ;;  %v3961_v10 = vld [vmem:[#allocation3 + $0x4d0] sm:$0xf0]  ;;  %v3836_v16 = vor.u32 %v5069_v6, %v3833_v8 }
  0x80   :  { %2235 = vmatpush.bf16.msra.mxu0 %v4408_v21  ;;  %2248 = vmatpush.bf16.msra.mxu1 %v4536_v22  ;;  %v5706_v11 = vld [vmem:[#allocation1] sm:$0xff]  ;;  %v5133_v12 = vld [vmem:[#allocation3 + $0x5c4] sm:$0xf]  ;;  %v3964_v17 = vor.u32 %v5101_v9, %v3961_v10 }
  0x81   :  { %2261 = vmatpush.bf16.msra.mxu2 %v3388_v23  ;;  %v4089_v13 = vld [vmem:[#allocation3 + $0x5d0] sm:$0xf0]  ;;  %v5708_v14 = vld [vmem:[#allocation1 + $0x9] sm:$0xff] }
  0x82   :  { %2274 = vmatpush.bf16.msra.mxu3 %v3516_v27  ;;  %v5033_v18 = vld [vmem:[#allocation3 + $0x2a4] sm:$0xf]  ;;  %v3689_v19 = vld [vmem:[#allocation3 + $0x2b0] sm:$0xf0]  ;;  %v4092_v21 = vor.u32 %v5133_v12, %v4089_v13 }
  0x83   :  { %v5065_v20 = vld [vmem:[#allocation3 + $0x3a4] sm:$0xf]  ;;  %v3817_v22 = vld [vmem:[#allocation3 + $0x3b0] sm:$0xf0]  ;;  %v3692_v27 = vor.u32 %v5033_v18, %v3689_v19 }
  0x84   :  { %2236 = vmatpush.bf16.msra.mxu0 %v4392_v40  ;;  %2249 = vmatpush.bf16.msra.mxu1 %v4520_v44  ;;  %v5097_v23 = vld [vmem:[#allocation3 + $0x4a4] sm:$0xf]  ;;  %v3945_v24 = vld [vmem:[#allocation3 + $0x4b0] sm:$0xf0]  ;;  %v3820_v32 = vor.u32 %v5065_v20, %v3817_v22 }
  0x85   :  { %2262 = vmatpush.bf16.msra.mxu2 %v3372_v45  ;;  %v5129_v25 = vld [vmem:[#allocation3 + $0x5a4] sm:$0xf]  ;;  %v4073_v26 = vld [vmem:[#allocation3 + $0x5b0] sm:$0xf0]  ;;  %v3948_v33 = vor.u32 %v5097_v23, %v3945_v24 }
  0x86   :  { %2275 = vmatpush.bf16.msra.mxu3 %v3500_v49  ;;  %v5029_v37 = vld [vmem:[#allocation3 + $0x284] sm:$0xf]  ;;  %v3673_v38 = vld [vmem:[#allocation3 + $0x290] sm:$0xf0]  ;;  %v4076_v40 = vor.u32 %v5129_v25, %v4073_v26 }
  0x87   :  { %v5061_v39 = vld [vmem:[#allocation3 + $0x384] sm:$0xf]  ;;  %v3801_v42 = vld [vmem:[#allocation3 + $0x390] sm:$0xf0]  ;;  %v3676_v47 = vor.u32 %v5029_v37, %v3673_v38 }
  0x88   :  { %2237 = vmatpush.bf16.msra.mxu0 %v4376_v56  ;;  %2250 = vmatpush.bf16.msra.mxu1 %v4504_v60  ;;  %v5093_v43 = vld [vmem:[#allocation3 + $0x484] sm:$0xf]  ;;  %v3929_v44 = vld [vmem:[#allocation3 + $0x490] sm:$0xf0]  ;;  %v3804_v48 = vor.u32 %v5061_v39, %v3801_v42 }
  0x89   :  { %2263 = vmatpush.bf16.msra.mxu2 %v3356_v61  ;;  %v5125_v45 = vld [vmem:[#allocation3 + $0x584] sm:$0xf]  ;;  %v4057_v46 = vld [vmem:[#allocation3 + $0x590] sm:$0xf0]  ;;  %v3932_v49 = vor.u32 %v5093_v43, %v3929_v44 }
  0x8a   :  { %2276 = vmatpush.bf16.msra.mxu3 %v3484_v0  ;;  %v5025_v50 = vld [vmem:[#allocation3 + $0x264] sm:$0xf]  ;;  %v3657_v51 = vld [vmem:[#allocation3 + $0x270] sm:$0xf0]  ;;  %v4060_v53 = vor.u32 %v5125_v45, %v4057_v46 }
  0x8b   :  { %2238 = vmatmul.bf16.vlgmr.msra.gmra.mxu0 %v5706_v11  ;;  %2251 = vmatmul.bf16.vlgmr.msra.gmra.mxu1 %v5708_v14  ;;  %v5057_v52 = vld [vmem:[#allocation3 + $0x364] sm:$0xf]  ;;  %v3785_v54 = vld [vmem:[#allocation3 + $0x370] sm:$0xf0]  ;;  %v3660_v59 = vor.u32 %v5025_v50, %v3657_v51 }
  0x8c   :  { %2282 = vmatpush.bf16.msrb.mxu0 %v3724_v1  ;;  %2295 = vmatpush.bf16.msrb.mxu1 %v3852_v2  ;;  %v5089_v55 = vld [vmem:[#allocation3 + $0x464] sm:$0xf]  ;;  %v3913_v56 = vld [vmem:[#allocation3 + $0x470] sm:$0xf0]  ;;  %v3788_v60 = vor.u32 %v5057_v52, %v3785_v54 }
  0x8d   :  { %2308 = vmatpush.bf16.msrb.mxu2 %v3980_v3  ;;  %2277 = vmatmul.bf16.vlgmr.msra.gmra.mxu3 %v5682_v35  ;;  %v5121_v57 = vld [vmem:[#allocation3 + $0x564] sm:$0xf]  ;;  %v4041_v58 = vld [vmem:[#allocation3 + $0x570] sm:$0xf0]  ;;  %v3916_v61 = vor.u32 %v5089_v55, %v3913_v56 }
  0x8e   :  { %2321 = vmatpush.bf16.msrb.mxu3 %v4108_v7  ;;  %2264 = vmatmul.bf16.vlgmr.msra.gmra.mxu2 %v5678_v29  ;;  %v5021_v62 = vld [vmem:[#allocation3 + $0x244] sm:$0xf]  ;;  %v3641_v63 = vld [vmem:[#allocation3 + $0x250] sm:$0xf0]  ;;  %v4044_v1 = vor.u32 %v5121_v57, %v4041_v58 }
  0x8f   :  { %v5053_v0 = vld [vmem:[#allocation3 + $0x344] sm:$0xf]  ;;  %v3769_v2 = vld [vmem:[#allocation3 + $0x350] sm:$0xf0]  ;;  %v3644_v7 = vor.u32 %v5021_v62, %v3641_v63 }
  0x90   :  { %2283 = vmatpush.bf16.msrb.mxu0 %v3708_v15  ;;  %2296 = vmatpush.bf16.msrb.mxu1 %v3836_v16  ;;  %v5085_v3 = vld [vmem:[#allocation3 + $0x444] sm:$0xf]  ;;  %v3897_v4 = vld [vmem:[#allocation3 + $0x450] sm:$0xf0]  ;;  %v3772_v8 = vor.u32 %v5053_v0, %v3769_v2 }
  0x91   :  { %2309 = vmatpush.bf16.msrb.mxu2 %v3964_v17  ;;  %v5117_v5 = vld [vmem:[#allocation3 + $0x544] sm:$0xf]  ;;  %v4025_v6 = vld [vmem:[#allocation3 + $0x550] sm:$0xf0]  ;;  %v3900_v9 = vor.u32 %v5085_v3, %v3897_v4 }
  0x92   :  { %2322 = vmatpush.bf16.msrb.mxu3 %v4092_v21  ;;  %v5017_v10 = vld [vmem:[#allocation3 + $0x224] sm:$0xf]  ;;  %v3625_v12 = vld [vmem:[#allocation3 + $0x230] sm:$0xf0]  ;;  %v4028_v15 = vor.u32 %v5117_v5, %v4025_v6 }
  0x93   :  { %v5049_v13 = vld [vmem:[#allocation3 + $0x324] sm:$0xf]  ;;  %v3753_v16 = vld [vmem:[#allocation3 + $0x330] sm:$0xf0]  ;;  %v3628_v21 = vor.u32 %v5017_v10, %v3625_v12 }
  0x94   :  { %2284 = vmatpush.bf16.msrb.mxu0 %v3692_v27  ;;  %2297 = vmatpush.bf16.msrb.mxu1 %v3820_v32  ;;  %v5081_v17 = vld [vmem:[#allocation3 + $0x424] sm:$0xf]  ;;  %v3881_v18 = vld [vmem:[#allocation3 + $0x430] sm:$0xf0]  ;;  %v3756_v24 = vor.u32 %v5049_v13, %v3753_v16 }
  0x95   :  { %2310 = vmatpush.bf16.msrb.mxu2 %v3948_v33  ;;  %v5113_v19 = vld [vmem:[#allocation3 + $0x524] sm:$0xf]  ;;  %v4009_v20 = vld [vmem:[#allocation3 + $0x530] sm:$0xf0]  ;;  %v3884_v25 = vor.u32 %v5081_v17, %v3881_v18 }
  0x96   :  { %2323 = vmatpush.bf16.msrb.mxu3 %v4076_v40  ;;  %v5013_v22 = vld [vmem:[#allocation3 + $0x204] sm:$0xf]  ;;  %v3609_v23 = vld [vmem:[#allocation3 + $0x210] sm:$0xf0]  ;;  %v4012_v33 = vor.u32 %v5113_v19, %v4009_v20 }
  0x97   :  { %v5045_v26 = vld [vmem:[#allocation3 + $0x304] sm:$0xf]  ;;  %v3737_v27 = vld [vmem:[#allocation3 + $0x310] sm:$0xf0]  ;;  %v3612_v44 = vor.u32 %v5013_v22, %v3609_v23 }
  0x98   :  { %2285 = vmatpush.bf16.msrb.mxu0 %v3676_v47  ;;  %2298 = vmatpush.bf16.msrb.mxu1 %v3804_v48  ;;  %v5077_v32 = vld [vmem:[#allocation3 + $0x404] sm:$0xf]  ;;  %v3865_v37 = vld [vmem:[#allocation3 + $0x410] sm:$0xf0]  ;;  %v3740_v48 = vor.u32 %v5045_v26, %v3737_v27 }
  0x99   :  { %2311 = vmatpush.bf16.msrb.mxu2 %v3932_v49  ;;  %v5109_v38 = vld [vmem:[#allocation3 + $0x504] sm:$0xf]  ;;  %v3993_v39 = vld [vmem:[#allocation3 + $0x510] sm:$0xf0]  ;;  %v3868_v49 = vor.u32 %v5077_v32, %v3865_v37 }
  0x9a   :  { %2324 = vmatpush.bf16.msrb.mxu3 %v4060_v53  ;;  %v5169_v40 = vld [vmem:[#allocation3 + $0x6e4] sm:$0xf]  ;;  %v4233_v42 = vld [vmem:[#allocation3 + $0x6f0] sm:$0xf0]  ;;  %v3996_v52 = vor.u32 %v5109_v38, %v3993_v39 }
  0x9b   :  { %v5201_v43 = vld [vmem:[#allocation3 + $0x7e4] sm:$0xf]  ;;  %v4361_v45 = vld [vmem:[#allocation3 + $0x7f0] sm:$0xf0]  ;;  %v4236_v53 = vor.u32 %v5169_v40, %v4233_v42 }
  0x9c   :  { %2286 = vmatpush.bf16.msrb.mxu0 %v3660_v59  ;;  %2299 = vmatpush.bf16.msrb.mxu1 %v3788_v60  ;;  %v5233_v46 = vld [vmem:[#allocation3 + $0x8e4] sm:$0xf]  ;;  %v4489_v47 = vld [vmem:[#allocation3 + $0x8f0] sm:$0xf0]  ;;  %v4364_v54 = vor.u32 %v5201_v43, %v4361_v45 }
  0x9d   :  { %2312 = vmatpush.bf16.msrb.mxu2 %v3916_v61  ;;  %v5265_v50 = vld [vmem:[#allocation3 + $0x9e4] sm:$0xf]  ;;  %v4617_v51 = vld [vmem:[#allocation3 + $0x9f0] sm:$0xf0]  ;;  %v4492_v55 = vor.u32 %v5233_v46, %v4489_v47 }
  0x9e   :  { %2325 = vmatpush.bf16.msrb.mxu3 %v4044_v1  ;;  %v5165_v56 = vld [vmem:[#allocation3 + $0x6c4] sm:$0xf]  ;;  %v4217_v57 = vld [vmem:[#allocation3 + $0x6d0] sm:$0xf0]  ;;  %v4620_v59 = vor.u32 %v5265_v50, %v4617_v51 }
  0x9f   :  { %v5197_v58 = vld [vmem:[#allocation3 + $0x7c4] sm:$0xf]  ;;  %v4345_v60 = vld [vmem:[#allocation3 + $0x7d0] sm:$0xf0]  ;;  %v4220_v1 = vor.u32 %v5165_v56, %v4217_v57 }
  0xa0   :  { %2287 = vmatpush.bf16.msrb.mxu0 %v3644_v7  ;;  %2300 = vmatpush.bf16.msrb.mxu1 %v3772_v8  ;;  %v5229_v61 = vld [vmem:[#allocation3 + $0x8c4] sm:$0xf]  ;;  %v4473_v62 = vld [vmem:[#allocation3 + $0x8d0] sm:$0xf0]  ;;  %v4348_v2 = vor.u32 %v5197_v58, %v4345_v60 }
  0xa1   :  { %2313 = vmatpush.bf16.msrb.mxu2 %v3900_v9  ;;  %v5261_v63 = vld [vmem:[#allocation3 + $0x9c4] sm:$0xf]  ;;  %v4601_v0 = vld [vmem:[#allocation3 + $0x9d0] sm:$0xf0]  ;;  %v4476_v3 = vor.u32 %v5229_v61, %v4473_v62 }
  0xa2   :  { %2326 = vmatpush.bf16.msrb.mxu3 %v4028_v15  ;;  %v5161_v4 = vld [vmem:[#allocation3 + $0x6a4] sm:$0xf]  ;;  %v4201_v5 = vld [vmem:[#allocation3 + $0x6b0] sm:$0xf0]  ;;  %v4604_v7 = vor.u32 %v5261_v63, %v4601_v0 }
  0xa3   :  { %v5193_v6 = vld [vmem:[#allocation3 + $0x7a4] sm:$0xf]  ;;  %v4329_v8 = vld [vmem:[#allocation3 + $0x7b0] sm:$0xf0]  ;;  %v4204_v15 = vor.u32 %v5161_v4, %v4201_v5 }
  0xa4   :  { %2288 = vmatpush.bf16.msrb.mxu0 %v3628_v21  ;;  %2301 = vmatpush.bf16.msrb.mxu1 %v3756_v24  ;;  %v5225_v9 = vld [vmem:[#allocation3 + $0x8a4] sm:$0xf]  ;;  %v4457_v10 = vld [vmem:[#allocation3 + $0x8b0] sm:$0xf0]  ;;  %v4332_v16 = vor.u32 %v5193_v6, %v4329_v8 }
  0xa5   :  { %2314 = vmatpush.bf16.msrb.mxu2 %v3884_v25  ;;  %v5257_v12 = vld [vmem:[#allocation3 + $0x9a4] sm:$0xf]  ;;  %v4585_v13 = vld [vmem:[#allocation3 + $0x9b0] sm:$0xf0]  ;;  %v4460_v17 = vor.u32 %v5225_v9, %v4457_v10 }
  0xa6   :  { %2327 = vmatpush.bf16.msrb.mxu3 %v4012_v33  ;;  %v5157_v18 = vld [vmem:[#allocation3 + $0x684] sm:$0xf]  ;;  %v4185_v19 = vld [vmem:[#allocation3 + $0x690] sm:$0xf0]  ;;  %v4588_v21 = vor.u32 %v5257_v12, %v4585_v13 }
  0xa7   :  { %v5189_v20 = vld [vmem:[#allocation3 + $0x784] sm:$0xf]  ;;  %v4313_v22 = vld [vmem:[#allocation3 + $0x790] sm:$0xf0]  ;;  %v4188_v27 = vor.u32 %v5157_v18, %v4185_v19 }
  0xa8   :  { %2289 = vmatpush.bf16.msrb.mxu0 %v3612_v44  ;;  %2302 = vmatpush.bf16.msrb.mxu1 %v3740_v48  ;;  %v5221_v23 = vld [vmem:[#allocation3 + $0x884] sm:$0xf]  ;;  %v4441_v24 = vld [vmem:[#allocation3 + $0x890] sm:$0xf0]  ;;  %v4316_v32 = vor.u32 %v5189_v20, %v4313_v22  ;;  %v4980_v22 = vld [vmem:[#allocation3 + $0xf4] sm:$0xf0] }
  0xa9   :  { %2315 = vmatpush.bf16.msrb.mxu2 %v3868_v49  ;;  %v5253_v25 = vld [vmem:[#allocation3 + $0x984] sm:$0xf]  ;;  %v4569_v26 = vld [vmem:[#allocation3 + $0x990] sm:$0xf0]  ;;  %v4444_v33 = vor.u32 %v5221_v23, %v4441_v24  ;;  %v3599_v23 = vld [vmem:[#allocation3 + $0x1e8] sm:$0xf] }
  0xaa   :  { %2328 = vmatpush.bf16.msrb.mxu3 %v3996_v52  ;;  %v5153_v37 = vld [vmem:[#allocation3 + $0x664] sm:$0xf]  ;;  %v4169_v38 = vld [vmem:[#allocation3 + $0x670] sm:$0xf0]  ;;  %v4572_v40 = vor.u32 %v5253_v25, %v4569_v26  ;;  %v5012_v25 = vld [vmem:[#allocation3 + $0x1f4] sm:$0xf0] }
  0xab   :  { %2290 = vmatmul.bf16.vlgmr.msrb.gmra.mxu0 %v5676_v28  ;;  %2303 = vmatmul.bf16.vlgmr.msrb.gmra.mxu1 %v5680_v30  ;;  %v5185_v39 = vld [vmem:[#allocation3 + $0x764] sm:$0xf]  ;;  %v4297_v42 = vld [vmem:[#allocation3 + $0x770] sm:$0xf0]  ;;  %v4172_v47 = vor.u32 %v5153_v37, %v4169_v38  ;;  %v3727_v26 = vld [vmem:[#allocation3 + $0x2e8] sm:$0xf] }
  0xac   :  { %2334 = vmatpush.bf16.msra.mxu0 %v4236_v53  ;;  %2347 = vmatpush.bf16.msra.mxu1 %v4364_v54  ;;  %v5217_v43 = vld [vmem:[#allocation3 + $0x864] sm:$0xf]  ;;  %v4425_v44 = vld [vmem:[#allocation3 + $0x870] sm:$0xf0]  ;;  %v4300_v48 = vor.u32 %v5185_v39, %v4297_v42  ;;  %v3855_v37 = vld [vmem:[#allocation3 + $0x3e8] sm:$0xf]  ;;  %v3600_v42 = vor.u32 %v5012_v25, %v3599_v23 }
  0xad   :  { %2360 = vmatpush.bf16.msra.mxu2 %v4492_v55  ;;  %2329 = vmatmul.bf16.vlgmr.msrb.gmra.mxu3 %v5697_v41  ;;  %v5249_v45 = vld [vmem:[#allocation3 + $0x964] sm:$0xf]  ;;  %v4553_v46 = vld [vmem:[#allocation3 + $0x970] sm:$0xf0]  ;;  %v4428_v49 = vor.u32 %v5217_v43, %v4425_v44  ;;  %v5076_v38 = vld [vmem:[#allocation3 + $0x3f4] sm:$0xf0] }
  0xae   :  { %2373 = vmatpush.bf16.msra.mxu3 %v4620_v59  ;;  %2316 = vmatmul.bf16.vlgmr.msrb.gmra.mxu2 %v5693_v34  ;;  %v5149_v50 = vld [vmem:[#allocation3 + $0x644] sm:$0xf]  ;;  %v4153_v51 = vld [vmem:[#allocation3 + $0x650] sm:$0xf0]  ;;  %v4556_v53 = vor.u32 %v5249_v45, %v4553_v46  ;;  %v3455_v44 = vld [vmem:[#allocation3 + $0xc8] sm:$0xf] }
  0xaf   :  { %v5181_v52 = vld [vmem:[#allocation3 + $0x744] sm:$0xf]  ;;  %v4281_v54 = vld [vmem:[#allocation3 + $0x750] sm:$0xf0]  ;;  %v4156_v59 = vor.u32 %v5149_v50, %v4153_v51  ;;  %v4976_v45 = vld [vmem:[#allocation3 + $0xd4] sm:$0xf0] }
  0xb0   :  { %2335 = vmatpush.bf16.msra.mxu0 %v4220_v1  ;;  %2348 = vmatpush.bf16.msra.mxu1 %v4348_v2  ;;  %v5213_v55 = vld [vmem:[#allocation3 + $0x844] sm:$0xf]  ;;  %v4409_v56 = vld [vmem:[#allocation3 + $0x850] sm:$0xf0]  ;;  %v4284_v60 = vor.u32 %v5181_v52, %v4281_v54  ;;  %v3583_v46 = vld [vmem:[#allocation3 + $0x1c8] sm:$0xf] }
  0xb1   :  { %2361 = vmatpush.bf16.msra.mxu2 %v4476_v3  ;;  %v5245_v57 = vld [vmem:[#allocation3 + $0x944] sm:$0xf]  ;;  %v4537_v58 = vld [vmem:[#allocation3 + $0x950] sm:$0xf0]  ;;  %v4412_v61 = vor.u32 %v5213_v55, %v4409_v56  ;;  %v5040_v50 = vld [vmem:[#allocation3 + $0x2d4] sm:$0xf0] }
  0xb2   :  { %2374 = vmatpush.bf16.msra.mxu3 %v4604_v7  ;;  %v5145_v62 = vld [vmem:[#allocation3 + $0x624] sm:$0xf]  ;;  %v4137_v63 = vld [vmem:[#allocation3 + $0x630] sm:$0xf0]  ;;  %v4540_v1 = vor.u32 %v5245_v57, %v4537_v58  ;;  %v3839_v51 = vld [vmem:[#allocation3 + $0x3c8] sm:$0xf] }
  0xb3   :  { %v5177_v0 = vld [vmem:[#allocation3 + $0x724] sm:$0xf]  ;;  %v4265_v2 = vld [vmem:[#allocation3 + $0x730] sm:$0xf0]  ;;  %v4140_v7 = vor.u32 %v5145_v62, %v4137_v63  ;;  %v5072_v52 = vld [vmem:[#allocation3 + $0x3d4] sm:$0xf0] }
  0xb4   :  { %2336 = vmatpush.bf16.msra.mxu0 %v4204_v15  ;;  %2349 = vmatpush.bf16.msra.mxu1 %v4332_v16  ;;  %v5209_v3 = vld [vmem:[#allocation3 + $0x824] sm:$0xf]  ;;  %v4393_v4 = vld [vmem:[#allocation3 + $0x830] sm:$0xf0]  ;;  %v4268_v10 = vor.u32 %v5177_v0, %v4265_v2  ;;  %v3439_v56 = vld [vmem:[#allocation3 + $0xa8] sm:$0xf] }
  0xb5   :  { %2362 = vmatpush.bf16.msra.mxu2 %v4460_v17  ;;  %v5241_v5 = vld [vmem:[#allocation3 + $0x924] sm:$0xf]  ;;  %v4521_v6 = vld [vmem:[#allocation3 + $0x930] sm:$0xf0]  ;;  %v4396_v12 = vor.u32 %v5209_v3, %v4393_v4  ;;  %v4972_v57 = vld [vmem:[#allocation3 + $0xb4] sm:$0xf0] }
  0xb6   :  { %2375 = vmatpush.bf16.msra.mxu3 %v4588_v21  ;;  %v5141_v8 = vld [vmem:[#allocation3 + $0x604] sm:$0xf]  ;;  %v4121_v9 = vld [vmem:[#allocation3 + $0x610] sm:$0xf0]  ;;  %v4524_v17 = vor.u32 %v5241_v5, %v4521_v6  ;;  %v3471_v21 = vld [vmem:[#allocation3 + $0xe8] sm:$0xf]  ;;  %v3440_v2 = vor.u32 %v4972_v57, %v3439_v56 }
  0xb7   :  { %v5173_v13 = vld [vmem:[#allocation3 + $0x704] sm:$0xf]  ;;  %v4249_v15 = vld [vmem:[#allocation3 + $0x710] sm:$0xf0]  ;;  %v4124_v24 = vor.u32 %v5141_v8, %v4121_v9  ;;  %v3567_v58 = vld [vmem:[#allocation3 + $0x1a8] sm:$0xf] }
  0xb8   :  { %2337 = vmatpush.bf16.msra.mxu0 %v4188_v27  ;;  %2350 = vmatpush.bf16.msra.mxu1 %v4316_v32  ;;  %v5205_v16 = vld [vmem:[#allocation3 + $0x804] sm:$0xf]  ;;  %v4377_v18 = vld [vmem:[#allocation3 + $0x810] sm:$0xf0]  ;;  %v5044_v27 = vld [vmem:[#allocation3 + $0x2f4] sm:$0xf0]  ;;  %v4252_v32 = vor.u32 %v5173_v13, %v4249_v15 }
  0xb9   :  { %2363 = vmatpush.bf16.msra.mxu2 %v4444_v33  ;;  %v5237_v19 = vld [vmem:[#allocation3 + $0x904] sm:$0xf]  ;;  %v4505_v20 = vld [vmem:[#allocation3 + $0x910] sm:$0xf0]  ;;  %v4380_v33 = vor.u32 %v5205_v16, %v4377_v18  ;;  %v3728_v43 = vor.u32 %v5044_v27, %v3727_v26  ;;  %v5036_v62 = vld [vmem:[#allocation3 + $0x2b4] sm:$0xf0] }
  0xba   :  { %2376 = vmatpush.bf16.msra.mxu3 %v4572_v40  ;;  %v4508_v39 = vor.u32 %v5237_v19, %v4505_v20  ;;  %v3472_v40 = vor.u32 %v4980_v22, %v3471_v21  ;;  %v3823_v63 = vld [vmem:[#allocation3 + $0x3a8] sm:$0xf]  ;;  %v5068_v0 = vld [vmem:[#allocation3 + $0x3b4] sm:$0xf0] }
  0xbb   :  { %v3423_v5 = vld [vmem:[#allocation3 + $0x88] sm:$0xf]  ;;  %v4968_v6 = vld [vmem:[#allocation3 + $0x94] sm:$0xf0] }
  0xbc   :  { %2338 = vmatpush.bf16.msra.mxu0 %v4172_v47  ;;  %2351 = vmatpush.bf16.msra.mxu1 %v4300_v48  ;;  %v3856_v47 = vor.u32 %v5076_v38, %v3855_v37  ;;  %v5008_v48 = vld [vmem:[#allocation3 + $0x1d4] sm:$0xf0]  ;;  %v3807_v13 = vld [vmem:[#allocation3 + $0x388] sm:$0xf] }
  0xbd   :  { %2364 = vmatpush.bf16.msra.mxu2 %v4428_v49  ;;  %v3711_v49 = vld [vmem:[#allocation3 + $0x2c8] sm:$0xf]  ;;  %v3584_v54 = vor.u32 %v5008_v48, %v3583_v46  ;;  %v5000_v9 = vld [vmem:[#allocation3 + $0x194] sm:$0xf0] }
  0xbe   :  { %2377 = vmatpush.bf16.msra.mxu3 %v4556_v53  ;;  %v3456_v53 = vor.u32 %v4976_v45, %v3455_v44  ;;  %v3712_v55 = vor.u32 %v5040_v50, %v3711_v49  ;;  %v5064_v15 = vld [vmem:[#allocation3 + $0x394] sm:$0xf0]  ;;  %v3407_v16 = vld [vmem:[#allocation3 + $0x68] sm:$0xf] }
  0xbf   :  { %v4964_v19 = vld [vmem:[#allocation3 + $0x74] sm:$0xf0]  ;;  %v3535_v20 = vld [vmem:[#allocation3 + $0x168] sm:$0xf]  ;;  %v3808_v22 = vor.u32 %v5064_v15, %v3807_v13 }
  0xc0   :  { %2339 = vmatpush.bf16.msra.mxu0 %v4156_v59  ;;  %2352 = vmatpush.bf16.msra.mxu1 %v4284_v60  ;;  %v3840_v59 = vor.u32 %v5072_v52, %v3839_v51  ;;  %v5004_v60 = vld [vmem:[#allocation3 + $0x1b4] sm:$0xf0]  ;;  %v3791_v26 = vld [vmem:[#allocation3 + $0x368] sm:$0xf] }
  0xc1   :  { %2365 = vmatpush.bf16.msra.mxu2 %v4412_v61  ;;  %v3695_v61 = vld [vmem:[#allocation3 + $0x2a8] sm:$0xf]  ;;  %v3568_v3 = vor.u32 %v5004_v60, %v3567_v58  ;;  %v4996_v23 = vld [vmem:[#allocation3 + $0x174] sm:$0xf0] }
  0xc2   :  { %2378 = vmatpush.bf16.msra.mxu3 %v4540_v1  ;;  %v478_v1 = vld [vmem:[#allocation5] sm:$0xf]  ;;  %v3696_v4 = vor.u32 %v5036_v62, %v3695_v61  ;;  %v5028_v25 = vld [vmem:[#allocation3 + $0x274] sm:$0xf0]  ;;  %v3536_v37 = vor.u32 %v4996_v23, %v3535_v20  ;;  %v3647_v45 = vld [vmem:[#allocation3 + $0x248] sm:$0xf] }
  0xc3   :  { %v5722_v8 = vunpack.c.l.bf16 %v478_v1  ;;  %v5060_v27 = vld [vmem:[#allocation3 + $0x374] sm:$0xf0]  ;;  %v3759_v61 = vld [vmem:[#allocation3 + $0x328] sm:$0xf] }
  0xc4   :  { %2340 = vmatpush.bf16.msra.mxu0 %v4140_v7  ;;  %2353 = vmatpush.bf16.msra.mxu1 %v4268_v10  ;;  %v3551_v7 = vld [vmem:[#allocation3 + $0x188] sm:$0xf]  ;;  %v4992_v44 = vld [vmem:[#allocation3 + $0x154] sm:$0xf0]  ;;  %v5725_v50 = vpop.permute.xlu0 %482 }
  0xc5   :  { %2366 = vmatpush.bf16.msra.mxu2 %v4396_v12  ;;  %v3679_v10 = vld [vmem:[#allocation3 + $0x288] sm:$0xf]  ;;  %v5032_v12 = vld [vmem:[#allocation3 + $0x294] sm:$0xf0]  ;;  %v486_v21 = vperm.slane %v5722_v8, 0 }
  0xc6   :  { %2379 = vmatpush.bf16.msra.mxu3 %v4524_v17  ;;  %v3552_v17 = vor.u32 %v5000_v9, %v3551_v7  ;;  %v3680_v18 = vor.u32 %v5032_v12, %v3679_v10  ;;  %v5024_v46 = vld [vmem:[#allocation3 + $0x254] sm:$0xf0]  ;;  %v3615_v7 = vld [vmem:[#allocation3 + $0x208] sm:$0xf] }
  0xc7   :  { %v5056_v48 = vld [vmem:[#allocation3 + $0x354] sm:$0xf0]  ;;  %v3648_v52 = vor.u32 %v5024_v46, %v3647_v45  ;;  %v3743_v13 = vld [vmem:[#allocation3 + $0x308] sm:$0xf] }
  0xc8   :  { %2341 = vmatpush.bf16.msra.mxu0 %v4124_v24  ;;  %2354 = vmatpush.bf16.msra.mxu1 %v4252_v32  ;;  %v3663_v24 = vld [vmem:[#allocation3 + $0x268] sm:$0xf]  ;;  %v3408_v32 = vor.u32 %v4964_v19, %v3407_v16  ;;  %v4988_v58 = vld [vmem:[#allocation3 + $0x134] sm:$0xf0] }
  0xc9   :  { %2367 = vmatpush.bf16.msra.mxu2 %v4380_v33  ;;  %v3391_v33 = vld [vmem:[#allocation3 + $0x48] sm:$0xf]  ;;  %v3664_v38 = vor.u32 %v5028_v25, %v3663_v24  ;;  %v5020_v60 = vld [vmem:[#allocation3 + $0x234] sm:$0xf0] }
  0xca   :  { %2380 = vmatpush.bf16.msra.mxu3 %v4508_v39  ;;  %v4960_v39 = vld [vmem:[#allocation3 + $0x54] sm:$0xf0]  ;;  %v4367_v25 = vld [vmem:[#allocation3 + $0x7e8] sm:$0xf] }
  0xcb   :  { %2342 = vmatmul.bf16.vlgmr.msra.gmra.mxu0 %v5691_v31  ;;  %2355 = vmatmul.bf16.vlgmr.msra.gmra.mxu1 %v5695_v36  ;;  %v3392_v49 = vor.u32 %v4960_v39, %v3391_v33  ;;  %v5052_v62 = vld [vmem:[#allocation3 + $0x334] sm:$0xf0] }
  0xcc   :  { %2386 = vmatpush.bf16.msrb.mxu0 %v3472_v40  ;;  %2399 = vmatpush.bf16.msrb.mxu1 %v3600_v42  ;;  %v3519_v40 = vld [vmem:[#allocation3 + $0x148] sm:$0xf]  ;;  %v494_v42 = vperm.slane %v486_v21, 0  ;;  %v4952_v1 = vld [vmem:[#allocation3 + $0x14] sm:$0xf0]  ;;  %v3760_v10 = vor.u32 %v5052_v62, %v3759_v61 }
  0xcd   :  { %2412 = vmatpush.bf16.msrb.mxu2 %v3728_v43  ;;  %2381 = vmatmul.bf16.vlgmr.msra.gmra.mxu3 %v5708_v14  ;;  %v3424_v14 = vor.u32 %v4968_v6, %v3423_v5  ;;  %v3792_v43 = vor.u32 %v5060_v27, %v3791_v26  ;;  %v3520_v51 = vor.u32 %v4992_v44, %v3519_v40  ;;  %v3487_v5 = vld [vmem:[#allocation3 + $0x108] sm:$0xf]  ;;  %v4984_v6 = vld [vmem:[#allocation3 + $0x114] sm:$0xf0] }
  0xce   :  { %2425 = vmatpush.bf16.msrb.mxu3 %v3856_v47  ;;  %2368 = vmatmul.bf16.vlgmr.msra.gmra.mxu2 %v5706_v11  ;;  %v3824_v11 = vor.u32 %v5068_v0, %v3823_v63  ;;  %v3775_v47 = vld [vmem:[#allocation3 + $0x348] sm:$0xf]  ;;  %v498_v56 = vmul.f32 %v494_v42, %v5725_v50  ;;  %v5016_v12 = vld [vmem:[#allocation3 + $0x214] sm:$0xf0]  ;;  %v3488_v23 = vor.u32 %v4984_v6, %v3487_v5 }
  0xcf   :  { %v3776_v57 = vor.u32 %v5056_v48, %v3775_v47  ;;  %v3359_v0 = vld [vmem:[#allocation3 + $0x8] sm:$0xf]  ;;  %v5048_v15 = vld [vmem:[#allocation3 + $0x314] sm:$0xf0]  ;;  %v3616_v24 = vor.u32 %v5016_v12, %v3615_v7 }
  0xd0   :  { %2387 = vmatpush.bf16.msrb.mxu0 %v3456_v53  ;;  %2400 = vmatpush.bf16.msrb.mxu1 %v3584_v54  ;;  %v3375_v53 = vld [vmem:[#allocation3 + $0x28] sm:$0xf]  ;;  %v4956_v54 = vld [vmem:[#allocation3 + $0x34] sm:$0xf0]  ;;  %v3360_v19 = vor.u32 %v4952_v1, %v3359_v0 }
  0xd1   :  { %2413 = vmatpush.bf16.msrb.mxu2 %v3712_v55  ;;  %v3503_v55 = vld [vmem:[#allocation3 + $0x128] sm:$0xf]  ;;  %v3376_v63 = vor.u32 %v4956_v54, %v3375_v53  ;;  %v5108_v16 = vld [vmem:[#allocation3 + $0x4f4] sm:$0xf0] }
  0xd2   :  { %2426 = vmatpush.bf16.msrb.mxu3 %v3840_v59  ;;  %v3631_v59 = vld [vmem:[#allocation3 + $0x228] sm:$0xf]  ;;  %v5140_v20 = vld [vmem:[#allocation3 + $0x5f4] sm:$0xf0] }
  0xd3   :  { %v4239_v21 = vld [vmem:[#allocation3 + $0x6e8] sm:$0xf]  ;;  %v5204_v26 = vld [vmem:[#allocation3 + $0x7f4] sm:$0xf0] }
  0xd4   :  { %2388 = vmatpush.bf16.msrb.mxu0 %v3440_v2  ;;  %2401 = vmatpush.bf16.msrb.mxu1 %v3568_v3  ;;  %v2135_v2 = vpop.f32.mrf.mxu0  ;;  %v3504_v3 = vor.u32 %v4988_v58, %v3503_v55  ;;  %v3967_v42 = vld [vmem:[#allocation3 + $0x4c8] sm:$0xf]  ;;  %v4368_v45 = vor.u32 %v5204_v26, %v4367_v25  ;;  %v5136_v46 = vld [vmem:[#allocation3 + $0x5d4] sm:$0xf0] }
  0xd5   :  { %2414 = vmatpush.bf16.msrb.mxu2 %v3696_v4  ;;  %v3632_v4 = vor.u32 %v5020_v60, %v3631_v59  ;;  %v2136_v9 = vadd.f32 %v2135_v2, %v498_v56  ;;  %v4095_v44 = vld [vmem:[#allocation3 + $0x5c8] sm:$0xf]  ;;  %v5168_v48 = vld [vmem:[#allocation3 + $0x6d4] sm:$0xf0] }
  0xd6   :  { %2427 = vmatpush.bf16.msrb.mxu3 %v3824_v11  ;;  %v4223_v47 = vld [vmem:[#allocation3 + $0x6c8] sm:$0xf]  ;;  %v5200_v53 = vld [vmem:[#allocation3 + $0x7d4] sm:$0xf0]  ;;  %v4096_v56 = vor.u32 %v5136_v46, %v4095_v44 }
  0xd7   :  { %v3951_v58 = vld [vmem:[#allocation3 + $0x4a8] sm:$0xf]  ;;  %v5100_v59 = vld [vmem:[#allocation3 + $0x4b4] sm:$0xf0] }
  0xd8   :  { %2389 = vmatpush.bf16.msrb.mxu0 %v3424_v14  ;;  %2402 = vmatpush.bf16.msrb.mxu1 %v3552_v17  ;;  %v3983_v14 = vld [vmem:[#allocation3 + $0x4e8] sm:$0xf]  ;;  %v5132_v62 = vld [vmem:[#allocation3 + $0x5b4] sm:$0xf0] }
  0xd9   :  { %2415 = vmatpush.bf16.msrb.mxu2 %v3680_v18  ;;  %v4111_v17 = vld [vmem:[#allocation3 + $0x5e8] sm:$0xf]  ;;  %v3984_v33 = vor.u32 %v5108_v16, %v3983_v14  ;;  %v5164_v0 = vld [vmem:[#allocation3 + $0x6b4] sm:$0xf0] }
  0xda   :  { %2428 = vmatpush.bf16.msrb.mxu3 %v3808_v22  ;;  %v5172_v22 = vld [vmem:[#allocation3 + $0x6f4] sm:$0xf0]  ;;  %v4112_v39 = vor.u32 %v5140_v20, %v4111_v17  ;;  %v4079_v60 = vld [vmem:[#allocation3 + $0x5a8] sm:$0xf] }
  0xdb   :  { %v2148_v11 = vpop.f32.mrf.mxu1  ;;  %v4240_v40 = vor.u32 %v5172_v22, %v4239_v21  ;;  %v4335_v1 = vld [vmem:[#allocation3 + $0x7a8] sm:$0xf]  ;;  %v5196_v2 = vld [vmem:[#allocation3 + $0x7b4] sm:$0xf0]  ;;  %v4080_v6 = vor.u32 %v5132_v62, %v4079_v60 }
  0xdc   :  { %2390 = vmatpush.bf16.msrb.mxu0 %v3408_v32  ;;  %2403 = vmatpush.bf16.msrb.mxu1 %v3536_v37  ;;  %v2149_v18 = vadd.f32 %v2148_v11, %v2136_v9  ;;  %v3744_v32 = vor.u32 %v5048_v15, %v3743_v13  ;;  %v3935_v11 = vld [vmem:[#allocation3 + $0x488] sm:$0xf]  ;;  %v5096_v9 = vld [vmem:[#allocation3 + $0x494] sm:$0xf0]  ;;  %v4336_v12 = vor.u32 %v5196_v2, %v4335_v1 }
  0xdd   :  { %2416 = vmatpush.bf16.msrb.mxu2 %v3664_v38  ;;  %v5128_v13 = vld [vmem:[#allocation3 + $0x594] sm:$0xf0]  ;;  %v4191_v15 = vld [vmem:[#allocation3 + $0x688] sm:$0xf] }
  0xde   :  { %2429 = vmatpush.bf16.msrb.mxu3 %v3792_v43  ;;  %v5104_v43 = vld [vmem:[#allocation3 + $0x4d4] sm:$0xf0]  ;;  %v4319_v16 = vld [vmem:[#allocation3 + $0x788] sm:$0xf] }
  0xdf   :  { %v2161_v27 = vpop.f32.mrf.mxu2  ;;  %v2174_v38 = vpop.f32.mrf.mxu3  ;;  %v3968_v55 = vor.u32 %v5104_v43, %v3967_v42  ;;  %v5160_v14 = vld [vmem:[#allocation3 + $0x694] sm:$0xf0]  ;;  %v3919_v22 = vld [vmem:[#allocation3 + $0x468] sm:$0xf] }
  0xe0   :  { %2391 = vmatpush.bf16.msrb.mxu0 %v3392_v49  ;;  %2404 = vmatpush.bf16.msrb.mxu1 %v3520_v51  ;;  %v2162_v37 = vadd.f32 %v2161_v27, %v2149_v18  ;;  %v2137_v51 = vpop.f32.mrf.mxu0  ;;  %v5192_v17 = vld [vmem:[#allocation3 + $0x794] sm:$0xf0]  ;;  %v3936_v18 = vor.u32 %v5096_v9, %v3935_v11  ;;  %v4192_v21 = vor.u32 %v5160_v14, %v4191_v15  ;;  %v4015_v1 = vld [vmem:[#allocation3 + $0x528] sm:$0xf] }
  0xe1   :  { %2417 = vmatpush.bf16.msrb.mxu2 %v3648_v52  ;;  %v4351_v52 = vld [vmem:[#allocation3 + $0x7c8] sm:$0xf]  ;;  %v4320_v27 = vor.u32 %v5192_v17, %v4319_v16  ;;  %v5088_v46 = vld [vmem:[#allocation3 + $0x454] sm:$0xf0] }
  0xe2   :  { %2430 = vmatpush.bf16.msrb.mxu3 %v3776_v57  ;;  %v2175_v49 = vadd.f32 %v2174_v38, %v2162_v37  ;;  %v4224_v57 = vor.u32 %v5168_v48, %v4223_v47  ;;  %v4352_v61 = vor.u32 %v5200_v53, %v4351_v52  ;;  %v5156_v37 = vld [vmem:[#allocation3 + $0x674] sm:$0xf0]  ;;  %v4303_v38 = vld [vmem:[#allocation3 + $0x768] sm:$0xf] }
  0xe3   :  { %v2150_v54 = vpop.f32.mrf.mxu1  ;;  %v4031_v47 = vld [vmem:[#allocation3 + $0x548] sm:$0xf]  ;;  %v5120_v51 = vld [vmem:[#allocation3 + $0x554] sm:$0xf0] }
  0xe4   :  { %2392 = vmatpush.bf16.msrb.mxu0 %v3376_v63  ;;  %2405 = vmatpush.bf16.msrb.mxu1 %v3504_v3  ;;  %v4207_v63 = vld [vmem:[#allocation3 + $0x6a8] sm:$0xf]  ;;  %v5152_v53 = vld [vmem:[#allocation3 + $0x654] sm:$0xf0] }
  0xe5   :  { %2418 = vmatpush.bf16.msrb.mxu2 %v3632_v4  ;;  %v3952_v4 = vor.u32 %v5100_v59, %v3951_v58  ;;  %v4208_v7 = vor.u32 %v5164_v0, %v4207_v63  ;;  %v4159_v52 = vld [vmem:[#allocation3 + $0x648] sm:$0xf]  ;;  %v5084_v0 = vld [vmem:[#allocation3 + $0x434] sm:$0xf0] }
  0xe6   :  { %2431 = vmatpush.bf16.msrb.mxu3 %v3760_v10  ;;  %v4063_v10 = vld [vmem:[#allocation3 + $0x588] sm:$0xf]  ;;  %v4160_v62 = vor.u32 %v5152_v53, %v4159_v52  ;;  %v5180_v11 = vld [vmem:[#allocation3 + $0x734] sm:$0xf0]  ;;  %v4974_v53 = vld [vmem:[#allocation3 + $0xcc] sm:$0xf] }
  0xe7   :  { %v2163_v3 = vpop.f32.mrf.mxu2  ;;  %v2176_v5 = vpop.f32.mrf.mxu3  ;;  %v4064_v20 = vor.u32 %v5128_v13, %v4063_v10  ;;  %v3887_v63 = vld [vmem:[#allocation3 + $0x428] sm:$0xf]  ;;  %v5112_v16 = vld [vmem:[#allocation3 + $0x514] sm:$0xf0] }
  0xe8   :  { %2393 = vmatpush.bf16.msrb.mxu0 %v3360_v19  ;;  %2406 = vmatpush.bf16.msrb.mxu1 %v3488_v23  ;;  %v5092_v23 = vld [vmem:[#allocation3 + $0x474] sm:$0xf0]  ;;  %v4143_v5 = vld [vmem:[#allocation3 + $0x628] sm:$0xf]  ;;  %v3888_v9 = vor.u32 %v5084_v0, %v3887_v63 }
  0xe9   :  { %2419 = vmatpush.bf16.msrb.mxu2 %v3616_v24  ;;  %v4047_v24 = vld [vmem:[#allocation3 + $0x568] sm:$0xf]  ;;  %v3920_v42 = vor.u32 %v5092_v23, %v3919_v22  ;;  %v5176_v22 = vld [vmem:[#allocation3 + $0x714] sm:$0xf0] }
  0xea   :  { %2432 = vmatpush.bf16.msrb.mxu3 %v3744_v32  ;;  %v5124_v32 = vld [vmem:[#allocation3 + $0x574] sm:$0xf0]  ;;  %v3871_v10 = vld [vmem:[#allocation3 + $0x408] sm:$0xf] }
  0xeb   :  { %2394 = vmatmul.bf16.vlgmr.msrb.gmra.mxu0 %v5678_v29  ;;  %2407 = vmatmul.bf16.vlgmr.msrb.gmra.mxu1 %v5682_v35  ;;  %v4048_v43 = vor.u32 %v5124_v32, %v4047_v24  ;;  %v3999_v14 = vld [vmem:[#allocation3 + $0x508] sm:$0xf]  ;;  %v5268_v32 = vld [vmem:[#allocation3 + $0x9f4] sm:$0xf0] }
  0xec   :  { %2438 = vmatpush.bf16.msra.mxu0 %v3984_v33  ;;  %2451 = vmatpush.bf16.msra.mxu1 %v4112_v39  ;;  %v2187_v19 = vpop.f32.mrf.mxu0  ;;  %v2200_v26 = vpop.f32.mrf.mxu1  ;;  %v4175_v33 = vld [vmem:[#allocation3 + $0x668] sm:$0xf]  ;;  %v5188_v39 = vld [vmem:[#allocation3 + $0x774] sm:$0xf0] }
  0xed   :  { %2464 = vmatpush.bf16.msra.mxu2 %v4240_v40  ;;  %2433 = vmatmul.bf16.vlgmr.msrb.gmra.mxu3 %v5680_v30  ;;  %v2188_v25 = vadd.f32 %v2187_v19, %v2175_v49  ;;  %v4176_v44 = vor.u32 %v5156_v37, %v4175_v33  ;;  %v4304_v49 = vor.u32 %v5188_v39, %v4303_v38  ;;  %v4127_v17 = vld [vmem:[#allocation3 + $0x608] sm:$0xf]  ;;  %v4978_v33 = vld [vmem:[#allocation3 + $0xec] sm:$0xf]  ;;  %v3473_v37 = vld [vmem:[#allocation3 + $0xf8] sm:$0xf0] }
  0xee   :  { %2477 = vmatpush.bf16.msra.mxu3 %v4368_v45  ;;  %2420 = vmatmul.bf16.vlgmr.msrb.gmra.mxu2 %v5676_v28  ;;  %v3903_v45 = vld [vmem:[#allocation3 + $0x448] sm:$0xf]  ;;  %v4000_v38 = vor.u32 %v5112_v16, %v3999_v14  ;;  %v5264_v52 = vld [vmem:[#allocation3 + $0x9d4] sm:$0xf0]  ;;  %v4966_v16 = vld [vmem:[#allocation3 + $0x8c] sm:$0xf] }
  0xef   :  { %v2201_v40 = vadd.f32 %v2200_v26, %v2188_v25  ;;  %v3904_v58 = vor.u32 %v5088_v46, %v3903_v45  ;;  %v4495_v24 = vld [vmem:[#allocation3 + $0x8e8] sm:$0xf]  ;;  %v5236_v25 = vld [vmem:[#allocation3 + $0x8f4] sm:$0xf0]  ;;  %v3476_v46 = vor.u32 %v4978_v33, %v3473_v37 }
  0xf0   :  { %2439 = vmatpush.bf16.msra.mxu0 %v3968_v55  ;;  %2452 = vmatpush.bf16.msra.mxu1 %v4096_v56  ;;  %v2226_v55 = vpop.f32.mrf.mxu3  ;;  %v4287_v56 = vld [vmem:[#allocation3 + $0x748] sm:$0xf]  ;;  %v5256_v14 = vld [vmem:[#allocation3 + $0x994] sm:$0xf0] }
  0xf1   :  { %2465 = vmatpush.bf16.msra.mxu2 %v4224_v57  ;;  %v2213_v48 = vpop.f32.mrf.mxu2  ;;  %v5184_v57 = vld [vmem:[#allocation3 + $0x754] sm:$0xf0]  ;;  %v4623_v26 = vld [vmem:[#allocation3 + $0x9e8] sm:$0xf] }
  0xf2   :  { %2478 = vmatpush.bf16.msra.mxu3 %v4352_v61  ;;  %v2214_v54 = vadd.f32 %v2213_v48, %v2201_v40  ;;  %v4032_v61 = vor.u32 %v5120_v51, %v4031_v47  ;;  %v4288_v3 = vor.u32 %v5184_v57, %v4287_v56  ;;  %v5010_v40 = vld [vmem:[#allocation3 + $0x1ec] sm:$0xf]  ;;  %v4624_v45 = vor.u32 %v5268_v32, %v4623_v26  ;;  %v4479_v47 = vld [vmem:[#allocation3 + $0x8c8] sm:$0xf]  ;;  %v5232_v48 = vld [vmem:[#allocation3 + $0x8d4] sm:$0xf0] }
  0xf3   :  { %v3585_v56 = vld [vmem:[#allocation3 + $0x1d8] sm:$0xf0]  ;;  %v4480_v57 = vor.u32 %v5232_v48, %v4479_v47  ;;  %v4591_v63 = vld [vmem:[#allocation3 + $0x9a8] sm:$0xf]  ;;  %v5220_v32 = vld [vmem:[#allocation3 + $0x874] sm:$0xf0] }
  0xf4   :  { %2440 = vmatpush.bf16.msra.mxu0 %v3952_v4  ;;  %2453 = vmatpush.bf16.msra.mxu1 %v4080_v6  ;;  %v5732_v59 = vadd.f32 %v2226_v55, %v2214_v54  ;;  %v2189_v60 = vpop.f32.mrf.mxu0  ;;  %v2202_v2 = vpop.f32.mrf.mxu1  ;;  %v5116_v4 = vld [vmem:[#allocation3 + $0x534] sm:$0xf0]  ;;  %v3457_v54 = vld [vmem:[#allocation3 + $0xd8] sm:$0xf0]  ;;  %v5006_v55 = vld [vmem:[#allocation3 + $0x1cc] sm:$0xf] }
  0xf5   :  { %2466 = vmatpush.bf16.msra.mxu2 %v4208_v7  ;;  %v5148_v6 = vld [vmem:[#allocation3 + $0x634] sm:$0xf0]  ;;  %v4271_v7 = vld [vmem:[#allocation3 + $0x728] sm:$0xf]  ;;  %v4016_v13 = vor.u32 %v5116_v4, %v4015_v1  ;;  %v3460_v60 = vor.u32 %v4974_v53, %v3457_v54  ;;  %v3588_v0 = vor.u32 %v5006_v55, %v3585_v56  ;;  %v4970_v2 = vld [vmem:[#allocation3 + $0xac] sm:$0xf] }
  0xf6   :  { %2479 = vmatpush.bf16.msra.mxu3 %v4336_v12  ;;  %v5080_v12 = vld [vmem:[#allocation3 + $0x414] sm:$0xf0]  ;;  %v4144_v15 = vor.u32 %v5148_v6, %v4143_v5  ;;  %v4272_v19 = vor.u32 %v5180_v11, %v4271_v7  ;;  %v5002_v4 = vld [vmem:[#allocation3 + $0x1ac] sm:$0xf]  ;;  %v3569_v5 = vld [vmem:[#allocation3 + $0x1b8] sm:$0xf0] }
  0xf7   :  { %v5260_v1 = vld [vmem:[#allocation3 + $0x9b4] sm:$0xf0]  ;;  %v487_v7 = vperm.slane %v5722_v8, 2  ;;  %v4559_v33 = vld [vmem:[#allocation3 + $0x968] sm:$0xf] }
  0xf8   :  { %2441 = vmatpush.bf16.msra.mxu0 %v3936_v18  ;;  %2454 = vmatpush.bf16.msra.mxu1 %v4064_v20  ;;  %v5144_v20 = vld [vmem:[#allocation3 + $0x614] sm:$0xf0]  ;;  %v2228_v23 = vpop.f32.mrf.mxu3  ;;  %v4592_v11 = vor.u32 %v5260_v1, %v4591_v63  ;;  %v4415_v48 = vld [vmem:[#allocation3 + $0x848] sm:$0xf]  ;;  %v4958_v54 = vld [vmem:[#allocation3 + $0x4c] sm:$0xf] }
  0xf9   :  { %2467 = vmatpush.bf16.msra.mxu2 %v4192_v21  ;;  %v2215_v18 = vpop.f32.mrf.mxu2  ;;  %v4255_v21 = vld [vmem:[#allocation3 + $0x708] sm:$0xf]  ;;  %v4128_v39 = vor.u32 %v5144_v20, %v4127_v17  ;;  %v3425_v17 = vld [vmem:[#allocation3 + $0x98] sm:$0xf0]  ;;  %v5248_v53 = vld [vmem:[#allocation3 + $0x954] sm:$0xf0] }
  0xfa   :  { %2480 = vmatpush.bf16.msra.mxu3 %v4320_v27  ;;  %v3872_v27 = vor.u32 %v5080_v12, %v3871_v10  ;;  %v4447_v10 = vld [vmem:[#allocation3 + $0x888] sm:$0xf]  ;;  %v5224_v12 = vld [vmem:[#allocation3 + $0x894] sm:$0xf0]  ;;  %v3553_v20 = vld [vmem:[#allocation3 + $0x198] sm:$0xf0]  ;;  %v3428_v26 = vor.u32 %v4966_v16, %v3425_v17 }
  0xfb   :  { %v4448_v23 = vor.u32 %v5224_v12, %v4447_v10  ;;  %v3393_v55 = vld [vmem:[#allocation3 + $0x58] sm:$0xf0]  ;;  %v4986_v12 = vld [vmem:[#allocation3 + $0x12c] sm:$0xf]  ;;  %v5208_v16 = vld [vmem:[#allocation3 + $0x814] sm:$0xf0] }
  0xfc   :  { %2442 = vmatpush.bf16.msra.mxu0 %v3920_v42  ;;  %2455 = vmatpush.bf16.msra.mxu1 %v4048_v43  ;;  %v3601_v42 = vld [vmem:[#allocation3 + $0x1f8] sm:$0xf0]  ;;  %v4256_v43 = vor.u32 %v5176_v22, %v4255_v21  ;;  %v495_v21 = vperm.slane %v487_v7, 0 }
  0xfd   :  { %2468 = vmatpush.bf16.msra.mxu2 %v4176_v44  ;;  %v4496_v44 = vor.u32 %v5236_v25, %v4495_v24  ;;  %v3604_v51 = vor.u32 %v5010_v40, %v3601_v42  ;;  %v4962_v40 = vld [vmem:[#allocation3 + $0x6c] sm:$0xf]  ;;  %v3409_v42 = vld [vmem:[#allocation3 + $0x78] sm:$0xf0] }
  0xfe   :  { %2481 = vmatpush.bf16.msra.mxu3 %v4304_v49  ;;  %v4607_v49 = vld [vmem:[#allocation3 + $0x9c8] sm:$0xf]  ;;  %v3412_v47 = vor.u32 %v4962_v40, %v3409_v42  ;;  %v3377_v10 = vld [vmem:[#allocation3 + $0x38] sm:$0xf0]  ;;  %v5106_v42 = vld [vmem:[#allocation3 + $0x4ec] sm:$0xf] }
  0xff   :  { %v3857_v40 = vld [vmem:[#allocation3 + $0x3f8] sm:$0xf0] }
 0x100   :  { %2443 = vmatpush.bf16.msra.mxu0 %v3904_v58  ;;  %2456 = vmatpush.bf16.msra.mxu1 %v4032_v61  ;;  %v4608_v58 = vor.u32 %v5264_v52, %v4607_v49  ;;  %v4463_v61 = vld [vmem:[#allocation3 + $0x8a8] sm:$0xf]  ;;  %v5216_v49 = vld [vmem:[#allocation3 + $0x854] sm:$0xf0] }
 0x101   :  { %2469 = vmatpush.bf16.msra.mxu2 %v4160_v62  ;;  %v5228_v62 = vld [vmem:[#allocation3 + $0x8b4] sm:$0xf0]  ;;  %v4416_v63 = vor.u32 %v5216_v49, %v4415_v48 }
 0x102   :  { %2482 = vmatpush.bf16.msra.mxu3 %v4288_v3  ;;  %v3441_v3 = vld [vmem:[#allocation3 + $0xb8] sm:$0xf0]  ;;  %v4464_v6 = vor.u32 %v5228_v62, %v4463_v61 }
 0x104   :  { %2444 = vmatpush.bf16.msra.mxu0 %v3888_v9  ;;  %2457 = vmatpush.bf16.msra.mxu1 %v4016_v13  ;;  %v3444_v9 = vor.u32 %v4970_v2, %v3441_v3  ;;  %v4575_v13 = vld [vmem:[#allocation3 + $0x988] sm:$0xf]  ;;  %v3396_v2 = vor.u32 %v4958_v54, %v3393_v55  ;;  %v5070_v54 = vld [vmem:[#allocation3 + $0x3cc] sm:$0xf] }
 0x105   :  { %2470 = vmatpush.bf16.msra.mxu2 %v4144_v15  ;;  %v3572_v15 = vor.u32 %v5002_v4, %v3569_v5  ;;  %v4576_v25 = vor.u32 %v5256_v14, %v4575_v13  ;;  %v4399_v3 = vld [vmem:[#allocation3 + $0x828] sm:$0xf]  ;;  %v5212_v4 = vld [vmem:[#allocation3 + $0x834] sm:$0xf0]  ;;  %v3505_v13 = vld [vmem:[#allocation3 + $0x138] sm:$0xf0] }
 0x106   :  { %2483 = vmatpush.bf16.msra.mxu3 %v4272_v19  ;;  %v4998_v19 = vld [vmem:[#allocation3 + $0x18c] sm:$0xf]  ;;  %v4527_v5 = vld [vmem:[#allocation3 + $0x928] sm:$0xf] }
 0x107   :  { %v3556_v37 = vor.u32 %v4998_v19, %v3553_v20  ;;  %v4383_v14 = vld [vmem:[#allocation3 + $0x808] sm:$0xf]  ;;  %v5240_v20 = vld [vmem:[#allocation3 + $0x914] sm:$0xf0] }
 0x108   :  { %2445 = vmatpush.bf16.msra.mxu0 %v3872_v27  ;;  %2458 = vmatpush.bf16.msra.mxu1 %v4000_v38  ;;  %v2239_v18 = vpop.f32.mrf.mxu0  ;;  %v2252_v24 = vpop.f32.mrf.mxu1  ;;  %v4431_v27 = vld [vmem:[#allocation3 + $0x868] sm:$0xf] }
 0x109   :  { %2471 = vmatpush.bf16.msra.mxu2 %v4128_v39  ;;  %v2240_v22 = vadd.f32 %v2239_v18, %v5732_v59  ;;  %v5252_v39 = vld [vmem:[#allocation3 + $0x974] sm:$0xf0]  ;;  %v499_v59 = vmul.f32 %v495_v21, %v5725_v50  ;;  %v4511_v19 = vld [vmem:[#allocation3 + $0x908] sm:$0xf]  ;;  %v4950_v21 = vld [vmem:[#allocation3 + $0xc] sm:$0xf] }
 0x10a   :  { %2484 = vmatpush.bf16.msra.mxu3 %v4256_v43  ;;  %v4994_v43 = vld [vmem:[#allocation3 + $0x16c] sm:$0xf] }
 0x10b   :  { %2446 = vmatmul.bf16.vlgmr.msra.gmra.mxu0 %v5693_v34  ;;  %2459 = vmatmul.bf16.vlgmr.msra.gmra.mxu1 %v5697_v41  ;;  %v5740_v38 = vadd.f32 %v2252_v24, %v2240_v22  ;;  %v3508_v22 = vor.u32 %v4986_v12, %v3505_v13  ;;  %v4982_v24 = vld [vmem:[#allocation3 + $0x10c] sm:$0xf]  ;;  %v4081_v13 = vld [vmem:[#allocation3 + $0x5b8] sm:$0xf0] }
 0x10c   :  { %2490 = vmatpush.bf16.msrb.mxu0 %v4496_v44  ;;  %2503 = vmatpush.bf16.msrb.mxu1 %v4624_v45  ;;  %v3537_v44 = vld [vmem:[#allocation3 + $0x178] sm:$0xf0]  ;;  %v4432_v45 = vor.u32 %v5220_v32, %v4431_v27  ;;  %v5042_v27 = vld [vmem:[#allocation3 + $0x2ec] sm:$0xf] }
 0x10d   :  { %2516 = vmatpush.bf16.msrb.mxu2 %v3476_v46  ;;  %2485 = vmatmul.bf16.vlgmr.msra.gmra.mxu3 %v5695_v36  ;;  %v4560_v46 = vor.u32 %v5252_v39, %v4559_v33  ;;  %v3540_v52 = vor.u32 %v4994_v43, %v3537_v44  ;;  %v3729_v32 = vld [vmem:[#allocation3 + $0x2f8] sm:$0xf0]  ;;  %v5074_v33 = vld [vmem:[#allocation3 + $0x3ec] sm:$0xf]  ;;  %v4384_v39 = vor.u32 %v5208_v16, %v4383_v14 }
 0x10e   :  { %2529 = vmatpush.bf16.msrb.mxu3 %v3604_v51  ;;  %2472 = vmatmul.bf16.vlgmr.msra.gmra.mxu2 %v5691_v31  ;;  %v4543_v51 = vld [vmem:[#allocation3 + $0x948] sm:$0xf]  ;;  %v3985_v43 = vld [vmem:[#allocation3 + $0x4f8] sm:$0xf0]  ;;  %v4512_v44 = vor.u32 %v5240_v20, %v4511_v19  ;;  %v3732_v48 = vor.u32 %v5042_v27, %v3729_v32  ;;  %v3860_v49 = vor.u32 %v5074_v33, %v3857_v40  ;;  %v5130_v12 = vld [vmem:[#allocation3 + $0x5ac] sm:$0xf] }
 0x10f   :  { %v4544_v1 = vor.u32 %v5248_v53, %v4543_v51  ;;  %v3988_v51 = vor.u32 %v5106_v42, %v3985_v43  ;;  %v3713_v53 = vld [vmem:[#allocation3 + $0x2d8] sm:$0xf0]  ;;  %v5062_v19 = vld [vmem:[#allocation3 + $0x38c] sm:$0xf]  ;;  %v4084_v20 = vor.u32 %v5130_v12, %v4081_v13 }
 0x110   :  { %2491 = vmatpush.bf16.msrb.mxu0 %v4480_v57  ;;  %2504 = vmatpush.bf16.msrb.mxu1 %v4608_v58  ;;  %v4990_v57 = vld [vmem:[#allocation3 + $0x14c] sm:$0xf]  ;;  %v3521_v58 = vld [vmem:[#allocation3 + $0x158] sm:$0xf0]  ;;  %v2278_v61 = vpop.f32.mrf.mxu3  ;;  %v2241_v62 = vpop.f32.mrf.mxu0 }
 0x111   :  { %2517 = vmatpush.bf16.msrb.mxu2 %v3460_v60  ;;  %v2265_v56 = vpop.f32.mrf.mxu2  ;;  %v3524_v7 = vor.u32 %v4990_v57, %v3521_v58  ;;  %v5102_v57 = vld [vmem:[#allocation3 + $0x4cc] sm:$0xf]  ;;  %v3969_v58 = vld [vmem:[#allocation3 + $0x4d8] sm:$0xf0] }
 0x112   :  { %2530 = vmatpush.bf16.msrb.mxu3 %v3588_v0  ;;  %v2266_v60 = vadd.f32 %v2265_v56, %v499_v59  ;;  %v2254_v0 = vpop.f32.mrf.mxu1  ;;  %v3841_v56 = vld [vmem:[#allocation3 + $0x3d8] sm:$0xf0]  ;;  %v5026_v32 = vld [vmem:[#allocation3 + $0x26c] sm:$0xf] }
 0x113   :  { %v3972_v0 = vor.u32 %v5102_v57, %v3969_v58  ;;  %v3665_v33 = vld [vmem:[#allocation3 + $0x278] sm:$0xf0]  ;;  %v5090_v43 = vld [vmem:[#allocation3 + $0x46c] sm:$0xf] }
 0x114   :  { %2492 = vmatpush.bf16.msrb.mxu0 %v4464_v6  ;;  %2505 = vmatpush.bf16.msrb.mxu1 %v4592_v11  ;;  %v5743_v6 = vadd.f32 %v2278_v61, %v2266_v60  ;;  %v5244_v11 = vld [vmem:[#allocation3 + $0x934] sm:$0xf0]  ;;  %v5134_v60 = vld [vmem:[#allocation3 + $0x5cc] sm:$0xf]  ;;  %v4097_v61 = vld [vmem:[#allocation3 + $0x5d8] sm:$0xf0] }
 0x115   :  { %2518 = vmatpush.bf16.msrb.mxu2 %v3444_v9  ;;  %v4954_v9 = vld [vmem:[#allocation3 + $0x2c] sm:$0xf]  ;;  %v4528_v17 = vor.u32 %v5244_v11, %v4527_v5  ;;  %v4100_v5 = vor.u32 %v5134_v60, %v4097_v61  ;;  %v3793_v42 = vld [vmem:[#allocation3 + $0x378] sm:$0xf0] }
 0x116   :  { %2531 = vmatpush.bf16.msrb.mxu3 %v3572_v15  ;;  %v4400_v15 = vor.u32 %v5212_v4, %v4399_v3  ;;  %v3380_v18 = vor.u32 %v4954_v9, %v3377_v10  ;;  %v5066_v3 = vld [vmem:[#allocation3 + $0x3ac] sm:$0xf]  ;;  %v5745_v4 = vld [vmem:[#allocation1] sm:$0xff]  ;;  %v5748_v10 = vld [vmem:[#allocation1 + $0x9] sm:$0xff] }
 0x117   :  { %v5098_v11 = vld [vmem:[#allocation3 + $0x4ac] sm:$0xf]  ;;  %v3953_v9 = vld [vmem:[#allocation3 + $0x4b8] sm:$0xf0] }
 0x118   :  { %2493 = vmatpush.bf16.msrb.mxu0 %v4448_v23  ;;  %2506 = vmatpush.bf16.msrb.mxu1 %v4576_v25  ;;  %v3361_v23 = vld [vmem:[#allocation3 + $0x18] sm:$0xf0]  ;;  %v3956_v16 = vor.u32 %v5098_v11, %v3953_v9  ;;  %v5118_v60 = vld [vmem:[#allocation3 + $0x54c] sm:$0xf] }
 0x119   :  { %2519 = vmatpush.bf16.msrb.mxu2 %v3428_v26  ;;  %v3489_v25 = vld [vmem:[#allocation3 + $0x118] sm:$0xf0]  ;;  %v2267_v26 = vpop.f32.mrf.mxu2  ;;  %v3364_v59 = vor.u32 %v4950_v21, %v3361_v23  ;;  %v5082_v12 = vld [vmem:[#allocation3 + $0x42c] sm:$0xf] }
 0x11a   :  { %2532 = vmatpush.bf16.msrb.mxu3 %v3556_v37  ;;  %v2280_v37 = vpop.f32.mrf.mxu3  ;;  %v3809_v21 = vld [vmem:[#allocation3 + $0x398] sm:$0xf0] }
 0x11b   :  { %v3937_v23 = vld [vmem:[#allocation3 + $0x498] sm:$0xf0]  ;;  %v5058_v37 = vld [vmem:[#allocation3 + $0x36c] sm:$0xf] }
 0x11c   :  { %2494 = vmatpush.bf16.msrb.mxu0 %v4432_v45  ;;  %2507 = vmatpush.bf16.msrb.mxu1 %v4560_v46  ;;  %v5138_v45 = vld [vmem:[#allocation3 + $0x5ec] sm:$0xf]  ;;  %v4113_v46 = vld [vmem:[#allocation3 + $0x5f8] sm:$0xf0] }
 0x11d   :  { %2520 = vmatpush.bf16.msrb.mxu2 %v3412_v47  ;;  %v3492_v47 = vor.u32 %v4982_v24, %v3489_v25  ;;  %v4116_v55 = vor.u32 %v5138_v45, %v4113_v46  ;;  %v5126_v24 = vld [vmem:[#allocation3 + $0x58c] sm:$0xf]  ;;  %v4065_v25 = vld [vmem:[#allocation3 + $0x598] sm:$0xf0]  ;;  %v3668_v46 = vor.u32 %v5026_v32, %v3665_v33 }
 0x11e   :  { %2533 = vmatpush.bf16.msrb.mxu3 %v3540_v52  ;;  %v5038_v52 = vld [vmem:[#allocation3 + $0x2cc] sm:$0xf]  ;;  %v4068_v40 = vor.u32 %v5126_v24, %v4065_v25  ;;  %v4049_v45 = vld [vmem:[#allocation3 + $0x578] sm:$0xf0] }
 0x11f   :  { %v3716_v62 = vor.u32 %v5038_v52, %v3713_v53  ;;  %v5054_v52 = vld [vmem:[#allocation3 + $0x34c] sm:$0xf]  ;;  %v3905_v57 = vld [vmem:[#allocation3 + $0x458] sm:$0xf0] }
 0x120   :  { %2495 = vmatpush.bf16.msrb.mxu0 %v4416_v63  ;;  %2508 = vmatpush.bf16.msrb.mxu1 %v4544_v1  ;;  %v3844_v63 = vor.u32 %v5070_v54, %v3841_v56  ;;  %v5034_v1 = vld [vmem:[#allocation3 + $0x2ac] sm:$0xf]  ;;  %v4033_v61 = vld [vmem:[#allocation3 + $0x558] sm:$0xf0] }
 0x121   :  { %2521 = vmatpush.bf16.msrb.mxu2 %v3396_v2  ;;  %v3697_v2 = vld [vmem:[#allocation3 + $0x2b8] sm:$0xf0]  ;;  %v5086_v56 = vld [vmem:[#allocation3 + $0x44c] sm:$0xf]  ;;  %v4036_v11 = vor.u32 %v5118_v60, %v4033_v61 }
 0x122   :  { %2534 = vmatpush.bf16.msrb.mxu3 %v3524_v7  ;;  %v3825_v7 = vld [vmem:[#allocation3 + $0x3b8] sm:$0xf0]  ;;  %v5170_v33 = vld [vmem:[#allocation3 + $0x6ec] sm:$0xf] }
 0x123   :  { %v3828_v14 = vor.u32 %v5066_v3, %v3825_v7  ;;  %v3633_v3 = vld [vmem:[#allocation3 + $0x238] sm:$0xf0] }
 0x124   :  { %2496 = vmatpush.bf16.msrb.mxu0 %v4400_v15  ;;  %2509 = vmatpush.bf16.msrb.mxu1 %v4528_v17  ;;  %v3700_v15 = vor.u32 %v5034_v1, %v3697_v2  ;;  %v5030_v17 = vld [vmem:[#allocation3 + $0x28c] sm:$0xf]  ;;  %v3908_v1 = vor.u32 %v5086_v56, %v3905_v57  ;;  %v3761_v9 = vld [vmem:[#allocation3 + $0x338] sm:$0xf0] }
 0x125   :  { %2522 = vmatpush.bf16.msrb.mxu2 %v3380_v18  ;;  %v3681_v18 = vld [vmem:[#allocation3 + $0x298] sm:$0xf0]  ;;  %v5018_v2 = vld [vmem:[#allocation3 + $0x22c] sm:$0xf] }
 0x126   :  { %2535 = vmatpush.bf16.msrb.mxu3 %v3508_v22  ;;  %v5094_v22 = vld [vmem:[#allocation3 + $0x48c] sm:$0xf]  ;;  %v3889_v13 = vld [vmem:[#allocation3 + $0x438] sm:$0xf0] }
 0x127   :  { %v3940_v27 = vor.u32 %v5094_v22, %v3937_v23  ;;  %v3745_v22 = vld [vmem:[#allocation3 + $0x318] sm:$0xf0]  ;;  %v5078_v23 = vld [vmem:[#allocation3 + $0x40c] sm:$0xf] }
 0x128   :  { %2497 = vmatpush.bf16.msrb.mxu0 %v4384_v39  ;;  %2510 = vmatpush.bf16.msrb.mxu1 %v4512_v44  ;;  %v5753_v26 = vpop.f32.mrf.mxu0  ;;  %v5755_v39 = vpop.f32.mrf.mxu1  ;;  %v3921_v44 = vld [vmem:[#allocation3 + $0x478] sm:$0xf0]  ;;  %v5198_v57 = vld [vmem:[#allocation3 + $0x7cc] sm:$0xf] }
 0x129   :  { %2523 = vmatpush.bf16.msrb.mxu2 %v3364_v59  ;;  %v5122_v59 = vld [vmem:[#allocation3 + $0x56c] sm:$0xf]  ;;  %v4225_v56 = vld [vmem:[#allocation3 + $0x6d8] sm:$0xf0] }
 0x12a   :  { %2536 = vmatpush.bf16.msrb.mxu3 %v3492_v47  ;;  %v3796_v47 = vor.u32 %v5058_v37, %v3793_v42  ;;  %v4052_v54 = vor.u32 %v5122_v59, %v4049_v45  ;;  %v4241_v37 = vld [vmem:[#allocation3 + $0x6f8] sm:$0xf0] }
 0x12b   :  { %2498 = vmatmul.bf16.vlgmr.msrb.gmra.mxu0 %v5745_v4  ;;  %2511 = vmatmul.bf16.vlgmr.msrb.gmra.mxu1 %v5748_v10  ;;  %v4497_v59 = vld [vmem:[#allocation3 + $0x8f8] sm:$0xf0] }
 0x12c   :  { %2542 = vmatpush.bf16.msra.mxu0 %v3732_v48  ;;  %2555 = vmatpush.bf16.msra.mxu1 %v3860_v49  ;;  %v3924_v48 = vor.u32 %v5090_v43, %v3921_v44  ;;  %v5022_v49 = vld [vmem:[#allocation3 + $0x24c] sm:$0xf]  ;;  %v4369_v43 = vld [vmem:[#allocation3 + $0x7f8] sm:$0xf0] }
 0x12d   :  { %2568 = vmatpush.bf16.msra.mxu2 %v3988_v51  ;;  %2537 = vmatmul.bf16.vlgmr.msrb.gmra.mxu3 %v5682_v35  ;;  %v3812_v35 = vor.u32 %v5062_v19, %v3809_v21  ;;  %v3649_v51 = vld [vmem:[#allocation3 + $0x258] sm:$0xf0]  ;;  %v5046_v21 = vld [vmem:[#allocation3 + $0x30c] sm:$0xf] }
 0x12e   :  { %2581 = vmatpush.bf16.msra.mxu3 %v4116_v55  ;;  %2524 = vmatmul.bf16.vlgmr.msrb.gmra.mxu2 %v5678_v29  ;;  %v3684_v29 = vor.u32 %v5030_v17, %v3681_v18  ;;  %v3777_v55 = vld [vmem:[#allocation3 + $0x358] sm:$0xf0]  ;;  %v5014_v17 = vld [vmem:[#allocation3 + $0x20c] sm:$0xf]  ;;  %v3748_v45 = vor.u32 %v5046_v21, %v3745_v22 }
 0x12f   :  { %v3617_v18 = vld [vmem:[#allocation3 + $0x218] sm:$0xf0]  ;;  %v5234_v44 = vld [vmem:[#allocation3 + $0x8ec] sm:$0xf] }
 0x130   :  { %2543 = vmatpush.bf16.msra.mxu0 %v3716_v62  ;;  %2556 = vmatpush.bf16.msra.mxu1 %v3844_v63  ;;  %v5759_v58 = vpop.f32.mrf.mxu3  ;;  %v3652_v62 = vor.u32 %v5022_v49, %v3649_v51  ;;  %v2293_v63 = vpop.f32.mrf.mxu0  ;;  %v3620_v42 = vor.u32 %v5014_v17, %v3617_v18  ;;  %v4244_v51 = vor.u32 %v5170_v33, %v4241_v37  ;;  %v4353_v61 = vld [vmem:[#allocation3 + $0x7d8] sm:$0xf0]  ;;  %v5158_v21 = vld [vmem:[#allocation3 + $0x68c] sm:$0xf] }
 0x131   :  { %2569 = vmatpush.bf16.msra.mxu2 %v3972_v0  ;;  %v5757_v53 = vpop.f32.mrf.mxu2  ;;  %v3780_v0 = vor.u32 %v5054_v52, %v3777_v55  ;;  %v2306_v7 = vpop.f32.mrf.mxu1  ;;  %v5166_v55 = vld [vmem:[#allocation3 + $0x6cc] sm:$0xf]  ;;  %v4481_v63 = vld [vmem:[#allocation3 + $0x8d8] sm:$0xf0] }
 0x132   :  { %2582 = vmatpush.bf16.msra.mxu3 %v4100_v5  ;;  %v5050_v5 = vld [vmem:[#allocation3 + $0x32c] sm:$0xf]  ;;  %v4593_v17 = vld [vmem:[#allocation3 + $0x9b8] sm:$0xf0] }
 0x133   :  { %v3764_v19 = vor.u32 %v5050_v5, %v3761_v9  ;;  %v5162_v7 = vld [vmem:[#allocation3 + $0x6ac] sm:$0xf]  ;;  %v4193_v22 = vld [vmem:[#allocation3 + $0x698] sm:$0xf0] }
 0x134   :  { %2544 = vmatpush.bf16.msra.mxu0 %v3700_v15  ;;  %2557 = vmatpush.bf16.msra.mxu1 %v3828_v14  ;;  %v5114_v15 = vld [vmem:[#allocation3 + $0x52c] sm:$0xf]  ;;  %v4017_v14 = vld [vmem:[#allocation3 + $0x538] sm:$0xf0] }
 0x135   :  { %2570 = vmatpush.bf16.msra.mxu2 %v3956_v16  ;;  %v3636_v16 = vor.u32 %v5018_v2, %v3633_v3  ;;  %v4020_v25 = vor.u32 %v5114_v15, %v4017_v14  ;;  %v4228_v2 = vor.u32 %v5166_v55, %v4225_v56  ;;  %v4356_v3 = vor.u32 %v5198_v57, %v4353_v61  ;;  %v5194_v9 = vld [vmem:[#allocation3 + $0x7ac] sm:$0xf]  ;;  %v4465_v14 = vld [vmem:[#allocation3 + $0x8b8] sm:$0xf0] }
 0x136   :  { %2583 = vmatpush.bf16.msra.mxu3 %v4084_v20  ;;  %v3892_v20 = vor.u32 %v5082_v12, %v3889_v13  ;;  %v4337_v13 = vld [vmem:[#allocation3 + $0x7b8] sm:$0xf0]  ;;  %v5226_v15 = vld [vmem:[#allocation3 + $0x8ac] sm:$0xf] }
 0x137   :  { %v5154_v37 = vld [vmem:[#allocation3 + $0x66c] sm:$0xf] }
 0x138   :  { %2545 = vmatpush.bf16.msra.mxu0 %v3684_v29  ;;  %2558 = vmatpush.bf16.msra.mxu1 %v3812_v35  ;;  %v3873_v29 = vld [vmem:[#allocation3 + $0x418] sm:$0xf0]  ;;  %v5110_v35 = vld [vmem:[#allocation3 + $0x50c] sm:$0xf]  ;;  %v2332_v32 = vpop.f32.mrf.mxu3 }
 0x139   :  { %2571 = vmatpush.bf16.msra.mxu2 %v3940_v27  ;;  %v2319_v24 = vpop.f32.mrf.mxu2  ;;  %v4001_v27 = vld [vmem:[#allocation3 + $0x518] sm:$0xf0]  ;;  %v5182_v55 = vld [vmem:[#allocation3 + $0x74c] sm:$0xf] }
 0x13a   :  { %2584 = vmatpush.bf16.msra.mxu3 %v4068_v40  ;;  %v5202_v40 = vld [vmem:[#allocation3 + $0x7ec] sm:$0xf]  ;;  %v4004_v49 = vor.u32 %v5110_v35, %v4001_v27  ;;  %v4321_v24 = vld [vmem:[#allocation3 + $0x798] sm:$0xf0]  ;;  %v4196_v27 = vor.u32 %v5158_v21, %v4193_v22 }
 0x13b   :  { %v4372_v52 = vor.u32 %v5202_v40, %v4369_v43  ;;  %v4177_v40 = vld [vmem:[#allocation3 + $0x678] sm:$0xf0]  ;;  %v5214_v61 = vld [vmem:[#allocation3 + $0x84c] sm:$0xf] }
 0x13c   :  { %2546 = vmatpush.bf16.msra.mxu0 %v3668_v46  ;;  %2559 = vmatpush.bf16.msra.mxu1 %v3796_v47  ;;  %v3876_v46 = vor.u32 %v5078_v23, %v3873_v29  ;;  %v5266_v47 = vld [vmem:[#allocation3 + $0x9ec] sm:$0xf]  ;;  %v4449_v29 = vld [vmem:[#allocation3 + $0x898] sm:$0xf0] }
 0x13d   :  { %2572 = vmatpush.bf16.msra.mxu2 %v3924_v48  ;;  %v4625_v48 = vld [vmem:[#allocation3 + $0x9f8] sm:$0xf0]  ;;  %v5142_v21 = vld [vmem:[#allocation3 + $0x60c] sm:$0xf] }
 0x13e   :  { %2585 = vmatpush.bf16.msra.mxu3 %v4052_v54  ;;  %v4500_v54 = vor.u32 %v5234_v44, %v4497_v59  ;;  %v4628_v60 = vor.u32 %v5266_v47, %v4625_v48  ;;  %v4305_v44 = vld [vmem:[#allocation3 + $0x778] sm:$0xf0]  ;;  %v5218_v59 = vld [vmem:[#allocation3 + $0x86c] sm:$0xf]  ;;  %v4180_v48 = vor.u32 %v5154_v37, %v4177_v40  ;;  %v4687_v40 = vld [vmem:[#allocation8 + $0x70] sm:$0xf] }
 0x13f   :  { %v4561_v47 = vld [vmem:[#allocation3 + $0x978] sm:$0xf0] }
 0x140   :  { %2547 = vmatpush.bf16.msra.mxu0 %v3652_v62  ;;  %2560 = vmatpush.bf16.msra.mxu1 %v3780_v0  ;;  %v5230_v62 = vld [vmem:[#allocation3 + $0x8cc] sm:$0xf]  ;;  %v4513_v37 = vld [vmem:[#allocation3 + $0x918] sm:$0xf0] }
 0x141   :  { %2573 = vmatpush.bf16.msra.mxu2 %v3908_v1  ;;  %v5262_v0 = vld [vmem:[#allocation3 + $0x9cc] sm:$0xf]  ;;  %v4609_v1 = vld [vmem:[#allocation3 + $0x9d8] sm:$0xf0]  ;;  %v4484_v5 = vor.u32 %v5230_v62, %v4481_v63 }
 0x142   :  { %2586 = vmatpush.bf16.msra.mxu3 %v4036_v11  ;;  %v4209_v11 = vld [vmem:[#allocation3 + $0x6b8] sm:$0xf0]  ;;  %v4612_v12 = vor.u32 %v5262_v0, %v4609_v1  ;;  %v5246_v0 = vld [vmem:[#allocation3 + $0x94c] sm:$0xf] }
 0x143   :  { %v4212_v18 = vor.u32 %v5162_v7, %v4209_v11  ;;  %v4417_v62 = vld [vmem:[#allocation3 + $0x858] sm:$0xf0] }
 0x144   :  { %2548 = vmatpush.bf16.msra.mxu0 %v3636_v16  ;;  %2561 = vmatpush.bf16.msra.mxu1 %v3764_v19  ;;  %v5258_v16 = vld [vmem:[#allocation3 + $0x9ac] sm:$0xf]  ;;  %v4340_v19 = vor.u32 %v5194_v9, %v4337_v13  ;;  %v4545_v1 = vld [vmem:[#allocation3 + $0x958] sm:$0xf0]  ;;  %v4420_v11 = vor.u32 %v5214_v61, %v4417_v62  ;;  %v4671_v62 = vld [vmem:[#allocation8 + $0x50] sm:$0xf] }
 0x145   :  { %2574 = vmatpush.bf16.msra.mxu2 %v3892_v20  ;;  %v4468_v20 = vor.u32 %v5226_v15, %v4465_v14  ;;  %v4596_v23 = vor.u32 %v5258_v16, %v4593_v17  ;;  %v5146_v9 = vld [vmem:[#allocation3 + $0x62c] sm:$0xf]  ;;  %v4548_v15 = vor.u32 %v5246_v0, %v4545_v1  ;;  %v4273_v14 = vld [vmem:[#allocation3 + $0x738] sm:$0xf0]  ;;  %v5280_v0 = vld [vmem:[#allocation8 + $0x54] sm:$0xf0] }
 0x146   :  { %2587 = vmatpush.bf16.msra.mxu3 %v4020_v25  ;;  %v5222_v25 = vld [vmem:[#allocation3 + $0x88c] sm:$0xf]  ;;  %v4401_v17 = vld [vmem:[#allocation3 + $0x838] sm:$0xf0]  ;;  %v5296_v1 = vld [vmem:[#allocation8 + $0xd4] sm:$0xf0] }
 0x147   :  { %v4452_v33 = vor.u32 %v5222_v25, %v4449_v29  ;;  %v5178_v13 = vld [vmem:[#allocation3 + $0x72c] sm:$0xf]  ;;  %v4257_v25 = vld [vmem:[#allocation3 + $0x718] sm:$0xf0] }
 0x148   :  { %2549 = vmatpush.bf16.msra.mxu0 %v3620_v42  ;;  %2562 = vmatpush.bf16.msra.mxu1 %v3748_v45  ;;  %v5765_v35 = vpop.f32.mrf.mxu0  ;;  %v5767_v32 = vpop.f32.mrf.mxu1  ;;  %v5186_v42 = vld [vmem:[#allocation3 + $0x76c] sm:$0xf]  ;;  %v4433_v45 = vld [vmem:[#allocation3 + $0x878] sm:$0xf0]  ;;  %v4276_v22 = vor.u32 %v5178_v13, %v4273_v14  ;;  %v5294_v13 = vld [vmem:[#allocation8 + $0xc4] sm:$0xf0] }
 0x149   :  { %2575 = vmatpush.bf16.msra.mxu2 %v3876_v46  ;;  %v5250_v46 = vld [vmem:[#allocation3 + $0x96c] sm:$0xf] }
 0x14a   :  { %2588 = vmatpush.bf16.msra.mxu3 %v4004_v49  ;;  %v4308_v49 = vor.u32 %v5186_v42, %v4305_v44  ;;  %v4564_v56 = vor.u32 %v5250_v46, %v4561_v47  ;;  %v5210_v16 = vld [vmem:[#allocation3 + $0x82c] sm:$0xf]  ;;  %v5284_v42 = vld [vmem:[#allocation8 + $0x74] sm:$0xf0] }
 0x14b   :  { %2550 = vmatmul.bf16.vlgmr.msra.gmra.mxu0 %v5676_v28  ;;  %2563 = vmatmul.bf16.vlgmr.msra.gmra.mxu1 %v5680_v30  ;;  %v5254_v28 = vld [vmem:[#allocation3 + $0x98c] sm:$0xf] }
 0x14c   :  { %2594 = vmatpush.bf16.msrb.mxu0 %v4244_v51  ;;  %2607 = vmatpush.bf16.msrb.mxu1 %v4372_v52  ;;  %v4436_v51 = vor.u32 %v5218_v59, %v4433_v45  ;;  %v5150_v52 = vld [vmem:[#allocation3 + $0x64c] sm:$0xf]  ;;  %v4751_v59 = vld [vmem:[#allocation8 + $0xf0] sm:$0xf]  ;;  %v5300_v45 = vld [vmem:[#allocation8 + $0xf4] sm:$0xf0] }
 0x14d   :  { %2620 = vmatpush.bf16.msrb.mxu2 %v4500_v54  ;;  %2589 = vmatmul.bf16.vlgmr.msra.gmra.mxu3 %v5697_v41  ;;  %v4577_v41 = vld [vmem:[#allocation3 + $0x998] sm:$0xf0] }
 0x14e   :  { %2633 = vmatpush.bf16.msrb.mxu3 %v4628_v60  ;;  %2576 = vmatmul.bf16.vlgmr.msra.gmra.mxu2 %v5693_v34  ;;  %v5190_v34 = vld [vmem:[#allocation3 + $0x78c] sm:$0xf]  ;;  %v4580_v43 = vor.u32 %v5254_v28, %v4577_v41  ;;  %v4161_v54 = vld [vmem:[#allocation3 + $0x658] sm:$0xf0] }
 0x14f   :  { %v4324_v30 = vor.u32 %v5190_v34, %v4321_v24  ;;  %v4289_v60 = vld [vmem:[#allocation3 + $0x758] sm:$0xf0]  ;;  %v4404_v34 = vor.u32 %v5210_v16, %v4401_v17  ;;  %v5174_v24 = vld [vmem:[#allocation3 + $0x70c] sm:$0xf] }
 0x150   :  { %2595 = vmatpush.bf16.msrb.mxu0 %v4228_v2  ;;  %2608 = vmatpush.bf16.msrb.mxu1 %v4356_v3  ;;  %v5771_v63 = vpop.f32.mrf.mxu3  ;;  %v2345_v2 = vpop.f32.mrf.mxu0  ;;  %v4164_v3 = vor.u32 %v5150_v52, %v4161_v54  ;;  %v4292_v7 = vor.u32 %v5182_v55, %v4289_v60  ;;  %v5206_v28 = vld [vmem:[#allocation3 + $0x80c] sm:$0xf]  ;;  %v4385_v41 = vld [vmem:[#allocation3 + $0x818] sm:$0xf0]  ;;  %v4260_v46 = vor.u32 %v5174_v24, %v4257_v25  ;;  %v4679_v54 = vld [vmem:[#allocation8 + $0x60] sm:$0xf] }
 0x151   :  { %2621 = vmatpush.bf16.msrb.mxu2 %v4484_v5  ;;  %v5769_v57 = vpop.f32.mrf.mxu2  ;;  %v2358_v5 = vpop.f32.mrf.mxu1  ;;  %v4388_v47 = vor.u32 %v5206_v28, %v4385_v41  ;;  %v4752_v52 = vor.u32 %v5300_v45, %v4751_v59  ;;  %v5298_v55 = vld [vmem:[#allocation8 + $0xe4] sm:$0xf0]  ;;  %v4815_v2 = vld [vmem:[#allocation8 + $0x170] sm:$0xf]  ;;  %v4647_v41 = vld [vmem:[#allocation8 + $0x20] sm:$0xf] }
 0x152   :  { %2634 = vmatpush.bf16.msrb.mxu3 %v4612_v12  ;;  %v4145_v12 = vld [vmem:[#allocation3 + $0x638] sm:$0xf0] }
 0x154   :  { %2596 = vmatpush.bf16.msrb.mxu0 %v4212_v18  ;;  %2609 = vmatpush.bf16.msrb.mxu1 %v4340_v19  ;;  %v5242_v18 = vld [vmem:[#allocation3 + $0x92c] sm:$0xf]  ;;  %v4529_v19 = vld [vmem:[#allocation3 + $0x938] sm:$0xf0] }
 0x155   :  { %2622 = vmatpush.bf16.msrb.mxu2 %v4468_v20  ;;  %v4148_v20 = vor.u32 %v5146_v9, %v4145_v12  ;;  %v4532_v29 = vor.u32 %v5242_v18, %v4529_v19  ;;  %v5278_v9 = vld [vmem:[#allocation8 + $0x44] sm:$0xf0]  ;;  %v4727_v12 = vld [vmem:[#allocation8 + $0xc0] sm:$0xf]  ;;  %v4655_v18 = vld [vmem:[#allocation8 + $0x30] sm:$0xf] }
 0x156   :  { %2635 = vmatpush.bf16.msrb.mxu3 %v4596_v23  ;;  %v4129_v23 = vld [vmem:[#allocation3 + $0x618] sm:$0xf0]  ;;  %v4728_v17 = vor.u32 %v5294_v13, %v4727_v12  ;;  %v4719_v19 = vld [vmem:[#allocation8 + $0xb0] sm:$0xf] }
 0x157   :  { %v4132_v44 = vor.u32 %v5142_v21, %v4129_v23  ;;  %v5292_v21 = vld [vmem:[#allocation8 + $0xb4] sm:$0xf0] }
 0x158   :  { %2597 = vmatpush.bf16.msrb.mxu0 %v4196_v27  ;;  %2610 = vmatpush.bf16.msrb.mxu1 %v4324_v30  ;;  %v5238_v27 = vld [vmem:[#allocation3 + $0x90c] sm:$0xf]  ;;  %v4720_v28 = vor.u32 %v5292_v21, %v4719_v19  ;;  %v5304_v19 = vld [vmem:[#allocation8 + $0x114] sm:$0xf0] }
 0x159   :  { %2623 = vmatpush.bf16.msrb.mxu2 %v4452_v33  ;;  %v2371_v30 = vpop.f32.mrf.mxu2  ;;  %v2292_v33 = vadd.f32 %v5753_v26, %v5743_v6  ;;  %v5282_v6 = vld [vmem:[#allocation8 + $0x64] sm:$0xf0]  ;;  %v4743_v26 = vld [vmem:[#allocation8 + $0xe0] sm:$0xf]  ;;  %v5297_v21 = vld [vmem:[#allocation8 + $0xe4] sm:$0xf] }
 0x15a   :  { %2636 = vmatpush.bf16.msrb.mxu3 %v4580_v43  ;;  %v2384_v43 = vpop.f32.mrf.mxu3  ;;  %v4744_v61 = vor.u32 %v5298_v55, %v4743_v26  ;;  %v4711_v30 = vld [vmem:[#allocation8 + $0xa0] sm:$0xf]  ;;  %v5308_v26 = vld [vmem:[#allocation8 + $0x134] sm:$0xf0] }
 0x15c   :  { %2598 = vmatpush.bf16.msrb.mxu0 %v4180_v48  ;;  %2611 = vmatpush.bf16.msrb.mxu1 %v4308_v49  ;;  %v4516_v48 = vor.u32 %v5238_v27, %v4513_v37  ;;  %v4688_v49 = vor.u32 %v5284_v42, %v4687_v40  ;;  %v5274_v27 = vld [vmem:[#allocation8 + $0x24] sm:$0xf0]  ;;  %v4791_v42 = vld [vmem:[#allocation8 + $0x140] sm:$0xf] }
 0x15d   :  { %2624 = vmatpush.bf16.msrb.mxu2 %v4436_v51  ;;  %v2305_v51 = vadd.f32 %v5755_v39, %v2292_v33  ;;  %v4735_v39 = vld [vmem:[#allocation8 + $0xd0] sm:$0xf]  ;;  %v5290_v37 = vld [vmem:[#allocation8 + $0xa4] sm:$0xf0] }
 0x15e   :  { %2637 = vmatpush.bf16.msrb.mxu3 %v4564_v56  ;;  %v4680_v56 = vor.u32 %v5282_v6, %v4679_v54  ;;  %v5288_v54 = vld [vmem:[#allocation8 + $0x94] sm:$0xf0]  ;;  %v4783_v6 = vld [vmem:[#allocation8 + $0x130] sm:$0xf] }
 0x15f   :  { %v2318_v60 = vadd.f32 %v5757_v53, %v2305_v51  ;;  %v4703_v51 = vld [vmem:[#allocation8 + $0x90] sm:$0xf]  ;;  %v4784_v55 = vor.u32 %v5308_v26, %v4783_v6  ;;  %v4809_v6 = vld [vmem:[#allocation8 + $0x168] sm:$0xf0] }
 0x160   :  { %2599 = vmatpush.bf16.msrb.mxu0 %v4164_v3  ;;  %2612 = vmatpush.bf16.msrb.mxu1 %v4292_v7  ;;  %v5316_v3 = vld [vmem:[#allocation8 + $0x174] sm:$0xf0]  ;;  %v4672_v7 = vor.u32 %v5280_v0, %v4671_v62 }
 0x161   :  { %2625 = vmatpush.bf16.msrb.mxu2 %v4420_v11  ;;  %v4816_v5 = vor.u32 %v5316_v3, %v4815_v2  ;;  %v2331_v53 = vadd.f32 %v5759_v58, %v2318_v60  ;;  %v4663_v11 = vld [vmem:[#allocation8 + $0x40] sm:$0xf]  ;;  %v5276_v58 = vld [vmem:[#allocation8 + $0x34] sm:$0xf0]  ;;  %v5283_v2 = vld [vmem:[#allocation8 + $0x74] sm:$0xf] }
 0x162   :  { %2638 = vmatpush.bf16.msrb.mxu3 %v4548_v15  ;;  %v5314_v15 = vld [vmem:[#allocation8 + $0x164] sm:$0xf0]  ;;  %v4664_v16 = vor.u32 %v5278_v9, %v4663_v11  ;;  %v4656_v25 = vor.u32 %v5276_v58, %v4655_v18  ;;  %v4631_v60 = vld [vmem:[#allocation8] sm:$0xf]  ;;  %v5299_v11 = vld [vmem:[#allocation8 + $0xf4] sm:$0xf] }
 0x163   :  { %v4753_v9 = vld [vmem:[#allocation8 + $0xf8] sm:$0xf0]  ;;  %v4681_v18 = vld [vmem:[#allocation8 + $0x68] sm:$0xf0]  ;;  %v4767_v58 = vld [vmem:[#allocation8 + $0x110] sm:$0xf] }
 0x164   :  { %2600 = vmatpush.bf16.msrb.mxu0 %v4148_v20  ;;  %2613 = vmatpush.bf16.msrb.mxu1 %v4276_v22  ;;  %v4799_v22 = vld [vmem:[#allocation8 + $0x150] sm:$0xf] }
 0x165   :  { %2626 = vmatpush.bf16.msrb.mxu2 %v4404_v34  ;;  %v5312_v34 = vld [vmem:[#allocation8 + $0x154] sm:$0xf0] }
 0x166   :  { %2639 = vmatpush.bf16.msrb.mxu3 %v4532_v29  ;;  %v4800_v24 = vor.u32 %v5312_v34, %v4799_v22  ;;  %v4745_v22 = vld [vmem:[#allocation8 + $0xe8] sm:$0xf0]  ;;  %v4768_v34 = vor.u32 %v5304_v19, %v4767_v58  ;;  %v5307_v19 = vld [vmem:[#allocation8 + $0x134] sm:$0xf] }
 0x168   :  { %2601 = vmatpush.bf16.msrb.mxu0 %v4132_v44  ;;  %2614 = vmatpush.bf16.msrb.mxu1 %v4260_v46  ;;  %v5785_v20 = vpop.f32.mrf.mxu1 }
 0x169   :  { %2627 = vmatpush.bf16.msrb.mxu2 %v4388_v47  ;;  %v4712_v47 = vor.u32 %v5290_v37, %v4711_v30  ;;  %v4748_v30 = vor.u32 %v5297_v21, %v4745_v22  ;;  %v5279_v37 = vld [vmem:[#allocation8 + $0x54] sm:$0xf]  ;;  %v4785_v21 = vld [vmem:[#allocation8 + $0x138] sm:$0xf0] }
 0x16a   :  { %2640 = vmatpush.bf16.msrb.mxu3 %v4516_v48  ;;  %v4639_v48 = vld [vmem:[#allocation8 + $0x10] sm:$0xf]  ;;  %v5287_v22 = vld [vmem:[#allocation8 + $0x94] sm:$0xf] }
 0x16b   :  { %2602 = vmatmul.bf16.vlgmr.msrb.gmra.mxu0 %v5691_v31  ;;  %2615 = vmatmul.bf16.vlgmr.msrb.gmra.mxu1 %v5695_v36  ;;  %v4736_v31 = vor.u32 %v5296_v1, %v4735_v39  ;;  %v4807_v36 = vld [vmem:[#allocation8 + $0x160] sm:$0xf]  ;;  %v5286_v1 = vld [vmem:[#allocation8 + $0x84] sm:$0xf0] }
 0x16c   :  { %3058 = vmatpush.bf16.msra.mxu0 %v4688_v49  ;;  %3071 = vmatpush.bf16.msra.mxu1 %v4752_v52  ;;  %v4808_v14 = vor.u32 %v5314_v15, %v4807_v36  ;;  %v5272_v49 = vld [vmem:[#allocation8 + $0x14] sm:$0xf0]  ;;  %v4695_v39 = vld [vmem:[#allocation8 + $0x80] sm:$0xf]  ;;  %v488_v36 = vperm.slane %v5722_v8, 4 }
 0x16d   :  { %2628 = vmatmul.bf16.vlgmr.msrb.gmra.mxu2 %v5745_v4  ;;  %2641 = vmatmul.bf16.vlgmr.msrb.gmra.mxu3 %v5748_v10  ;;  %v2344_v4 = vadd.f32 %v5765_v35, %v2331_v53  ;;  %v5783_v10 = vpop.f32.mrf.mxu0  ;;  %v5788_v35 = vld [vmem:[#allocation7] sm:$0xf]  ;;  %v4775_v53 = vld [vmem:[#allocation8 + $0x120] sm:$0xf] }
 0x16e   :  { %3084 = vmatpush.bf16.msra.mxu2 %v4816_v5  ;;  %v2648_v44 = vperm.slane %v5788_v35, 0  ;;  %v2649_v59 = vperm.slane %v5788_v35, 1  ;;  %v4689_v5 = vld [vmem:[#allocation8 + $0x78] sm:$0xf0] }
 0x16f   :  { %v2357_v23 = vadd.f32 %v5767_v32, %v2344_v4  ;;  %v5310_v32 = vld [vmem:[#allocation8 + $0x144] sm:$0xf0]  ;;  %v4696_v4 = vor.u32 %v5286_v1, %v4695_v39  ;;  %v4721_v39 = vld [vmem:[#allocation8 + $0xb8] sm:$0xf0] }
 0x170   :  { %3059 = vmatpush.bf16.msra.mxu0 %v4680_v56  ;;  %3072 = vmatpush.bf16.msra.mxu1 %v4744_v61  ;;  %v5793_v40 = vpop.f32.mrf.mxu3  ;;  %v4792_v43 = vor.u32 %v5310_v32, %v4791_v42  ;;  %v2410_v52 = vpop.f32.mrf.mxu1  ;;  %v4640_v56 = vor.u32 %v5272_v49, %v4639_v48  ;;  %v5270_v61 = vld [vmem:[#allocation8 + $0x4] sm:$0xf0]  ;;  %v2656_v62 = vadd.f32 %v2648_v44, %v5740_v38  ;;  %v4673_v42 = vld [vmem:[#allocation8 + $0x58] sm:$0xf0]  ;;  %v5295_v44 = vld [vmem:[#allocation8 + $0xd4] sm:$0xf] }
 0x171   :  { %v2370_v29 = vadd.f32 %v5769_v57, %v2357_v23  ;;  %v5791_v33 = vpop.f32.mrf.mxu2  ;;  %v4648_v57 = vor.u32 %v5274_v27, %v4647_v41  ;;  %v4632_v13 = vor.u32 %v5270_v61, %v4631_v60  ;;  %v496_v23 = vperm.slane %v488_v36, 0  ;;  %v5315_v41 = vld [vmem:[#allocation8 + $0x174] sm:$0xf]  ;;  %v5277_v48 = vld [vmem:[#allocation8 + $0x44] sm:$0xf] }
 0x172   :  { %3085 = vmatpush.bf16.msra.mxu2 %v4808_v14  ;;  %v2660_v38 = vmax.f32 %v2656_v62, 0.0  ;;  %v4692_v14 = vor.u32 %v5283_v2, %v4689_v5  ;;  %v4665_v49 = vld [vmem:[#allocation8 + $0x48] sm:$0xf0]  ;;  %v5275_v61 = vld [vmem:[#allocation8 + $0x34] sm:$0xf] }
 0x173   :  { %v2383_v46 = vadd.f32 %v5771_v63, %v2370_v29  ;;  %v4704_v63 = vor.u32 %v5288_v54, %v4703_v51  ;;  %v4759_v29 = vld [vmem:[#allocation8 + $0x100] sm:$0xf]  ;;  %v5293_v51 = vld [vmem:[#allocation8 + $0xc4] sm:$0xf]  ;;  %v4729_v52 = vld [vmem:[#allocation8 + $0xc8] sm:$0xf0] }
 0x174   :  { %3060 = vmatpush.bf16.msra.mxu0 %v4672_v7  ;;  %3073 = vmatpush.bf16.msra.mxu1 %v4736_v31  ;;  %v5306_v31 = vld [vmem:[#allocation8 + $0x124] sm:$0xf0]  ;;  %v5313_v54 = vld [vmem:[#allocation8 + $0x164] sm:$0xf]  ;;  %v4732_v60 = vor.u32 %v5293_v51, %v4729_v52  ;;  %v4657_v62 = vld [vmem:[#allocation8 + $0x38] sm:$0xf0] }
 0x175   :  { %v2397_v45 = vpop.f32.mrf.mxu0  ;;  %v2657_v0 = vadd.f32 %v2649_v59, %v2383_v46  ;;  %v4776_v12 = vor.u32 %v5306_v31, %v4775_v53  ;;  %v4737_v59 = vld [vmem:[#allocation8 + $0xd8] sm:$0xf0]  ;;  %v500_v46 = vmul.f32 %v496_v23, %v5725_v50  ;;  %v4812_v26 = vor.u32 %v5313_v54, %v4809_v6  ;;  %v5311_v2 = vld [vmem:[#allocation8 + $0x154] sm:$0xf]  ;;  %v5309_v36 = vld [vmem:[#allocation8 + $0x144] sm:$0xf] }
 0x176   :  { %3086 = vmatpush.bf16.msra.mxu2 %v4800_v24  ;;  %v5800_v24 = vpack.c.bf16 %v2660_v38, %v2660_v38  ;;  %v4676_v45 = vor.u32 %v5279_v37, %v4673_v42  ;;  %v4793_v38 = vld [vmem:[#allocation8 + $0x148] sm:$0xf0] }
 0x177   :  { %v2661_v15 = vmax.f32 %v2657_v0, 0.0  ;;  %v5291_v0 = vld [vmem:[#allocation8 + $0xb4] sm:$0xf]  ;;  %v4633_v42 = vld [vmem:[#allocation8 + $0x8] sm:$0xf0] }
 0x178   :  { %3061 = vmatpush.bf16.msra.mxu0 %v4664_v16  ;;  %3074 = vmatpush.bf16.msra.mxu1 %v4728_v17  ;;  %v2436_v7 = vpop.f32.mrf.mxu3  ;;  %v5281_v16 = vld [vmem:[#allocation8 + $0x64] sm:$0xf]  ;;  %v4756_v17 = vor.u32 %v5299_v11, %v4753_v9  ;;  %v4724_v31 = vor.u32 %v5291_v0, %v4721_v39  ;;  %v4761_v52 = vld [vmem:[#allocation8 + $0x108] sm:$0xf0] }
 0x179   :  { %v2423_v3 = vpop.f32.mrf.mxu2  ;;  %v5802_v27 = vpack.c.bf16 %v2661_v15, %v2661_v15  ;;  %v4660_v7 = vor.u32 %v5275_v61, %v4657_v62  ;;  %v5273_v11 = vld [vmem:[#allocation8 + $0x24] sm:$0xf]  ;;  %v5330_v62 = vld [vmem:[#allocation8 + $0x1e4] sm:$0xf0] }
 0x17a   :  { %3087 = vmatpush.bf16.msra.mxu2 %v4792_v43  ;;  %v4817_v43 = vld [vmem:[#allocation8 + $0x178] sm:$0xf0]  ;;  %v5289_v9 = vld [vmem:[#allocation8 + $0xa4] sm:$0xf] }
 0x17b   :  { %v4801_v3 = vld [vmem:[#allocation8 + $0x158] sm:$0xf0] }
 0x17c   :  { %3062 = vmatpush.bf16.msra.mxu0 %v4656_v25  ;;  %3075 = vmatpush.bf16.msra.mxu1 %v4720_v28  ;;  %v4684_v25 = vor.u32 %v5281_v16, %v4681_v18  ;;  %v5302_v28 = vld [vmem:[#allocation8 + $0x104] sm:$0xf0]  ;;  %v4804_v5 = vor.u32 %v5311_v2, %v4801_v3  ;;  %v5271_v16 = vld [vmem:[#allocation8 + $0x14] sm:$0xf]  ;;  %v2650_v3 = vperm.slane %v5788_v35, 2 }
 0x17d   :  { %v4760_v32 = vor.u32 %v5302_v28, %v4759_v29  ;;  %v5305_v29 = vld [vmem:[#allocation8 + $0x124] sm:$0xf]  ;;  %v4777_v28 = vld [vmem:[#allocation8 + $0x128] sm:$0xf0] }
 0x17e   :  { %3088 = vmatpush.bf16.msra.mxu2 %v4784_v55  ;;  %v4668_v55 = vor.u32 %v5277_v48, %v4665_v49 }
 0x180   :  { %3063 = vmatpush.bf16.msra.mxu0 %v4648_v57  ;;  %3076 = vmatpush.bf16.msra.mxu1 %v4712_v47  ;;  %v4820_v57 = vor.u32 %v5315_v41, %v4817_v43  ;;  %v4740_v47 = vor.u32 %v5295_v44, %v4737_v59  ;;  %v4697_v43 = vld [vmem:[#allocation8 + $0x88] sm:$0xf0]  ;;  %v4780_v59 = vor.u32 %v5305_v29, %v4777_v28  ;;  %v5318_v29 = vld [vmem:[#allocation8 + $0x184] sm:$0xf0] }
 0x182   :  { %3089 = vmatpush.bf16.msra.mxu2 %v4776_v12  ;;  %v4713_v12 = vld [vmem:[#allocation8 + $0xa8] sm:$0xf0] }
 0x183   :  { %v4716_v18 = vor.u32 %v5289_v9, %v4713_v12  ;;  %v5326_v9 = vld [vmem:[#allocation8 + $0x1c4] sm:$0xf0] }
 0x184   :  { %3064 = vmatpush.bf16.msra.mxu0 %v4640_v56  ;;  %3077 = vmatpush.bf16.msra.mxu1 %v4704_v63  ;;  %v2396_v56 = vadd.f32 %v5783_v10, %v500_v46  ;;  %v4649_v10 = vld [vmem:[#allocation8 + $0x28] sm:$0xf0]  ;;  %v4769_v46 = vld [vmem:[#allocation8 + $0x118] sm:$0xf0] }
 0x186   :  { %3090 = vmatpush.bf16.msra.mxu2 %v4768_v34  ;;  %v2409_v53 = vadd.f32 %v5785_v20, %v2396_v56  ;;  %v4641_v20 = vld [vmem:[#allocation8 + $0x18] sm:$0xf0]  ;;  %v5332_v56 = vld [vmem:[#allocation8 + $0x1f4] sm:$0xf0] }
 0x187   :  { %v4705_v34 = vld [vmem:[#allocation8 + $0x98] sm:$0xf0]  ;;  %v4644_v41 = vor.u32 %v5271_v16, %v4641_v20 }
 0x188   :  { %3065 = vmatpush.bf16.msra.mxu0 %v4632_v13  ;;  %3078 = vmatpush.bf16.msra.mxu1 %v4696_v4  ;;  %v2447_v63 = vpop.f32.mrf.mxu0  ;;  %v2460_v1 = vpop.f32.mrf.mxu1  ;;  %v4796_v4 = vor.u32 %v5309_v36, %v4793_v38  ;;  %v4708_v37 = vor.u32 %v5287_v22, %v4705_v34  ;;  %v4847_v38 = vld [vmem:[#allocation8 + $0x1b0] sm:$0xf] }
 0x18a   :  { %3091 = vmatpush.bf16.msra.mxu2 %v4760_v32  ;;  %v5285_v32 = vld [vmem:[#allocation8 + $0x84] sm:$0xf] }
 0x18b   :  { %3066 = vmatmul.bf16.vlgmr.msra.gmra.mxu0 %v5800_v24  ;;  %3079 = vmatmul.bf16.vlgmr.msra.gmra.mxu1 %v5802_v27  ;;  %v4700_v49 = vor.u32 %v5285_v32, %v4697_v43  ;;  %v5329_v43 = vld [vmem:[#allocation8 + $0x1e4] sm:$0xf] }
 0x18c   :  { %3110 = vmatpush.bf16.msrb.mxu0 %v4692_v14  ;;  %3123 = vmatpush.bf16.msrb.mxu1 %v4756_v17  ;;  %v4652_v14 = vor.u32 %v5273_v11, %v4649_v10  ;;  %v2422_v17 = vadd.f32 %v5791_v33, %v2409_v53  ;;  %v5269_v33 = vld [vmem:[#allocation8 + $0x4] sm:$0xf]  ;;  %v4855_v10 = vld [vmem:[#allocation8 + $0x1c0] sm:$0xf] }
 0x18d   :  { %v4856_v36 = vor.u32 %v5326_v9, %v4855_v10 }
 0x18e   :  { %3136 = vmatpush.bf16.msrb.mxu2 %v4820_v57 }
 0x190   :  { %3111 = vmatpush.bf16.msrb.mxu0 %v4684_v25  ;;  %3124 = vmatpush.bf16.msrb.mxu1 %v4748_v30  ;;  %v2486_v15 = vpop.f32.mrf.mxu3  ;;  %v2449_v58 = vpop.f32.mrf.mxu0  ;;  %v4788_v25 = vor.u32 %v5307_v19, %v4785_v21  ;;  %v2435_v30 = vadd.f32 %v5793_v40, %v2422_v17  ;;  %v5301_v40 = vld [vmem:[#allocation8 + $0x104] sm:$0xf]  ;;  %v4839_v17 = vld [vmem:[#allocation8 + $0x1a0] sm:$0xf]  ;;  %v4831_v19 = vld [vmem:[#allocation8 + $0x190] sm:$0xf] }
 0x191   :  { %v2473_v13 = vpop.f32.mrf.mxu2  ;;  %v2462_v23 = vpop.f32.mrf.mxu1  ;;  %v4764_v6 = vor.u32 %v5301_v40, %v4761_v52  ;;  %v5320_v21 = vld [vmem:[#allocation8 + $0x194] sm:$0xf0]  ;;  %v5325_v52 = vld [vmem:[#allocation8 + $0x1c4] sm:$0xf] }
 0x192   :  { %3137 = vmatpush.bf16.msrb.mxu2 %v4812_v26  ;;  %v2448_v48 = vadd.f32 %v2447_v63, %v2435_v30  ;;  %v4832_v34 = vor.u32 %v5320_v21, %v4831_v19  ;;  %v489_v23 = vperm.slane %v5722_v8, 6  ;;  %v4881_v30 = vld [vmem:[#allocation8 + $0x1f8] sm:$0xf0]  ;;  %v5327_v8 = vld [vmem:[#allocation8 + $0x1d4] sm:$0xf] }
 0x193   :  { %v2732_v21 = vld [vmem:[#allocation10] sm:$0x3] }
 0x194   :  { %3112 = vmatpush.bf16.msrb.mxu0 %v4676_v45  ;;  %3125 = vmatpush.bf16.msrb.mxu1 %v4740_v47  ;;  %v5303_v45 = vld [vmem:[#allocation8 + $0x114] sm:$0xf]  ;;  %v4636_v47 = vor.u32 %v5269_v33, %v4633_v42  ;;  %v2461_v54 = vadd.f32 %v2460_v1, %v2448_v48  ;;  %v497_v33 = vperm.slane %v489_v23, 0 }
 0x195   :  { %v4772_v51 = vor.u32 %v5303_v45, %v4769_v46  ;;  %v4865_v46 = vld [vmem:[#allocation8 + $0x1d8] sm:$0xf0] }
 0x196   :  { %3138 = vmatpush.bf16.msrb.mxu2 %v4804_v5  ;;  %v2474_v26 = vadd.f32 %v2473_v13, %v2461_v54  ;;  %v4863_v5 = vld [vmem:[#allocation8 + $0x1d0] sm:$0xf]  ;;  %v4868_v48 = vor.u32 %v5327_v8, %v4865_v46  ;;  %v4857_v54 = vld [vmem:[#allocation8 + $0x1c8] sm:$0xf0] }
 0x197   :  { %v5338_v8 = vld [vmem:[#allocation11 + $0x28] sm:$0xff] }
 0x198   :  { %3113 = vmatpush.bf16.msrb.mxu0 %v4668_v55  ;;  %3126 = vmatpush.bf16.msrb.mxu1 %v4732_v60  ;;  %v2488_v57 = vpop.f32.mrf.mxu3  ;;  %v4879_v55 = vld [vmem:[#allocation8 + $0x1f0] sm:$0xf]  ;;  %v4871_v60 = vld [vmem:[#allocation8 + $0x1e0] sm:$0xf]  ;;  %v2487_v63 = vadd.f32 %v2486_v15, %v2474_v26  ;;  %v5324_v15 = vld [vmem:[#allocation8 + $0x1b4] sm:$0xf0] }
 0x199   :  { %v2475_v44 = vpop.f32.mrf.mxu2  ;;  %v4880_v61 = vor.u32 %v5332_v56, %v4879_v55  ;;  %v4872_v0 = vor.u32 %v5330_v62, %v4871_v60  ;;  %v4848_v16 = vor.u32 %v5324_v15, %v4847_v38  ;;  %v501_v57 = vmul.f32 %v497_v33, %v5725_v50  ;;  %v5323_v56 = vld [vmem:[#allocation8 + $0x1b4] sm:$0xf]  ;;  %v4849_v60 = vld [vmem:[#allocation8 + $0x1b8] sm:$0xf0]  ;;  %v5321_v62 = vld [vmem:[#allocation8 + $0x1a4] sm:$0xf] }
 0x19a   :  { %3139 = vmatpush.bf16.msrb.mxu2 %v4796_v4  ;;  %v4873_v44 = vld [vmem:[#allocation8 + $0x1e8] sm:$0xf0]  ;;  %v4852_v50 = vor.u32 %v5323_v56, %v4849_v60  ;;  %v2651_v15 = vperm.slane %v5788_v35, 3  ;;  %v5333_v56 = vld [vmem:[#allocation11] sm:$0xff] }
 0x19b   :  { %3097 = vmatpush.bf16.msra.mxu3 %v4880_v61  ;;  %v5345_v60 = vld [vmem:[#allocation11 + $0x60] sm:$0xff] }
 0x19c   :  { %3114 = vmatpush.bf16.msrb.mxu0 %v4660_v7  ;;  %3127 = vmatpush.bf16.msrb.mxu1 %v4724_v31 }
 0x19e   :  { %3140 = vmatpush.bf16.msrb.mxu2 %v4788_v25  ;;  %v4823_v25 = vld [vmem:[#allocation8 + $0x180] sm:$0xf] }
 0x19f   :  { %3098 = vmatpush.bf16.msra.mxu3 %v4872_v0  ;;  %v4824_v28 = vor.u32 %v5318_v29, %v4823_v25  ;;  %v4841_v0 = vld [vmem:[#allocation8 + $0x1a8] sm:$0xf0] }
 0x1a0   :  { %3115 = vmatpush.bf16.msrb.mxu0 %v4652_v14  ;;  %3128 = vmatpush.bf16.msrb.mxu1 %v4716_v18  ;;  %v5322_v18 = vld [vmem:[#allocation8 + $0x1a4] sm:$0xf0] }
 0x1a1   :  { %v4840_v20 = vor.u32 %v5322_v18, %v4839_v17 }
 0x1a2   :  { %3141 = vmatpush.bf16.msrb.mxu2 %v4780_v59  ;;  %v4876_v59 = vor.u32 %v5329_v43, %v4873_v44  ;;  %v5340_v44 = vld [vmem:[#allocation11 + $0x38] sm:$0xff] }
 0x1a4   :  { %3116 = vmatpush.bf16.msrb.mxu0 %v4644_v41  ;;  %3129 = vmatpush.bf16.msrb.mxu1 %v4708_v37  ;;  %v5331_v41 = vld [vmem:[#allocation8 + $0x1f4] sm:$0xf] }
 0x1a5   :  { %v4884_v37 = vor.u32 %v5331_v41, %v4881_v30  ;;  %v2735_v30 = vperm.slane %v2732_v21, 1 }
 0x1a6   :  { %3142 = vmatpush.bf16.msrb.mxu2 %v4772_v51 }
 0x1a8   :  { %3117 = vmatpush.bf16.msrb.mxu0 %v4636_v47  ;;  %3130 = vmatpush.bf16.msrb.mxu1 %v4700_v49  ;;  %v2499_v39 = vpop.f32.mrf.mxu0  ;;  %v2512_v1 = vpop.f32.mrf.mxu1 }
 0x1a9   :  { %v2500_v2 = vadd.f32 %v2499_v39, %v2487_v63  ;;  %v4844_v39 = vor.u32 %v5321_v62, %v4841_v0  ;;  %v5342_v62 = vld [vmem:[#allocation11 + $0x48] sm:$0xff]  ;;  %v5341_v0 = vld [vmem:[#allocation11 + $0x40] sm:$0xff] }
 0x1aa   :  { %3143 = vmatpush.bf16.msrb.mxu2 %v4764_v6  ;;  %v4860_v6 = vor.u32 %v5325_v52, %v4857_v54 }
 0x1ab   :  { %3118 = vmatmul.bf16.vlgmr.msrb.gmra.mxu0 %v5800_v24  ;;  %3131 = vmatmul.bf16.vlgmr.msrb.gmra.mxu1 %v5802_v27  ;;  %v5328_v24 = vld [vmem:[#allocation8 + $0x1d4] sm:$0xf0]  ;;  %v2513_v7 = vadd.f32 %v2512_v1, %v2500_v2  ;;  %v5319_v2 = vld [vmem:[#allocation8 + $0x194] sm:$0xf]  ;;  %v4833_v1 = vld [vmem:[#allocation8 + $0x198] sm:$0xf0] }
 0x1ac   :  { %v4864_v27 = vor.u32 %v5328_v24, %v4863_v5  ;;  %v4836_v5 = vor.u32 %v5319_v2, %v4833_v1  ;;  %3298 = vmatpush.bf16.msra.mxu0 %v5340_v44 }
 0x1ad   :  { %v2658_v53 = vadd.f32 %v2650_v3, %v2513_v7  ;;  %v5317_v7 = vld [vmem:[#allocation8 + $0x184] sm:$0xf] }
 0x1ae   :  { %3099 = vmatpush.bf16.msra.mxu3 %v4864_v27  ;;  %v4825_v27 = vld [vmem:[#allocation8 + $0x188] sm:$0xf0] }
 0x1af   :  { %v2662_v31 = vmax.f32 %v2658_v53, 0.0  ;;  %v4828_v53 = vor.u32 %v5317_v7, %v4825_v27 }
 0x1b0   :  { %v2538_v12 = vpop.f32.mrf.mxu3  ;;  %v2501_v13 = vpop.f32.mrf.mxu0 }
 0x1b1   :  { %v2525_v11 = vpop.f32.mrf.mxu2  ;;  %v2666_v4 = vpack.c.bf16 %v2662_v31, %v2662_v31  ;;  %v2514_v14 = vpop.f32.mrf.mxu1 }
 0x1b2   :  { %3100 = vmatpush.bf16.msra.mxu3 %v4856_v36  ;;  %v2526_v49 = vadd.f32 %v2525_v11, %v501_v57  ;;  %v5339_v57 = vld [vmem:[#allocation11 + $0x30] sm:$0xff] }
 0x1b3   :  { %3092 = vmatmul.bf16.vlgmr.msra.gmra.mxu2 %v2666_v4  ;;  %3299 = vmatpush.bf16.msra.mxu0 %v5339_v57 }
 0x1b4   :  { %v2539_v26 = vadd.f32 %v2538_v12, %v2526_v49  ;;  %v5336_v49 = vld [vmem:[#allocation11 + $0x18] sm:$0xff] }
 0x1b6   :  { %3101 = vmatpush.bf16.msra.mxu3 %v4848_v16 }
 0x1b7   :  { %3300 = vmatpush.bf16.msra.mxu0 %v5338_v8 }
 0x1b8   :  { %v2540_v22 = vpop.f32.mrf.mxu3 }
 0x1b9   :  { %v2527_v58 = vpop.f32.mrf.mxu2  ;;  %v2734_v22 = vperm.slane %v2732_v21, 0 }
 0x1ba   :  { %3102 = vmatpush.bf16.msra.mxu3 %v4840_v20 }
 0x1be   :  { %3103 = vmatpush.bf16.msra.mxu3 %v4832_v34 }
 0x1c2   :  { %3104 = vmatpush.bf16.msra.mxu3 %v4824_v28 }
 0x1c3   :  { %3144 = vmatmul.bf16.vlgmr.msrb.gmra.mxu2 %v2666_v4 }
 0x1c6   :  { %3149 = vmatpush.bf16.msrb.mxu3 %v4884_v37 }
 0x1c8   :  { %v2551_v42 = vpop.f32.mrf.mxu0  ;;  %v2564_v32 = vpop.f32.mrf.mxu1 }
 0x1c9   :  { %v2552_v63 = vadd.f32 %v2551_v42, %v2539_v26  ;;  %v5334_v26 = vld [vmem:[#allocation11 + $0x8] sm:$0xff] }
 0x1ca   :  { %3150 = vmatpush.bf16.msrb.mxu3 %v4876_v59  ;;  %v5348_v59 = vld [vmem:[#allocation11 + $0x78] sm:$0xff] }
 0x1cb   :  { %v2565_v3 = vadd.f32 %v2564_v32, %v2552_v63  ;;  %3311 = vmatpush.bf16.msra.mxu1 %v5348_v59 }
 0x1ce   :  { %3151 = vmatpush.bf16.msrb.mxu3 %v4868_v48  ;;  %v5337_v48 = vld [vmem:[#allocation11 + $0x20] sm:$0xff] }
 0x1cf   :  { %3301 = vmatpush.bf16.msra.mxu0 %v5337_v48 }
 0x1d0   :  { %v2590_v47 = vpop.f32.mrf.mxu3  ;;  %v2553_v51 = vpop.f32.mrf.mxu0 }
 0x1d1   :  { %v2577_v45 = vpop.f32.mrf.mxu2  ;;  %v2566_v40 = vpop.f32.mrf.mxu1 }
 0x1d2   :  { %3152 = vmatpush.bf16.msrb.mxu3 %v4860_v6  ;;  %v2578_v24 = vadd.f32 %v2577_v45, %v2565_v3  ;;  %v5347_v45 = vld [vmem:[#allocation11 + $0x70] sm:$0xff] }
 0x1d3   :  { %3312 = vmatpush.bf16.msra.mxu1 %v5347_v45  ;;  %3302 = vmatpush.bf16.msra.mxu0 %v5336_v49  ;;  %v5335_v40 = vld [vmem:[#allocation11 + $0x10] sm:$0xff] }
 0x1d4   :  { %v2591_v31 = vadd.f32 %v2590_v47, %v2578_v24 }
 0x1d6   :  { %3153 = vmatpush.bf16.msrb.mxu3 %v4852_v50  ;;  %v5343_v50 = vld [vmem:[#allocation11 + $0x50] sm:$0xff] }
 0x1d7   :  { %3303 = vmatpush.bf16.msra.mxu0 %v5335_v40 }
 0x1d8   :  { %v2592_v61 = vpop.f32.mrf.mxu3 }
 0x1d9   :  { %v2579_v55 = vpop.f32.mrf.mxu2  ;;  %v5344_v61 = vld [vmem:[#allocation11 + $0x58] sm:$0xff] }
 0x1da   :  { %3154 = vmatpush.bf16.msrb.mxu3 %v4844_v39  ;;  %v5346_v55 = vld [vmem:[#allocation11 + $0x68] sm:$0xff] }
 0x1db   :  { %3304 = vmatpush.bf16.msra.mxu0 %v5334_v26  ;;  %3313 = vmatpush.bf16.msra.mxu1 %v5346_v55 }
 0x1de   :  { %3155 = vmatpush.bf16.msrb.mxu3 %v4836_v5 }
 0x1df   :  { %3305 = vmatpush.bf16.msra.mxu0 %v5333_v56  ;;  %3314 = vmatpush.bf16.msra.mxu1 %v5345_v60 }
 0x1e2   :  { %3156 = vmatpush.bf16.msrb.mxu3 %v4828_v53 }
 0x1e3   :  { %3315 = vmatpush.bf16.msra.mxu1 %v5344_v61 }
 0x1e7   :  { %3316 = vmatpush.bf16.msra.mxu1 %v5343_v50 }
 0x1e8   :  { %v2603_v11 = vpop.f32.mrf.mxu0  ;;  %v2616_v10 = vpop.f32.mrf.mxu1 }
 0x1e9   :  { %v2604_v9 = vadd.f32 %v2603_v11, %v2591_v31 }
 0x1eb   :  { %v2617_v12 = vadd.f32 %v2616_v10, %v2604_v9  ;;  %3317 = vmatpush.bf16.msra.mxu1 %v5342_v62  ;;  %v3325_v10 = vld [vmem:[#allocation14] sm:$0x1]  ;;  %v5365_v9 = vld [vmem:[#allocation13] ss:$0 sm:$0xff] }
 0x1ef   :  { %3318 = vmatpush.bf16.msra.mxu1 %v5341_v0 }
 0x1f0   :  { %v2629_v13 = vpop.f32.mrf.mxu2  ;;  %v2642_v38 = vpop.f32.mrf.mxu3 }
 0x1f1   :  { %v2630_v36 = vadd.f32 %v2629_v13, %v2617_v12  ;;  %v2605_v4 = vpop.f32.mrf.mxu0  ;;  %v2618_v14 = vpop.f32.mrf.mxu1  ;;  %v3326_v12 = vunpack.c.l.bf16 %v3325_v10 }
 0x1f3   :  { %v2643_v16 = vadd.f32 %v2642_v38, %v2630_v36 }
 0x1f5   :  { %v2659_v17 = vadd.f32 %v2651_v15, %v2643_v16  ;;  %v3327_v15 = vperm.slane %v3326_v12, 0 }
 0x1f7   :  { %v2663_v18 = vmax.f32 %v2659_v17, 0.0 }
 0x1f8   :  { %v2631_v20 = vpop.f32.mrf.mxu2  ;;  %v2644_v19 = vpop.f32.mrf.mxu3 }
 0x1f9   :  { %v2667_v58 = vpack.c.bf16 %v2663_v18, %v2663_v18  ;;  %v5366_v18 = vld [vmem:[#allocation2] ss:$0 sm:$0xff] }
 0x1fb   :  { %3105 = vmatmul.bf16.vlgmr.msra.gmra.mxu3 %v2667_v58 }
 0x208   :  { %v3067_v34 = vpop.f32.mrf.mxu0  ;;  %v3080_v25 = vpop.f32.mrf.mxu1 }
 0x209   :  { %v3068_v23 = vadd.f32 %v3067_v34, %v2734_v22 }
 0x20b   :  { %v3081_v29 = vadd.f32 %v3080_v25, %v3068_v23  ;;  %3157 = vmatmul.bf16.vlgmr.msrb.gmra.mxu3 %v2667_v58 }
 0x210   :  { %v3069_v28 = vpop.f32.mrf.mxu0  ;;  %v3082_v41 = vpop.f32.mrf.mxu1 }
 0x228   :  { %v3119_v35 = vpop.f32.mrf.mxu0  ;;  %v3132_v33 = vpop.f32.mrf.mxu1 }
 0x229   :  { %v3120_v37 = vadd.f32 %v3119_v35, %v2735_v30 }
 0x22b   :  { %v3133_v42 = vadd.f32 %v3132_v33, %v3120_v37 }
 0x230   :  { %v3121_v32 = vpop.f32.mrf.mxu0  ;;  %v3134_v43 = vpop.f32.mrf.mxu1 }
 0x236   :  { %v3093_v46 = vpop.f32.mrf.mxu2 }
 0x237   :  { %v3094_v47 = vadd.f32 %v3093_v46, %v3081_v29 }
 0x23e   :  { %v3095_v51 = vpop.f32.mrf.mxu2 }
 0x246   :  { %v3145_v52 = vpop.f32.mrf.mxu2 }
 0x247   :  { %v3146_v54 = vadd.f32 %v3145_v52, %v3133_v42 }
 0x24e   :  { %v3147_v6 = vpop.f32.mrf.mxu2 }
 0x27e   :  { %v3106_v63 = vpop.f32.mrf.mxu3 }
 0x27f   :  { %v3107_v39 = vadd.f32 %v3106_v63, %v3094_v47 }
 0x281   :  { %v3162_v2 = vmax.f32 %v3107_v39, 0.0 }
 0x283   :  { %v3164_v1 = vpack.c.bf16 %v3162_v2, %v3162_v2 }
 0x285   :  { %3306 = vmatmul.bf16.vlgmr.msra.gmra.mxu0 %v3164_v1 }
 0x286   :  { %v3108_v3 = vpop.f32.mrf.mxu3 }
 0x28e   :  { %v3158_v5 = vpop.f32.mrf.mxu3 }
 0x28f   :  { %v3159_v24 = vadd.f32 %v3158_v5, %v3146_v54 }
 0x291   :  { %v3163_v7 = vmax.f32 %v3159_v24, 0.0 }
 0x293   :  { %v3165_v27 = vpack.c.bf16 %v3163_v7, %v3163_v7 }
 0x295   :  { %3319 = vmatmul.bf16.vlgmr.msra.gmra.mxu1 %v3165_v27 }
 0x296   :  { %v3160_v53 = vpop.f32.mrf.mxu3 }
 0x302   :  { %v3307_v31 = vpop.f32.mrf.mxu0 }
 0x303   :  { %v3308_v13 = vadd.f32 %v5365_v9, %v3307_v31 }
 0x30a   :  { %v3309_v11 = vpop.f32.mrf.mxu0 }
 0x312   :  { %v3320_v36 = vpop.f32.mrf.mxu1 }
 0x313   :  { %v3321_v38 = vadd.f32 %v3320_v36, %v3308_v13 }
 0x315   :  { %v3324_v4 = vmax.f32 %v3321_v38, 0.0 }
 0x317   :  { %v3328_v14 = vmul.f32 %v3327_v15, %v3324_v4 }
 0x319   :  { %v3330_v16 = vsel %vm3329_vm0, %v3328_v14, 0.0 }
 0x31a   :  { %v3322_v17 = vpop.f32.mrf.mxu1  ;;  %3331 = vadd.xlane.f32.xlu0 %v3330_v16 }
 0x38d   :  { %v3332_v20 = vpop.xlane.xlu0 %3331 }
 0x38e   :  { %v3337_v58 = vadd.f32 %v5366_v18, %v3332_v20 }
 0x390   :  { %3339 = vst.msk [vmem:[%s5831_s11] sm:$0x3] %vm3338_vm1, %v3337_v58 }
 0x391   :  { %3344 = vsyncpa [#allocation4], 1 }
 0x392   :  { %3345 = vsyncpa [#allocation6], 1 }
 0x393   :  { %3346 = vsyncpa [#allocation9], 1 }
 0x394   :  { %3347 = vsyncpa [#allocation12], 1 }
 0x395   :  { %3348 = vsyncpa [#allocation15], 1 }

</bundles_post_ra>
